<compile_context>
chip_gen: v7x
topology: tpu7x:2x2x1
jax: 0.10.0
libtpu: 0.0.40
codegen_flags: <defaults>
</compile_context>

<pallas_src>
import functools

import jax
import jax.numpy as jnp
from jax import lax
from jax.experimental import pallas as pl
from jax.experimental.pallas import tpu as pltpu

NEG_SLOPE = 0.2
BN_EPS = 1e-5

# ConvTranspose2d(k=4, s=2, p=1) phase decomposition (per axis):
#   out[2q + r] = sum_t in_padded[q + r + t] * w[_TAP_KIDX[r][t]],  t in {0, 1}
# where in_padded is the 1-zero-padded input.
_TAP_KIDX = ((3, 1), (2, 0))


# ----------------------------- Pallas kernels ------------------------------ #

def _latent_mm_kernel(z_ref, w_ref, out_ref):
    """Layer 1 (1x1 spatial input, stride 1, pad 0) == a plain matmul."""
    out_ref[...] = jnp.dot(z_ref[...], w_ref[...],
                           preferred_element_type=jnp.float32)


def _convt_phase_kernel(x_ref, w_ref, out_ref, *stats, nb, wp, wvalid, use_tanh):
    """One grid step: nb samples x 4 output phases of a k=4/s=2/p=1 ConvTranspose.

    x_ref:   (nb, Cin, Lin)  bf16  post-activation input, per-sample flat padded
             image, Lin = (H+3)*Wp with Wp = W+2 (y-pad (1,2), x-pad (1,1)).
    w_ref:   (16, Cout, Cin) bf16  per-(phase, tap) weight sub-matrices.
    out_ref: (nb, 4, Cout, Mout)   Mout = H*Wp flat phase outputs; the columns
             with (m % Wp) >= W are don't-care and are sliced off outside.
    stats:   optional (Cout, 2) f32 resident accumulator of (sum, sum-of-sq)
             over valid columns only, for the following BatchNorm.
    """
    cout, mout = out_ref.shape[2], out_ref.shape[3]
    step = pl.program_id(0)

    if stats:
        stats_ref, = stats

        @pl.when(step == 0)
        def _init():
            stats_ref[...] = jnp.zeros_like(stats_ref)

        col = lax.broadcasted_iota(jnp.int32, (1, mout), 1)
        valid = (col % wp) < wvalid                       # (1, Mout) bool
        s1 = jnp.zeros((cout, 1), jnp.float32)
        s2 = jnp.zeros((cout, 1), jnp.float32)

    for s in range(nb):
        for ph in range(4):
            ry, rx = divmod(ph, 2)
            acc = jnp.zeros((cout, mout), jnp.float32)
            for ty in range(2):
                for tx in range(2):
                    off = (ry + ty) * wp + (rx + tx)      # flat tap offset
                    xt = x_ref[s, :, off:off + mout]      # (Cin, Mout) bf16
                    acc = acc + jnp.dot(w_ref[4 * ph + 2 * ty + tx], xt,
                                        preferred_element_type=jnp.float32)
            if use_tanh:
                out_ref[s, ph] = jnp.tanh(acc).astype(out_ref.dtype)
            else:
                out_ref[s, ph] = acc.astype(out_ref.dtype)
            if stats:
                av = jnp.where(valid, acc, 0.0)           # exclude padded cols
                s1 = s1 + jnp.sum(av, axis=1, keepdims=True)
                s2 = s2 + jnp.sum(av * av, axis=1, keepdims=True)

    if stats:
        stats_ref[:, 0:1] += s1
        stats_ref[:, 1:2] += s2


# ----------------------------- kernel wrappers ----------------------------- #

def _pick_nb(n, mout):
    """Samples per grid step: batch the tiny-spatial early layers so each step
    has enough lane work, capped for VMEM / unroll size."""
    target = max(1, 512 // mout)
    best = 1
    for cand in range(1, min(n, 8, target) + 1):
        if n % cand == 0:
            best = cand
    return best


def _convt_s2(x_flat, wm, *, h, w, with_stats, use_tanh, out_dtype):
    """x_flat: (N, Cin, (H+3)*(W+2)) bf16, wm: (16, Cout, Cin) bf16."""
    n, cin, lin = x_flat.shape
    cout = wm.shape[1]
    wp = w + 2
    mout = h * wp
    assert lin == (h + 3) * wp
    nb = _pick_nb(n, mout)
    grid = (n // nb,)

    kernel = functools.partial(_convt_phase_kernel, nb=nb, wp=wp, wvalid=w,
                               use_tanh=use_tanh)

    in_specs = [
        pl.BlockSpec((nb, cin, lin), lambda i: (i, 0, 0)),
        pl.BlockSpec((16, cout, cin), lambda i: (0, 0, 0)),   # resident weights
    ]
    conv_spec = pl.BlockSpec((nb, 4, cout, mout), lambda i: (i, 0, 0, 0))

    if with_stats:
        out_shape = (jax.ShapeDtypeStruct((n, 4, cout, mout), out_dtype),
                     jax.ShapeDtypeStruct((cout, 2), jnp.float32))
        out_specs = (conv_spec, pl.BlockSpec((cout, 2), lambda i: (0, 0)))
    else:
        out_shape = jax.ShapeDtypeStruct((n, 4, cout, mout), out_dtype)
        out_specs = conv_spec

    itemsize = jnp.dtype(out_dtype).itemsize
    vmem_need = (6 * (nb * cin * lin * 2 + nb * 4 * cout * mout * itemsize)
                 + 4 * (16 * cout * cin * 2) + (4 << 20))
    vmem_limit = int(min(64 << 20, max(32 << 20, vmem_need)))  # v7x-safe cap

    return pl.pallas_call(
        kernel,
        out_shape=out_shape,
        grid=grid,
        in_specs=in_specs,
        out_specs=out_specs,
        compiler_params=pltpu.CompilerParams(
            # TODO(synk): 'arbitrary' because the BN stats accumulate across the
            # grid; a leading parallel axis of extent 2 with per-half stats
            # outputs would re-enable v7x megacore.
            dimension_semantics=("arbitrary",),
            vmem_limit_bytes=vmem_limit),
    )(x_flat, wm)


def _latent_conv(z2, w1m):
    n, nz_ = z2.shape
    kout = w1m.shape[1]
    return pl.pallas_call(
        _latent_mm_kernel,
        out_shape=jax.ShapeDtypeStruct((n, kout), jnp.float32),
        grid=(1,),
        in_specs=[pl.BlockSpec((n, nz_), lambda i: (0, 0)),
                  pl.BlockSpec((nz_, kout), lambda i: (0, 0))],
        out_specs=pl.BlockSpec((n, kout), lambda i: (0, 0)),
        compiler_params=pltpu.CompilerParams(
            dimension_semantics=("arbitrary",)),
    )(z2, w1m)


# ------------------------------- JAX glue ---------------------------------- #

def _bn_scale_shift(gamma, beta, mean, var):
    var = jnp.maximum(var, 0.0)          # guard the E[x^2]-E[x]^2 cancellation
    scale = gamma / jnp.sqrt(var + BN_EPS)
    return scale, beta - mean * scale


def _activate_pad_flatten(a, scale, shift):
    """a: raw conv output (N, C, H, W).  Applies the previous layer's BN affine
    + LeakyReLU, zero-pads (y:(1,2), x:(1,1)) and flattens the spatial dims so
    the ConvT kernel can gather its taps with flat lane offsets.  This is the
    single fused inter-layer HBM pass (affine + interleave + pad in one)."""
    y = (a.astype(jnp.float32) * scale[None, :, None, None]
         + shift[None, :, None, None])
    y = jnp.where(y >= 0.0, y, NEG_SLOPE * y)
    y = jnp.pad(y, ((0, 0), (0, 0), (1, 2), (1, 1)))
    n, c, hp, wp = y.shape
    return y.reshape(n, c, hp * wp).astype(jnp.bfloat16)


def _assemble_phases(op, h, w):
    """op: (N, 4, Cout, H*(W+2)) phase-layout conv output -> (N, Cout, 2H, 2W)."""
    n, _, cout, _ = op.shape
    wp = w + 2
    x = op.reshape(n, 2, 2, cout, h, wp)[..., :w]     # drop don't-care columns
    x = x.transpose(0, 3, 4, 1, 5, 2)                 # (N, Cout, H, ry, W, rx)
    return x.reshape(n, cout, 2 * h, 2 * w)


# ------------------------------ parameters --------------------------------- #

def init_params(key, nz, ngf, nc):
    """Raw PyTorch-layout parameters (ConvTranspose2d(..., bias=False))."""
    chans = [nz, ngf * 8, ngf * 4, ngf * 2, ngf, nc]
    params = []
    for li in range(5):
        key, wk, gk, bk = jax.random.split(key, 4)
        cin, cout = chans[li], chans[li + 1]
        w = 0.05 * jax.random.normal(wk, (cin, cout, 4, 4), jnp.float32)
        if li < 4:
            gamma = 1.0 + 0.1 * jax.random.normal(gk, (cout,), jnp.float32)
            beta = 0.1 * jax.random.normal(bk, (cout,), jnp.float32)
        else:
            gamma = beta = None
        params.append((w, gamma, beta))
    return params


def _phase_tap_weights(w):
    """w: (Cin, Cout, 4, 4) -> (16, Cout, Cin) bf16 indexed by 4*ph + 2*ty + tx."""
    mats = []
    for ry in range(2):
        for rx in range(2):
            for ty in range(2):
                for tx in range(2):
                    sub = w[:, :, _TAP_KIDX[ry][ty], _TAP_KIDX[rx][tx]]
                    mats.append(sub.T)                       # (Cout, Cin)
    return jnp.stack(mats, axis=0).astype(jnp.bfloat16)


def prepare_params(params_raw):
    """Hoisted out of the jitted forward: per-phase/tap weight matrices and the
    bf16 casts are computed exactly once."""
    w1, g1, b1 = params_raw[0]
    nz_, c1 = w1.shape[0], w1.shape[1]
    w1m = jnp.asarray(w1).reshape(nz_, c1 * 16).astype(jnp.bfloat16)
    prepared = [(w1m, g1, b1)]
    for li in range(1, 5):
        w, g, b = params_raw[li]
        prepared.append((_phase_tap_weights(jnp.asarray(w)), g, b))
    return prepared


# ----------------------------- _netG forward -------------------------------- #

def netG_forward(z, params, kernels=(4, 4, 4, 4, 4), strides=(1, 2, 2, 2, 2),
                 pads=(0, 1, 1, 1, 1)):
    # TODO(synk): only the standard DCGAN hyper-parameters are supported by the
    # phase-decomposed path; other (k, s, p) combos would need a generic fallback.
    assert tuple(kernels) == (4, 4, 4, 4, 4)
    assert tuple(strides) == (1, 2, 2, 2, 2)
    assert tuple(pads) == (0, 1, 1, 1, 1)
    assert z.shape[2:] == (1, 1)
    n = z.shape[0]

    # Layer 1: ConvT(nz -> 8*ngf, 4, 1, 0) on a 1x1 input is a pure matmul.
    w1m, gamma, beta = params[0]
    nz_ = w1m.shape[0]
    c1 = w1m.shape[1] // 16
    z2 = z.reshape(n, nz_).astype(jnp.bfloat16)
    a = _latent_conv(z2, w1m).reshape(n, c1, 4, 4)        # (N, C1, 4, 4) f32
    mean = jnp.mean(a, axis=(0, 2, 3))                    # training-mode BN stats
    var = jnp.var(a, axis=(0, 2, 3))                      # biased variance

    # Layers 2-5: ConvT(k=4,s=2,p=1); BN affine + LeakyReLU of layer i applied
    # on entry to layer i+1 (fused with the interleave/pad/flatten pass).
    h = w_sp = 4
    for li in range(1, 5):
        wm, g_next, b_next = params[li]
        scale, shift = _bn_scale_shift(gamma, beta, mean, var)
        x_flat = _activate_pad_flatten(a, scale, shift)    # (N, C, (H+3)*(W+2))
        if li < 4:
            op, stats = _convt_s2(x_flat, wm, h=h, w=w_sp, with_stats=True,
                                  use_tanh=False, out_dtype=jnp.bfloat16)
            cnt = float(n * 4 * h * w_sp)                  # = N * OH * OW
            mean = stats[:, 0] / cnt
            var = jnp.maximum(stats[:, 1] / cnt - mean * mean, 0.0)
            a = _assemble_phases(op, h, w_sp)              # (N, Cout, 2H, 2W)
            gamma, beta = g_next, b_next
        else:
            op = _convt_s2(x_flat, wm, h=h, w=w_sp, with_stats=False,
                           use_tanh=True, out_dtype=jnp.float32)
            a = _assemble_phases(op, h, w_sp)              # (N, nc, 64, 64) f32
        h, w_sp = 2 * h, 2 * w_sp
    return a


# ------------------------- pure-JAX reference check ------------------------- #

def _ref_convT(x_bf, w, stride, pad):
    k = w.shape[2]
    wf = jnp.flip(w, (2, 3)).transpose(1, 0, 2, 3).astype(jnp.bfloat16)
    return lax.conv_general_dilated(
        x_bf, wf, window_strides=(1, 1),
        padding=[(k - 1 - pad, k - 1 - pad)] * 2,
        lhs_dilation=(stride, stride),
        dimension_numbers=("NCHW", "OIHW", "NCHW"),
        preferred_element_type=jnp.float32)


def netG_reference(z, params_raw):
    """lax-conv reference with the same bf16 casting points as the Pallas path."""
    strides = (1, 2, 2, 2, 2)
    pads = (0, 1, 1, 1, 1)
    x = z.astype(jnp.bfloat16)
    for li in range(5):
        w, g, b = params_raw[li]
        conv = _ref_convT(x, w, strides[li], pads[li])      # f32 accumulation
        if li == 4:
            return jnp.tanh(conv)
        mean = jnp.mean(conv, axis=(0, 2, 3))
        var = jnp.var(conv, axis=(0, 2, 3))
        raw = conv if li == 0 else conv.astype(jnp.bfloat16).astype(jnp.float32)
        scale = g / jnp.sqrt(var + BN_EPS)
        shift = b - mean * scale
        y = raw * scale[None, :, None, None] + shift[None, :, None, None]
        y = jnp.where(y >= 0.0, y, NEG_SLOPE * y)
        x = y.astype(jnp.bfloat16)


if __name__ == "__main__":
    # Small DCGAN-style configuration.
    nz, ngf, nc, N = 16, 8, 3, 2
    key = jax.random.PRNGKey(0)
    key, zk = jax.random.split(key)
    z = jax.random.normal(zk, (N, nz, 1, 1), jnp.float32)    # NCHW latent
    params_raw = init_params(key, nz, ngf, nc)
    params = prepare_params(params_raw)

    fwd = jax.jit(netG_forward)
    out = fwd(z, params)
    jax.block_until_ready(out)

    assert out.shape == (N, nc, 64, 64), out.shape
    assert bool(jnp.all(jnp.isfinite(out)))
    assert bool(jnp.all(jnp.abs(out) <= 1.0))                # tanh range

    ref = jax.jit(netG_reference)(z, params_raw)
    err = float(jnp.max(jnp.abs(out - ref.astype(out.dtype))))
    assert err < 0.1, f"max abs diff vs lax reference = {err}"
    print("KERNEL_OK")
</pallas_src>

<mosaic_0001>
module attributes {stable_mosaic.version = 11 : i64} {
  func.func @_latent_mm_kernel(%arg0: i32, %arg1: memref<2x16xbf16, #tpu.memory_space<vmem>>, %arg2: memref<16x1024xbf16, #tpu.memory_space<vmem>>, %arg3: memref<2x1024xf32, #tpu.memory_space<vmem>>) attributes {dimension_semantics = [#tpu.dimension_semantics<arbitrary>], iteration_bounds = array<i64: 1>, scalar_prefetch = 0 : i64, scratch_operands = 0 : i64, tpu.core_type = #tpu.core_type<tc>, window_params = [{pipeline_mode = #tpu.pipeline_mode<synchronous>, transform_indices = @transform_0, window_bounds = array<i64: 2, 16>}, {pipeline_mode = #tpu.pipeline_mode<synchronous>, transform_indices = @transform_1, window_bounds = array<i64: 16, 1024>}, {pipeline_mode = #tpu.pipeline_mode<synchronous>, transform_indices = @transform_2, window_bounds = array<i64: 2, 1024>}]} {
    %c0 = arith.constant 0 : index
    %c0_0 = arith.constant 0 : index
    %0 = vector.load %arg1[%c0, %c0_0] : memref<2x16xbf16, #tpu.memory_space<vmem>>, vector<2x16xbf16>
    %c0_1 = arith.constant 0 : index
    %c0_2 = arith.constant 0 : index
    %1 = vector.load %arg2[%c0_1, %c0_2] : memref<16x1024xbf16, #tpu.memory_space<vmem>>, vector<16x1024xbf16>
    %cst = arith.constant dense<0.000000e+00> : vector<2x1024xf32>
    %2 = tpu.matmul %0, %1, %cst {dimension_numbers = #tpu.dot_dimension_numbers<[1], [0], [0], [1], [0, 0, 1, 1], [], []>} : vector<2x16xbf16>, vector<16x1024xbf16>, vector<2x1024xf32> -> vector<2x1024xf32>
    %c0_3 = arith.constant 0 : index
    %c0_4 = arith.constant 0 : index
    %3 = vector.load %arg3[%c0_3, %c0_4] : memref<2x1024xf32, #tpu.memory_space<vmem>>, vector<2x1024xf32>
    tpu.vector_store %arg3[%c0_3, %c0_4], %2 {strides = array<i32>} : memref<2x1024xf32, #tpu.memory_space<vmem>>, vector<2x1024xf32>,
    return
  }
  func.func @transform_0(%arg0: i32) -> (i32, i32) {
    %c0_i32 = arith.constant 0 : i32
    %c0_i32_0 = arith.constant 0 : i32
    %c0_i32_1 = arith.constant 0 : i32
    return %c0_i32, %c0_i32_0 : i32, i32
  }
  func.func @transform_1(%arg0: i32) -> (i32, i32) {
    %c0_i32 = arith.constant 0 : i32
    %c0_i32_0 = arith.constant 0 : i32
    %c0_i32_1 = arith.constant 0 : i32
    return %c0_i32, %c0_i32_0 : i32, i32
  }
  func.func @transform_2(%arg0: i32) -> (i32, i32) {
    %c0_i32 = arith.constant 0 : i32
    %c0_i32_0 = arith.constant 0 : i32
    %c0_i32_1 = arith.constant 0 : i32
    return %c0_i32, %c0_i32_0 : i32, i32
  }
}

module attributes {stable_mosaic.version = 11 : i64} {
  func.func @_convt_phase_kernel(%arg0: i32, %arg1: memref<2x64x42xbf16, #tpu.memory_space<vmem>>, %arg2: memref<16x32x64xbf16, #tpu.memory_space<vmem>>, %arg3: memref<2x4x32x24xbf16, #tpu.memory_space<vmem>>, %arg4: memref<32x2xf32, #tpu.memory_space<vmem>>) attributes {dimension_semantics = [#tpu.dimension_semantics<arbitrary>], iteration_bounds = array<i64: 1>, scalar_prefetch = 0 : i64, scratch_operands = 0 : i64, tpu.core_type = #tpu.core_type<tc>, window_params = [{transform_indices = @transform_0, window_bounds = array<i64: 2, 64, 42>}, {pipeline_mode = #tpu.pipeline_mode<synchronous>, transform_indices = @transform_1, window_bounds = array<i64: 16, 32, 64>}, {transform_indices = @transform_2, window_bounds = array<i64: 2, 4, 32, 24>}, {pipeline_mode = #tpu.pipeline_mode<synchronous>, transform_indices = @transform_3, window_bounds = array<i64: 32, 2>}]} {
    %c0_i32 = arith.constant 0 : i32
    %0 = arith.cmpi eq, %arg0, %c0_i32 : i32
    %1 = arith.extui %0 : i1 to i32
    %c0_i32_0 = arith.constant 0 : i32
    %2 = arith.cmpi ne, %1, %c0_i32_0 : i32
    scf.if %2 {
      %cst_286 = arith.constant 0.000000e+00 : f32
      %350 = vector.broadcast %cst_286 : f32 to vector<32x2xf32>
      %c0_287 = arith.constant 0 : index
      %c0_288 = arith.constant 0 : index
      %351 = vector.load %arg4[%c0_287, %c0_288] : memref<32x2xf32, #tpu.memory_space<vmem>>, vector<32x2xf32>
      tpu.vector_store %arg4[%c0_287, %c0_288], %350 {strides = array<i32>} : memref<32x2xf32, #tpu.memory_space<vmem>>, vector<32x2xf32>,
    } else {
    }
    %3 = tpu.iota {dimensions = array<i32: 1>} : vector<1x24xi32>
    %c6_i32 = arith.constant 6 : i32
    %c0_i32_1 = arith.constant 0 : i32
    %4 = arith.cmpi eq, %c6_i32, %c0_i32_1 : i32
    %c1_i32 = arith.constant 1 : i32
    %5 = arith.select %4, %c1_i32, %c6_i32 : i32
    %6 = vector.broadcast %5 : i32 to vector<1x24xi32>
    %7 = arith.remsi %3, %6 : vector<1x24xi32>
    %c0_i32_2 = arith.constant 0 : i32
    %8 = vector.broadcast %c0_i32_2 : i32 to vector<1x24xi32>
    %9 = arith.cmpi ne, %7, %8 : vector<1x24xi32>
    %c0_i32_3 = arith.constant 0 : i32
    %10 = vector.broadcast %c0_i32_3 : i32 to vector<1x24xi32>
    %11 = arith.cmpi slt, %7, %10 : vector<1x24xi32>
    %c0_i32_4 = arith.constant 0 : i32
    %12 = arith.cmpi slt, %5, %c0_i32_4 : i32
    %13 = vector.broadcast %12 : i1 to vector<1x24xi1>
    %14 = vector.broadcast %13 : vector<1x24xi1> to vector<1x24xi1>
    %15 = arith.xori %11, %14 : vector<1x24xi1>
    %16 = arith.andi %15, %9 : vector<1x24xi1>
    %17 = vector.broadcast %5 : i32 to vector<1x24xi32>
    %18 = arith.addi %7, %17 : vector<1x24xi32>
    %19 = arith.select %16, %18, %7 : vector<1x24xi1>, vector<1x24xi32>
    %c4_i32 = arith.constant 4 : i32
    %20 = vector.broadcast %c4_i32 : i32 to vector<1x24xi32>
    %21 = arith.cmpi slt, %19, %20 : vector<1x24xi32>
    %cst = arith.constant 0.000000e+00 : f32
    %22 = vector.broadcast %cst : f32 to vector<32x1xf32>
    %cst_5 = arith.constant 0.000000e+00 : f32
    %23 = vector.broadcast %cst_5 : f32 to vector<32x1xf32>
    %cst_6 = arith.constant 0.000000e+00 : f32
    %24 = vector.broadcast %cst_6 : f32 to vector<32x24xf32>
    %c0 = arith.constant 0 : index
    %c0_7 = arith.constant 0 : index
    %c0_8 = arith.constant 0 : index
    %25 = vector.load %arg1[%c0, %c0_7, %c0_8] : memref<2x64x42xbf16, #tpu.memory_space<vmem>>, vector<1x64x24xbf16>
    %26 = vector.shape_cast %25 : vector<1x64x24xbf16> to vector<64x24xbf16>
    %c0_9 = arith.constant 0 : index
    %c0_10 = arith.constant 0 : index
    %c0_11 = arith.constant 0 : index
    %27 = vector.load %arg2[%c0_9, %c0_10, %c0_11] : memref<16x32x64xbf16, #tpu.memory_space<vmem>>, vector<1x32x64xbf16>
    %28 = vector.shape_cast %27 : vector<1x32x64xbf16> to vector<32x64xbf16>
    %cst_12 = arith.constant dense<0.000000e+00> : vector<32x24xf32>
    %29 = tpu.matmul %28, %26, %cst_12 {dimension_numbers = #tpu.dot_dimension_numbers<[1], [0], [0], [1], [0, 0, 1, 1], [], []>} : vector<32x64xbf16>, vector<64x24xbf16>, vector<32x24xf32> -> vector<32x24xf32>
    %30 = arith.addf %24, %29 : vector<32x24xf32>
    %c0_13 = arith.constant 0 : index
    %c0_14 = arith.constant 0 : index
    %c1 = arith.constant 1 : index
    %31 = vector.load %arg1[%c0_13, %c0_14, %c1] : memref<2x64x42xbf16, #tpu.memory_space<vmem>>, vector<1x64x24xbf16>
    %32 = vector.shape_cast %31 : vector<1x64x24xbf16> to vector<64x24xbf16>
    %c1_15 = arith.constant 1 : index
    %c0_16 = arith.constant 0 : index
    %c0_17 = arith.constant 0 : index
    %33 = vector.load %arg2[%c1_15, %c0_16, %c0_17] : memref<16x32x64xbf16, #tpu.memory_space<vmem>>, vector<1x32x64xbf16>
    %34 = vector.shape_cast %33 : vector<1x32x64xbf16> to vector<32x64xbf16>
    %cst_18 = arith.constant dense<0.000000e+00> : vector<32x24xf32>
    %35 = tpu.matmul %34, %32, %cst_18 {dimension_numbers = #tpu.dot_dimension_numbers<[1], [0], [0], [1], [0, 0, 1, 1], [], []>} : vector<32x64xbf16>, vector<64x24xbf16>, vector<32x24xf32> -> vector<32x24xf32>
    %36 = arith.addf %30, %35 : vector<32x24xf32>
    %c0_19 = arith.constant 0 : index
    %c0_20 = arith.constant 0 : index
    %c6 = arith.constant 6 : index
    %37 = vector.load %arg1[%c0_19, %c0_20, %c6] : memref<2x64x42xbf16, #tpu.memory_space<vmem>>, vector<1x64x24xbf16>
    %38 = vector.shape_cast %37 : vector<1x64x24xbf16> to vector<64x24xbf16>
    %c2 = arith.constant 2 : index
    %c0_21 = arith.constant 0 : index
    %c0_22 = arith.constant 0 : index
    %39 = vector.load %arg2[%c2, %c0_21, %c0_22] : memref<16x32x64xbf16, #tpu.memory_space<vmem>>, vector<1x32x64xbf16>
    %40 = vector.shape_cast %39 : vector<1x32x64xbf16> to vector<32x64xbf16>
    %cst_23 = arith.constant dense<0.000000e+00> : vector<32x24xf32>
    %41 = tpu.matmul %40, %38, %cst_23 {dimension_numbers = #tpu.dot_dimension_numbers<[1], [0], [0], [1], [0, 0, 1, 1], [], []>} : vector<32x64xbf16>, vector<64x24xbf16>, vector<32x24xf32> -> vector<32x24xf32>
    %42 = arith.addf %36, %41 : vector<32x24xf32>
    %c0_24 = arith.constant 0 : index
    %c0_25 = arith.constant 0 : index
    %c7 = arith.constant 7 : index
    %43 = vector.load %arg1[%c0_24, %c0_25, %c7] : memref<2x64x42xbf16, #tpu.memory_space<vmem>>, vector<1x64x24xbf16>
    %44 = vector.shape_cast %43 : vector<1x64x24xbf16> to vector<64x24xbf16>
    %c3 = arith.constant 3 : index
    %c0_26 = arith.constant 0 : index
    %c0_27 = arith.constant 0 : index
    %45 = vector.load %arg2[%c3, %c0_26, %c0_27] : memref<16x32x64xbf16, #tpu.memory_space<vmem>>, vector<1x32x64xbf16>
    %46 = vector.shape_cast %45 : vector<1x32x64xbf16> to vector<32x64xbf16>
    %cst_28 = arith.constant dense<0.000000e+00> : vector<32x24xf32>
    %47 = tpu.matmul %46, %44, %cst_28 {dimension_numbers = #tpu.dot_dimension_numbers<[1], [0], [0], [1], [0, 0, 1, 1], [], []>} : vector<32x64xbf16>, vector<64x24xbf16>, vector<32x24xf32> -> vector<32x24xf32>
    %48 = arith.addf %42, %47 : vector<32x24xf32>
    %49 = arith.truncf %48 : vector<32x24xf32> to vector<32x24xbf16>
    %c0_29 = arith.constant 0 : index
    %c0_30 = arith.constant 0 : index
    %c0_31 = arith.constant 0 : index
    %c0_32 = arith.constant 0 : index
    %50 = vector.load %arg3[%c0_29, %c0_30, %c0_31, %c0_32] : memref<2x4x32x24xbf16, #tpu.memory_space<vmem>>, vector<1x1x32x24xbf16>
    %51 = vector.shape_cast %50 : vector<1x1x32x24xbf16> to vector<32x24xbf16>
    %52 = vector.shape_cast %49 : vector<32x24xbf16> to vector<1x1x32x24xbf16>
    tpu.vector_store %arg3[%c0_29, %c0_30, %c0_31, %c0_32], %52 {strides = array<i32>} : memref<2x4x32x24xbf16, #tpu.memory_space<vmem>>, vector<1x1x32x24xbf16>,
    %cst_33 = arith.constant 0.000000e+00 : f32
    %53 = vector.shape_cast %21 : vector<1x24xi1> to vector<1x24xi1>
    %54 = vector.broadcast %53 : vector<1x24xi1> to vector<32x24xi1>
    %55 = vector.broadcast %cst_33 : f32 to vector<32x24xf32>
    %56 = arith.select %54, %48, %55 : vector<32x24xi1>, vector<32x24xf32>
    %cst_34 = arith.constant dense<0.000000e+00> : vector<32xf32>
    %57 = vector.multi_reduction <add>, %56, %cst_34 [1] : vector<32x24xf32> to vector<32xf32>
    %58 = vector.shape_cast %57 : vector<32xf32> to vector<32x1xf32>
    %59 = arith.addf %22, %58 : vector<32x1xf32>
    %60 = arith.mulf %56, %56 : vector<32x24xf32>
    %cst_35 = arith.constant dense<0.000000e+00> : vector<32xf32>
    %61 = vector.multi_reduction <add>, %60, %cst_35 [1] : vector<32x24xf32> to vector<32xf32>
    %62 = vector.shape_cast %61 : vector<32xf32> to vector<32x1xf32>
    %63 = arith.addf %23, %62 : vector<32x1xf32>
    %cst_36 = arith.constant 0.000000e+00 : f32
    %64 = vector.broadcast %cst_36 : f32 to vector<32x24xf32>
    %c0_37 = arith.constant 0 : index
    %c0_38 = arith.constant 0 : index
    %c1_39 = arith.constant 1 : index
    %65 = vector.load %arg1[%c0_37, %c0_38, %c1_39] : memref<2x64x42xbf16, #tpu.memory_space<vmem>>, vector<1x64x24xbf16>
    %66 = vector.shape_cast %65 : vector<1x64x24xbf16> to vector<64x24xbf16>
    %c4 = arith.constant 4 : index
    %c0_40 = arith.constant 0 : index
    %c0_41 = arith.constant 0 : index
    %67 = vector.load %arg2[%c4, %c0_40, %c0_41] : memref<16x32x64xbf16, #tpu.memory_space<vmem>>, vector<1x32x64xbf16>
    %68 = vector.shape_cast %67 : vector<1x32x64xbf16> to vector<32x64xbf16>
    %cst_42 = arith.constant dense<0.000000e+00> : vector<32x24xf32>
    %69 = tpu.matmul %68, %66, %cst_42 {dimension_numbers = #tpu.dot_dimension_numbers<[1], [0], [0], [1], [0, 0, 1, 1], [], []>} : vector<32x64xbf16>, vector<64x24xbf16>, vector<32x24xf32> -> vector<32x24xf32>
    %70 = arith.addf %64, %69 : vector<32x24xf32>
    %c0_43 = arith.constant 0 : index
    %c0_44 = arith.constant 0 : index
    %c2_45 = arith.constant 2 : index
    %71 = vector.load %arg1[%c0_43, %c0_44, %c2_45] : memref<2x64x42xbf16, #tpu.memory_space<vmem>>, vector<1x64x24xbf16>
    %72 = vector.shape_cast %71 : vector<1x64x24xbf16> to vector<64x24xbf16>
    %c5 = arith.constant 5 : index
    %c0_46 = arith.constant 0 : index
    %c0_47 = arith.constant 0 : index
    %73 = vector.load %arg2[%c5, %c0_46, %c0_47] : memref<16x32x64xbf16, #tpu.memory_space<vmem>>, vector<1x32x64xbf16>
    %74 = vector.shape_cast %73 : vector<1x32x64xbf16> to vector<32x64xbf16>
    %cst_48 = arith.constant dense<0.000000e+00> : vector<32x24xf32>
    %75 = tpu.matmul %74, %72, %cst_48 {dimension_numbers = #tpu.dot_dimension_numbers<[1], [0], [0], [1], [0, 0, 1, 1], [], []>} : vector<32x64xbf16>, vector<64x24xbf16>, vector<32x24xf32> -> vector<32x24xf32>
    %76 = arith.addf %70, %75 : vector<32x24xf32>
    %c0_49 = arith.constant 0 : index
    %c0_50 = arith.constant 0 : index
    %c7_51 = arith.constant 7 : index
    %77 = vector.load %arg1[%c0_49, %c0_50, %c7_51] : memref<2x64x42xbf16, #tpu.memory_space<vmem>>, vector<1x64x24xbf16>
    %78 = vector.shape_cast %77 : vector<1x64x24xbf16> to vector<64x24xbf16>
    %c6_52 = arith.constant 6 : index
    %c0_53 = arith.constant 0 : index
    %c0_54 = arith.constant 0 : index
    %79 = vector.load %arg2[%c6_52, %c0_53, %c0_54] : memref<16x32x64xbf16, #tpu.memory_space<vmem>>, vector<1x32x64xbf16>
    %80 = vector.shape_cast %79 : vector<1x32x64xbf16> to vector<32x64xbf16>
    %cst_55 = arith.constant dense<0.000000e+00> : vector<32x24xf32>
    %81 = tpu.matmul %80, %78, %cst_55 {dimension_numbers = #tpu.dot_dimension_numbers<[1], [0], [0], [1], [0, 0, 1, 1], [], []>} : vector<32x64xbf16>, vector<64x24xbf16>, vector<32x24xf32> -> vector<32x24xf32>
    %82 = arith.addf %76, %81 : vector<32x24xf32>
    %c0_56 = arith.constant 0 : index
    %c0_57 = arith.constant 0 : index
    %c8 = arith.constant 8 : index
    %83 = vector.load %arg1[%c0_56, %c0_57, %c8] : memref<2x64x42xbf16, #tpu.memory_space<vmem>>, vector<1x64x24xbf16>
    %84 = vector.shape_cast %83 : vector<1x64x24xbf16> to vector<64x24xbf16>
    %c7_58 = arith.constant 7 : index
    %c0_59 = arith.constant 0 : index
    %c0_60 = arith.constant 0 : index
    %85 = vector.load %arg2[%c7_58, %c0_59, %c0_60] : memref<16x32x64xbf16, #tpu.memory_space<vmem>>, vector<1x32x64xbf16>
    %86 = vector.shape_cast %85 : vector<1x32x64xbf16> to vector<32x64xbf16>
    %cst_61 = arith.constant dense<0.000000e+00> : vector<32x24xf32>
    %87 = tpu.matmul %86, %84, %cst_61 {dimension_numbers = #tpu.dot_dimension_numbers<[1], [0], [0], [1], [0, 0, 1, 1], [], []>} : vector<32x64xbf16>, vector<64x24xbf16>, vector<32x24xf32> -> vector<32x24xf32>
    %88 = arith.addf %82, %87 : vector<32x24xf32>
    %89 = arith.truncf %88 : vector<32x24xf32> to vector<32x24xbf16>
    %c0_62 = arith.constant 0 : index
    %c1_63 = arith.constant 1 : index
    %c0_64 = arith.constant 0 : index
    %c0_65 = arith.constant 0 : index
    %90 = vector.load %arg3[%c0_62, %c1_63, %c0_64, %c0_65] : memref<2x4x32x24xbf16, #tpu.memory_space<vmem>>, vector<1x1x32x24xbf16>
    %91 = vector.shape_cast %90 : vector<1x1x32x24xbf16> to vector<32x24xbf16>
    %92 = vector.shape_cast %89 : vector<32x24xbf16> to vector<1x1x32x24xbf16>
    tpu.vector_store %arg3[%c0_62, %c1_63, %c0_64, %c0_65], %92 {strides = array<i32>} : memref<2x4x32x24xbf16, #tpu.memory_space<vmem>>, vector<1x1x32x24xbf16>,
    %cst_66 = arith.constant 0.000000e+00 : f32
    %93 = vector.shape_cast %21 : vector<1x24xi1> to vector<1x24xi1>
    %94 = vector.broadcast %93 : vector<1x24xi1> to vector<32x24xi1>
    %95 = vector.broadcast %cst_66 : f32 to vector<32x24xf32>
    %96 = arith.select %94, %88, %95 : vector<32x24xi1>, vector<32x24xf32>
    %cst_67 = arith.constant dense<0.000000e+00> : vector<32xf32>
    %97 = vector.multi_reduction <add>, %96, %cst_67 [1] : vector<32x24xf32> to vector<32xf32>
    %98 = vector.shape_cast %97 : vector<32xf32> to vector<32x1xf32>
    %99 = arith.addf %59, %98 : vector<32x1xf32>
    %100 = arith.mulf %96, %96 : vector<32x24xf32>
    %cst_68 = arith.constant dense<0.000000e+00> : vector<32xf32>
    %101 = vector.multi_reduction <add>, %100, %cst_68 [1] : vector<32x24xf32> to vector<32xf32>
    %102 = vector.shape_cast %101 : vector<32xf32> to vector<32x1xf32>
    %103 = arith.addf %63, %102 : vector<32x1xf32>
    %cst_69 = arith.constant 0.000000e+00 : f32
    %104 = vector.broadcast %cst_69 : f32 to vector<32x24xf32>
    %c0_70 = arith.constant 0 : index
    %c0_71 = arith.constant 0 : index
    %c6_72 = arith.constant 6 : index
    %105 = vector.load %arg1[%c0_70, %c0_71, %c6_72] : memref<2x64x42xbf16, #tpu.memory_space<vmem>>, vector<1x64x24xbf16>
    %106 = vector.shape_cast %105 : vector<1x64x24xbf16> to vector<64x24xbf16>
    %c8_73 = arith.constant 8 : index
    %c0_74 = arith.constant 0 : index
    %c0_75 = arith.constant 0 : index
    %107 = vector.load %arg2[%c8_73, %c0_74, %c0_75] : memref<16x32x64xbf16, #tpu.memory_space<vmem>>, vector<1x32x64xbf16>
    %108 = vector.shape_cast %107 : vector<1x32x64xbf16> to vector<32x64xbf16>
    %cst_76 = arith.constant dense<0.000000e+00> : vector<32x24xf32>
    %109 = tpu.matmul %108, %106, %cst_76 {dimension_numbers = #tpu.dot_dimension_numbers<[1], [0], [0], [1], [0, 0, 1, 1], [], []>} : vector<32x64xbf16>, vector<64x24xbf16>, vector<32x24xf32> -> vector<32x24xf32>
    %110 = arith.addf %104, %109 : vector<32x24xf32>
    %c0_77 = arith.constant 0 : index
    %c0_78 = arith.constant 0 : index
    %c7_79 = arith.constant 7 : index
    %111 = vector.load %arg1[%c0_77, %c0_78, %c7_79] : memref<2x64x42xbf16, #tpu.memory_space<vmem>>, vector<1x64x24xbf16>
    %112 = vector.shape_cast %111 : vector<1x64x24xbf16> to vector<64x24xbf16>
    %c9 = arith.constant 9 : index
    %c0_80 = arith.constant 0 : index
    %c0_81 = arith.constant 0 : index
    %113 = vector.load %arg2[%c9, %c0_80, %c0_81] : memref<16x32x64xbf16, #tpu.memory_space<vmem>>, vector<1x32x64xbf16>
    %114 = vector.shape_cast %113 : vector<1x32x64xbf16> to vector<32x64xbf16>
    %cst_82 = arith.constant dense<0.000000e+00> : vector<32x24xf32>
    %115 = tpu.matmul %114, %112, %cst_82 {dimension_numbers = #tpu.dot_dimension_numbers<[1], [0], [0], [1], [0, 0, 1, 1], [], []>} : vector<32x64xbf16>, vector<64x24xbf16>, vector<32x24xf32> -> vector<32x24xf32>
    %116 = arith.addf %110, %115 : vector<32x24xf32>
    %c0_83 = arith.constant 0 : index
    %c0_84 = arith.constant 0 : index
    %c12 = arith.constant 12 : index
    %117 = vector.load %arg1[%c0_83, %c0_84, %c12] : memref<2x64x42xbf16, #tpu.memory_space<vmem>>, vector<1x64x24xbf16>
    %118 = vector.shape_cast %117 : vector<1x64x24xbf16> to vector<64x24xbf16>
    %c10 = arith.constant 10 : index
    %c0_85 = arith.constant 0 : index
    %c0_86 = arith.constant 0 : index
    %119 = vector.load %arg2[%c10, %c0_85, %c0_86] : memref<16x32x64xbf16, #tpu.memory_space<vmem>>, vector<1x32x64xbf16>
    %120 = vector.shape_cast %119 : vector<1x32x64xbf16> to vector<32x64xbf16>
    %cst_87 = arith.constant dense<0.000000e+00> : vector<32x24xf32>
    %121 = tpu.matmul %120, %118, %cst_87 {dimension_numbers = #tpu.dot_dimension_numbers<[1], [0], [0], [1], [0, 0, 1, 1], [], []>} : vector<32x64xbf16>, vector<64x24xbf16>, vector<32x24xf32> -> vector<32x24xf32>
    %122 = arith.addf %116, %121 : vector<32x24xf32>
    %c0_88 = arith.constant 0 : index
    %c0_89 = arith.constant 0 : index
    %c13 = arith.constant 13 : index
    %123 = vector.load %arg1[%c0_88, %c0_89, %c13] : memref<2x64x42xbf16, #tpu.memory_space<vmem>>, vector<1x64x24xbf16>
    %124 = vector.shape_cast %123 : vector<1x64x24xbf16> to vector<64x24xbf16>
    %c11 = arith.constant 11 : index
    %c0_90 = arith.constant 0 : index
    %c0_91 = arith.constant 0 : index
    %125 = vector.load %arg2[%c11, %c0_90, %c0_91] : memref<16x32x64xbf16, #tpu.memory_space<vmem>>, vector<1x32x64xbf16>
    %126 = vector.shape_cast %125 : vector<1x32x64xbf16> to vector<32x64xbf16>
    %cst_92 = arith.constant dense<0.000000e+00> : vector<32x24xf32>
    %127 = tpu.matmul %126, %124, %cst_92 {dimension_numbers = #tpu.dot_dimension_numbers<[1], [0], [0], [1], [0, 0, 1, 1], [], []>} : vector<32x64xbf16>, vector<64x24xbf16>, vector<32x24xf32> -> vector<32x24xf32>
    %128 = arith.addf %122, %127 : vector<32x24xf32>
    %129 = arith.truncf %128 : vector<32x24xf32> to vector<32x24xbf16>
    %c0_93 = arith.constant 0 : index
    %c2_94 = arith.constant 2 : index
    %c0_95 = arith.constant 0 : index
    %c0_96 = arith.constant 0 : index
    %130 = vector.load %arg3[%c0_93, %c2_94, %c0_95, %c0_96] : memref<2x4x32x24xbf16, #tpu.memory_space<vmem>>, vector<1x1x32x24xbf16>
    %131 = vector.shape_cast %130 : vector<1x1x32x24xbf16> to vector<32x24xbf16>
    %132 = vector.shape_cast %129 : vector<32x24xbf16> to vector<1x1x32x24xbf16>
    tpu.vector_store %arg3[%c0_93, %c2_94, %c0_95, %c0_96], %132 {strides = array<i32>} : memref<2x4x32x24xbf16, #tpu.memory_space<vmem>>, vector<1x1x32x24xbf16>,
    %cst_97 = arith.constant 0.000000e+00 : f32
    %133 = vector.shape_cast %21 : vector<1x24xi1> to vector<1x24xi1>
    %134 = vector.broadcast %133 : vector<1x24xi1> to vector<32x24xi1>
    %135 = vector.broadcast %cst_97 : f32 to vector<32x24xf32>
    %136 = arith.select %134, %128, %135 : vector<32x24xi1>, vector<32x24xf32>
    %cst_98 = arith.constant dense<0.000000e+00> : vector<32xf32>
    %137 = vector.multi_reduction <add>, %136, %cst_98 [1] : vector<32x24xf32> to vector<32xf32>
    %138 = vector.shape_cast %137 : vector<32xf32> to vector<32x1xf32>
    %139 = arith.addf %99, %138 : vector<32x1xf32>
    %140 = arith.mulf %136, %136 : vector<32x24xf32>
    %cst_99 = arith.constant dense<0.000000e+00> : vector<32xf32>
    %141 = vector.multi_reduction <add>, %140, %cst_99 [1] : vector<32x24xf32> to vector<32xf32>
    %142 = vector.shape_cast %141 : vector<32xf32> to vector<32x1xf32>
    %143 = arith.addf %103, %142 : vector<32x1xf32>
    %cst_100 = arith.constant 0.000000e+00 : f32
    %144 = vector.broadcast %cst_100 : f32 to vector<32x24xf32>
    %c0_101 = arith.constant 0 : index
    %c0_102 = arith.constant 0 : index
    %c7_103 = arith.constant 7 : index
    %145 = vector.load %arg1[%c0_101, %c0_102, %c7_103] : memref<2x64x42xbf16, #tpu.memory_space<vmem>>, vector<1x64x24xbf16>
    %146 = vector.shape_cast %145 : vector<1x64x24xbf16> to vector<64x24xbf16>
    %c12_104 = arith.constant 12 : index
    %c0_105 = arith.constant 0 : index
    %c0_106 = arith.constant 0 : index
    %147 = vector.load %arg2[%c12_104, %c0_105, %c0_106] : memref<16x32x64xbf16, #tpu.memory_space<vmem>>, vector<1x32x64xbf16>
    %148 = vector.shape_cast %147 : vector<1x32x64xbf16> to vector<32x64xbf16>
    %cst_107 = arith.constant dense<0.000000e+00> : vector<32x24xf32>
    %149 = tpu.matmul %148, %146, %cst_107 {dimension_numbers = #tpu.dot_dimension_numbers<[1], [0], [0], [1], [0, 0, 1, 1], [], []>} : vector<32x64xbf16>, vector<64x24xbf16>, vector<32x24xf32> -> vector<32x24xf32>
    %150 = arith.addf %144, %149 : vector<32x24xf32>
    %c0_108 = arith.constant 0 : index
    %c0_109 = arith.constant 0 : index
    %c8_110 = arith.constant 8 : index
    %151 = vector.load %arg1[%c0_108, %c0_109, %c8_110] : memref<2x64x42xbf16, #tpu.memory_space<vmem>>, vector<1x64x24xbf16>
    %152 = vector.shape_cast %151 : vector<1x64x24xbf16> to vector<64x24xbf16>
    %c13_111 = arith.constant 13 : index
    %c0_112 = arith.constant 0 : index
    %c0_113 = arith.constant 0 : index
    %153 = vector.load %arg2[%c13_111, %c0_112, %c0_113] : memref<16x32x64xbf16, #tpu.memory_space<vmem>>, vector<1x32x64xbf16>
    %154 = vector.shape_cast %153 : vector<1x32x64xbf16> to vector<32x64xbf16>
    %cst_114 = arith.constant dense<0.000000e+00> : vector<32x24xf32>
    %155 = tpu.matmul %154, %152, %cst_114 {dimension_numbers = #tpu.dot_dimension_numbers<[1], [0], [0], [1], [0, 0, 1, 1], [], []>} : vector<32x64xbf16>, vector<64x24xbf16>, vector<32x24xf32> -> vector<32x24xf32>
    %156 = arith.addf %150, %155 : vector<32x24xf32>
    %c0_115 = arith.constant 0 : index
    %c0_116 = arith.constant 0 : index
    %c13_117 = arith.constant 13 : index
    %157 = vector.load %arg1[%c0_115, %c0_116, %c13_117] : memref<2x64x42xbf16, #tpu.memory_space<vmem>>, vector<1x64x24xbf16>
    %158 = vector.shape_cast %157 : vector<1x64x24xbf16> to vector<64x24xbf16>
    %c14 = arith.constant 14 : index
    %c0_118 = arith.constant 0 : index
    %c0_119 = arith.constant 0 : index
    %159 = vector.load %arg2[%c14, %c0_118, %c0_119] : memref<16x32x64xbf16, #tpu.memory_space<vmem>>, vector<1x32x64xbf16>
    %160 = vector.shape_cast %159 : vector<1x32x64xbf16> to vector<32x64xbf16>
    %cst_120 = arith.constant dense<0.000000e+00> : vector<32x24xf32>
    %161 = tpu.matmul %160, %158, %cst_120 {dimension_numbers = #tpu.dot_dimension_numbers<[1], [0], [0], [1], [0, 0, 1, 1], [], []>} : vector<32x64xbf16>, vector<64x24xbf16>, vector<32x24xf32> -> vector<32x24xf32>
    %162 = arith.addf %156, %161 : vector<32x24xf32>
    %c0_121 = arith.constant 0 : index
    %c0_122 = arith.constant 0 : index
    %c14_123 = arith.constant 14 : index
    %163 = vector.load %arg1[%c0_121, %c0_122, %c14_123] : memref<2x64x42xbf16, #tpu.memory_space<vmem>>, vector<1x64x24xbf16>
    %164 = vector.shape_cast %163 : vector<1x64x24xbf16> to vector<64x24xbf16>
    %c15 = arith.constant 15 : index
    %c0_124 = arith.constant 0 : index
    %c0_125 = arith.constant 0 : index
    %165 = vector.load %arg2[%c15, %c0_124, %c0_125] : memref<16x32x64xbf16, #tpu.memory_space<vmem>>, vector<1x32x64xbf16>
    %166 = vector.shape_cast %165 : vector<1x32x64xbf16> to vector<32x64xbf16>
    %cst_126 = arith.constant dense<0.000000e+00> : vector<32x24xf32>
    %167 = tpu.matmul %166, %164, %cst_126 {dimension_numbers = #tpu.dot_dimension_numbers<[1], [0], [0], [1], [0, 0, 1, 1], [], []>} : vector<32x64xbf16>, vector<64x24xbf16>, vector<32x24xf32> -> vector<32x24xf32>
    %168 = arith.addf %162, %167 : vector<32x24xf32>
    %169 = arith.truncf %168 : vector<32x24xf32> to vector<32x24xbf16>
    %c0_127 = arith.constant 0 : index
    %c3_128 = arith.constant 3 : index
    %c0_129 = arith.constant 0 : index
    %c0_130 = arith.constant 0 : index
    %170 = vector.load %arg3[%c0_127, %c3_128, %c0_129, %c0_130] : memref<2x4x32x24xbf16, #tpu.memory_space<vmem>>, vector<1x1x32x24xbf16>
    %171 = vector.shape_cast %170 : vector<1x1x32x24xbf16> to vector<32x24xbf16>
    %172 = vector.shape_cast %169 : vector<32x24xbf16> to vector<1x1x32x24xbf16>
    tpu.vector_store %arg3[%c0_127, %c3_128, %c0_129, %c0_130], %172 {strides = array<i32>} : memref<2x4x32x24xbf16, #tpu.memory_space<vmem>>, vector<1x1x32x24xbf16>,
    %cst_131 = arith.constant 0.000000e+00 : f32
    %173 = vector.shape_cast %21 : vector<1x24xi1> to vector<1x24xi1>
    %174 = vector.broadcast %173 : vector<1x24xi1> to vector<32x24xi1>
    %175 = vector.broadcast %cst_131 : f32 to vector<32x24xf32>
    %176 = arith.select %174, %168, %175 : vector<32x24xi1>, vector<32x24xf32>
    %cst_132 = arith.constant dense<0.000000e+00> : vector<32xf32>
    %177 = vector.multi_reduction <add>, %176, %cst_132 [1] : vector<32x24xf32> to vector<32xf32>
    %178 = vector.shape_cast %177 : vector<32xf32> to vector<32x1xf32>
    %179 = arith.addf %139, %178 : vector<32x1xf32>
    %180 = arith.mulf %176, %176 : vector<32x24xf32>
    %cst_133 = arith.constant dense<0.000000e+00> : vector<32xf32>
    %181 = vector.multi_reduction <add>, %180, %cst_133 [1] : vector<32x24xf32> to vector<32xf32>
    %182 = vector.shape_cast %181 : vector<32xf32> to vector<32x1xf32>
    %183 = arith.addf %143, %182 : vector<32x1xf32>
    %cst_134 = arith.constant 0.000000e+00 : f32
    %184 = vector.broadcast %cst_134 : f32 to vector<32x24xf32>
    %c1_135 = arith.constant 1 : index
    %c0_136 = arith.constant 0 : index
    %c0_137 = arith.constant 0 : index
    %185 = vector.load %arg1[%c1_135, %c0_136, %c0_137] : memref<2x64x42xbf16, #tpu.memory_space<vmem>>, vector<1x64x24xbf16>
    %186 = vector.shape_cast %185 : vector<1x64x24xbf16> to vector<64x24xbf16>
    %c0_138 = arith.constant 0 : index
    %c0_139 = arith.constant 0 : index
    %c0_140 = arith.constant 0 : index
    %187 = vector.load %arg2[%c0_138, %c0_139, %c0_140] : memref<16x32x64xbf16, #tpu.memory_space<vmem>>, vector<1x32x64xbf16>
    %188 = vector.shape_cast %187 : vector<1x32x64xbf16> to vector<32x64xbf16>
    %cst_141 = arith.constant dense<0.000000e+00> : vector<32x24xf32>
    %189 = tpu.matmul %188, %186, %cst_141 {dimension_numbers = #tpu.dot_dimension_numbers<[1], [0], [0], [1], [0, 0, 1, 1], [], []>} : vector<32x64xbf16>, vector<64x24xbf16>, vector<32x24xf32> -> vector<32x24xf32>
    %190 = arith.addf %184, %189 : vector<32x24xf32>
    %c1_142 = arith.constant 1 : index
    %c0_143 = arith.constant 0 : index
    %c1_144 = arith.constant 1 : index
    %191 = vector.load %arg1[%c1_142, %c0_143, %c1_144] : memref<2x64x42xbf16, #tpu.memory_space<vmem>>, vector<1x64x24xbf16>
    %192 = vector.shape_cast %191 : vector<1x64x24xbf16> to vector<64x24xbf16>
    %c1_145 = arith.constant 1 : index
    %c0_146 = arith.constant 0 : index
    %c0_147 = arith.constant 0 : index
    %193 = vector.load %arg2[%c1_145, %c0_146, %c0_147] : memref<16x32x64xbf16, #tpu.memory_space<vmem>>, vector<1x32x64xbf16>
    %194 = vector.shape_cast %193 : vector<1x32x64xbf16> to vector<32x64xbf16>
    %cst_148 = arith.constant dense<0.000000e+00> : vector<32x24xf32>
    %195 = tpu.matmul %194, %192, %cst_148 {dimension_numbers = #tpu.dot_dimension_numbers<[1], [0], [0], [1], [0, 0, 1, 1], [], []>} : vector<32x64xbf16>, vector<64x24xbf16>, vector<32x24xf32> -> vector<32x24xf32>
    %196 = arith.addf %190, %195 : vector<32x24xf32>
    %c1_149 = arith.constant 1 : index
    %c0_150 = arith.constant 0 : index
    %c6_151 = arith.constant 6 : index
    %197 = vector.load %arg1[%c1_149, %c0_150, %c6_151] : memref<2x64x42xbf16, #tpu.memory_space<vmem>>, vector<1x64x24xbf16>
    %198 = vector.shape_cast %197 : vector<1x64x24xbf16> to vector<64x24xbf16>
    %c2_152 = arith.constant 2 : index
    %c0_153 = arith.constant 0 : index
    %c0_154 = arith.constant 0 : index
    %199 = vector.load %arg2[%c2_152, %c0_153, %c0_154] : memref<16x32x64xbf16, #tpu.memory_space<vmem>>, vector<1x32x64xbf16>
    %200 = vector.shape_cast %199 : vector<1x32x64xbf16> to vector<32x64xbf16>
    %cst_155 = arith.constant dense<0.000000e+00> : vector<32x24xf32>
    %201 = tpu.matmul %200, %198, %cst_155 {dimension_numbers = #tpu.dot_dimension_numbers<[1], [0], [0], [1], [0, 0, 1, 1], [], []>} : vector<32x64xbf16>, vector<64x24xbf16>, vector<32x24xf32> -> vector<32x24xf32>
    %202 = arith.addf %196, %201 : vector<32x24xf32>
    %c1_156 = arith.constant 1 : index
    %c0_157 = arith.constant 0 : index
    %c7_158 = arith.constant 7 : index
    %203 = vector.load %arg1[%c1_156, %c0_157, %c7_158] : memref<2x64x42xbf16, #tpu.memory_space<vmem>>, vector<1x64x24xbf16>
    %204 = vector.shape_cast %203 : vector<1x64x24xbf16> to vector<64x24xbf16>
    %c3_159 = arith.constant 3 : index
    %c0_160 = arith.constant 0 : index
    %c0_161 = arith.constant 0 : index
    %205 = vector.load %arg2[%c3_159, %c0_160, %c0_161] : memref<16x32x64xbf16, #tpu.memory_space<vmem>>, vector<1x32x64xbf16>
    %206 = vector.shape_cast %205 : vector<1x32x64xbf16> to vector<32x64xbf16>
    %cst_162 = arith.constant dense<0.000000e+00> : vector<32x24xf32>
    %207 = tpu.matmul %206, %204, %cst_162 {dimension_numbers = #tpu.dot_dimension_numbers<[1], [0], [0], [1], [0, 0, 1, 1], [], []>} : vector<32x64xbf16>, vector<64x24xbf16>, vector<32x24xf32> -> vector<32x24xf32>
    %208 = arith.addf %202, %207 : vector<32x24xf32>
    %209 = arith.truncf %208 : vector<32x24xf32> to vector<32x24xbf16>
    %c1_163 = arith.constant 1 : index
    %c0_164 = arith.constant 0 : index
    %c0_165 = arith.constant 0 : index
    %c0_166 = arith.constant 0 : index
    %210 = vector.load %arg3[%c1_163, %c0_164, %c0_165, %c0_166] : memref<2x4x32x24xbf16, #tpu.memory_space<vmem>>, vector<1x1x32x24xbf16>
    %211 = vector.shape_cast %210 : vector<1x1x32x24xbf16> to vector<32x24xbf16>
    %212 = vector.shape_cast %209 : vector<32x24xbf16> to vector<1x1x32x24xbf16>
    tpu.vector_store %arg3[%c1_163, %c0_164, %c0_165, %c0_166], %212 {strides = array<i32>} : memref<2x4x32x24xbf16, #tpu.memory_space<vmem>>, vector<1x1x32x24xbf16>,
    %cst_167 = arith.constant 0.000000e+00 : f32
    %213 = vector.shape_cast %21 : vector<1x24xi1> to vector<1x24xi1>
    %214 = vector.broadcast %213 : vector<1x24xi1> to vector<32x24xi1>
    %215 = vector.broadcast %cst_167 : f32 to vector<32x24xf32>
    %216 = arith.select %214, %208, %215 : vector<32x24xi1>, vector<32x24xf32>
    %cst_168 = arith.constant dense<0.000000e+00> : vector<32xf32>
    %217 = vector.multi_reduction <add>, %216, %cst_168 [1] : vector<32x24xf32> to vector<32xf32>
    %218 = vector.shape_cast %217 : vector<32xf32> to vector<32x1xf32>
    %219 = arith.addf %179, %218 : vector<32x1xf32>
    %220 = arith.mulf %216, %216 : vector<32x24xf32>
    %cst_169 = arith.constant dense<0.000000e+00> : vector<32xf32>
    %221 = vector.multi_reduction <add>, %220, %cst_169 [1] : vector<32x24xf32> to vector<32xf32>
    %222 = vector.shape_cast %221 : vector<32xf32> to vector<32x1xf32>
    %223 = arith.addf %183, %222 : vector<32x1xf32>
    %cst_170 = arith.constant 0.000000e+00 : f32
    %224 = vector.broadcast %cst_170 : f32 to vector<32x24xf32>
    %c1_171 = arith.constant 1 : index
    %c0_172 = arith.constant 0 : index
    %c1_173 = arith.constant 1 : index
    %225 = vector.load %arg1[%c1_171, %c0_172, %c1_173] : memref<2x64x42xbf16, #tpu.memory_space<vmem>>, vector<1x64x24xbf16>
    %226 = vector.shape_cast %225 : vector<1x64x24xbf16> to vector<64x24xbf16>
    %c4_174 = arith.constant 4 : index
    %c0_175 = arith.constant 0 : index
    %c0_176 = arith.constant 0 : index
    %227 = vector.load %arg2[%c4_174, %c0_175, %c0_176] : memref<16x32x64xbf16, #tpu.memory_space<vmem>>, vector<1x32x64xbf16>
    %228 = vector.shape_cast %227 : vector<1x32x64xbf16> to vector<32x64xbf16>
    %cst_177 = arith.constant dense<0.000000e+00> : vector<32x24xf32>
    %229 = tpu.matmul %228, %226, %cst_177 {dimension_numbers = #tpu.dot_dimension_numbers<[1], [0], [0], [1], [0, 0, 1, 1], [], []>} : vector<32x64xbf16>, vector<64x24xbf16>, vector<32x24xf32> -> vector<32x24xf32>
    %230 = arith.addf %224, %229 : vector<32x24xf32>
    %c1_178 = arith.constant 1 : index
    %c0_179 = arith.constant 0 : index
    %c2_180 = arith.constant 2 : index
    %231 = vector.load %arg1[%c1_178, %c0_179, %c2_180] : memref<2x64x42xbf16, #tpu.memory_space<vmem>>, vector<1x64x24xbf16>
    %232 = vector.shape_cast %231 : vector<1x64x24xbf16> to vector<64x24xbf16>
    %c5_181 = arith.constant 5 : index
    %c0_182 = arith.constant 0 : index
    %c0_183 = arith.constant 0 : index
    %233 = vector.load %arg2[%c5_181, %c0_182, %c0_183] : memref<16x32x64xbf16, #tpu.memory_space<vmem>>, vector<1x32x64xbf16>
    %234 = vector.shape_cast %233 : vector<1x32x64xbf16> to vector<32x64xbf16>
    %cst_184 = arith.constant dense<0.000000e+00> : vector<32x24xf32>
    %235 = tpu.matmul %234, %232, %cst_184 {dimension_numbers = #tpu.dot_dimension_numbers<[1], [0], [0], [1], [0, 0, 1, 1], [], []>} : vector<32x64xbf16>, vector<64x24xbf16>, vector<32x24xf32> -> vector<32x24xf32>
    %236 = arith.addf %230, %235 : vector<32x24xf32>
    %c1_185 = arith.constant 1 : index
    %c0_186 = arith.constant 0 : index
    %c7_187 = arith.constant 7 : index
    %237 = vector.load %arg1[%c1_185, %c0_186, %c7_187] : memref<2x64x42xbf16, #tpu.memory_space<vmem>>, vector<1x64x24xbf16>
    %238 = vector.shape_cast %237 : vector<1x64x24xbf16> to vector<64x24xbf16>
    %c6_188 = arith.constant 6 : index
    %c0_189 = arith.constant 0 : index
    %c0_190 = arith.constant 0 : index
    %239 = vector.load %arg2[%c6_188, %c0_189, %c0_190] : memref<16x32x64xbf16, #tpu.memory_space<vmem>>, vector<1x32x64xbf16>
    %240 = vector.shape_cast %239 : vector<1x32x64xbf16> to vector<32x64xbf16>
    %cst_191 = arith.constant dense<0.000000e+00> : vector<32x24xf32>
    %241 = tpu.matmul %240, %238, %cst_191 {dimension_numbers = #tpu.dot_dimension_numbers<[1], [0], [0], [1], [0, 0, 1, 1], [], []>} : vector<32x64xbf16>, vector<64x24xbf16>, vector<32x24xf32> -> vector<32x24xf32>
    %242 = arith.addf %236, %241 : vector<32x24xf32>
    %c1_192 = arith.constant 1 : index
    %c0_193 = arith.constant 0 : index
    %c8_194 = arith.constant 8 : index
    %243 = vector.load %arg1[%c1_192, %c0_193, %c8_194] : memref<2x64x42xbf16, #tpu.memory_space<vmem>>, vector<1x64x24xbf16>
    %244 = vector.shape_cast %243 : vector<1x64x24xbf16> to vector<64x24xbf16>
    %c7_195 = arith.constant 7 : index
    %c0_196 = arith.constant 0 : index
    %c0_197 = arith.constant 0 : index
    %245 = vector.load %arg2[%c7_195, %c0_196, %c0_197] : memref<16x32x64xbf16, #tpu.memory_space<vmem>>, vector<1x32x64xbf16>
    %246 = vector.shape_cast %245 : vector<1x32x64xbf16> to vector<32x64xbf16>
    %cst_198 = arith.constant dense<0.000000e+00> : vector<32x24xf32>
    %247 = tpu.matmul %246, %244, %cst_198 {dimension_numbers = #tpu.dot_dimension_numbers<[1], [0], [0], [1], [0, 0, 1, 1], [], []>} : vector<32x64xbf16>, vector<64x24xbf16>, vector<32x24xf32> -> vector<32x24xf32>
    %248 = arith.addf %242, %247 : vector<32x24xf32>
    %249 = arith.truncf %248 : vector<32x24xf32> to vector<32x24xbf16>
    %c1_199 = arith.constant 1 : index
    %c1_200 = arith.constant 1 : index
    %c0_201 = arith.constant 0 : index
    %c0_202 = arith.constant 0 : index
    %250 = vector.load %arg3[%c1_199, %c1_200, %c0_201, %c0_202] : memref<2x4x32x24xbf16, #tpu.memory_space<vmem>>, vector<1x1x32x24xbf16>
    %251 = vector.shape_cast %250 : vector<1x1x32x24xbf16> to vector<32x24xbf16>
    %252 = vector.shape_cast %249 : vector<32x24xbf16> to vector<1x1x32x24xbf16>
    tpu.vector_store %arg3[%c1_199, %c1_200, %c0_201, %c0_202], %252 {strides = array<i32>} : memref<2x4x32x24xbf16, #tpu.memory_space<vmem>>, vector<1x1x32x24xbf16>,
    %cst_203 = arith.constant 0.000000e+00 : f32
    %253 = vector.shape_cast %21 : vector<1x24xi1> to vector<1x24xi1>
    %254 = vector.broadcast %253 : vector<1x24xi1> to vector<32x24xi1>
    %255 = vector.broadcast %cst_203 : f32 to vector<32x24xf32>
    %256 = arith.select %254, %248, %255 : vector<32x24xi1>, vector<32x24xf32>
    %cst_204 = arith.constant dense<0.000000e+00> : vector<32xf32>
    %257 = vector.multi_reduction <add>, %256, %cst_204 [1] : vector<32x24xf32> to vector<32xf32>
    %258 = vector.shape_cast %257 : vector<32xf32> to vector<32x1xf32>
    %259 = arith.addf %219, %258 : vector<32x1xf32>
    %260 = arith.mulf %256, %256 : vector<32x24xf32>
    %cst_205 = arith.constant dense<0.000000e+00> : vector<32xf32>
    %261 = vector.multi_reduction <add>, %260, %cst_205 [1] : vector<32x24xf32> to vector<32xf32>
    %262 = vector.shape_cast %261 : vector<32xf32> to vector<32x1xf32>
    %263 = arith.addf %223, %262 : vector<32x1xf32>
    %cst_206 = arith.constant 0.000000e+00 : f32
    %264 = vector.broadcast %cst_206 : f32 to vector<32x24xf32>
    %c1_207 = arith.constant 1 : index
    %c0_208 = arith.constant 0 : index
    %c6_209 = arith.constant 6 : index
    %265 = vector.load %arg1[%c1_207, %c0_208, %c6_209] : memref<2x64x42xbf16, #tpu.memory_space<vmem>>, vector<1x64x24xbf16>
    %266 = vector.shape_cast %265 : vector<1x64x24xbf16> to vector<64x24xbf16>
    %c8_210 = arith.constant 8 : index
    %c0_211 = arith.constant 0 : index
    %c0_212 = arith.constant 0 : index
    %267 = vector.load %arg2[%c8_210, %c0_211, %c0_212] : memref<16x32x64xbf16, #tpu.memory_space<vmem>>, vector<1x32x64xbf16>
    %268 = vector.shape_cast %267 : vector<1x32x64xbf16> to vector<32x64xbf16>
    %cst_213 = arith.constant dense<0.000000e+00> : vector<32x24xf32>
    %269 = tpu.matmul %268, %266, %cst_213 {dimension_numbers = #tpu.dot_dimension_numbers<[1], [0], [0], [1], [0, 0, 1, 1], [], []>} : vector<32x64xbf16>, vector<64x24xbf16>, vector<32x24xf32> -> vector<32x24xf32>
    %270 = arith.addf %264, %269 : vector<32x24xf32>
    %c1_214 = arith.constant 1 : index
    %c0_215 = arith.constant 0 : index
    %c7_216 = arith.constant 7 : index
    %271 = vector.load %arg1[%c1_214, %c0_215, %c7_216] : memref<2x64x42xbf16, #tpu.memory_space<vmem>>, vector<1x64x24xbf16>
    %272 = vector.shape_cast %271 : vector<1x64x24xbf16> to vector<64x24xbf16>
    %c9_217 = arith.constant 9 : index
    %c0_218 = arith.constant 0 : index
    %c0_219 = arith.constant 0 : index
    %273 = vector.load %arg2[%c9_217, %c0_218, %c0_219] : memref<16x32x64xbf16, #tpu.memory_space<vmem>>, vector<1x32x64xbf16>
    %274 = vector.shape_cast %273 : vector<1x32x64xbf16> to vector<32x64xbf16>
    %cst_220 = arith.constant dense<0.000000e+00> : vector<32x24xf32>
    %275 = tpu.matmul %274, %272, %cst_220 {dimension_numbers = #tpu.dot_dimension_numbers<[1], [0], [0], [1], [0, 0, 1, 1], [], []>} : vector<32x64xbf16>, vector<64x24xbf16>, vector<32x24xf32> -> vector<32x24xf32>
    %276 = arith.addf %270, %275 : vector<32x24xf32>
    %c1_221 = arith.constant 1 : index
    %c0_222 = arith.constant 0 : index
    %c12_223 = arith.constant 12 : index
    %277 = vector.load %arg1[%c1_221, %c0_222, %c12_223] : memref<2x64x42xbf16, #tpu.memory_space<vmem>>, vector<1x64x24xbf16>
    %278 = vector.shape_cast %277 : vector<1x64x24xbf16> to vector<64x24xbf16>
    %c10_224 = arith.constant 10 : index
    %c0_225 = arith.constant 0 : index
    %c0_226 = arith.constant 0 : index
    %279 = vector.load %arg2[%c10_224, %c0_225, %c0_226] : memref<16x32x64xbf16, #tpu.memory_space<vmem>>, vector<1x32x64xbf16>
    %280 = vector.shape_cast %279 : vector<1x32x64xbf16> to vector<32x64xbf16>
    %cst_227 = arith.constant dense<0.000000e+00> : vector<32x24xf32>
    %281 = tpu.matmul %280, %278, %cst_227 {dimension_numbers = #tpu.dot_dimension_numbers<[1], [0], [0], [1], [0, 0, 1, 1], [], []>} : vector<32x64xbf16>, vector<64x24xbf16>, vector<32x24xf32> -> vector<32x24xf32>
    %282 = arith.addf %276, %281 : vector<32x24xf32>
    %c1_228 = arith.constant 1 : index
    %c0_229 = arith.constant 0 : index
    %c13_230 = arith.constant 13 : index
    %283 = vector.load %arg1[%c1_228, %c0_229, %c13_230] : memref<2x64x42xbf16, #tpu.memory_space<vmem>>, vector<1x64x24xbf16>
    %284 = vector.shape_cast %283 : vector<1x64x24xbf16> to vector<64x24xbf16>
    %c11_231 = arith.constant 11 : index
    %c0_232 = arith.constant 0 : index
    %c0_233 = arith.constant 0 : index
    %285 = vector.load %arg2[%c11_231, %c0_232, %c0_233] : memref<16x32x64xbf16, #tpu.memory_space<vmem>>, vector<1x32x64xbf16>
    %286 = vector.shape_cast %285 : vector<1x32x64xbf16> to vector<32x64xbf16>
    %cst_234 = arith.constant dense<0.000000e+00> : vector<32x24xf32>
    %287 = tpu.matmul %286, %284, %cst_234 {dimension_numbers = #tpu.dot_dimension_numbers<[1], [0], [0], [1], [0, 0, 1, 1], [], []>} : vector<32x64xbf16>, vector<64x24xbf16>, vector<32x24xf32> -> vector<32x24xf32>
    %288 = arith.addf %282, %287 : vector<32x24xf32>
    %289 = arith.truncf %288 : vector<32x24xf32> to vector<32x24xbf16>
    %c1_235 = arith.constant 1 : index
    %c2_236 = arith.constant 2 : index
    %c0_237 = arith.constant 0 : index
    %c0_238 = arith.constant 0 : index
    %290 = vector.load %arg3[%c1_235, %c2_236, %c0_237, %c0_238] : memref<2x4x32x24xbf16, #tpu.memory_space<vmem>>, vector<1x1x32x24xbf16>
    %291 = vector.shape_cast %290 : vector<1x1x32x24xbf16> to vector<32x24xbf16>
    %292 = vector.shape_cast %289 : vector<32x24xbf16> to vector<1x1x32x24xbf16>
    tpu.vector_store %arg3[%c1_235, %c2_236, %c0_237, %c0_238], %292 {strides = array<i32>} : memref<2x4x32x24xbf16, #tpu.memory_space<vmem>>, vector<1x1x32x24xbf16>,
    %cst_239 = arith.constant 0.000000e+00 : f32
    %293 = vector.shape_cast %21 : vector<1x24xi1> to vector<1x24xi1>
    %294 = vector.broadcast %293 : vector<1x24xi1> to vector<32x24xi1>
    %295 = vector.broadcast %cst_239 : f32 to vector<32x24xf32>
    %296 = arith.select %294, %288, %295 : vector<32x24xi1>, vector<32x24xf32>
    %cst_240 = arith.constant dense<0.000000e+00> : vector<32xf32>
    %297 = vector.multi_reduction <add>, %296, %cst_240 [1] : vector<32x24xf32> to vector<32xf32>
    %298 = vector.shape_cast %297 : vector<32xf32> to vector<32x1xf32>
    %299 = arith.addf %259, %298 : vector<32x1xf32>
    %300 = arith.mulf %296, %296 : vector<32x24xf32>
    %cst_241 = arith.constant dense<0.000000e+00> : vector<32xf32>
    %301 = vector.multi_reduction <add>, %300, %cst_241 [1] : vector<32x24xf32> to vector<32xf32>
    %302 = vector.shape_cast %301 : vector<32xf32> to vector<32x1xf32>
    %303 = arith.addf %263, %302 : vector<32x1xf32>
    %cst_242 = arith.constant 0.000000e+00 : f32
    %304 = vector.broadcast %cst_242 : f32 to vector<32x24xf32>
    %c1_243 = arith.constant 1 : index
    %c0_244 = arith.constant 0 : index
    %c7_245 = arith.constant 7 : index
    %305 = vector.load %arg1[%c1_243, %c0_244, %c7_245] : memref<2x64x42xbf16, #tpu.memory_space<vmem>>, vector<1x64x24xbf16>
    %306 = vector.shape_cast %305 : vector<1x64x24xbf16> to vector<64x24xbf16>
    %c12_246 = arith.constant 12 : index
    %c0_247 = arith.constant 0 : index
    %c0_248 = arith.constant 0 : index
    %307 = vector.load %arg2[%c12_246, %c0_247, %c0_248] : memref<16x32x64xbf16, #tpu.memory_space<vmem>>, vector<1x32x64xbf16>
    %308 = vector.shape_cast %307 : vector<1x32x64xbf16> to vector<32x64xbf16>
    %cst_249 = arith.constant dense<0.000000e+00> : vector<32x24xf32>
    %309 = tpu.matmul %308, %306, %cst_249 {dimension_numbers = #tpu.dot_dimension_numbers<[1], [0], [0], [1], [0, 0, 1, 1], [], []>} : vector<32x64xbf16>, vector<64x24xbf16>, vector<32x24xf32> -> vector<32x24xf32>
    %310 = arith.addf %304, %309 : vector<32x24xf32>
    %c1_250 = arith.constant 1 : index
    %c0_251 = arith.constant 0 : index
    %c8_252 = arith.constant 8 : index
    %311 = vector.load %arg1[%c1_250, %c0_251, %c8_252] : memref<2x64x42xbf16, #tpu.memory_space<vmem>>, vector<1x64x24xbf16>
    %312 = vector.shape_cast %311 : vector<1x64x24xbf16> to vector<64x24xbf16>
    %c13_253 = arith.constant 13 : index
    %c0_254 = arith.constant 0 : index
    %c0_255 = arith.constant 0 : index
    %313 = vector.load %arg2[%c13_253, %c0_254, %c0_255] : memref<16x32x64xbf16, #tpu.memory_space<vmem>>, vector<1x32x64xbf16>
    %314 = vector.shape_cast %313 : vector<1x32x64xbf16> to vector<32x64xbf16>
    %cst_256 = arith.constant dense<0.000000e+00> : vector<32x24xf32>
    %315 = tpu.matmul %314, %312, %cst_256 {dimension_numbers = #tpu.dot_dimension_numbers<[1], [0], [0], [1], [0, 0, 1, 1], [], []>} : vector<32x64xbf16>, vector<64x24xbf16>, vector<32x24xf32> -> vector<32x24xf32>
    %316 = arith.addf %310, %315 : vector<32x24xf32>
    %c1_257 = arith.constant 1 : index
    %c0_258 = arith.constant 0 : index
    %c13_259 = arith.constant 13 : index
    %317 = vector.load %arg1[%c1_257, %c0_258, %c13_259] : memref<2x64x42xbf16, #tpu.memory_space<vmem>>, vector<1x64x24xbf16>
    %318 = vector.shape_cast %317 : vector<1x64x24xbf16> to vector<64x24xbf16>
    %c14_260 = arith.constant 14 : index
    %c0_261 = arith.constant 0 : index
    %c0_262 = arith.constant 0 : index
    %319 = vector.load %arg2[%c14_260, %c0_261, %c0_262] : memref<16x32x64xbf16, #tpu.memory_space<vmem>>, vector<1x32x64xbf16>
    %320 = vector.shape_cast %319 : vector<1x32x64xbf16> to vector<32x64xbf16>
    %cst_263 = arith.constant dense<0.000000e+00> : vector<32x24xf32>
    %321 = tpu.matmul %320, %318, %cst_263 {dimension_numbers = #tpu.dot_dimension_numbers<[1], [0], [0], [1], [0, 0, 1, 1], [], []>} : vector<32x64xbf16>, vector<64x24xbf16>, vector<32x24xf32> -> vector<32x24xf32>
    %322 = arith.addf %316, %321 : vector<32x24xf32>
    %c1_264 = arith.constant 1 : index
    %c0_265 = arith.constant 0 : index
    %c14_266 = arith.constant 14 : index
    %323 = vector.load %arg1[%c1_264, %c0_265, %c14_266] : memref<2x64x42xbf16, #tpu.memory_space<vmem>>, vector<1x64x24xbf16>
    %324 = vector.shape_cast %323 : vector<1x64x24xbf16> to vector<64x24xbf16>
    %c15_267 = arith.constant 15 : index
    %c0_268 = arith.constant 0 : index
    %c0_269 = arith.constant 0 : index
    %325 = vector.load %arg2[%c15_267, %c0_268, %c0_269] : memref<16x32x64xbf16, #tpu.memory_space<vmem>>, vector<1x32x64xbf16>
    %326 = vector.shape_cast %325 : vector<1x32x64xbf16> to vector<32x64xbf16>
    %cst_270 = arith.constant dense<0.000000e+00> : vector<32x24xf32>
    %327 = tpu.matmul %326, %324, %cst_270 {dimension_numbers = #tpu.dot_dimension_numbers<[1], [0], [0], [1], [0, 0, 1, 1], [], []>} : vector<32x64xbf16>, vector<64x24xbf16>, vector<32x24xf32> -> vector<32x24xf32>
    %328 = arith.addf %322, %327 : vector<32x24xf32>
    %329 = arith.truncf %328 : vector<32x24xf32> to vector<32x24xbf16>
    %c1_271 = arith.constant 1 : index
    %c3_272 = arith.constant 3 : index
    %c0_273 = arith.constant 0 : index
    %c0_274 = arith.constant 0 : index
    %330 = vector.load %arg3[%c1_271, %c3_272, %c0_273, %c0_274] : memref<2x4x32x24xbf16, #tpu.memory_space<vmem>>, vector<1x1x32x24xbf16>
    %331 = vector.shape_cast %330 : vector<1x1x32x24xbf16> to vector<32x24xbf16>
    %332 = vector.shape_cast %329 : vector<32x24xbf16> to vector<1x1x32x24xbf16>
    tpu.vector_store %arg3[%c1_271, %c3_272, %c0_273, %c0_274], %332 {strides = array<i32>} : memref<2x4x32x24xbf16, #tpu.memory_space<vmem>>, vector<1x1x32x24xbf16>,
    %cst_275 = arith.constant 0.000000e+00 : f32
    %333 = vector.shape_cast %21 : vector<1x24xi1> to vector<1x24xi1>
    %334 = vector.broadcast %333 : vector<1x24xi1> to vector<32x24xi1>
    %335 = vector.broadcast %cst_275 : f32 to vector<32x24xf32>
    %336 = arith.select %334, %328, %335 : vector<32x24xi1>, vector<32x24xf32>
    %cst_276 = arith.constant dense<0.000000e+00> : vector<32xf32>
    %337 = vector.multi_reduction <add>, %336, %cst_276 [1] : vector<32x24xf32> to vector<32xf32>
    %338 = vector.shape_cast %337 : vector<32xf32> to vector<32x1xf32>
    %339 = arith.addf %299, %338 : vector<32x1xf32>
    %340 = arith.mulf %336, %336 : vector<32x24xf32>
    %cst_277 = arith.constant dense<0.000000e+00> : vector<32xf32>
    %341 = vector.multi_reduction <add>, %340, %cst_277 [1] : vector<32x24xf32> to vector<32xf32>
    %342 = vector.shape_cast %341 : vector<32xf32> to vector<32x1xf32>
    %343 = arith.addf %303, %342 : vector<32x1xf32>
    %c0_278 = arith.constant 0 : index
    %c0_279 = arith.constant 0 : index
    %344 = vector.load %arg4[%c0_278, %c0_279] : memref<32x2xf32, #tpu.memory_space<vmem>>, vector<32x1xf32>
    %345 = arith.addf %344, %339 : vector<32x1xf32>
    %c0_280 = arith.constant 0 : index
    %c0_281 = arith.constant 0 : index
    %346 = vector.load %arg4[%c0_280, %c0_281] : memref<32x2xf32, #tpu.memory_space<vmem>>, vector<32x1xf32>
    tpu.vector_store %arg4[%c0_280, %c0_281], %345 {strides = array<i32>} : memref<32x2xf32, #tpu.memory_space<vmem>>, vector<32x1xf32>,
    %c0_282 = arith.constant 0 : index
    %c1_283 = arith.constant 1 : index
    %347 = vector.load %arg4[%c0_282, %c1_283] : memref<32x2xf32, #tpu.memory_space<vmem>>, vector<32x1xf32>
    %348 = arith.addf %347, %343 : vector<32x1xf32>
    %c0_284 = arith.constant 0 : index
    %c1_285 = arith.constant 1 : index
    %349 = vector.load %arg4[%c0_284, %c1_285] : memref<32x2xf32, #tpu.memory_space<vmem>>, vector<32x1xf32>
    tpu.vector_store %arg4[%c0_284, %c1_285], %348 {strides = array<i32>} : memref<32x2xf32, #tpu.memory_space<vmem>>, vector<32x1xf32>,
    return
  }
  func.func @transform_0(%arg0: i32) -> (i32, i32, i32) {
    %c0_i32 = arith.constant 0 : i32
    %c0_i32_0 = arith.constant 0 : i32
    %c0_i32_1 = arith.constant 0 : i32
    return %arg0, %c0_i32, %c0_i32_0 : i32, i32, i32
  }
  func.func @transform_1(%arg0: i32) -> (i32, i32, i32) {
    %c0_i32 = arith.constant 0 : i32
    %c0_i32_0 = arith.constant 0 : i32
    %c0_i32_1 = arith.constant 0 : i32
    %c0_i32_2 = arith.constant 0 : i32
    return %c0_i32, %c0_i32_0, %c0_i32_1 : i32, i32, i32
  }
  func.func @transform_2(%arg0: i32) -> (i32, i32, i32, i32) {
    %c0_i32 = arith.constant 0 : i32
    %c0_i32_0 = arith.constant 0 : i32
    %c0_i32_1 = arith.constant 0 : i32
    %c0_i32_2 = arith.constant 0 : i32
    return %arg0, %c0_i32, %c0_i32_0, %c0_i32_1 : i32, i32, i32, i32
  }
  func.func @transform_3(%arg0: i32) -> (i32, i32) {
    %c0_i32 = arith.constant 0 : i32
    %c0_i32_0 = arith.constant 0 : i32
    %c0_i32_1 = arith.constant 0 : i32
    return %c0_i32, %c0_i32_0 : i32, i32
  }
}

module attributes {stable_mosaic.version = 11 : i64} {
  func.func @_convt_phase_kernel(%arg0: i32, %arg1: memref<2x32x110xbf16, #tpu.memory_space<vmem>>, %arg2: memref<16x16x32xbf16, #tpu.memory_space<vmem>>, %arg3: memref<2x4x16x80xbf16, #tpu.memory_space<vmem>>, %arg4: memref<16x2xf32, #tpu.memory_space<vmem>>) attributes {dimension_semantics = [#tpu.dimension_semantics<arbitrary>], iteration_bounds = array<i64: 1>, scalar_prefetch = 0 : i64, scratch_operands = 0 : i64, tpu.core_type = #tpu.core_type<tc>, window_params = [{transform_indices = @transform_0, window_bounds = array<i64: 2, 32, 110>}, {pipeline_mode = #tpu.pipeline_mode<synchronous>, transform_indices = @transform_1, window_bounds = array<i64: 16, 16, 32>}, {transform_indices = @transform_2, window_bounds = array<i64: 2, 4, 16, 80>}, {pipeline_mode = #tpu.pipeline_mode<synchronous>, transform_indices = @transform_3, window_bounds = array<i64: 16, 2>}]} {
    %c0_i32 = arith.constant 0 : i32
    %0 = arith.cmpi eq, %arg0, %c0_i32 : i32
    %1 = arith.extui %0 : i1 to i32
    %c0_i32_0 = arith.constant 0 : i32
    %2 = arith.cmpi ne, %1, %c0_i32_0 : i32
    scf.if %2 {
      %cst_283 = arith.constant 0.000000e+00 : f32
      %350 = vector.broadcast %cst_283 : f32 to vector<16x2xf32>
      %c0_284 = arith.constant 0 : index
      %c0_285 = arith.constant 0 : index
      %351 = vector.load %arg4[%c0_284, %c0_285] : memref<16x2xf32, #tpu.memory_space<vmem>>, vector<16x2xf32>
      tpu.vector_store %arg4[%c0_284, %c0_285], %350 {strides = array<i32>} : memref<16x2xf32, #tpu.memory_space<vmem>>, vector<16x2xf32>,
    } else {
    }
    %3 = tpu.iota {dimensions = array<i32: 1>} : vector<1x80xi32>
    %c10_i32 = arith.constant 10 : i32
    %c0_i32_1 = arith.constant 0 : i32
    %4 = arith.cmpi eq, %c10_i32, %c0_i32_1 : i32
    %c1_i32 = arith.constant 1 : i32
    %5 = arith.select %4, %c1_i32, %c10_i32 : i32
    %6 = vector.broadcast %5 : i32 to vector<1x80xi32>
    %7 = arith.remsi %3, %6 : vector<1x80xi32>
    %c0_i32_2 = arith.constant 0 : i32
    %8 = vector.broadcast %c0_i32_2 : i32 to vector<1x80xi32>
    %9 = arith.cmpi ne, %7, %8 : vector<1x80xi32>
    %c0_i32_3 = arith.constant 0 : i32
    %10 = vector.broadcast %c0_i32_3 : i32 to vector<1x80xi32>
    %11 = arith.cmpi slt, %7, %10 : vector<1x80xi32>
    %c0_i32_4 = arith.constant 0 : i32
    %12 = arith.cmpi slt, %5, %c0_i32_4 : i32
    %13 = vector.broadcast %12 : i1 to vector<1x80xi1>
    %14 = vector.broadcast %13 : vector<1x80xi1> to vector<1x80xi1>
    %15 = arith.xori %11, %14 : vector<1x80xi1>
    %16 = arith.andi %15, %9 : vector<1x80xi1>
    %17 = vector.broadcast %5 : i32 to vector<1x80xi32>
    %18 = arith.addi %7, %17 : vector<1x80xi32>
    %19 = arith.select %16, %18, %7 : vector<1x80xi1>, vector<1x80xi32>
    %c8_i32 = arith.constant 8 : i32
    %20 = vector.broadcast %c8_i32 : i32 to vector<1x80xi32>
    %21 = arith.cmpi slt, %19, %20 : vector<1x80xi32>
    %cst = arith.constant 0.000000e+00 : f32
    %22 = vector.broadcast %cst : f32 to vector<16x1xf32>
    %cst_5 = arith.constant 0.000000e+00 : f32
    %23 = vector.broadcast %cst_5 : f32 to vector<16x1xf32>
    %cst_6 = arith.constant 0.000000e+00 : f32
    %24 = vector.broadcast %cst_6 : f32 to vector<16x80xf32>
    %c0 = arith.constant 0 : index
    %c0_7 = arith.constant 0 : index
    %c0_8 = arith.constant 0 : index
    %25 = vector.load %arg1[%c0, %c0_7, %c0_8] : memref<2x32x110xbf16, #tpu.memory_space<vmem>>, vector<1x32x80xbf16>
    %26 = vector.shape_cast %25 : vector<1x32x80xbf16> to vector<32x80xbf16>
    %c0_9 = arith.constant 0 : index
    %c0_10 = arith.constant 0 : index
    %c0_11 = arith.constant 0 : index
    %27 = vector.load %arg2[%c0_9, %c0_10, %c0_11] : memref<16x16x32xbf16, #tpu.memory_space<vmem>>, vector<1x16x32xbf16>
    %28 = vector.shape_cast %27 : vector<1x16x32xbf16> to vector<16x32xbf16>
    %cst_12 = arith.constant dense<0.000000e+00> : vector<16x80xf32>
    %29 = tpu.matmul %28, %26, %cst_12 {dimension_numbers = #tpu.dot_dimension_numbers<[1], [0], [0], [1], [0, 0, 1, 1], [], []>} : vector<16x32xbf16>, vector<32x80xbf16>, vector<16x80xf32> -> vector<16x80xf32>
    %30 = arith.addf %24, %29 : vector<16x80xf32>
    %c0_13 = arith.constant 0 : index
    %c0_14 = arith.constant 0 : index
    %c1 = arith.constant 1 : index
    %31 = vector.load %arg1[%c0_13, %c0_14, %c1] : memref<2x32x110xbf16, #tpu.memory_space<vmem>>, vector<1x32x80xbf16>
    %32 = vector.shape_cast %31 : vector<1x32x80xbf16> to vector<32x80xbf16>
    %c1_15 = arith.constant 1 : index
    %c0_16 = arith.constant 0 : index
    %c0_17 = arith.constant 0 : index
    %33 = vector.load %arg2[%c1_15, %c0_16, %c0_17] : memref<16x16x32xbf16, #tpu.memory_space<vmem>>, vector<1x16x32xbf16>
    %34 = vector.shape_cast %33 : vector<1x16x32xbf16> to vector<16x32xbf16>
    %cst_18 = arith.constant dense<0.000000e+00> : vector<16x80xf32>
    %35 = tpu.matmul %34, %32, %cst_18 {dimension_numbers = #tpu.dot_dimension_numbers<[1], [0], [0], [1], [0, 0, 1, 1], [], []>} : vector<16x32xbf16>, vector<32x80xbf16>, vector<16x80xf32> -> vector<16x80xf32>
    %36 = arith.addf %30, %35 : vector<16x80xf32>
    %c0_19 = arith.constant 0 : index
    %c0_20 = arith.constant 0 : index
    %c10 = arith.constant 10 : index
    %37 = vector.load %arg1[%c0_19, %c0_20, %c10] : memref<2x32x110xbf16, #tpu.memory_space<vmem>>, vector<1x32x80xbf16>
    %38 = vector.shape_cast %37 : vector<1x32x80xbf16> to vector<32x80xbf16>
    %c2 = arith.constant 2 : index
    %c0_21 = arith.constant 0 : index
    %c0_22 = arith.constant 0 : index
    %39 = vector.load %arg2[%c2, %c0_21, %c0_22] : memref<16x16x32xbf16, #tpu.memory_space<vmem>>, vector<1x16x32xbf16>
    %40 = vector.shape_cast %39 : vector<1x16x32xbf16> to vector<16x32xbf16>
    %cst_23 = arith.constant dense<0.000000e+00> : vector<16x80xf32>
    %41 = tpu.matmul %40, %38, %cst_23 {dimension_numbers = #tpu.dot_dimension_numbers<[1], [0], [0], [1], [0, 0, 1, 1], [], []>} : vector<16x32xbf16>, vector<32x80xbf16>, vector<16x80xf32> -> vector<16x80xf32>
    %42 = arith.addf %36, %41 : vector<16x80xf32>
    %c0_24 = arith.constant 0 : index
    %c0_25 = arith.constant 0 : index
    %c11 = arith.constant 11 : index
    %43 = vector.load %arg1[%c0_24, %c0_25, %c11] : memref<2x32x110xbf16, #tpu.memory_space<vmem>>, vector<1x32x80xbf16>
    %44 = vector.shape_cast %43 : vector<1x32x80xbf16> to vector<32x80xbf16>
    %c3 = arith.constant 3 : index
    %c0_26 = arith.constant 0 : index
    %c0_27 = arith.constant 0 : index
    %45 = vector.load %arg2[%c3, %c0_26, %c0_27] : memref<16x16x32xbf16, #tpu.memory_space<vmem>>, vector<1x16x32xbf16>
    %46 = vector.shape_cast %45 : vector<1x16x32xbf16> to vector<16x32xbf16>
    %cst_28 = arith.constant dense<0.000000e+00> : vector<16x80xf32>
    %47 = tpu.matmul %46, %44, %cst_28 {dimension_numbers = #tpu.dot_dimension_numbers<[1], [0], [0], [1], [0, 0, 1, 1], [], []>} : vector<16x32xbf16>, vector<32x80xbf16>, vector<16x80xf32> -> vector<16x80xf32>
    %48 = arith.addf %42, %47 : vector<16x80xf32>
    %49 = arith.truncf %48 : vector<16x80xf32> to vector<16x80xbf16>
    %c0_29 = arith.constant 0 : index
    %c0_30 = arith.constant 0 : index
    %c0_31 = arith.constant 0 : index
    %c0_32 = arith.constant 0 : index
    %50 = vector.load %arg3[%c0_29, %c0_30, %c0_31, %c0_32] : memref<2x4x16x80xbf16, #tpu.memory_space<vmem>>, vector<1x1x16x80xbf16>
    %51 = vector.shape_cast %50 : vector<1x1x16x80xbf16> to vector<16x80xbf16>
    %52 = vector.shape_cast %49 : vector<16x80xbf16> to vector<1x1x16x80xbf16>
    tpu.vector_store %arg3[%c0_29, %c0_30, %c0_31, %c0_32], %52 {strides = array<i32>} : memref<2x4x16x80xbf16, #tpu.memory_space<vmem>>, vector<1x1x16x80xbf16>,
    %cst_33 = arith.constant 0.000000e+00 : f32
    %53 = vector.shape_cast %21 : vector<1x80xi1> to vector<1x80xi1>
    %54 = vector.broadcast %53 : vector<1x80xi1> to vector<16x80xi1>
    %55 = vector.broadcast %cst_33 : f32 to vector<16x80xf32>
    %56 = arith.select %54, %48, %55 : vector<16x80xi1>, vector<16x80xf32>
    %cst_34 = arith.constant dense<0.000000e+00> : vector<16xf32>
    %57 = vector.multi_reduction <add>, %56, %cst_34 [1] : vector<16x80xf32> to vector<16xf32>
    %58 = vector.shape_cast %57 : vector<16xf32> to vector<16x1xf32>
    %59 = arith.addf %22, %58 : vector<16x1xf32>
    %60 = arith.mulf %56, %56 : vector<16x80xf32>
    %cst_35 = arith.constant dense<0.000000e+00> : vector<16xf32>
    %61 = vector.multi_reduction <add>, %60, %cst_35 [1] : vector<16x80xf32> to vector<16xf32>
    %62 = vector.shape_cast %61 : vector<16xf32> to vector<16x1xf32>
    %63 = arith.addf %23, %62 : vector<16x1xf32>
    %cst_36 = arith.constant 0.000000e+00 : f32
    %64 = vector.broadcast %cst_36 : f32 to vector<16x80xf32>
    %c0_37 = arith.constant 0 : index
    %c0_38 = arith.constant 0 : index
    %c1_39 = arith.constant 1 : index
    %65 = vector.load %arg1[%c0_37, %c0_38, %c1_39] : memref<2x32x110xbf16, #tpu.memory_space<vmem>>, vector<1x32x80xbf16>
    %66 = vector.shape_cast %65 : vector<1x32x80xbf16> to vector<32x80xbf16>
    %c4 = arith.constant 4 : index
    %c0_40 = arith.constant 0 : index
    %c0_41 = arith.constant 0 : index
    %67 = vector.load %arg2[%c4, %c0_40, %c0_41] : memref<16x16x32xbf16, #tpu.memory_space<vmem>>, vector<1x16x32xbf16>
    %68 = vector.shape_cast %67 : vector<1x16x32xbf16> to vector<16x32xbf16>
    %cst_42 = arith.constant dense<0.000000e+00> : vector<16x80xf32>
    %69 = tpu.matmul %68, %66, %cst_42 {dimension_numbers = #tpu.dot_dimension_numbers<[1], [0], [0], [1], [0, 0, 1, 1], [], []>} : vector<16x32xbf16>, vector<32x80xbf16>, vector<16x80xf32> -> vector<16x80xf32>
    %70 = arith.addf %64, %69 : vector<16x80xf32>
    %c0_43 = arith.constant 0 : index
    %c0_44 = arith.constant 0 : index
    %c2_45 = arith.constant 2 : index
    %71 = vector.load %arg1[%c0_43, %c0_44, %c2_45] : memref<2x32x110xbf16, #tpu.memory_space<vmem>>, vector<1x32x80xbf16>
    %72 = vector.shape_cast %71 : vector<1x32x80xbf16> to vector<32x80xbf16>
    %c5 = arith.constant 5 : index
    %c0_46 = arith.constant 0 : index
    %c0_47 = arith.constant 0 : index
    %73 = vector.load %arg2[%c5, %c0_46, %c0_47] : memref<16x16x32xbf16, #tpu.memory_space<vmem>>, vector<1x16x32xbf16>
    %74 = vector.shape_cast %73 : vector<1x16x32xbf16> to vector<16x32xbf16>
    %cst_48 = arith.constant dense<0.000000e+00> : vector<16x80xf32>
    %75 = tpu.matmul %74, %72, %cst_48 {dimension_numbers = #tpu.dot_dimension_numbers<[1], [0], [0], [1], [0, 0, 1, 1], [], []>} : vector<16x32xbf16>, vector<32x80xbf16>, vector<16x80xf32> -> vector<16x80xf32>
    %76 = arith.addf %70, %75 : vector<16x80xf32>
    %c0_49 = arith.constant 0 : index
    %c0_50 = arith.constant 0 : index
    %c11_51 = arith.constant 11 : index
    %77 = vector.load %arg1[%c0_49, %c0_50, %c11_51] : memref<2x32x110xbf16, #tpu.memory_space<vmem>>, vector<1x32x80xbf16>
    %78 = vector.shape_cast %77 : vector<1x32x80xbf16> to vector<32x80xbf16>
    %c6 = arith.constant 6 : index
    %c0_52 = arith.constant 0 : index
    %c0_53 = arith.constant 0 : index
    %79 = vector.load %arg2[%c6, %c0_52, %c0_53] : memref<16x16x32xbf16, #tpu.memory_space<vmem>>, vector<1x16x32xbf16>
    %80 = vector.shape_cast %79 : vector<1x16x32xbf16> to vector<16x32xbf16>
    %cst_54 = arith.constant dense<0.000000e+00> : vector<16x80xf32>
    %81 = tpu.matmul %80, %78, %cst_54 {dimension_numbers = #tpu.dot_dimension_numbers<[1], [0], [0], [1], [0, 0, 1, 1], [], []>} : vector<16x32xbf16>, vector<32x80xbf16>, vector<16x80xf32> -> vector<16x80xf32>
    %82 = arith.addf %76, %81 : vector<16x80xf32>
    %c0_55 = arith.constant 0 : index
    %c0_56 = arith.constant 0 : index
    %c12 = arith.constant 12 : index
    %83 = vector.load %arg1[%c0_55, %c0_56, %c12] : memref<2x32x110xbf16, #tpu.memory_space<vmem>>, vector<1x32x80xbf16>
    %84 = vector.shape_cast %83 : vector<1x32x80xbf16> to vector<32x80xbf16>
    %c7 = arith.constant 7 : index
    %c0_57 = arith.constant 0 : index
    %c0_58 = arith.constant 0 : index
    %85 = vector.load %arg2[%c7, %c0_57, %c0_58] : memref<16x16x32xbf16, #tpu.memory_space<vmem>>, vector<1x16x32xbf16>
    %86 = vector.shape_cast %85 : vector<1x16x32xbf16> to vector<16x32xbf16>
    %cst_59 = arith.constant dense<0.000000e+00> : vector<16x80xf32>
    %87 = tpu.matmul %86, %84, %cst_59 {dimension_numbers = #tpu.dot_dimension_numbers<[1], [0], [0], [1], [0, 0, 1, 1], [], []>} : vector<16x32xbf16>, vector<32x80xbf16>, vector<16x80xf32> -> vector<16x80xf32>
    %88 = arith.addf %82, %87 : vector<16x80xf32>
    %89 = arith.truncf %88 : vector<16x80xf32> to vector<16x80xbf16>
    %c0_60 = arith.constant 0 : index
    %c1_61 = arith.constant 1 : index
    %c0_62 = arith.constant 0 : index
    %c0_63 = arith.constant 0 : index
    %90 = vector.load %arg3[%c0_60, %c1_61, %c0_62, %c0_63] : memref<2x4x16x80xbf16, #tpu.memory_space<vmem>>, vector<1x1x16x80xbf16>
    %91 = vector.shape_cast %90 : vector<1x1x16x80xbf16> to vector<16x80xbf16>
    %92 = vector.shape_cast %89 : vector<16x80xbf16> to vector<1x1x16x80xbf16>
    tpu.vector_store %arg3[%c0_60, %c1_61, %c0_62, %c0_63], %92 {strides = array<i32>} : memref<2x4x16x80xbf16, #tpu.memory_space<vmem>>, vector<1x1x16x80xbf16>,
    %cst_64 = arith.constant 0.000000e+00 : f32
    %93 = vector.shape_cast %21 : vector<1x80xi1> to vector<1x80xi1>
    %94 = vector.broadcast %93 : vector<1x80xi1> to vector<16x80xi1>
    %95 = vector.broadcast %cst_64 : f32 to vector<16x80xf32>
    %96 = arith.select %94, %88, %95 : vector<16x80xi1>, vector<16x80xf32>
    %cst_65 = arith.constant dense<0.000000e+00> : vector<16xf32>
    %97 = vector.multi_reduction <add>, %96, %cst_65 [1] : vector<16x80xf32> to vector<16xf32>
    %98 = vector.shape_cast %97 : vector<16xf32> to vector<16x1xf32>
    %99 = arith.addf %59, %98 : vector<16x1xf32>
    %100 = arith.mulf %96, %96 : vector<16x80xf32>
    %cst_66 = arith.constant dense<0.000000e+00> : vector<16xf32>
    %101 = vector.multi_reduction <add>, %100, %cst_66 [1] : vector<16x80xf32> to vector<16xf32>
    %102 = vector.shape_cast %101 : vector<16xf32> to vector<16x1xf32>
    %103 = arith.addf %63, %102 : vector<16x1xf32>
    %cst_67 = arith.constant 0.000000e+00 : f32
    %104 = vector.broadcast %cst_67 : f32 to vector<16x80xf32>
    %c0_68 = arith.constant 0 : index
    %c0_69 = arith.constant 0 : index
    %c10_70 = arith.constant 10 : index
    %105 = vector.load %arg1[%c0_68, %c0_69, %c10_70] : memref<2x32x110xbf16, #tpu.memory_space<vmem>>, vector<1x32x80xbf16>
    %106 = vector.shape_cast %105 : vector<1x32x80xbf16> to vector<32x80xbf16>
    %c8 = arith.constant 8 : index
    %c0_71 = arith.constant 0 : index
    %c0_72 = arith.constant 0 : index
    %107 = vector.load %arg2[%c8, %c0_71, %c0_72] : memref<16x16x32xbf16, #tpu.memory_space<vmem>>, vector<1x16x32xbf16>
    %108 = vector.shape_cast %107 : vector<1x16x32xbf16> to vector<16x32xbf16>
    %cst_73 = arith.constant dense<0.000000e+00> : vector<16x80xf32>
    %109 = tpu.matmul %108, %106, %cst_73 {dimension_numbers = #tpu.dot_dimension_numbers<[1], [0], [0], [1], [0, 0, 1, 1], [], []>} : vector<16x32xbf16>, vector<32x80xbf16>, vector<16x80xf32> -> vector<16x80xf32>
    %110 = arith.addf %104, %109 : vector<16x80xf32>
    %c0_74 = arith.constant 0 : index
    %c0_75 = arith.constant 0 : index
    %c11_76 = arith.constant 11 : index
    %111 = vector.load %arg1[%c0_74, %c0_75, %c11_76] : memref<2x32x110xbf16, #tpu.memory_space<vmem>>, vector<1x32x80xbf16>
    %112 = vector.shape_cast %111 : vector<1x32x80xbf16> to vector<32x80xbf16>
    %c9 = arith.constant 9 : index
    %c0_77 = arith.constant 0 : index
    %c0_78 = arith.constant 0 : index
    %113 = vector.load %arg2[%c9, %c0_77, %c0_78] : memref<16x16x32xbf16, #tpu.memory_space<vmem>>, vector<1x16x32xbf16>
    %114 = vector.shape_cast %113 : vector<1x16x32xbf16> to vector<16x32xbf16>
    %cst_79 = arith.constant dense<0.000000e+00> : vector<16x80xf32>
    %115 = tpu.matmul %114, %112, %cst_79 {dimension_numbers = #tpu.dot_dimension_numbers<[1], [0], [0], [1], [0, 0, 1, 1], [], []>} : vector<16x32xbf16>, vector<32x80xbf16>, vector<16x80xf32> -> vector<16x80xf32>
    %116 = arith.addf %110, %115 : vector<16x80xf32>
    %c0_80 = arith.constant 0 : index
    %c0_81 = arith.constant 0 : index
    %c20 = arith.constant 20 : index
    %117 = vector.load %arg1[%c0_80, %c0_81, %c20] : memref<2x32x110xbf16, #tpu.memory_space<vmem>>, vector<1x32x80xbf16>
    %118 = vector.shape_cast %117 : vector<1x32x80xbf16> to vector<32x80xbf16>
    %c10_82 = arith.constant 10 : index
    %c0_83 = arith.constant 0 : index
    %c0_84 = arith.constant 0 : index
    %119 = vector.load %arg2[%c10_82, %c0_83, %c0_84] : memref<16x16x32xbf16, #tpu.memory_space<vmem>>, vector<1x16x32xbf16>
    %120 = vector.shape_cast %119 : vector<1x16x32xbf16> to vector<16x32xbf16>
    %cst_85 = arith.constant dense<0.000000e+00> : vector<16x80xf32>
    %121 = tpu.matmul %120, %118, %cst_85 {dimension_numbers = #tpu.dot_dimension_numbers<[1], [0], [0], [1], [0, 0, 1, 1], [], []>} : vector<16x32xbf16>, vector<32x80xbf16>, vector<16x80xf32> -> vector<16x80xf32>
    %122 = arith.addf %116, %121 : vector<16x80xf32>
    %c0_86 = arith.constant 0 : index
    %c0_87 = arith.constant 0 : index
    %c21 = arith.constant 21 : index
    %123 = vector.load %arg1[%c0_86, %c0_87, %c21] : memref<2x32x110xbf16, #tpu.memory_space<vmem>>, vector<1x32x80xbf16>
    %124 = vector.shape_cast %123 : vector<1x32x80xbf16> to vector<32x80xbf16>
    %c11_88 = arith.constant 11 : index
    %c0_89 = arith.constant 0 : index
    %c0_90 = arith.constant 0 : index
    %125 = vector.load %arg2[%c11_88, %c0_89, %c0_90] : memref<16x16x32xbf16, #tpu.memory_space<vmem>>, vector<1x16x32xbf16>
    %126 = vector.shape_cast %125 : vector<1x16x32xbf16> to vector<16x32xbf16>
    %cst_91 = arith.constant dense<0.000000e+00> : vector<16x80xf32>
    %127 = tpu.matmul %126, %124, %cst_91 {dimension_numbers = #tpu.dot_dimension_numbers<[1], [0], [0], [1], [0, 0, 1, 1], [], []>} : vector<16x32xbf16>, vector<32x80xbf16>, vector<16x80xf32> -> vector<16x80xf32>
    %128 = arith.addf %122, %127 : vector<16x80xf32>
    %129 = arith.truncf %128 : vector<16x80xf32> to vector<16x80xbf16>
    %c0_92 = arith.constant 0 : index
    %c2_93 = arith.constant 2 : index
    %c0_94 = arith.constant 0 : index
    %c0_95 = arith.constant 0 : index
    %130 = vector.load %arg3[%c0_92, %c2_93, %c0_94, %c0_95] : memref<2x4x16x80xbf16, #tpu.memory_space<vmem>>, vector<1x1x16x80xbf16>
    %131 = vector.shape_cast %130 : vector<1x1x16x80xbf16> to vector<16x80xbf16>
    %132 = vector.shape_cast %129 : vector<16x80xbf16> to vector<1x1x16x80xbf16>
    tpu.vector_store %arg3[%c0_92, %c2_93, %c0_94, %c0_95], %132 {strides = array<i32>} : memref<2x4x16x80xbf16, #tpu.memory_space<vmem>>, vector<1x1x16x80xbf16>,
    %cst_96 = arith.constant 0.000000e+00 : f32
    %133 = vector.shape_cast %21 : vector<1x80xi1> to vector<1x80xi1>
    %134 = vector.broadcast %133 : vector<1x80xi1> to vector<16x80xi1>
    %135 = vector.broadcast %cst_96 : f32 to vector<16x80xf32>
    %136 = arith.select %134, %128, %135 : vector<16x80xi1>, vector<16x80xf32>
    %cst_97 = arith.constant dense<0.000000e+00> : vector<16xf32>
    %137 = vector.multi_reduction <add>, %136, %cst_97 [1] : vector<16x80xf32> to vector<16xf32>
    %138 = vector.shape_cast %137 : vector<16xf32> to vector<16x1xf32>
    %139 = arith.addf %99, %138 : vector<16x1xf32>
    %140 = arith.mulf %136, %136 : vector<16x80xf32>
    %cst_98 = arith.constant dense<0.000000e+00> : vector<16xf32>
    %141 = vector.multi_reduction <add>, %140, %cst_98 [1] : vector<16x80xf32> to vector<16xf32>
    %142 = vector.shape_cast %141 : vector<16xf32> to vector<16x1xf32>
    %143 = arith.addf %103, %142 : vector<16x1xf32>
    %cst_99 = arith.constant 0.000000e+00 : f32
    %144 = vector.broadcast %cst_99 : f32 to vector<16x80xf32>
    %c0_100 = arith.constant 0 : index
    %c0_101 = arith.constant 0 : index
    %c11_102 = arith.constant 11 : index
    %145 = vector.load %arg1[%c0_100, %c0_101, %c11_102] : memref<2x32x110xbf16, #tpu.memory_space<vmem>>, vector<1x32x80xbf16>
    %146 = vector.shape_cast %145 : vector<1x32x80xbf16> to vector<32x80xbf16>
    %c12_103 = arith.constant 12 : index
    %c0_104 = arith.constant 0 : index
    %c0_105 = arith.constant 0 : index
    %147 = vector.load %arg2[%c12_103, %c0_104, %c0_105] : memref<16x16x32xbf16, #tpu.memory_space<vmem>>, vector<1x16x32xbf16>
    %148 = vector.shape_cast %147 : vector<1x16x32xbf16> to vector<16x32xbf16>
    %cst_106 = arith.constant dense<0.000000e+00> : vector<16x80xf32>
    %149 = tpu.matmul %148, %146, %cst_106 {dimension_numbers = #tpu.dot_dimension_numbers<[1], [0], [0], [1], [0, 0, 1, 1], [], []>} : vector<16x32xbf16>, vector<32x80xbf16>, vector<16x80xf32> -> vector<16x80xf32>
    %150 = arith.addf %144, %149 : vector<16x80xf32>
    %c0_107 = arith.constant 0 : index
    %c0_108 = arith.constant 0 : index
    %c12_109 = arith.constant 12 : index
    %151 = vector.load %arg1[%c0_107, %c0_108, %c12_109] : memref<2x32x110xbf16, #tpu.memory_space<vmem>>, vector<1x32x80xbf16>
    %152 = vector.shape_cast %151 : vector<1x32x80xbf16> to vector<32x80xbf16>
    %c13 = arith.constant 13 : index
    %c0_110 = arith.constant 0 : index
    %c0_111 = arith.constant 0 : index
    %153 = vector.load %arg2[%c13, %c0_110, %c0_111] : memref<16x16x32xbf16, #tpu.memory_space<vmem>>, vector<1x16x32xbf16>
    %154 = vector.shape_cast %153 : vector<1x16x32xbf16> to vector<16x32xbf16>
    %cst_112 = arith.constant dense<0.000000e+00> : vector<16x80xf32>
    %155 = tpu.matmul %154, %152, %cst_112 {dimension_numbers = #tpu.dot_dimension_numbers<[1], [0], [0], [1], [0, 0, 1, 1], [], []>} : vector<16x32xbf16>, vector<32x80xbf16>, vector<16x80xf32> -> vector<16x80xf32>
    %156 = arith.addf %150, %155 : vector<16x80xf32>
    %c0_113 = arith.constant 0 : index
    %c0_114 = arith.constant 0 : index
    %c21_115 = arith.constant 21 : index
    %157 = vector.load %arg1[%c0_113, %c0_114, %c21_115] : memref<2x32x110xbf16, #tpu.memory_space<vmem>>, vector<1x32x80xbf16>
    %158 = vector.shape_cast %157 : vector<1x32x80xbf16> to vector<32x80xbf16>
    %c14 = arith.constant 14 : index
    %c0_116 = arith.constant 0 : index
    %c0_117 = arith.constant 0 : index
    %159 = vector.load %arg2[%c14, %c0_116, %c0_117] : memref<16x16x32xbf16, #tpu.memory_space<vmem>>, vector<1x16x32xbf16>
    %160 = vector.shape_cast %159 : vector<1x16x32xbf16> to vector<16x32xbf16>
    %cst_118 = arith.constant dense<0.000000e+00> : vector<16x80xf32>
    %161 = tpu.matmul %160, %158, %cst_118 {dimension_numbers = #tpu.dot_dimension_numbers<[1], [0], [0], [1], [0, 0, 1, 1], [], []>} : vector<16x32xbf16>, vector<32x80xbf16>, vector<16x80xf32> -> vector<16x80xf32>
    %162 = arith.addf %156, %161 : vector<16x80xf32>
    %c0_119 = arith.constant 0 : index
    %c0_120 = arith.constant 0 : index
    %c22 = arith.constant 22 : index
    %163 = vector.load %arg1[%c0_119, %c0_120, %c22] : memref<2x32x110xbf16, #tpu.memory_space<vmem>>, vector<1x32x80xbf16>
    %164 = vector.shape_cast %163 : vector<1x32x80xbf16> to vector<32x80xbf16>
    %c15 = arith.constant 15 : index
    %c0_121 = arith.constant 0 : index
    %c0_122 = arith.constant 0 : index
    %165 = vector.load %arg2[%c15, %c0_121, %c0_122] : memref<16x16x32xbf16, #tpu.memory_space<vmem>>, vector<1x16x32xbf16>
    %166 = vector.shape_cast %165 : vector<1x16x32xbf16> to vector<16x32xbf16>
    %cst_123 = arith.constant dense<0.000000e+00> : vector<16x80xf32>
    %167 = tpu.matmul %166, %164, %cst_123 {dimension_numbers = #tpu.dot_dimension_numbers<[1], [0], [0], [1], [0, 0, 1, 1], [], []>} : vector<16x32xbf16>, vector<32x80xbf16>, vector<16x80xf32> -> vector<16x80xf32>
    %168 = arith.addf %162, %167 : vector<16x80xf32>
    %169 = arith.truncf %168 : vector<16x80xf32> to vector<16x80xbf16>
    %c0_124 = arith.constant 0 : index
    %c3_125 = arith.constant 3 : index
    %c0_126 = arith.constant 0 : index
    %c0_127 = arith.constant 0 : index
    %170 = vector.load %arg3[%c0_124, %c3_125, %c0_126, %c0_127] : memref<2x4x16x80xbf16, #tpu.memory_space<vmem>>, vector<1x1x16x80xbf16>
    %171 = vector.shape_cast %170 : vector<1x1x16x80xbf16> to vector<16x80xbf16>
    %172 = vector.shape_cast %169 : vector<16x80xbf16> to vector<1x1x16x80xbf16>
    tpu.vector_store %arg3[%c0_124, %c3_125, %c0_126, %c0_127], %172 {strides = array<i32>} : memref<2x4x16x80xbf16, #tpu.memory_space<vmem>>, vector<1x1x16x80xbf16>,
    %cst_128 = arith.constant 0.000000e+00 : f32
    %173 = vector.shape_cast %21 : vector<1x80xi1> to vector<1x80xi1>
    %174 = vector.broadcast %173 : vector<1x80xi1> to vector<16x80xi1>
    %175 = vector.broadcast %cst_128 : f32 to vector<16x80xf32>
    %176 = arith.select %174, %168, %175 : vector<16x80xi1>, vector<16x80xf32>
    %cst_129 = arith.constant dense<0.000000e+00> : vector<16xf32>
    %177 = vector.multi_reduction <add>, %176, %cst_129 [1] : vector<16x80xf32> to vector<16xf32>
    %178 = vector.shape_cast %177 : vector<16xf32> to vector<16x1xf32>
    %179 = arith.addf %139, %178 : vector<16x1xf32>
    %180 = arith.mulf %176, %176 : vector<16x80xf32>
    %cst_130 = arith.constant dense<0.000000e+00> : vector<16xf32>
    %181 = vector.multi_reduction <add>, %180, %cst_130 [1] : vector<16x80xf32> to vector<16xf32>
    %182 = vector.shape_cast %181 : vector<16xf32> to vector<16x1xf32>
    %183 = arith.addf %143, %182 : vector<16x1xf32>
    %cst_131 = arith.constant 0.000000e+00 : f32
    %184 = vector.broadcast %cst_131 : f32 to vector<16x80xf32>
    %c1_132 = arith.constant 1 : index
    %c0_133 = arith.constant 0 : index
    %c0_134 = arith.constant 0 : index
    %185 = vector.load %arg1[%c1_132, %c0_133, %c0_134] : memref<2x32x110xbf16, #tpu.memory_space<vmem>>, vector<1x32x80xbf16>
    %186 = vector.shape_cast %185 : vector<1x32x80xbf16> to vector<32x80xbf16>
    %c0_135 = arith.constant 0 : index
    %c0_136 = arith.constant 0 : index
    %c0_137 = arith.constant 0 : index
    %187 = vector.load %arg2[%c0_135, %c0_136, %c0_137] : memref<16x16x32xbf16, #tpu.memory_space<vmem>>, vector<1x16x32xbf16>
    %188 = vector.shape_cast %187 : vector<1x16x32xbf16> to vector<16x32xbf16>
    %cst_138 = arith.constant dense<0.000000e+00> : vector<16x80xf32>
    %189 = tpu.matmul %188, %186, %cst_138 {dimension_numbers = #tpu.dot_dimension_numbers<[1], [0], [0], [1], [0, 0, 1, 1], [], []>} : vector<16x32xbf16>, vector<32x80xbf16>, vector<16x80xf32> -> vector<16x80xf32>
    %190 = arith.addf %184, %189 : vector<16x80xf32>
    %c1_139 = arith.constant 1 : index
    %c0_140 = arith.constant 0 : index
    %c1_141 = arith.constant 1 : index
    %191 = vector.load %arg1[%c1_139, %c0_140, %c1_141] : memref<2x32x110xbf16, #tpu.memory_space<vmem>>, vector<1x32x80xbf16>
    %192 = vector.shape_cast %191 : vector<1x32x80xbf16> to vector<32x80xbf16>
    %c1_142 = arith.constant 1 : index
    %c0_143 = arith.constant 0 : index
    %c0_144 = arith.constant 0 : index
    %193 = vector.load %arg2[%c1_142, %c0_143, %c0_144] : memref<16x16x32xbf16, #tpu.memory_space<vmem>>, vector<1x16x32xbf16>
    %194 = vector.shape_cast %193 : vector<1x16x32xbf16> to vector<16x32xbf16>
    %cst_145 = arith.constant dense<0.000000e+00> : vector<16x80xf32>
    %195 = tpu.matmul %194, %192, %cst_145 {dimension_numbers = #tpu.dot_dimension_numbers<[1], [0], [0], [1], [0, 0, 1, 1], [], []>} : vector<16x32xbf16>, vector<32x80xbf16>, vector<16x80xf32> -> vector<16x80xf32>
    %196 = arith.addf %190, %195 : vector<16x80xf32>
    %c1_146 = arith.constant 1 : index
    %c0_147 = arith.constant 0 : index
    %c10_148 = arith.constant 10 : index
    %197 = vector.load %arg1[%c1_146, %c0_147, %c10_148] : memref<2x32x110xbf16, #tpu.memory_space<vmem>>, vector<1x32x80xbf16>
    %198 = vector.shape_cast %197 : vector<1x32x80xbf16> to vector<32x80xbf16>
    %c2_149 = arith.constant 2 : index
    %c0_150 = arith.constant 0 : index
    %c0_151 = arith.constant 0 : index
    %199 = vector.load %arg2[%c2_149, %c0_150, %c0_151] : memref<16x16x32xbf16, #tpu.memory_space<vmem>>, vector<1x16x32xbf16>
    %200 = vector.shape_cast %199 : vector<1x16x32xbf16> to vector<16x32xbf16>
    %cst_152 = arith.constant dense<0.000000e+00> : vector<16x80xf32>
    %201 = tpu.matmul %200, %198, %cst_152 {dimension_numbers = #tpu.dot_dimension_numbers<[1], [0], [0], [1], [0, 0, 1, 1], [], []>} : vector<16x32xbf16>, vector<32x80xbf16>, vector<16x80xf32> -> vector<16x80xf32>
    %202 = arith.addf %196, %201 : vector<16x80xf32>
    %c1_153 = arith.constant 1 : index
    %c0_154 = arith.constant 0 : index
    %c11_155 = arith.constant 11 : index
    %203 = vector.load %arg1[%c1_153, %c0_154, %c11_155] : memref<2x32x110xbf16, #tpu.memory_space<vmem>>, vector<1x32x80xbf16>
    %204 = vector.shape_cast %203 : vector<1x32x80xbf16> to vector<32x80xbf16>
    %c3_156 = arith.constant 3 : index
    %c0_157 = arith.constant 0 : index
    %c0_158 = arith.constant 0 : index
    %205 = vector.load %arg2[%c3_156, %c0_157, %c0_158] : memref<16x16x32xbf16, #tpu.memory_space<vmem>>, vector<1x16x32xbf16>
    %206 = vector.shape_cast %205 : vector<1x16x32xbf16> to vector<16x32xbf16>
    %cst_159 = arith.constant dense<0.000000e+00> : vector<16x80xf32>
    %207 = tpu.matmul %206, %204, %cst_159 {dimension_numbers = #tpu.dot_dimension_numbers<[1], [0], [0], [1], [0, 0, 1, 1], [], []>} : vector<16x32xbf16>, vector<32x80xbf16>, vector<16x80xf32> -> vector<16x80xf32>
    %208 = arith.addf %202, %207 : vector<16x80xf32>
    %209 = arith.truncf %208 : vector<16x80xf32> to vector<16x80xbf16>
    %c1_160 = arith.constant 1 : index
    %c0_161 = arith.constant 0 : index
    %c0_162 = arith.constant 0 : index
    %c0_163 = arith.constant 0 : index
    %210 = vector.load %arg3[%c1_160, %c0_161, %c0_162, %c0_163] : memref<2x4x16x80xbf16, #tpu.memory_space<vmem>>, vector<1x1x16x80xbf16>
    %211 = vector.shape_cast %210 : vector<1x1x16x80xbf16> to vector<16x80xbf16>
    %212 = vector.shape_cast %209 : vector<16x80xbf16> to vector<1x1x16x80xbf16>
    tpu.vector_store %arg3[%c1_160, %c0_161, %c0_162, %c0_163], %212 {strides = array<i32>} : memref<2x4x16x80xbf16, #tpu.memory_space<vmem>>, vector<1x1x16x80xbf16>,
    %cst_164 = arith.constant 0.000000e+00 : f32
    %213 = vector.shape_cast %21 : vector<1x80xi1> to vector<1x80xi1>
    %214 = vector.broadcast %213 : vector<1x80xi1> to vector<16x80xi1>
    %215 = vector.broadcast %cst_164 : f32 to vector<16x80xf32>
    %216 = arith.select %214, %208, %215 : vector<16x80xi1>, vector<16x80xf32>
    %cst_165 = arith.constant dense<0.000000e+00> : vector<16xf32>
    %217 = vector.multi_reduction <add>, %216, %cst_165 [1] : vector<16x80xf32> to vector<16xf32>
    %218 = vector.shape_cast %217 : vector<16xf32> to vector<16x1xf32>
    %219 = arith.addf %179, %218 : vector<16x1xf32>
    %220 = arith.mulf %216, %216 : vector<16x80xf32>
    %cst_166 = arith.constant dense<0.000000e+00> : vector<16xf32>
    %221 = vector.multi_reduction <add>, %220, %cst_166 [1] : vector<16x80xf32> to vector<16xf32>
    %222 = vector.shape_cast %221 : vector<16xf32> to vector<16x1xf32>
    %223 = arith.addf %183, %222 : vector<16x1xf32>
    %cst_167 = arith.constant 0.000000e+00 : f32
    %224 = vector.broadcast %cst_167 : f32 to vector<16x80xf32>
    %c1_168 = arith.constant 1 : index
    %c0_169 = arith.constant 0 : index
    %c1_170 = arith.constant 1 : index
    %225 = vector.load %arg1[%c1_168, %c0_169, %c1_170] : memref<2x32x110xbf16, #tpu.memory_space<vmem>>, vector<1x32x80xbf16>
    %226 = vector.shape_cast %225 : vector<1x32x80xbf16> to vector<32x80xbf16>
    %c4_171 = arith.constant 4 : index
    %c0_172 = arith.constant 0 : index
    %c0_173 = arith.constant 0 : index
    %227 = vector.load %arg2[%c4_171, %c0_172, %c0_173] : memref<16x16x32xbf16, #tpu.memory_space<vmem>>, vector<1x16x32xbf16>
    %228 = vector.shape_cast %227 : vector<1x16x32xbf16> to vector<16x32xbf16>
    %cst_174 = arith.constant dense<0.000000e+00> : vector<16x80xf32>
    %229 = tpu.matmul %228, %226, %cst_174 {dimension_numbers = #tpu.dot_dimension_numbers<[1], [0], [0], [1], [0, 0, 1, 1], [], []>} : vector<16x32xbf16>, vector<32x80xbf16>, vector<16x80xf32> -> vector<16x80xf32>
    %230 = arith.addf %224, %229 : vector<16x80xf32>
    %c1_175 = arith.constant 1 : index
    %c0_176 = arith.constant 0 : index
    %c2_177 = arith.constant 2 : index
    %231 = vector.load %arg1[%c1_175, %c0_176, %c2_177] : memref<2x32x110xbf16, #tpu.memory_space<vmem>>, vector<1x32x80xbf16>
    %232 = vector.shape_cast %231 : vector<1x32x80xbf16> to vector<32x80xbf16>
    %c5_178 = arith.constant 5 : index
    %c0_179 = arith.constant 0 : index
    %c0_180 = arith.constant 0 : index
    %233 = vector.load %arg2[%c5_178, %c0_179, %c0_180] : memref<16x16x32xbf16, #tpu.memory_space<vmem>>, vector<1x16x32xbf16>
    %234 = vector.shape_cast %233 : vector<1x16x32xbf16> to vector<16x32xbf16>
    %cst_181 = arith.constant dense<0.000000e+00> : vector<16x80xf32>
    %235 = tpu.matmul %234, %232, %cst_181 {dimension_numbers = #tpu.dot_dimension_numbers<[1], [0], [0], [1], [0, 0, 1, 1], [], []>} : vector<16x32xbf16>, vector<32x80xbf16>, vector<16x80xf32> -> vector<16x80xf32>
    %236 = arith.addf %230, %235 : vector<16x80xf32>
    %c1_182 = arith.constant 1 : index
    %c0_183 = arith.constant 0 : index
    %c11_184 = arith.constant 11 : index
    %237 = vector.load %arg1[%c1_182, %c0_183, %c11_184] : memref<2x32x110xbf16, #tpu.memory_space<vmem>>, vector<1x32x80xbf16>
    %238 = vector.shape_cast %237 : vector<1x32x80xbf16> to vector<32x80xbf16>
    %c6_185 = arith.constant 6 : index
    %c0_186 = arith.constant 0 : index
    %c0_187 = arith.constant 0 : index
    %239 = vector.load %arg2[%c6_185, %c0_186, %c0_187] : memref<16x16x32xbf16, #tpu.memory_space<vmem>>, vector<1x16x32xbf16>
    %240 = vector.shape_cast %239 : vector<1x16x32xbf16> to vector<16x32xbf16>
    %cst_188 = arith.constant dense<0.000000e+00> : vector<16x80xf32>
    %241 = tpu.matmul %240, %238, %cst_188 {dimension_numbers = #tpu.dot_dimension_numbers<[1], [0], [0], [1], [0, 0, 1, 1], [], []>} : vector<16x32xbf16>, vector<32x80xbf16>, vector<16x80xf32> -> vector<16x80xf32>
    %242 = arith.addf %236, %241 : vector<16x80xf32>
    %c1_189 = arith.constant 1 : index
    %c0_190 = arith.constant 0 : index
    %c12_191 = arith.constant 12 : index
    %243 = vector.load %arg1[%c1_189, %c0_190, %c12_191] : memref<2x32x110xbf16, #tpu.memory_space<vmem>>, vector<1x32x80xbf16>
    %244 = vector.shape_cast %243 : vector<1x32x80xbf16> to vector<32x80xbf16>
    %c7_192 = arith.constant 7 : index
    %c0_193 = arith.constant 0 : index
    %c0_194 = arith.constant 0 : index
    %245 = vector.load %arg2[%c7_192, %c0_193, %c0_194] : memref<16x16x32xbf16, #tpu.memory_space<vmem>>, vector<1x16x32xbf16>
    %246 = vector.shape_cast %245 : vector<1x16x32xbf16> to vector<16x32xbf16>
    %cst_195 = arith.constant dense<0.000000e+00> : vector<16x80xf32>
    %247 = tpu.matmul %246, %244, %cst_195 {dimension_numbers = #tpu.dot_dimension_numbers<[1], [0], [0], [1], [0, 0, 1, 1], [], []>} : vector<16x32xbf16>, vector<32x80xbf16>, vector<16x80xf32> -> vector<16x80xf32>
    %248 = arith.addf %242, %247 : vector<16x80xf32>
    %249 = arith.truncf %248 : vector<16x80xf32> to vector<16x80xbf16>
    %c1_196 = arith.constant 1 : index
    %c1_197 = arith.constant 1 : index
    %c0_198 = arith.constant 0 : index
    %c0_199 = arith.constant 0 : index
    %250 = vector.load %arg3[%c1_196, %c1_197, %c0_198, %c0_199] : memref<2x4x16x80xbf16, #tpu.memory_space<vmem>>, vector<1x1x16x80xbf16>
    %251 = vector.shape_cast %250 : vector<1x1x16x80xbf16> to vector<16x80xbf16>
    %252 = vector.shape_cast %249 : vector<16x80xbf16> to vector<1x1x16x80xbf16>
    tpu.vector_store %arg3[%c1_196, %c1_197, %c0_198, %c0_199], %252 {strides = array<i32>} : memref<2x4x16x80xbf16, #tpu.memory_space<vmem>>, vector<1x1x16x80xbf16>,
    %cst_200 = arith.constant 0.000000e+00 : f32
    %253 = vector.shape_cast %21 : vector<1x80xi1> to vector<1x80xi1>
    %254 = vector.broadcast %253 : vector<1x80xi1> to vector<16x80xi1>
    %255 = vector.broadcast %cst_200 : f32 to vector<16x80xf32>
    %256 = arith.select %254, %248, %255 : vector<16x80xi1>, vector<16x80xf32>
    %cst_201 = arith.constant dense<0.000000e+00> : vector<16xf32>
    %257 = vector.multi_reduction <add>, %256, %cst_201 [1] : vector<16x80xf32> to vector<16xf32>
    %258 = vector.shape_cast %257 : vector<16xf32> to vector<16x1xf32>
    %259 = arith.addf %219, %258 : vector<16x1xf32>
    %260 = arith.mulf %256, %256 : vector<16x80xf32>
    %cst_202 = arith.constant dense<0.000000e+00> : vector<16xf32>
    %261 = vector.multi_reduction <add>, %260, %cst_202 [1] : vector<16x80xf32> to vector<16xf32>
    %262 = vector.shape_cast %261 : vector<16xf32> to vector<16x1xf32>
    %263 = arith.addf %223, %262 : vector<16x1xf32>
    %cst_203 = arith.constant 0.000000e+00 : f32
    %264 = vector.broadcast %cst_203 : f32 to vector<16x80xf32>
    %c1_204 = arith.constant 1 : index
    %c0_205 = arith.constant 0 : index
    %c10_206 = arith.constant 10 : index
    %265 = vector.load %arg1[%c1_204, %c0_205, %c10_206] : memref<2x32x110xbf16, #tpu.memory_space<vmem>>, vector<1x32x80xbf16>
    %266 = vector.shape_cast %265 : vector<1x32x80xbf16> to vector<32x80xbf16>
    %c8_207 = arith.constant 8 : index
    %c0_208 = arith.constant 0 : index
    %c0_209 = arith.constant 0 : index
    %267 = vector.load %arg2[%c8_207, %c0_208, %c0_209] : memref<16x16x32xbf16, #tpu.memory_space<vmem>>, vector<1x16x32xbf16>
    %268 = vector.shape_cast %267 : vector<1x16x32xbf16> to vector<16x32xbf16>
    %cst_210 = arith.constant dense<0.000000e+00> : vector<16x80xf32>
    %269 = tpu.matmul %268, %266, %cst_210 {dimension_numbers = #tpu.dot_dimension_numbers<[1], [0], [0], [1], [0, 0, 1, 1], [], []>} : vector<16x32xbf16>, vector<32x80xbf16>, vector<16x80xf32> -> vector<16x80xf32>
    %270 = arith.addf %264, %269 : vector<16x80xf32>
    %c1_211 = arith.constant 1 : index
    %c0_212 = arith.constant 0 : index
    %c11_213 = arith.constant 11 : index
    %271 = vector.load %arg1[%c1_211, %c0_212, %c11_213] : memref<2x32x110xbf16, #tpu.memory_space<vmem>>, vector<1x32x80xbf16>
    %272 = vector.shape_cast %271 : vector<1x32x80xbf16> to vector<32x80xbf16>
    %c9_214 = arith.constant 9 : index
    %c0_215 = arith.constant 0 : index
    %c0_216 = arith.constant 0 : index
    %273 = vector.load %arg2[%c9_214, %c0_215, %c0_216] : memref<16x16x32xbf16, #tpu.memory_space<vmem>>, vector<1x16x32xbf16>
    %274 = vector.shape_cast %273 : vector<1x16x32xbf16> to vector<16x32xbf16>
    %cst_217 = arith.constant dense<0.000000e+00> : vector<16x80xf32>
    %275 = tpu.matmul %274, %272, %cst_217 {dimension_numbers = #tpu.dot_dimension_numbers<[1], [0], [0], [1], [0, 0, 1, 1], [], []>} : vector<16x32xbf16>, vector<32x80xbf16>, vector<16x80xf32> -> vector<16x80xf32>
    %276 = arith.addf %270, %275 : vector<16x80xf32>
    %c1_218 = arith.constant 1 : index
    %c0_219 = arith.constant 0 : index
    %c20_220 = arith.constant 20 : index
    %277 = vector.load %arg1[%c1_218, %c0_219, %c20_220] : memref<2x32x110xbf16, #tpu.memory_space<vmem>>, vector<1x32x80xbf16>
    %278 = vector.shape_cast %277 : vector<1x32x80xbf16> to vector<32x80xbf16>
    %c10_221 = arith.constant 10 : index
    %c0_222 = arith.constant 0 : index
    %c0_223 = arith.constant 0 : index
    %279 = vector.load %arg2[%c10_221, %c0_222, %c0_223] : memref<16x16x32xbf16, #tpu.memory_space<vmem>>, vector<1x16x32xbf16>
    %280 = vector.shape_cast %279 : vector<1x16x32xbf16> to vector<16x32xbf16>
    %cst_224 = arith.constant dense<0.000000e+00> : vector<16x80xf32>
    %281 = tpu.matmul %280, %278, %cst_224 {dimension_numbers = #tpu.dot_dimension_numbers<[1], [0], [0], [1], [0, 0, 1, 1], [], []>} : vector<16x32xbf16>, vector<32x80xbf16>, vector<16x80xf32> -> vector<16x80xf32>
    %282 = arith.addf %276, %281 : vector<16x80xf32>
    %c1_225 = arith.constant 1 : index
    %c0_226 = arith.constant 0 : index
    %c21_227 = arith.constant 21 : index
    %283 = vector.load %arg1[%c1_225, %c0_226, %c21_227] : memref<2x32x110xbf16, #tpu.memory_space<vmem>>, vector<1x32x80xbf16>
    %284 = vector.shape_cast %283 : vector<1x32x80xbf16> to vector<32x80xbf16>
    %c11_228 = arith.constant 11 : index
    %c0_229 = arith.constant 0 : index
    %c0_230 = arith.constant 0 : index
    %285 = vector.load %arg2[%c11_228, %c0_229, %c0_230] : memref<16x16x32xbf16, #tpu.memory_space<vmem>>, vector<1x16x32xbf16>
    %286 = vector.shape_cast %285 : vector<1x16x32xbf16> to vector<16x32xbf16>
    %cst_231 = arith.constant dense<0.000000e+00> : vector<16x80xf32>
    %287 = tpu.matmul %286, %284, %cst_231 {dimension_numbers = #tpu.dot_dimension_numbers<[1], [0], [0], [1], [0, 0, 1, 1], [], []>} : vector<16x32xbf16>, vector<32x80xbf16>, vector<16x80xf32> -> vector<16x80xf32>
    %288 = arith.addf %282, %287 : vector<16x80xf32>
    %289 = arith.truncf %288 : vector<16x80xf32> to vector<16x80xbf16>
    %c1_232 = arith.constant 1 : index
    %c2_233 = arith.constant 2 : index
    %c0_234 = arith.constant 0 : index
    %c0_235 = arith.constant 0 : index
    %290 = vector.load %arg3[%c1_232, %c2_233, %c0_234, %c0_235] : memref<2x4x16x80xbf16, #tpu.memory_space<vmem>>, vector<1x1x16x80xbf16>
    %291 = vector.shape_cast %290 : vector<1x1x16x80xbf16> to vector<16x80xbf16>
    %292 = vector.shape_cast %289 : vector<16x80xbf16> to vector<1x1x16x80xbf16>
    tpu.vector_store %arg3[%c1_232, %c2_233, %c0_234, %c0_235], %292 {strides = array<i32>} : memref<2x4x16x80xbf16, #tpu.memory_space<vmem>>, vector<1x1x16x80xbf16>,
    %cst_236 = arith.constant 0.000000e+00 : f32
    %293 = vector.shape_cast %21 : vector<1x80xi1> to vector<1x80xi1>
    %294 = vector.broadcast %293 : vector<1x80xi1> to vector<16x80xi1>
    %295 = vector.broadcast %cst_236 : f32 to vector<16x80xf32>
    %296 = arith.select %294, %288, %295 : vector<16x80xi1>, vector<16x80xf32>
    %cst_237 = arith.constant dense<0.000000e+00> : vector<16xf32>
    %297 = vector.multi_reduction <add>, %296, %cst_237 [1] : vector<16x80xf32> to vector<16xf32>
    %298 = vector.shape_cast %297 : vector<16xf32> to vector<16x1xf32>
    %299 = arith.addf %259, %298 : vector<16x1xf32>
    %300 = arith.mulf %296, %296 : vector<16x80xf32>
    %cst_238 = arith.constant dense<0.000000e+00> : vector<16xf32>
    %301 = vector.multi_reduction <add>, %300, %cst_238 [1] : vector<16x80xf32> to vector<16xf32>
    %302 = vector.shape_cast %301 : vector<16xf32> to vector<16x1xf32>
    %303 = arith.addf %263, %302 : vector<16x1xf32>
    %cst_239 = arith.constant 0.000000e+00 : f32
    %304 = vector.broadcast %cst_239 : f32 to vector<16x80xf32>
    %c1_240 = arith.constant 1 : index
    %c0_241 = arith.constant 0 : index
    %c11_242 = arith.constant 11 : index
    %305 = vector.load %arg1[%c1_240, %c0_241, %c11_242] : memref<2x32x110xbf16, #tpu.memory_space<vmem>>, vector<1x32x80xbf16>
    %306 = vector.shape_cast %305 : vector<1x32x80xbf16> to vector<32x80xbf16>
    %c12_243 = arith.constant 12 : index
    %c0_244 = arith.constant 0 : index
    %c0_245 = arith.constant 0 : index
    %307 = vector.load %arg2[%c12_243, %c0_244, %c0_245] : memref<16x16x32xbf16, #tpu.memory_space<vmem>>, vector<1x16x32xbf16>
    %308 = vector.shape_cast %307 : vector<1x16x32xbf16> to vector<16x32xbf16>
    %cst_246 = arith.constant dense<0.000000e+00> : vector<16x80xf32>
    %309 = tpu.matmul %308, %306, %cst_246 {dimension_numbers = #tpu.dot_dimension_numbers<[1], [0], [0], [1], [0, 0, 1, 1], [], []>} : vector<16x32xbf16>, vector<32x80xbf16>, vector<16x80xf32> -> vector<16x80xf32>
    %310 = arith.addf %304, %309 : vector<16x80xf32>
    %c1_247 = arith.constant 1 : index
    %c0_248 = arith.constant 0 : index
    %c12_249 = arith.constant 12 : index
    %311 = vector.load %arg1[%c1_247, %c0_248, %c12_249] : memref<2x32x110xbf16, #tpu.memory_space<vmem>>, vector<1x32x80xbf16>
    %312 = vector.shape_cast %311 : vector<1x32x80xbf16> to vector<32x80xbf16>
    %c13_250 = arith.constant 13 : index
    %c0_251 = arith.constant 0 : index
    %c0_252 = arith.constant 0 : index
    %313 = vector.load %arg2[%c13_250, %c0_251, %c0_252] : memref<16x16x32xbf16, #tpu.memory_space<vmem>>, vector<1x16x32xbf16>
    %314 = vector.shape_cast %313 : vector<1x16x32xbf16> to vector<16x32xbf16>
    %cst_253 = arith.constant dense<0.000000e+00> : vector<16x80xf32>
    %315 = tpu.matmul %314, %312, %cst_253 {dimension_numbers = #tpu.dot_dimension_numbers<[1], [0], [0], [1], [0, 0, 1, 1], [], []>} : vector<16x32xbf16>, vector<32x80xbf16>, vector<16x80xf32> -> vector<16x80xf32>
    %316 = arith.addf %310, %315 : vector<16x80xf32>
    %c1_254 = arith.constant 1 : index
    %c0_255 = arith.constant 0 : index
    %c21_256 = arith.constant 21 : index
    %317 = vector.load %arg1[%c1_254, %c0_255, %c21_256] : memref<2x32x110xbf16, #tpu.memory_space<vmem>>, vector<1x32x80xbf16>
    %318 = vector.shape_cast %317 : vector<1x32x80xbf16> to vector<32x80xbf16>
    %c14_257 = arith.constant 14 : index
    %c0_258 = arith.constant 0 : index
    %c0_259 = arith.constant 0 : index
    %319 = vector.load %arg2[%c14_257, %c0_258, %c0_259] : memref<16x16x32xbf16, #tpu.memory_space<vmem>>, vector<1x16x32xbf16>
    %320 = vector.shape_cast %319 : vector<1x16x32xbf16> to vector<16x32xbf16>
    %cst_260 = arith.constant dense<0.000000e+00> : vector<16x80xf32>
    %321 = tpu.matmul %320, %318, %cst_260 {dimension_numbers = #tpu.dot_dimension_numbers<[1], [0], [0], [1], [0, 0, 1, 1], [], []>} : vector<16x32xbf16>, vector<32x80xbf16>, vector<16x80xf32> -> vector<16x80xf32>
    %322 = arith.addf %316, %321 : vector<16x80xf32>
    %c1_261 = arith.constant 1 : index
    %c0_262 = arith.constant 0 : index
    %c22_263 = arith.constant 22 : index
    %323 = vector.load %arg1[%c1_261, %c0_262, %c22_263] : memref<2x32x110xbf16, #tpu.memory_space<vmem>>, vector<1x32x80xbf16>
    %324 = vector.shape_cast %323 : vector<1x32x80xbf16> to vector<32x80xbf16>
    %c15_264 = arith.constant 15 : index
    %c0_265 = arith.constant 0 : index
    %c0_266 = arith.constant 0 : index
    %325 = vector.load %arg2[%c15_264, %c0_265, %c0_266] : memref<16x16x32xbf16, #tpu.memory_space<vmem>>, vector<1x16x32xbf16>
    %326 = vector.shape_cast %325 : vector<1x16x32xbf16> to vector<16x32xbf16>
    %cst_267 = arith.constant dense<0.000000e+00> : vector<16x80xf32>
    %327 = tpu.matmul %326, %324, %cst_267 {dimension_numbers = #tpu.dot_dimension_numbers<[1], [0], [0], [1], [0, 0, 1, 1], [], []>} : vector<16x32xbf16>, vector<32x80xbf16>, vector<16x80xf32> -> vector<16x80xf32>
    %328 = arith.addf %322, %327 : vector<16x80xf32>
    %329 = arith.truncf %328 : vector<16x80xf32> to vector<16x80xbf16>
    %c1_268 = arith.constant 1 : index
    %c3_269 = arith.constant 3 : index
    %c0_270 = arith.constant 0 : index
    %c0_271 = arith.constant 0 : index
    %330 = vector.load %arg3[%c1_268, %c3_269, %c0_270, %c0_271] : memref<2x4x16x80xbf16, #tpu.memory_space<vmem>>, vector<1x1x16x80xbf16>
    %331 = vector.shape_cast %330 : vector<1x1x16x80xbf16> to vector<16x80xbf16>
    %332 = vector.shape_cast %329 : vector<16x80xbf16> to vector<1x1x16x80xbf16>
    tpu.vector_store %arg3[%c1_268, %c3_269, %c0_270, %c0_271], %332 {strides = array<i32>} : memref<2x4x16x80xbf16, #tpu.memory_space<vmem>>, vector<1x1x16x80xbf16>,
    %cst_272 = arith.constant 0.000000e+00 : f32
    %333 = vector.shape_cast %21 : vector<1x80xi1> to vector<1x80xi1>
    %334 = vector.broadcast %333 : vector<1x80xi1> to vector<16x80xi1>
    %335 = vector.broadcast %cst_272 : f32 to vector<16x80xf32>
    %336 = arith.select %334, %328, %335 : vector<16x80xi1>, vector<16x80xf32>
    %cst_273 = arith.constant dense<0.000000e+00> : vector<16xf32>
    %337 = vector.multi_reduction <add>, %336, %cst_273 [1] : vector<16x80xf32> to vector<16xf32>
    %338 = vector.shape_cast %337 : vector<16xf32> to vector<16x1xf32>
    %339 = arith.addf %299, %338 : vector<16x1xf32>
    %340 = arith.mulf %336, %336 : vector<16x80xf32>
    %cst_274 = arith.constant dense<0.000000e+00> : vector<16xf32>
    %341 = vector.multi_reduction <add>, %340, %cst_274 [1] : vector<16x80xf32> to vector<16xf32>
    %342 = vector.shape_cast %341 : vector<16xf32> to vector<16x1xf32>
    %343 = arith.addf %303, %342 : vector<16x1xf32>
    %c0_275 = arith.constant 0 : index
    %c0_276 = arith.constant 0 : index
    %344 = vector.load %arg4[%c0_275, %c0_276] : memref<16x2xf32, #tpu.memory_space<vmem>>, vector<16x1xf32>
    %345 = arith.addf %344, %339 : vector<16x1xf32>
    %c0_277 = arith.constant 0 : index
    %c0_278 = arith.constant 0 : index
    %346 = vector.load %arg4[%c0_277, %c0_278] : memref<16x2xf32, #tpu.memory_space<vmem>>, vector<16x1xf32>
    tpu.vector_store %arg4[%c0_277, %c0_278], %345 {strides = array<i32>} : memref<16x2xf32, #tpu.memory_space<vmem>>, vector<16x1xf32>,
    %c0_279 = arith.constant 0 : index
    %c1_280 = arith.constant 1 : index
    %347 = vector.load %arg4[%c0_279, %c1_280] : memref<16x2xf32, #tpu.memory_space<vmem>>, vector<16x1xf32>
    %348 = arith.addf %347, %343 : vector<16x1xf32>
    %c0_281 = arith.constant 0 : index
    %c1_282 = arith.constant 1 : index
    %349 = vector.load %arg4[%c0_281, %c1_282] : memref<16x2xf32, #tpu.memory_space<vmem>>, vector<16x1xf32>
    tpu.vector_store %arg4[%c0_281, %c1_282], %348 {strides = array<i32>} : memref<16x2xf32, #tpu.memory_space<vmem>>, vector<16x1xf32>,
    return
  }
  func.func @transform_0(%arg0: i32) -> (i32, i32, i32) {
    %c0_i32 = arith.constant 0 : i32
    %c0_i32_0 = arith.constant 0 : i32
    %c0_i32_1 = arith.constant 0 : i32
    return %arg0, %c0_i32, %c0_i32_0 : i32, i32, i32
  }
  func.func @transform_1(%arg0: i32) -> (i32, i32, i32) {
    %c0_i32 = arith.constant 0 : i32
    %c0_i32_0 = arith.constant 0 : i32
    %c0_i32_1 = arith.constant 0 : i32
    %c0_i32_2 = arith.constant 0 : i32
    return %c0_i32, %c0_i32_0, %c0_i32_1 : i32, i32, i32
  }
  func.func @transform_2(%arg0: i32) -> (i32, i32, i32, i32) {
    %c0_i32 = arith.constant 0 : i32
    %c0_i32_0 = arith.constant 0 : i32
    %c0_i32_1 = arith.constant 0 : i32
    %c0_i32_2 = arith.constant 0 : i32
    return %arg0, %c0_i32, %c0_i32_0, %c0_i32_1 : i32, i32, i32, i32
  }
  func.func @transform_3(%arg0: i32) -> (i32, i32) {
    %c0_i32 = arith.constant 0 : i32
    %c0_i32_0 = arith.constant 0 : i32
    %c0_i32_1 = arith.constant 0 : i32
    return %c0_i32, %c0_i32_0 : i32, i32
  }
}

module attributes {stable_mosaic.version = 11 : i64} {
  func.func @_convt_phase_kernel(%arg0: i32, %arg1: memref<1x16x342xbf16, #tpu.memory_space<vmem>>, %arg2: memref<16x8x16xbf16, #tpu.memory_space<vmem>>, %arg3: memref<1x4x8x288xbf16, #tpu.memory_space<vmem>>, %arg4: memref<8x2xf32, #tpu.memory_space<vmem>>) attributes {dimension_semantics = [#tpu.dimension_semantics<arbitrary>], iteration_bounds = array<i64: 2>, scalar_prefetch = 0 : i64, scratch_operands = 0 : i64, tpu.core_type = #tpu.core_type<tc>, window_params = [{transform_indices = @transform_0, window_bounds = array<i64: 1, 16, 342>}, {pipeline_mode = #tpu.pipeline_mode<synchronous>, transform_indices = @transform_1, window_bounds = array<i64: 16, 8, 16>}, {transform_indices = @transform_2, window_bounds = array<i64: 1, 4, 8, 288>}, {pipeline_mode = #tpu.pipeline_mode<synchronous>, transform_indices = @transform_3, window_bounds = array<i64: 8, 2>}]} {
    %c0_i32 = arith.constant 0 : i32
    %0 = arith.cmpi eq, %arg0, %c0_i32 : i32
    %1 = arith.extui %0 : i1 to i32
    %c0_i32_0 = arith.constant 0 : i32
    %2 = arith.cmpi ne, %1, %c0_i32_0 : i32
    scf.if %2 {
      %cst_136 = arith.constant 0.000000e+00 : f32
      %190 = vector.broadcast %cst_136 : f32 to vector<8x2xf32>
      %c0_137 = arith.constant 0 : index
      %c0_138 = arith.constant 0 : index
      %191 = vector.load %arg4[%c0_137, %c0_138] : memref<8x2xf32, #tpu.memory_space<vmem>>, vector<8x2xf32>
      tpu.vector_store %arg4[%c0_137, %c0_138], %190 {strides = array<i32>} : memref<8x2xf32, #tpu.memory_space<vmem>>, vector<8x2xf32>,
    } else {
    }
    %3 = tpu.iota {dimensions = array<i32: 1>} : vector<1x288xi32>
    %c18_i32 = arith.constant 18 : i32
    %c0_i32_1 = arith.constant 0 : i32
    %4 = arith.cmpi eq, %c18_i32, %c0_i32_1 : i32
    %c1_i32 = arith.constant 1 : i32
    %5 = arith.select %4, %c1_i32, %c18_i32 : i32
    %6 = vector.broadcast %5 : i32 to vector<1x288xi32>
    %7 = arith.remsi %3, %6 : vector<1x288xi32>
    %c0_i32_2 = arith.constant 0 : i32
    %8 = vector.broadcast %c0_i32_2 : i32 to vector<1x288xi32>
    %9 = arith.cmpi ne, %7, %8 : vector<1x288xi32>
    %c0_i32_3 = arith.constant 0 : i32
    %10 = vector.broadcast %c0_i32_3 : i32 to vector<1x288xi32>
    %11 = arith.cmpi slt, %7, %10 : vector<1x288xi32>
    %c0_i32_4 = arith.constant 0 : i32
    %12 = arith.cmpi slt, %5, %c0_i32_4 : i32
    %13 = vector.broadcast %12 : i1 to vector<1x288xi1>
    %14 = vector.broadcast %13 : vector<1x288xi1> to vector<1x288xi1>
    %15 = arith.xori %11, %14 : vector<1x288xi1>
    %16 = arith.andi %15, %9 : vector<1x288xi1>
    %17 = vector.broadcast %5 : i32 to vector<1x288xi32>
    %18 = arith.addi %7, %17 : vector<1x288xi32>
    %19 = arith.select %16, %18, %7 : vector<1x288xi1>, vector<1x288xi32>
    %c16_i32 = arith.constant 16 : i32
    %20 = vector.broadcast %c16_i32 : i32 to vector<1x288xi32>
    %21 = arith.cmpi slt, %19, %20 : vector<1x288xi32>
    %cst = arith.constant 0.000000e+00 : f32
    %22 = vector.broadcast %cst : f32 to vector<8x1xf32>
    %cst_5 = arith.constant 0.000000e+00 : f32
    %23 = vector.broadcast %cst_5 : f32 to vector<8x1xf32>
    %cst_6 = arith.constant 0.000000e+00 : f32
    %24 = vector.broadcast %cst_6 : f32 to vector<8x288xf32>
    %c0 = arith.constant 0 : index
    %c0_7 = arith.constant 0 : index
    %c0_8 = arith.constant 0 : index
    %25 = vector.load %arg1[%c0, %c0_7, %c0_8] : memref<1x16x342xbf16, #tpu.memory_space<vmem>>, vector<1x16x288xbf16>
    %26 = vector.shape_cast %25 : vector<1x16x288xbf16> to vector<16x288xbf16>
    %c0_9 = arith.constant 0 : index
    %c0_10 = arith.constant 0 : index
    %c0_11 = arith.constant 0 : index
    %27 = vector.load %arg2[%c0_9, %c0_10, %c0_11] : memref<16x8x16xbf16, #tpu.memory_space<vmem>>, vector<1x8x16xbf16>
    %28 = vector.shape_cast %27 : vector<1x8x16xbf16> to vector<8x16xbf16>
    %cst_12 = arith.constant dense<0.000000e+00> : vector<8x288xf32>
    %29 = tpu.matmul %28, %26, %cst_12 {dimension_numbers = #tpu.dot_dimension_numbers<[1], [0], [0], [1], [0, 0, 1, 1], [], []>} : vector<8x16xbf16>, vector<16x288xbf16>, vector<8x288xf32> -> vector<8x288xf32>
    %30 = arith.addf %24, %29 : vector<8x288xf32>
    %c0_13 = arith.constant 0 : index
    %c0_14 = arith.constant 0 : index
    %c1 = arith.constant 1 : index
    %31 = vector.load %arg1[%c0_13, %c0_14, %c1] : memref<1x16x342xbf16, #tpu.memory_space<vmem>>, vector<1x16x288xbf16>
    %32 = vector.shape_cast %31 : vector<1x16x288xbf16> to vector<16x288xbf16>
    %c1_15 = arith.constant 1 : index
    %c0_16 = arith.constant 0 : index
    %c0_17 = arith.constant 0 : index
    %33 = vector.load %arg2[%c1_15, %c0_16, %c0_17] : memref<16x8x16xbf16, #tpu.memory_space<vmem>>, vector<1x8x16xbf16>
    %34 = vector.shape_cast %33 : vector<1x8x16xbf16> to vector<8x16xbf16>
    %cst_18 = arith.constant dense<0.000000e+00> : vector<8x288xf32>
    %35 = tpu.matmul %34, %32, %cst_18 {dimension_numbers = #tpu.dot_dimension_numbers<[1], [0], [0], [1], [0, 0, 1, 1], [], []>} : vector<8x16xbf16>, vector<16x288xbf16>, vector<8x288xf32> -> vector<8x288xf32>
    %36 = arith.addf %30, %35 : vector<8x288xf32>
    %c0_19 = arith.constant 0 : index
    %c0_20 = arith.constant 0 : index
    %c18 = arith.constant 18 : index
    %37 = vector.load %arg1[%c0_19, %c0_20, %c18] : memref<1x16x342xbf16, #tpu.memory_space<vmem>>, vector<1x16x288xbf16>
    %38 = vector.shape_cast %37 : vector<1x16x288xbf16> to vector<16x288xbf16>
    %c2 = arith.constant 2 : index
    %c0_21 = arith.constant 0 : index
    %c0_22 = arith.constant 0 : index
    %39 = vector.load %arg2[%c2, %c0_21, %c0_22] : memref<16x8x16xbf16, #tpu.memory_space<vmem>>, vector<1x8x16xbf16>
    %40 = vector.shape_cast %39 : vector<1x8x16xbf16> to vector<8x16xbf16>
    %cst_23 = arith.constant dense<0.000000e+00> : vector<8x288xf32>
    %41 = tpu.matmul %40, %38, %cst_23 {dimension_numbers = #tpu.dot_dimension_numbers<[1], [0], [0], [1], [0, 0, 1, 1], [], []>} : vector<8x16xbf16>, vector<16x288xbf16>, vector<8x288xf32> -> vector<8x288xf32>
    %42 = arith.addf %36, %41 : vector<8x288xf32>
    %c0_24 = arith.constant 0 : index
    %c0_25 = arith.constant 0 : index
    %c19 = arith.constant 19 : index
    %43 = vector.load %arg1[%c0_24, %c0_25, %c19] : memref<1x16x342xbf16, #tpu.memory_space<vmem>>, vector<1x16x288xbf16>
    %44 = vector.shape_cast %43 : vector<1x16x288xbf16> to vector<16x288xbf16>
    %c3 = arith.constant 3 : index
    %c0_26 = arith.constant 0 : index
    %c0_27 = arith.constant 0 : index
    %45 = vector.load %arg2[%c3, %c0_26, %c0_27] : memref<16x8x16xbf16, #tpu.memory_space<vmem>>, vector<1x8x16xbf16>
    %46 = vector.shape_cast %45 : vector<1x8x16xbf16> to vector<8x16xbf16>
    %cst_28 = arith.constant dense<0.000000e+00> : vector<8x288xf32>
    %47 = tpu.matmul %46, %44, %cst_28 {dimension_numbers = #tpu.dot_dimension_numbers<[1], [0], [0], [1], [0, 0, 1, 1], [], []>} : vector<8x16xbf16>, vector<16x288xbf16>, vector<8x288xf32> -> vector<8x288xf32>
    %48 = arith.addf %42, %47 : vector<8x288xf32>
    %49 = arith.truncf %48 : vector<8x288xf32> to vector<8x288xbf16>
    %c0_29 = arith.constant 0 : index
    %c0_30 = arith.constant 0 : index
    %c0_31 = arith.constant 0 : index
    %c0_32 = arith.constant 0 : index
    %50 = vector.load %arg3[%c0_29, %c0_30, %c0_31, %c0_32] : memref<1x4x8x288xbf16, #tpu.memory_space<vmem>>, vector<1x1x8x288xbf16>
    %51 = vector.shape_cast %50 : vector<1x1x8x288xbf16> to vector<8x288xbf16>
    %52 = vector.shape_cast %49 : vector<8x288xbf16> to vector<1x1x8x288xbf16>
    tpu.vector_store %arg3[%c0_29, %c0_30, %c0_31, %c0_32], %52 {strides = array<i32>} : memref<1x4x8x288xbf16, #tpu.memory_space<vmem>>, vector<1x1x8x288xbf16>,
    %cst_33 = arith.constant 0.000000e+00 : f32
    %53 = vector.shape_cast %21 : vector<1x288xi1> to vector<1x288xi1>
    %54 = vector.broadcast %53 : vector<1x288xi1> to vector<8x288xi1>
    %55 = vector.broadcast %cst_33 : f32 to vector<8x288xf32>
    %56 = arith.select %54, %48, %55 : vector<8x288xi1>, vector<8x288xf32>
    %cst_34 = arith.constant dense<0.000000e+00> : vector<8xf32>
    %57 = vector.multi_reduction <add>, %56, %cst_34 [1] : vector<8x288xf32> to vector<8xf32>
    %58 = vector.shape_cast %57 : vector<8xf32> to vector<8x1xf32>
    %59 = arith.addf %22, %58 : vector<8x1xf32>
    %60 = arith.mulf %56, %56 : vector<8x288xf32>
    %cst_35 = arith.constant dense<0.000000e+00> : vector<8xf32>
    %61 = vector.multi_reduction <add>, %60, %cst_35 [1] : vector<8x288xf32> to vector<8xf32>
    %62 = vector.shape_cast %61 : vector<8xf32> to vector<8x1xf32>
    %63 = arith.addf %23, %62 : vector<8x1xf32>
    %cst_36 = arith.constant 0.000000e+00 : f32
    %64 = vector.broadcast %cst_36 : f32 to vector<8x288xf32>
    %c0_37 = arith.constant 0 : index
    %c0_38 = arith.constant 0 : index
    %c1_39 = arith.constant 1 : index
    %65 = vector.load %arg1[%c0_37, %c0_38, %c1_39] : memref<1x16x342xbf16, #tpu.memory_space<vmem>>, vector<1x16x288xbf16>
    %66 = vector.shape_cast %65 : vector<1x16x288xbf16> to vector<16x288xbf16>
    %c4 = arith.constant 4 : index
    %c0_40 = arith.constant 0 : index
    %c0_41 = arith.constant 0 : index
    %67 = vector.load %arg2[%c4, %c0_40, %c0_41] : memref<16x8x16xbf16, #tpu.memory_space<vmem>>, vector<1x8x16xbf16>
    %68 = vector.shape_cast %67 : vector<1x8x16xbf16> to vector<8x16xbf16>
    %cst_42 = arith.constant dense<0.000000e+00> : vector<8x288xf32>
    %69 = tpu.matmul %68, %66, %cst_42 {dimension_numbers = #tpu.dot_dimension_numbers<[1], [0], [0], [1], [0, 0, 1, 1], [], []>} : vector<8x16xbf16>, vector<16x288xbf16>, vector<8x288xf32> -> vector<8x288xf32>
    %70 = arith.addf %64, %69 : vector<8x288xf32>
    %c0_43 = arith.constant 0 : index
    %c0_44 = arith.constant 0 : index
    %c2_45 = arith.constant 2 : index
    %71 = vector.load %arg1[%c0_43, %c0_44, %c2_45] : memref<1x16x342xbf16, #tpu.memory_space<vmem>>, vector<1x16x288xbf16>
    %72 = vector.shape_cast %71 : vector<1x16x288xbf16> to vector<16x288xbf16>
    %c5 = arith.constant 5 : index
    %c0_46 = arith.constant 0 : index
    %c0_47 = arith.constant 0 : index
    %73 = vector.load %arg2[%c5, %c0_46, %c0_47] : memref<16x8x16xbf16, #tpu.memory_space<vmem>>, vector<1x8x16xbf16>
    %74 = vector.shape_cast %73 : vector<1x8x16xbf16> to vector<8x16xbf16>
    %cst_48 = arith.constant dense<0.000000e+00> : vector<8x288xf32>
    %75 = tpu.matmul %74, %72, %cst_48 {dimension_numbers = #tpu.dot_dimension_numbers<[1], [0], [0], [1], [0, 0, 1, 1], [], []>} : vector<8x16xbf16>, vector<16x288xbf16>, vector<8x288xf32> -> vector<8x288xf32>
    %76 = arith.addf %70, %75 : vector<8x288xf32>
    %c0_49 = arith.constant 0 : index
    %c0_50 = arith.constant 0 : index
    %c19_51 = arith.constant 19 : index
    %77 = vector.load %arg1[%c0_49, %c0_50, %c19_51] : memref<1x16x342xbf16, #tpu.memory_space<vmem>>, vector<1x16x288xbf16>
    %78 = vector.shape_cast %77 : vector<1x16x288xbf16> to vector<16x288xbf16>
    %c6 = arith.constant 6 : index
    %c0_52 = arith.constant 0 : index
    %c0_53 = arith.constant 0 : index
    %79 = vector.load %arg2[%c6, %c0_52, %c0_53] : memref<16x8x16xbf16, #tpu.memory_space<vmem>>, vector<1x8x16xbf16>
    %80 = vector.shape_cast %79 : vector<1x8x16xbf16> to vector<8x16xbf16>
    %cst_54 = arith.constant dense<0.000000e+00> : vector<8x288xf32>
    %81 = tpu.matmul %80, %78, %cst_54 {dimension_numbers = #tpu.dot_dimension_numbers<[1], [0], [0], [1], [0, 0, 1, 1], [], []>} : vector<8x16xbf16>, vector<16x288xbf16>, vector<8x288xf32> -> vector<8x288xf32>
    %82 = arith.addf %76, %81 : vector<8x288xf32>
    %c0_55 = arith.constant 0 : index
    %c0_56 = arith.constant 0 : index
    %c20 = arith.constant 20 : index
    %83 = vector.load %arg1[%c0_55, %c0_56, %c20] : memref<1x16x342xbf16, #tpu.memory_space<vmem>>, vector<1x16x288xbf16>
    %84 = vector.shape_cast %83 : vector<1x16x288xbf16> to vector<16x288xbf16>
    %c7 = arith.constant 7 : index
    %c0_57 = arith.constant 0 : index
    %c0_58 = arith.constant 0 : index
    %85 = vector.load %arg2[%c7, %c0_57, %c0_58] : memref<16x8x16xbf16, #tpu.memory_space<vmem>>, vector<1x8x16xbf16>
    %86 = vector.shape_cast %85 : vector<1x8x16xbf16> to vector<8x16xbf16>
    %cst_59 = arith.constant dense<0.000000e+00> : vector<8x288xf32>
    %87 = tpu.matmul %86, %84, %cst_59 {dimension_numbers = #tpu.dot_dimension_numbers<[1], [0], [0], [1], [0, 0, 1, 1], [], []>} : vector<8x16xbf16>, vector<16x288xbf16>, vector<8x288xf32> -> vector<8x288xf32>
    %88 = arith.addf %82, %87 : vector<8x288xf32>
    %89 = arith.truncf %88 : vector<8x288xf32> to vector<8x288xbf16>
    %c0_60 = arith.constant 0 : index
    %c1_61 = arith.constant 1 : index
    %c0_62 = arith.constant 0 : index
    %c0_63 = arith.constant 0 : index
    %90 = vector.load %arg3[%c0_60, %c1_61, %c0_62, %c0_63] : memref<1x4x8x288xbf16, #tpu.memory_space<vmem>>, vector<1x1x8x288xbf16>
    %91 = vector.shape_cast %90 : vector<1x1x8x288xbf16> to vector<8x288xbf16>
    %92 = vector.shape_cast %89 : vector<8x288xbf16> to vector<1x1x8x288xbf16>
    tpu.vector_store %arg3[%c0_60, %c1_61, %c0_62, %c0_63], %92 {strides = array<i32>} : memref<1x4x8x288xbf16, #tpu.memory_space<vmem>>, vector<1x1x8x288xbf16>,
    %cst_64 = arith.constant 0.000000e+00 : f32
    %93 = vector.shape_cast %21 : vector<1x288xi1> to vector<1x288xi1>
    %94 = vector.broadcast %93 : vector<1x288xi1> to vector<8x288xi1>
    %95 = vector.broadcast %cst_64 : f32 to vector<8x288xf32>
    %96 = arith.select %94, %88, %95 : vector<8x288xi1>, vector<8x288xf32>
    %cst_65 = arith.constant dense<0.000000e+00> : vector<8xf32>
    %97 = vector.multi_reduction <add>, %96, %cst_65 [1] : vector<8x288xf32> to vector<8xf32>
    %98 = vector.shape_cast %97 : vector<8xf32> to vector<8x1xf32>
    %99 = arith.addf %59, %98 : vector<8x1xf32>
    %100 = arith.mulf %96, %96 : vector<8x288xf32>
    %cst_66 = arith.constant dense<0.000000e+00> : vector<8xf32>
    %101 = vector.multi_reduction <add>, %100, %cst_66 [1] : vector<8x288xf32> to vector<8xf32>
    %102 = vector.shape_cast %101 : vector<8xf32> to vector<8x1xf32>
    %103 = arith.addf %63, %102 : vector<8x1xf32>
    %cst_67 = arith.constant 0.000000e+00 : f32
    %104 = vector.broadcast %cst_67 : f32 to vector<8x288xf32>
    %c0_68 = arith.constant 0 : index
    %c0_69 = arith.constant 0 : index
    %c18_70 = arith.constant 18 : index
    %105 = vector.load %arg1[%c0_68, %c0_69, %c18_70] : memref<1x16x342xbf16, #tpu.memory_space<vmem>>, vector<1x16x288xbf16>
    %106 = vector.shape_cast %105 : vector<1x16x288xbf16> to vector<16x288xbf16>
    %c8 = arith.constant 8 : index
    %c0_71 = arith.constant 0 : index
    %c0_72 = arith.constant 0 : index
    %107 = vector.load %arg2[%c8, %c0_71, %c0_72] : memref<16x8x16xbf16, #tpu.memory_space<vmem>>, vector<1x8x16xbf16>
    %108 = vector.shape_cast %107 : vector<1x8x16xbf16> to vector<8x16xbf16>
    %cst_73 = arith.constant dense<0.000000e+00> : vector<8x288xf32>
    %109 = tpu.matmul %108, %106, %cst_73 {dimension_numbers = #tpu.dot_dimension_numbers<[1], [0], [0], [1], [0, 0, 1, 1], [], []>} : vector<8x16xbf16>, vector<16x288xbf16>, vector<8x288xf32> -> vector<8x288xf32>
    %110 = arith.addf %104, %109 : vector<8x288xf32>
    %c0_74 = arith.constant 0 : index
    %c0_75 = arith.constant 0 : index
    %c19_76 = arith.constant 19 : index
    %111 = vector.load %arg1[%c0_74, %c0_75, %c19_76] : memref<1x16x342xbf16, #tpu.memory_space<vmem>>, vector<1x16x288xbf16>
    %112 = vector.shape_cast %111 : vector<1x16x288xbf16> to vector<16x288xbf16>
    %c9 = arith.constant 9 : index
    %c0_77 = arith.constant 0 : index
    %c0_78 = arith.constant 0 : index
    %113 = vector.load %arg2[%c9, %c0_77, %c0_78] : memref<16x8x16xbf16, #tpu.memory_space<vmem>>, vector<1x8x16xbf16>
    %114 = vector.shape_cast %113 : vector<1x8x16xbf16> to vector<8x16xbf16>
    %cst_79 = arith.constant dense<0.000000e+00> : vector<8x288xf32>
    %115 = tpu.matmul %114, %112, %cst_79 {dimension_numbers = #tpu.dot_dimension_numbers<[1], [0], [0], [1], [0, 0, 1, 1], [], []>} : vector<8x16xbf16>, vector<16x288xbf16>, vector<8x288xf32> -> vector<8x288xf32>
    %116 = arith.addf %110, %115 : vector<8x288xf32>
    %c0_80 = arith.constant 0 : index
    %c0_81 = arith.constant 0 : index
    %c36 = arith.constant 36 : index
    %117 = vector.load %arg1[%c0_80, %c0_81, %c36] : memref<1x16x342xbf16, #tpu.memory_space<vmem>>, vector<1x16x288xbf16>
    %118 = vector.shape_cast %117 : vector<1x16x288xbf16> to vector<16x288xbf16>
    %c10 = arith.constant 10 : index
    %c0_82 = arith.constant 0 : index
    %c0_83 = arith.constant 0 : index
    %119 = vector.load %arg2[%c10, %c0_82, %c0_83] : memref<16x8x16xbf16, #tpu.memory_space<vmem>>, vector<1x8x16xbf16>
    %120 = vector.shape_cast %119 : vector<1x8x16xbf16> to vector<8x16xbf16>
    %cst_84 = arith.constant dense<0.000000e+00> : vector<8x288xf32>
    %121 = tpu.matmul %120, %118, %cst_84 {dimension_numbers = #tpu.dot_dimension_numbers<[1], [0], [0], [1], [0, 0, 1, 1], [], []>} : vector<8x16xbf16>, vector<16x288xbf16>, vector<8x288xf32> -> vector<8x288xf32>
    %122 = arith.addf %116, %121 : vector<8x288xf32>
    %c0_85 = arith.constant 0 : index
    %c0_86 = arith.constant 0 : index
    %c37 = arith.constant 37 : index
    %123 = vector.load %arg1[%c0_85, %c0_86, %c37] : memref<1x16x342xbf16, #tpu.memory_space<vmem>>, vector<1x16x288xbf16>
    %124 = vector.shape_cast %123 : vector<1x16x288xbf16> to vector<16x288xbf16>
    %c11 = arith.constant 11 : index
    %c0_87 = arith.constant 0 : index
    %c0_88 = arith.constant 0 : index
    %125 = vector.load %arg2[%c11, %c0_87, %c0_88] : memref<16x8x16xbf16, #tpu.memory_space<vmem>>, vector<1x8x16xbf16>
    %126 = vector.shape_cast %125 : vector<1x8x16xbf16> to vector<8x16xbf16>
    %cst_89 = arith.constant dense<0.000000e+00> : vector<8x288xf32>
    %127 = tpu.matmul %126, %124, %cst_89 {dimension_numbers = #tpu.dot_dimension_numbers<[1], [0], [0], [1], [0, 0, 1, 1], [], []>} : vector<8x16xbf16>, vector<16x288xbf16>, vector<8x288xf32> -> vector<8x288xf32>
    %128 = arith.addf %122, %127 : vector<8x288xf32>
    %129 = arith.truncf %128 : vector<8x288xf32> to vector<8x288xbf16>
    %c0_90 = arith.constant 0 : index
    %c2_91 = arith.constant 2 : index
    %c0_92 = arith.constant 0 : index
    %c0_93 = arith.constant 0 : index
    %130 = vector.load %arg3[%c0_90, %c2_91, %c0_92, %c0_93] : memref<1x4x8x288xbf16, #tpu.memory_space<vmem>>, vector<1x1x8x288xbf16>
    %131 = vector.shape_cast %130 : vector<1x1x8x288xbf16> to vector<8x288xbf16>
    %132 = vector.shape_cast %129 : vector<8x288xbf16> to vector<1x1x8x288xbf16>
    tpu.vector_store %arg3[%c0_90, %c2_91, %c0_92, %c0_93], %132 {strides = array<i32>} : memref<1x4x8x288xbf16, #tpu.memory_space<vmem>>, vector<1x1x8x288xbf16>,
    %cst_94 = arith.constant 0.000000e+00 : f32
    %133 = vector.shape_cast %21 : vector<1x288xi1> to vector<1x288xi1>
    %134 = vector.broadcast %133 : vector<1x288xi1> to vector<8x288xi1>
    %135 = vector.broadcast %cst_94 : f32 to vector<8x288xf32>
    %136 = arith.select %134, %128, %135 : vector<8x288xi1>, vector<8x288xf32>
    %cst_95 = arith.constant dense<0.000000e+00> : vector<8xf32>
    %137 = vector.multi_reduction <add>, %136, %cst_95 [1] : vector<8x288xf32> to vector<8xf32>
    %138 = vector.shape_cast %137 : vector<8xf32> to vector<8x1xf32>
    %139 = arith.addf %99, %138 : vector<8x1xf32>
    %140 = arith.mulf %136, %136 : vector<8x288xf32>
    %cst_96 = arith.constant dense<0.000000e+00> : vector<8xf32>
    %141 = vector.multi_reduction <add>, %140, %cst_96 [1] : vector<8x288xf32> to vector<8xf32>
    %142 = vector.shape_cast %141 : vector<8xf32> to vector<8x1xf32>
    %143 = arith.addf %103, %142 : vector<8x1xf32>
    %cst_97 = arith.constant 0.000000e+00 : f32
    %144 = vector.broadcast %cst_97 : f32 to vector<8x288xf32>
    %c0_98 = arith.constant 0 : index
    %c0_99 = arith.constant 0 : index
    %c19_100 = arith.constant 19 : index
    %145 = vector.load %arg1[%c0_98, %c0_99, %c19_100] : memref<1x16x342xbf16, #tpu.memory_space<vmem>>, vector<1x16x288xbf16>
    %146 = vector.shape_cast %145 : vector<1x16x288xbf16> to vector<16x288xbf16>
    %c12 = arith.constant 12 : index
    %c0_101 = arith.constant 0 : index
    %c0_102 = arith.constant 0 : index
    %147 = vector.load %arg2[%c12, %c0_101, %c0_102] : memref<16x8x16xbf16, #tpu.memory_space<vmem>>, vector<1x8x16xbf16>
    %148 = vector.shape_cast %147 : vector<1x8x16xbf16> to vector<8x16xbf16>
    %cst_103 = arith.constant dense<0.000000e+00> : vector<8x288xf32>
    %149 = tpu.matmul %148, %146, %cst_103 {dimension_numbers = #tpu.dot_dimension_numbers<[1], [0], [0], [1], [0, 0, 1, 1], [], []>} : vector<8x16xbf16>, vector<16x288xbf16>, vector<8x288xf32> -> vector<8x288xf32>
    %150 = arith.addf %144, %149 : vector<8x288xf32>
    %c0_104 = arith.constant 0 : index
    %c0_105 = arith.constant 0 : index
    %c20_106 = arith.constant 20 : index
    %151 = vector.load %arg1[%c0_104, %c0_105, %c20_106] : memref<1x16x342xbf16, #tpu.memory_space<vmem>>, vector<1x16x288xbf16>
    %152 = vector.shape_cast %151 : vector<1x16x288xbf16> to vector<16x288xbf16>
    %c13 = arith.constant 13 : index
    %c0_107 = arith.constant 0 : index
    %c0_108 = arith.constant 0 : index
    %153 = vector.load %arg2[%c13, %c0_107, %c0_108] : memref<16x8x16xbf16, #tpu.memory_space<vmem>>, vector<1x8x16xbf16>
    %154 = vector.shape_cast %153 : vector<1x8x16xbf16> to vector<8x16xbf16>
    %cst_109 = arith.constant dense<0.000000e+00> : vector<8x288xf32>
    %155 = tpu.matmul %154, %152, %cst_109 {dimension_numbers = #tpu.dot_dimension_numbers<[1], [0], [0], [1], [0, 0, 1, 1], [], []>} : vector<8x16xbf16>, vector<16x288xbf16>, vector<8x288xf32> -> vector<8x288xf32>
    %156 = arith.addf %150, %155 : vector<8x288xf32>
    %c0_110 = arith.constant 0 : index
    %c0_111 = arith.constant 0 : index
    %c37_112 = arith.constant 37 : index
    %157 = vector.load %arg1[%c0_110, %c0_111, %c37_112] : memref<1x16x342xbf16, #tpu.memory_space<vmem>>, vector<1x16x288xbf16>
    %158 = vector.shape_cast %157 : vector<1x16x288xbf16> to vector<16x288xbf16>
    %c14 = arith.constant 14 : index
    %c0_113 = arith.constant 0 : index
    %c0_114 = arith.constant 0 : index
    %159 = vector.load %arg2[%c14, %c0_113, %c0_114] : memref<16x8x16xbf16, #tpu.memory_space<vmem>>, vector<1x8x16xbf16>
    %160 = vector.shape_cast %159 : vector<1x8x16xbf16> to vector<8x16xbf16>
    %cst_115 = arith.constant dense<0.000000e+00> : vector<8x288xf32>
    %161 = tpu.matmul %160, %158, %cst_115 {dimension_numbers = #tpu.dot_dimension_numbers<[1], [0], [0], [1], [0, 0, 1, 1], [], []>} : vector<8x16xbf16>, vector<16x288xbf16>, vector<8x288xf32> -> vector<8x288xf32>
    %162 = arith.addf %156, %161 : vector<8x288xf32>
    %c0_116 = arith.constant 0 : index
    %c0_117 = arith.constant 0 : index
    %c38 = arith.constant 38 : index
    %163 = vector.load %arg1[%c0_116, %c0_117, %c38] : memref<1x16x342xbf16, #tpu.memory_space<vmem>>, vector<1x16x288xbf16>
    %164 = vector.shape_cast %163 : vector<1x16x288xbf16> to vector<16x288xbf16>
    %c15 = arith.constant 15 : index
    %c0_118 = arith.constant 0 : index
    %c0_119 = arith.constant 0 : index
    %165 = vector.load %arg2[%c15, %c0_118, %c0_119] : memref<16x8x16xbf16, #tpu.memory_space<vmem>>, vector<1x8x16xbf16>
    %166 = vector.shape_cast %165 : vector<1x8x16xbf16> to vector<8x16xbf16>
    %cst_120 = arith.constant dense<0.000000e+00> : vector<8x288xf32>
    %167 = tpu.matmul %166, %164, %cst_120 {dimension_numbers = #tpu.dot_dimension_numbers<[1], [0], [0], [1], [0, 0, 1, 1], [], []>} : vector<8x16xbf16>, vector<16x288xbf16>, vector<8x288xf32> -> vector<8x288xf32>
    %168 = arith.addf %162, %167 : vector<8x288xf32>
    %169 = arith.truncf %168 : vector<8x288xf32> to vector<8x288xbf16>
    %c0_121 = arith.constant 0 : index
    %c3_122 = arith.constant 3 : index
    %c0_123 = arith.constant 0 : index
    %c0_124 = arith.constant 0 : index
    %170 = vector.load %arg3[%c0_121, %c3_122, %c0_123, %c0_124] : memref<1x4x8x288xbf16, #tpu.memory_space<vmem>>, vector<1x1x8x288xbf16>
    %171 = vector.shape_cast %170 : vector<1x1x8x288xbf16> to vector<8x288xbf16>
    %172 = vector.shape_cast %169 : vector<8x288xbf16> to vector<1x1x8x288xbf16>
    tpu.vector_store %arg3[%c0_121, %c3_122, %c0_123, %c0_124], %172 {strides = array<i32>} : memref<1x4x8x288xbf16, #tpu.memory_space<vmem>>, vector<1x1x8x288xbf16>,
    %cst_125 = arith.constant 0.000000e+00 : f32
    %173 = vector.shape_cast %21 : vector<1x288xi1> to vector<1x288xi1>
    %174 = vector.broadcast %173 : vector<1x288xi1> to vector<8x288xi1>
    %175 = vector.broadcast %cst_125 : f32 to vector<8x288xf32>
    %176 = arith.select %174, %168, %175 : vector<8x288xi1>, vector<8x288xf32>
    %cst_126 = arith.constant dense<0.000000e+00> : vector<8xf32>
    %177 = vector.multi_reduction <add>, %176, %cst_126 [1] : vector<8x288xf32> to vector<8xf32>
    %178 = vector.shape_cast %177 : vector<8xf32> to vector<8x1xf32>
    %179 = arith.addf %139, %178 : vector<8x1xf32>
    %180 = arith.mulf %176, %176 : vector<8x288xf32>
    %cst_127 = arith.constant dense<0.000000e+00> : vector<8xf32>
    %181 = vector.multi_reduction <add>, %180, %cst_127 [1] : vector<8x288xf32> to vector<8xf32>
    %182 = vector.shape_cast %181 : vector<8xf32> to vector<8x1xf32>
    %183 = arith.addf %143, %182 : vector<8x1xf32>
    %c0_128 = arith.constant 0 : index
    %c0_129 = arith.constant 0 : index
    %184 = vector.load %arg4[%c0_128, %c0_129] : memref<8x2xf32, #tpu.memory_space<vmem>>, vector<8x1xf32>
    %185 = arith.addf %184, %179 : vector<8x1xf32>
    %c0_130 = arith.constant 0 : index
    %c0_131 = arith.constant 0 : index
    %186 = vector.load %arg4[%c0_130, %c0_131] : memref<8x2xf32, #tpu.memory_space<vmem>>, vector<8x1xf32>
    tpu.vector_store %arg4[%c0_130, %c0_131], %185 {strides = array<i32>} : memref<8x2xf32, #tpu.memory_space<vmem>>, vector<8x1xf32>,
    %c0_132 = arith.constant 0 : index
    %c1_133 = arith.constant 1 : index
    %187 = vector.load %arg4[%c0_132, %c1_133] : memref<8x2xf32, #tpu.memory_space<vmem>>, vector<8x1xf32>
    %188 = arith.addf %187, %183 : vector<8x1xf32>
    %c0_134 = arith.constant 0 : index
    %c1_135 = arith.constant 1 : index
    %189 = vector.load %arg4[%c0_134, %c1_135] : memref<8x2xf32, #tpu.memory_space<vmem>>, vector<8x1xf32>
    tpu.vector_store %arg4[%c0_134, %c1_135], %188 {strides = array<i32>} : memref<8x2xf32, #tpu.memory_space<vmem>>, vector<8x1xf32>,
    return
  }
  func.func @transform_0(%arg0: i32) -> (i32, i32, i32) {
    %c0_i32 = arith.constant 0 : i32
    %c0_i32_0 = arith.constant 0 : i32
    %c0_i32_1 = arith.constant 0 : i32
    return %arg0, %c0_i32, %c0_i32_0 : i32, i32, i32
  }
  func.func @transform_1(%arg0: i32) -> (i32, i32, i32) {
    %c0_i32 = arith.constant 0 : i32
    %c0_i32_0 = arith.constant 0 : i32
    %c0_i32_1 = arith.constant 0 : i32
    %c0_i32_2 = arith.constant 0 : i32
    return %c0_i32, %c0_i32_0, %c0_i32_1 : i32, i32, i32
  }
  func.func @transform_2(%arg0: i32) -> (i32, i32, i32, i32) {
    %c0_i32 = arith.constant 0 : i32
    %c0_i32_0 = arith.constant 0 : i32
    %c0_i32_1 = arith.constant 0 : i32
    %c0_i32_2 = arith.constant 0 : i32
    return %arg0, %c0_i32, %c0_i32_0, %c0_i32_1 : i32, i32, i32, i32
  }
  func.func @transform_3(%arg0: i32) -> (i32, i32) {
    %c0_i32 = arith.constant 0 : i32
    %c0_i32_0 = arith.constant 0 : i32
    %c0_i32_1 = arith.constant 0 : i32
    return %c0_i32, %c0_i32_0 : i32, i32
  }
}

module attributes {stable_mosaic.version = 11 : i64} {
  func.func @_convt_phase_kernel(%arg0: i32, %arg1: memref<1x8x1190xbf16, #tpu.memory_space<vmem>>, %arg2: memref<16x3x8xbf16, #tpu.memory_space<vmem>>, %arg3: memref<1x4x3x1088xf32, #tpu.memory_space<vmem>>) attributes {dimension_semantics = [#tpu.dimension_semantics<arbitrary>], iteration_bounds = array<i64: 2>, scalar_prefetch = 0 : i64, scratch_operands = 0 : i64, tpu.core_type = #tpu.core_type<tc>, window_params = [{transform_indices = @transform_0, window_bounds = array<i64: 1, 8, 1190>}, {pipeline_mode = #tpu.pipeline_mode<synchronous>, transform_indices = @transform_1, window_bounds = array<i64: 16, 3, 8>}, {transform_indices = @transform_2, window_bounds = array<i64: 1, 4, 3, 1088>}]} {
    %cst = arith.constant 0.000000e+00 : f32
    %0 = vector.broadcast %cst : f32 to vector<3x1088xf32>
    %c0 = arith.constant 0 : index
    %c0_0 = arith.constant 0 : index
    %c0_1 = arith.constant 0 : index
    %1 = vector.load %arg1[%c0, %c0_0, %c0_1] : memref<1x8x1190xbf16, #tpu.memory_space<vmem>>, vector<1x8x1088xbf16>
    %2 = vector.shape_cast %1 : vector<1x8x1088xbf16> to vector<8x1088xbf16>
    %c0_2 = arith.constant 0 : index
    %c0_3 = arith.constant 0 : index
    %c0_4 = arith.constant 0 : index
    %3 = vector.load %arg2[%c0_2, %c0_3, %c0_4] : memref<16x3x8xbf16, #tpu.memory_space<vmem>>, vector<1x3x8xbf16>
    %4 = vector.shape_cast %3 : vector<1x3x8xbf16> to vector<3x8xbf16>
    %cst_5 = arith.constant dense<0.000000e+00> : vector<3x1088xf32>
    %5 = tpu.matmul %4, %2, %cst_5 {dimension_numbers = #tpu.dot_dimension_numbers<[1], [0], [0], [1], [0, 0, 1, 1], [], []>} : vector<3x8xbf16>, vector<8x1088xbf16>, vector<3x1088xf32> -> vector<3x1088xf32>
    %6 = arith.addf %0, %5 : vector<3x1088xf32>
    %c0_6 = arith.constant 0 : index
    %c0_7 = arith.constant 0 : index
    %c1 = arith.constant 1 : index
    %7 = vector.load %arg1[%c0_6, %c0_7, %c1] : memref<1x8x1190xbf16, #tpu.memory_space<vmem>>, vector<1x8x1088xbf16>
    %8 = vector.shape_cast %7 : vector<1x8x1088xbf16> to vector<8x1088xbf16>
    %c1_8 = arith.constant 1 : index
    %c0_9 = arith.constant 0 : index
    %c0_10 = arith.constant 0 : index
    %9 = vector.load %arg2[%c1_8, %c0_9, %c0_10] : memref<16x3x8xbf16, #tpu.memory_space<vmem>>, vector<1x3x8xbf16>
    %10 = vector.shape_cast %9 : vector<1x3x8xbf16> to vector<3x8xbf16>
    %cst_11 = arith.constant dense<0.000000e+00> : vector<3x1088xf32>
    %11 = tpu.matmul %10, %8, %cst_11 {dimension_numbers = #tpu.dot_dimension_numbers<[1], [0], [0], [1], [0, 0, 1, 1], [], []>} : vector<3x8xbf16>, vector<8x1088xbf16>, vector<3x1088xf32> -> vector<3x1088xf32>
    %12 = arith.addf %6, %11 : vector<3x1088xf32>
    %c0_12 = arith.constant 0 : index
    %c0_13 = arith.constant 0 : index
    %c34 = arith.constant 34 : index
    %13 = vector.load %arg1[%c0_12, %c0_13, %c34] : memref<1x8x1190xbf16, #tpu.memory_space<vmem>>, vector<1x8x1088xbf16>
    %14 = vector.shape_cast %13 : vector<1x8x1088xbf16> to vector<8x1088xbf16>
    %c2 = arith.constant 2 : index
    %c0_14 = arith.constant 0 : index
    %c0_15 = arith.constant 0 : index
    %15 = vector.load %arg2[%c2, %c0_14, %c0_15] : memref<16x3x8xbf16, #tpu.memory_space<vmem>>, vector<1x3x8xbf16>
    %16 = vector.shape_cast %15 : vector<1x3x8xbf16> to vector<3x8xbf16>
    %cst_16 = arith.constant dense<0.000000e+00> : vector<3x1088xf32>
    %17 = tpu.matmul %16, %14, %cst_16 {dimension_numbers = #tpu.dot_dimension_numbers<[1], [0], [0], [1], [0, 0, 1, 1], [], []>} : vector<3x8xbf16>, vector<8x1088xbf16>, vector<3x1088xf32> -> vector<3x1088xf32>
    %18 = arith.addf %12, %17 : vector<3x1088xf32>
    %c0_17 = arith.constant 0 : index
    %c0_18 = arith.constant 0 : index
    %c35 = arith.constant 35 : index
    %19 = vector.load %arg1[%c0_17, %c0_18, %c35] : memref<1x8x1190xbf16, #tpu.memory_space<vmem>>, vector<1x8x1088xbf16>
    %20 = vector.shape_cast %19 : vector<1x8x1088xbf16> to vector<8x1088xbf16>
    %c3 = arith.constant 3 : index
    %c0_19 = arith.constant 0 : index
    %c0_20 = arith.constant 0 : index
    %21 = vector.load %arg2[%c3, %c0_19, %c0_20] : memref<16x3x8xbf16, #tpu.memory_space<vmem>>, vector<1x3x8xbf16>
    %22 = vector.shape_cast %21 : vector<1x3x8xbf16> to vector<3x8xbf16>
    %cst_21 = arith.constant dense<0.000000e+00> : vector<3x1088xf32>
    %23 = tpu.matmul %22, %20, %cst_21 {dimension_numbers = #tpu.dot_dimension_numbers<[1], [0], [0], [1], [0, 0, 1, 1], [], []>} : vector<3x8xbf16>, vector<8x1088xbf16>, vector<3x1088xf32> -> vector<3x1088xf32>
    %24 = arith.addf %18, %23 : vector<3x1088xf32>
    %25 = math.tanh %24 : vector<3x1088xf32>
    %c0_22 = arith.constant 0 : index
    %c0_23 = arith.constant 0 : index
    %c0_24 = arith.constant 0 : index
    %c0_25 = arith.constant 0 : index
    %26 = vector.load %arg3[%c0_22, %c0_23, %c0_24, %c0_25] : memref<1x4x3x1088xf32, #tpu.memory_space<vmem>>, vector<1x1x3x1088xf32>
    %27 = vector.shape_cast %26 : vector<1x1x3x1088xf32> to vector<3x1088xf32>
    %28 = vector.shape_cast %25 : vector<3x1088xf32> to vector<1x1x3x1088xf32>
    tpu.vector_store %arg3[%c0_22, %c0_23, %c0_24, %c0_25], %28 {strides = array<i32>} : memref<1x4x3x1088xf32, #tpu.memory_space<vmem>>, vector<1x1x3x1088xf32>,
    %cst_26 = arith.constant 0.000000e+00 : f32
    %29 = vector.broadcast %cst_26 : f32 to vector<3x1088xf32>
    %c0_27 = arith.constant 0 : index
    %c0_28 = arith.constant 0 : index
    %c1_29 = arith.constant 1 : index
    %30 = vector.load %arg1[%c0_27, %c0_28, %c1_29] : memref<1x8x1190xbf16, #tpu.memory_space<vmem>>, vector<1x8x1088xbf16>
    %31 = vector.shape_cast %30 : vector<1x8x1088xbf16> to vector<8x1088xbf16>
    %c4 = arith.constant 4 : index
    %c0_30 = arith.constant 0 : index
    %c0_31 = arith.constant 0 : index
    %32 = vector.load %arg2[%c4, %c0_30, %c0_31] : memref<16x3x8xbf16, #tpu.memory_space<vmem>>, vector<1x3x8xbf16>
    %33 = vector.shape_cast %32 : vector<1x3x8xbf16> to vector<3x8xbf16>
    %cst_32 = arith.constant dense<0.000000e+00> : vector<3x1088xf32>
    %34 = tpu.matmul %33, %31, %cst_32 {dimension_numbers = #tpu.dot_dimension_numbers<[1], [0], [0], [1], [0, 0, 1, 1], [], []>} : vector<3x8xbf16>, vector<8x1088xbf16>, vector<3x1088xf32> -> vector<3x1088xf32>
    %35 = arith.addf %29, %34 : vector<3x1088xf32>
    %c0_33 = arith.constant 0 : index
    %c0_34 = arith.constant 0 : index
    %c2_35 = arith.constant 2 : index
    %36 = vector.load %arg1[%c0_33, %c0_34, %c2_35] : memref<1x8x1190xbf16, #tpu.memory_space<vmem>>, vector<1x8x1088xbf16>
    %37 = vector.shape_cast %36 : vector<1x8x1088xbf16> to vector<8x1088xbf16>
    %c5 = arith.constant 5 : index
    %c0_36 = arith.constant 0 : index
    %c0_37 = arith.constant 0 : index
    %38 = vector.load %arg2[%c5, %c0_36, %c0_37] : memref<16x3x8xbf16, #tpu.memory_space<vmem>>, vector<1x3x8xbf16>
    %39 = vector.shape_cast %38 : vector<1x3x8xbf16> to vector<3x8xbf16>
    %cst_38 = arith.constant dense<0.000000e+00> : vector<3x1088xf32>
    %40 = tpu.matmul %39, %37, %cst_38 {dimension_numbers = #tpu.dot_dimension_numbers<[1], [0], [0], [1], [0, 0, 1, 1], [], []>} : vector<3x8xbf16>, vector<8x1088xbf16>, vector<3x1088xf32> -> vector<3x1088xf32>
    %41 = arith.addf %35, %40 : vector<3x1088xf32>
    %c0_39 = arith.constant 0 : index
    %c0_40 = arith.constant 0 : index
    %c35_41 = arith.constant 35 : index
    %42 = vector.load %arg1[%c0_39, %c0_40, %c35_41] : memref<1x8x1190xbf16, #tpu.memory_space<vmem>>, vector<1x8x1088xbf16>
    %43 = vector.shape_cast %42 : vector<1x8x1088xbf16> to vector<8x1088xbf16>
    %c6 = arith.constant 6 : index
    %c0_42 = arith.constant 0 : index
    %c0_43 = arith.constant 0 : index
    %44 = vector.load %arg2[%c6, %c0_42, %c0_43] : memref<16x3x8xbf16, #tpu.memory_space<vmem>>, vector<1x3x8xbf16>
    %45 = vector.shape_cast %44 : vector<1x3x8xbf16> to vector<3x8xbf16>
    %cst_44 = arith.constant dense<0.000000e+00> : vector<3x1088xf32>
    %46 = tpu.matmul %45, %43, %cst_44 {dimension_numbers = #tpu.dot_dimension_numbers<[1], [0], [0], [1], [0, 0, 1, 1], [], []>} : vector<3x8xbf16>, vector<8x1088xbf16>, vector<3x1088xf32> -> vector<3x1088xf32>
    %47 = arith.addf %41, %46 : vector<3x1088xf32>
    %c0_45 = arith.constant 0 : index
    %c0_46 = arith.constant 0 : index
    %c36 = arith.constant 36 : index
    %48 = vector.load %arg1[%c0_45, %c0_46, %c36] : memref<1x8x1190xbf16, #tpu.memory_space<vmem>>, vector<1x8x1088xbf16>
    %49 = vector.shape_cast %48 : vector<1x8x1088xbf16> to vector<8x1088xbf16>
    %c7 = arith.constant 7 : index
    %c0_47 = arith.constant 0 : index
    %c0_48 = arith.constant 0 : index
    %50 = vector.load %arg2[%c7, %c0_47, %c0_48] : memref<16x3x8xbf16, #tpu.memory_space<vmem>>, vector<1x3x8xbf16>
    %51 = vector.shape_cast %50 : vector<1x3x8xbf16> to vector<3x8xbf16>
    %cst_49 = arith.constant dense<0.000000e+00> : vector<3x1088xf32>
    %52 = tpu.matmul %51, %49, %cst_49 {dimension_numbers = #tpu.dot_dimension_numbers<[1], [0], [0], [1], [0, 0, 1, 1], [], []>} : vector<3x8xbf16>, vector<8x1088xbf16>, vector<3x1088xf32> -> vector<3x1088xf32>
    %53 = arith.addf %47, %52 : vector<3x1088xf32>
    %54 = math.tanh %53 : vector<3x1088xf32>
    %c0_50 = arith.constant 0 : index
    %c1_51 = arith.constant 1 : index
    %c0_52 = arith.constant 0 : index
    %c0_53 = arith.constant 0 : index
    %55 = vector.load %arg3[%c0_50, %c1_51, %c0_52, %c0_53] : memref<1x4x3x1088xf32, #tpu.memory_space<vmem>>, vector<1x1x3x1088xf32>
    %56 = vector.shape_cast %55 : vector<1x1x3x1088xf32> to vector<3x1088xf32>
    %57 = vector.shape_cast %54 : vector<3x1088xf32> to vector<1x1x3x1088xf32>
    tpu.vector_store %arg3[%c0_50, %c1_51, %c0_52, %c0_53], %57 {strides = array<i32>} : memref<1x4x3x1088xf32, #tpu.memory_space<vmem>>, vector<1x1x3x1088xf32>,
    %cst_54 = arith.constant 0.000000e+00 : f32
    %58 = vector.broadcast %cst_54 : f32 to vector<3x1088xf32>
    %c0_55 = arith.constant 0 : index
    %c0_56 = arith.constant 0 : index
    %c34_57 = arith.constant 34 : index
    %59 = vector.load %arg1[%c0_55, %c0_56, %c34_57] : memref<1x8x1190xbf16, #tpu.memory_space<vmem>>, vector<1x8x1088xbf16>
    %60 = vector.shape_cast %59 : vector<1x8x1088xbf16> to vector<8x1088xbf16>
    %c8 = arith.constant 8 : index
    %c0_58 = arith.constant 0 : index
    %c0_59 = arith.constant 0 : index
    %61 = vector.load %arg2[%c8, %c0_58, %c0_59] : memref<16x3x8xbf16, #tpu.memory_space<vmem>>, vector<1x3x8xbf16>
    %62 = vector.shape_cast %61 : vector<1x3x8xbf16> to vector<3x8xbf16>
    %cst_60 = arith.constant dense<0.000000e+00> : vector<3x1088xf32>
    %63 = tpu.matmul %62, %60, %cst_60 {dimension_numbers = #tpu.dot_dimension_numbers<[1], [0], [0], [1], [0, 0, 1, 1], [], []>} : vector<3x8xbf16>, vector<8x1088xbf16>, vector<3x1088xf32> -> vector<3x1088xf32>
    %64 = arith.addf %58, %63 : vector<3x1088xf32>
    %c0_61 = arith.constant 0 : index
    %c0_62 = arith.constant 0 : index
    %c35_63 = arith.constant 35 : index
    %65 = vector.load %arg1[%c0_61, %c0_62, %c35_63] : memref<1x8x1190xbf16, #tpu.memory_space<vmem>>, vector<1x8x1088xbf16>
    %66 = vector.shape_cast %65 : vector<1x8x1088xbf16> to vector<8x1088xbf16>
    %c9 = arith.constant 9 : index
    %c0_64 = arith.constant 0 : index
    %c0_65 = arith.constant 0 : index
    %67 = vector.load %arg2[%c9, %c0_64, %c0_65] : memref<16x3x8xbf16, #tpu.memory_space<vmem>>, vector<1x3x8xbf16>
    %68 = vector.shape_cast %67 : vector<1x3x8xbf16> to vector<3x8xbf16>
    %cst_66 = arith.constant dense<0.000000e+00> : vector<3x1088xf32>
    %69 = tpu.matmul %68, %66, %cst_66 {dimension_numbers = #tpu.dot_dimension_numbers<[1], [0], [0], [1], [0, 0, 1, 1], [], []>} : vector<3x8xbf16>, vector<8x1088xbf16>, vector<3x1088xf32> -> vector<3x1088xf32>
    %70 = arith.addf %64, %69 : vector<3x1088xf32>
    %c0_67 = arith.constant 0 : index
    %c0_68 = arith.constant 0 : index
    %c68 = arith.constant 68 : index
    %71 = vector.load %arg1[%c0_67, %c0_68, %c68] : memref<1x8x1190xbf16, #tpu.memory_space<vmem>>, vector<1x8x1088xbf16>
    %72 = vector.shape_cast %71 : vector<1x8x1088xbf16> to vector<8x1088xbf16>
    %c10 = arith.constant 10 : index
    %c0_69 = arith.constant 0 : index
    %c0_70 = arith.constant 0 : index
    %73 = vector.load %arg2[%c10, %c0_69, %c0_70] : memref<16x3x8xbf16, #tpu.memory_space<vmem>>, vector<1x3x8xbf16>
    %74 = vector.shape_cast %73 : vector<1x3x8xbf16> to vector<3x8xbf16>
    %cst_71 = arith.constant dense<0.000000e+00> : vector<3x1088xf32>
    %75 = tpu.matmul %74, %72, %cst_71 {dimension_numbers = #tpu.dot_dimension_numbers<[1], [0], [0], [1], [0, 0, 1, 1], [], []>} : vector<3x8xbf16>, vector<8x1088xbf16>, vector<3x1088xf32> -> vector<3x1088xf32>
    %76 = arith.addf %70, %75 : vector<3x1088xf32>
    %c0_72 = arith.constant 0 : index
    %c0_73 = arith.constant 0 : index
    %c69 = arith.constant 69 : index
    %77 = vector.load %arg1[%c0_72, %c0_73, %c69] : memref<1x8x1190xbf16, #tpu.memory_space<vmem>>, vector<1x8x1088xbf16>
    %78 = vector.shape_cast %77 : vector<1x8x1088xbf16> to vector<8x1088xbf16>
    %c11 = arith.constant 11 : index
    %c0_74 = arith.constant 0 : index
    %c0_75 = arith.constant 0 : index
    %79 = vector.load %arg2[%c11, %c0_74, %c0_75] : memref<16x3x8xbf16, #tpu.memory_space<vmem>>, vector<1x3x8xbf16>
    %80 = vector.shape_cast %79 : vector<1x3x8xbf16> to vector<3x8xbf16>
    %cst_76 = arith.constant dense<0.000000e+00> : vector<3x1088xf32>
    %81 = tpu.matmul %80, %78, %cst_76 {dimension_numbers = #tpu.dot_dimension_numbers<[1], [0], [0], [1], [0, 0, 1, 1], [], []>} : vector<3x8xbf16>, vector<8x1088xbf16>, vector<3x1088xf32> -> vector<3x1088xf32>
    %82 = arith.addf %76, %81 : vector<3x1088xf32>
    %83 = math.tanh %82 : vector<3x1088xf32>
    %c0_77 = arith.constant 0 : index
    %c2_78 = arith.constant 2 : index
    %c0_79 = arith.constant 0 : index
    %c0_80 = arith.constant 0 : index
    %84 = vector.load %arg3[%c0_77, %c2_78, %c0_79, %c0_80] : memref<1x4x3x1088xf32, #tpu.memory_space<vmem>>, vector<1x1x3x1088xf32>
    %85 = vector.shape_cast %84 : vector<1x1x3x1088xf32> to vector<3x1088xf32>
    %86 = vector.shape_cast %83 : vector<3x1088xf32> to vector<1x1x3x1088xf32>
    tpu.vector_store %arg3[%c0_77, %c2_78, %c0_79, %c0_80], %86 {strides = array<i32>} : memref<1x4x3x1088xf32, #tpu.memory_space<vmem>>, vector<1x1x3x1088xf32>,
    %cst_81 = arith.constant 0.000000e+00 : f32
    %87 = vector.broadcast %cst_81 : f32 to vector<3x1088xf32>
    %c0_82 = arith.constant 0 : index
    %c0_83 = arith.constant 0 : index
    %c35_84 = arith.constant 35 : index
    %88 = vector.load %arg1[%c0_82, %c0_83, %c35_84] : memref<1x8x1190xbf16, #tpu.memory_space<vmem>>, vector<1x8x1088xbf16>
    %89 = vector.shape_cast %88 : vector<1x8x1088xbf16> to vector<8x1088xbf16>
    %c12 = arith.constant 12 : index
    %c0_85 = arith.constant 0 : index
    %c0_86 = arith.constant 0 : index
    %90 = vector.load %arg2[%c12, %c0_85, %c0_86] : memref<16x3x8xbf16, #tpu.memory_space<vmem>>, vector<1x3x8xbf16>
    %91 = vector.shape_cast %90 : vector<1x3x8xbf16> to vector<3x8xbf16>
    %cst_87 = arith.constant dense<0.000000e+00> : vector<3x1088xf32>
    %92 = tpu.matmul %91, %89, %cst_87 {dimension_numbers = #tpu.dot_dimension_numbers<[1], [0], [0], [1], [0, 0, 1, 1], [], []>} : vector<3x8xbf16>, vector<8x1088xbf16>, vector<3x1088xf32> -> vector<3x1088xf32>
    %93 = arith.addf %87, %92 : vector<3x1088xf32>
    %c0_88 = arith.constant 0 : index
    %c0_89 = arith.constant 0 : index
    %c36_90 = arith.constant 36 : index
    %94 = vector.load %arg1[%c0_88, %c0_89, %c36_90] : memref<1x8x1190xbf16, #tpu.memory_space<vmem>>, vector<1x8x1088xbf16>
    %95 = vector.shape_cast %94 : vector<1x8x1088xbf16> to vector<8x1088xbf16>
    %c13 = arith.constant 13 : index
    %c0_91 = arith.constant 0 : index
    %c0_92 = arith.constant 0 : index
    %96 = vector.load %arg2[%c13, %c0_91, %c0_92] : memref<16x3x8xbf16, #tpu.memory_space<vmem>>, vector<1x3x8xbf16>
    %97 = vector.shape_cast %96 : vector<1x3x8xbf16> to vector<3x8xbf16>
    %cst_93 = arith.constant dense<0.000000e+00> : vector<3x1088xf32>
    %98 = tpu.matmul %97, %95, %cst_93 {dimension_numbers = #tpu.dot_dimension_numbers<[1], [0], [0], [1], [0, 0, 1, 1], [], []>} : vector<3x8xbf16>, vector<8x1088xbf16>, vector<3x1088xf32> -> vector<3x1088xf32>
    %99 = arith.addf %93, %98 : vector<3x1088xf32>
    %c0_94 = arith.constant 0 : index
    %c0_95 = arith.constant 0 : index
    %c69_96 = arith.constant 69 : index
    %100 = vector.load %arg1[%c0_94, %c0_95, %c69_96] : memref<1x8x1190xbf16, #tpu.memory_space<vmem>>, vector<1x8x1088xbf16>
    %101 = vector.shape_cast %100 : vector<1x8x1088xbf16> to vector<8x1088xbf16>
    %c14 = arith.constant 14 : index
    %c0_97 = arith.constant 0 : index
    %c0_98 = arith.constant 0 : index
    %102 = vector.load %arg2[%c14, %c0_97, %c0_98] : memref<16x3x8xbf16, #tpu.memory_space<vmem>>, vector<1x3x8xbf16>
    %103 = vector.shape_cast %102 : vector<1x3x8xbf16> to vector<3x8xbf16>
    %cst_99 = arith.constant dense<0.000000e+00> : vector<3x1088xf32>
    %104 = tpu.matmul %103, %101, %cst_99 {dimension_numbers = #tpu.dot_dimension_numbers<[1], [0], [0], [1], [0, 0, 1, 1], [], []>} : vector<3x8xbf16>, vector<8x1088xbf16>, vector<3x1088xf32> -> vector<3x1088xf32>
    %105 = arith.addf %99, %104 : vector<3x1088xf32>
    %c0_100 = arith.constant 0 : index
    %c0_101 = arith.constant 0 : index
    %c70 = arith.constant 70 : index
    %106 = vector.load %arg1[%c0_100, %c0_101, %c70] : memref<1x8x1190xbf16, #tpu.memory_space<vmem>>, vector<1x8x1088xbf16>
    %107 = vector.shape_cast %106 : vector<1x8x1088xbf16> to vector<8x1088xbf16>
    %c15 = arith.constant 15 : index
    %c0_102 = arith.constant 0 : index
    %c0_103 = arith.constant 0 : index
    %108 = vector.load %arg2[%c15, %c0_102, %c0_103] : memref<16x3x8xbf16, #tpu.memory_space<vmem>>, vector<1x3x8xbf16>
    %109 = vector.shape_cast %108 : vector<1x3x8xbf16> to vector<3x8xbf16>
    %cst_104 = arith.constant dense<0.000000e+00> : vector<3x1088xf32>
    %110 = tpu.matmul %109, %107, %cst_104 {dimension_numbers = #tpu.dot_dimension_numbers<[1], [0], [0], [1], [0, 0, 1, 1], [], []>} : vector<3x8xbf16>, vector<8x1088xbf16>, vector<3x1088xf32> -> vector<3x1088xf32>
    %111 = arith.addf %105, %110 : vector<3x1088xf32>
    %112 = math.tanh %111 : vector<3x1088xf32>
    %c0_105 = arith.constant 0 : index
    %c3_106 = arith.constant 3 : index
    %c0_107 = arith.constant 0 : index
    %c0_108 = arith.constant 0 : index
    %113 = vector.load %arg3[%c0_105, %c3_106, %c0_107, %c0_108] : memref<1x4x3x1088xf32, #tpu.memory_space<vmem>>, vector<1x1x3x1088xf32>
    %114 = vector.shape_cast %113 : vector<1x1x3x1088xf32> to vector<3x1088xf32>
    %115 = vector.shape_cast %112 : vector<3x1088xf32> to vector<1x1x3x1088xf32>
    tpu.vector_store %arg3[%c0_105, %c3_106, %c0_107, %c0_108], %115 {strides = array<i32>} : memref<1x4x3x1088xf32, #tpu.memory_space<vmem>>, vector<1x1x3x1088xf32>,
    return
  }
  func.func @transform_0(%arg0: i32) -> (i32, i32, i32) {
    %c0_i32 = arith.constant 0 : i32
    %c0_i32_0 = arith.constant 0 : i32
    %c0_i32_1 = arith.constant 0 : i32
    return %arg0, %c0_i32, %c0_i32_0 : i32, i32, i32
  }
  func.func @transform_1(%arg0: i32) -> (i32, i32, i32) {
    %c0_i32 = arith.constant 0 : i32
    %c0_i32_0 = arith.constant 0 : i32
    %c0_i32_1 = arith.constant 0 : i32
    %c0_i32_2 = arith.constant 0 : i32
    return %c0_i32, %c0_i32_0, %c0_i32_1 : i32, i32, i32
  }
  func.func @transform_2(%arg0: i32) -> (i32, i32, i32, i32) {
    %c0_i32 = arith.constant 0 : i32
    %c0_i32_0 = arith.constant 0 : i32
    %c0_i32_1 = arith.constant 0 : i32
    %c0_i32_2 = arith.constant 0 : i32
    return %arg0, %c0_i32, %c0_i32_0, %c0_i32_1 : i32, i32, i32, i32
  }
}

</mosaic_0001>

<bundles_post_ra>
// kernel: netG_forward.5
= control target key start
LH: loop header
LB: loop body
LE: loop exit
PB: predicated region body
PF: predicated region fallthrough
CT: control target
= control target key end

     0   :  { %7 = vsyncpa [#allocation3], 0  ;;  %s335_s9 = smov [#allocation2]   ;;  %s376_s0 = inlined_call_operand.vmem [shape: bf16[2,16], index: 0, kind: input, shape index: {}]   ;;  %s377_s1 = inlined_call_operand.hbm [shape: bf16[16,1024], index: 1, kind: input, shape index: {}]   ;;  %s378_s2 = inlined_call_operand.vmem [shape: f32[2,1024], index: 2, kind: output, shape index: {}]  }
   0x1   :  { %s15_s10 = sshll.u32 %s335_s9, 4  ;;  %s311_s13 = scalar_lea.hbm %s377_s1, 1024  ;;  %s16_s10 = int_to_ptr.vmem [resolvable:$true] %s15_s10 }
   0x2   :  { %p312_p0 = scmp.ne.s32.totalorder %s377_s1, %s311_s13  ;;  %p315_p1 = scmp.lt.u32.totalorder %s311_s13, %s377_s1 }
   0x4   :  { %p317_p2 = pnand %p315_p1, %p312_p0 }
   0x6   :  { %320 = shalt.err (!%p317_p2)
}
   0x7   :  { %s321_s18 = scalar_lea.vmem %s16_s10, 1024  ;;  %p326_p4 = scmp.lt.s32.totalorder %s16_s10, %s16_s10 }
   0x8   :  { %p322_p3 = scmp.ne.s32.totalorder %s16_s10, %s321_s18  ;;  %p327_p5 = scmp.lt.s32.totalorder %s321_s18, %s321_s18 }
   0xa   :  { %p328_p6 = por %p327_p5, %p326_p4 }
   0xc   :  { %p329_p7 = pnand %p328_p6, %p322_p3 }
   0xe   :  { %332 = shalt.err (!%p329_p7)
}
   0xf   :  { %s336_s19 = smov 512   ;;  %s337_s20 = smov 32  }
  0x10   :  { %21 = dma.hbm_to_vmem [thread:$0]  %s377_s1, 1024, %s16_s10, [#allocation3], %s336_s19, %s336_s19, %s337_s20  }
  0x11   :  { %333 = dma.done.wait [#allocation3], 1024  }
  0x12   :  { %334 = vsyncadd [#allocation3], 4294966272  ;;  %v338_v0 = vmov 0   ;;  %v27_v1 = vld [vmem:[#allocation2] sm:$0xff]  ;;  %v28_v3 = vld [vmem:[#allocation2 + $0x8] sm:$0xff]  ;;  %vm75_vm0 = vcmask 130048   ;;  %v256_v20 = vlaneseq }
  0x13   :  { %111 = vmatprep.mubr.bf16.mxu0 %v338_v0  ;;  %152 = vmatprep.mubr.bf16.mxu1 %v338_v0  ;;  %v31_v2 = vld [vmem:[#allocation2 + $0x20] sm:$0xff]  ;;  %v32_v5 = vld [vmem:[#allocation2 + $0x28] sm:$0xff]  ;;  %v29_v7 = vld [vmem:[#allocation2 + $0x10] sm:$0xff]  ;;  %v339_v18 = vmov 1983009808  }
  0x14   :  { %v295_v4 = vcombine.high %v27_v1, %v31_v2  ;;  %v294_v6 = vcombine.low %v27_v1, %v31_v2  ;;  %v297_v8 = vcombine.high %v28_v3, %v32_v5  ;;  %v296_v9 = vcombine.low %v28_v3, %v32_v5  ;;  %v33_v10 = vld [vmem:[#allocation2 + $0x30] sm:$0xff]  ;;  %v30_v11 = vld [vmem:[#allocation2 + $0x18] sm:$0xff]  ;;  %v26_v15 = vld [vmem:[%s376_s0] sm:$0x1] }
  0x15   :  { %v34_v12 = vld [vmem:[#allocation2 + $0x38] sm:$0xff]  ;;  %v299_v13 = vcombine.high %v29_v7, %v33_v10  ;;  %v298_v16 = vcombine.low %v29_v7, %v33_v10  ;;  %v254_v19 = vunpack.c.l.s4 %v339_v18  ;;  %v257_v22 = vshrl.u32 %v256_v20, 7 }
  0x16   :  { %79 = vmatprep.subr.bf16.mxu0 %v295_v4  ;;  %v301_v14 = vcombine.high %v30_v11, %v34_v12  ;;  %120 = vmatprep.subr.bf16.mxu1 %v297_v8  ;;  %v300_v17 = vcombine.low %v30_v11, %v34_v12 }
  0x17   :  { %80 = vmatpush1.bf16.msra.mxu0 %v294_v6  ;;  %121 = vmatpush1.bf16.msra.mxu1 %v296_v9  ;;  %v255_v21 = vunpack.c.0.s8 %v254_v19 }
  0x18   :  { %161 = vmatprep.subr.bf16.mxu0 %v299_v13  ;;  %202 = vmatprep.subr.bf16.mxu1 %v301_v14 }
  0x19   :  { %v258_v24 = vsub.s32 %v255_v21, %v257_v22 }
  0x1a   :  { %302 = vmatmul.mubr.msk.bf16.vlgmr.msra.gmra.mrb[0].mxu0 %vm75_vm0, %v26_v15  ;;  %303 = vmatmul.mubr.msk.bf16.vlgmr.msra.gmra.mrb[0].mxu1 %vm75_vm0, %v26_v15 }
  0x1b   :  { %162 = vmatpush1.bf16.msra.mxu0 %v298_v16  ;;  %203 = vmatpush1.bf16.msra.mxu1 %v300_v17 }
  0x1c   :  { %193 = vmatprep.mubr.bf16.mxu0 %v338_v0  ;;  %234 = vmatprep.mubr.bf16.mxu1 %v338_v0 }
  0x22   :  { %304 = vmatmul.mubr.msk.bf16.vlgmr.msra.gmra.mrb[4].mxu0 %vm75_vm0, %v26_v15  ;;  %305 = vmatmul.mubr.msk.bf16.vlgmr.msra.gmra.mrb[4].mxu1 %vm75_vm0, %v26_v15 }
  0xed   :  { %v113_v23 = vpop.f32.mrb[0].mxu0  ;;  %v154_v25 = vpop.f32.mrb[0].mxu1 }
  0xee   :  { %v115_v26 = vpop.f32.mrb[1].mxu0  ;;  %v156_v28 = vpop.f32.mrb[1].mxu1 }
  0xef   :  { %v251_v27 = vcombine.low %v113_v23, %v115_v26  ;;  %v117_v29 = vpop.f32.mrb[2].mxu0  ;;  %v252_v30 = vcombine.low %v154_v25, %v156_v28  ;;  %v158_v31 = vpop.f32.mrb[2].mxu1 }
  0xf0   :  { %v118_v32 = vpop.f32.mrb[3].mxu0  ;;  %v159_v34 = vpop.f32.mrb[3].mxu1 }
  0xf1   :  { %v259_v33 = vrot.slane %v251_v27, %v258_v24  ;;  %v266_v35 = vrot.slane %v252_v30, %v258_v24 }
  0xf3   :  { %v267_v36 = vcombine.low %v259_v33, %v266_v35 }
  0xf5   :  { %v195_v37 = vpop.f32.mrb[4].mxu0  ;;  %287 = vst [vmem:[%s378_s2] sm:$0xff] %v267_v36  ;;  %v236_v38 = vpop.f32.mrb[4].mxu1 }
  0xf6   :  { %v197_v39 = vpop.f32.mrb[5].mxu0  ;;  %v238_v41 = vpop.f32.mrb[5].mxu1 }
  0xf7   :  { %v268_v40 = vcombine.low %v195_v37, %v197_v39  ;;  %v199_v42 = vpop.f32.mrb[6].mxu0  ;;  %v269_v43 = vcombine.low %v236_v38, %v238_v41  ;;  %v240_v44 = vpop.f32.mrb[6].mxu1 }
  0xf8   :  { %v200_v45 = vpop.f32.mrb[7].mxu0  ;;  %v241_v47 = vpop.f32.mrb[7].mxu1 }
  0xf9   :  { %v276_v46 = vrot.slane %v268_v40, %v258_v24  ;;  %v283_v48 = vrot.slane %v269_v43, %v258_v24 }
  0xfb   :  { %v284_v49 = vcombine.low %v276_v46, %v283_v48 }
  0xfd   :  { %288 = vst [vmem:[%s378_s2 + $0x8] sm:$0xff] %v284_v49 }
  0xfe   :  { %293 = vsyncpa [#allocation3], 1 }

// kernel: netG_forward.7
= control target key start
LH: loop header
LB: loop body
LE: loop exit
PB: predicated region body
PF: predicated region fallthrough
CT: control target
= control target key end

     0   :  { %9 = vsyncpa [#allocation3], 0  ;;  %s2982_s12 = smov [#allocation2]   ;;  %s3487_s0 = inlined_call_operand.vmem [shape: bf16[2,32,110], index: 0, kind: input, shape index: {}]   ;;  %s3488_s1 = inlined_call_operand.hbm [shape: bf16[16,16,32], index: 1, kind: input, shape index: {}]   ;;  %s3489_s2 = inlined_call_operand.vmem [shape: bf16[2,4,16,80], index: 2, kind: output, shape index: {0}]   ;;  %s3490_s3 = inlined_call_operand.vmem [shape: f32[16,2], index: 3, kind: output, shape index: {1}]  }
   0x1   :  { %s17_s13 = sshll.u32 %s2982_s12, 4  ;;  %s2958_s16 = scalar_lea.hbm %s3488_s1, 2048  ;;  %s18_s13 = int_to_ptr.vmem [resolvable:$true] %s17_s13 }
   0x2   :  { %p2959_p0 = scmp.ne.s32.totalorder %s3488_s1, %s2958_s16  ;;  %p2962_p1 = scmp.lt.u32.totalorder %s2958_s16, %s3488_s1 }
   0x4   :  { %p2964_p2 = pnand %p2962_p1, %p2959_p0 }
   0x6   :  { %2967 = shalt.err (!%p2964_p2)
}
   0x7   :  { %s2968_s21 = scalar_lea.vmem %s18_s13, 2048  ;;  %p2973_p4 = scmp.lt.s32.totalorder %s18_s13, %s18_s13 }
   0x8   :  { %p2969_p3 = scmp.ne.s32.totalorder %s18_s13, %s2968_s21  ;;  %p2974_p5 = scmp.lt.s32.totalorder %s2968_s21, %s2968_s21 }
   0xa   :  { %p2975_p6 = por %p2974_p5, %p2973_p4 }
   0xc   :  { %p2976_p7 = pnand %p2975_p6, %p2969_p3 }
   0xe   :  { %2979 = shalt.err (!%p2976_p7)
}
   0xf   :  { %s2983_s22 = smov 64   ;;  %s2984_s23 = smov 4  }
  0x10   :  { %23 = dma.hbm_to_vmem [thread:$0]  %s3488_s1, 2048, %s18_s13, [#allocation3], %s2983_s22, %s2983_s22, %s2984_s23  }
  0x11   :  { %2980 = dma.done.wait [#allocation3], 2048  }
  0x12   :  { %2981 = vsyncadd [#allocation3], 4294965248  ;;  %v2985_v0 = vmov 0.0   ;;  %vm2986_vm0 = vmmov 0   ;;  %v3036_v1 = vld [vmem:[%s3487_s0] sm:$0xff]   ;;  %v3041_v2 = vld [vmem:[%s3487_s0 + $0x8] sm:$0xff]  }
  0x13   :  { %2543 = vmatprep.subr.bf16.mxu0 %v2985_v0  ;;  %2575 = vmatprep.subr.bf16.mxu1 %v2985_v0  ;;  %s2987_s29 = smov 127   ;;  %v2912_v3 = vld [vmem:[%s3487_s0] sm:$0xff]   ;;  %v2913_v4 = vld [vmem:[%s3487_s0 + $0x8] sm:$0xff]   ;;  %s2988_s7 = smov 126   ;;  %v3099_v9 = vld [vmem:[%s3487_s0 + $0x10] sm:$0xff]   ;;  %vm84_vm1 = vcmask 261120  }
  0x14   :  { %2547 = vmatprep.mubr.msk.bf16.mxu0 %vm2986_vm0, %v2985_v0  ;;  %2579 = vmatprep.mubr.msk.bf16.mxu1 %vm2986_vm0, %v2985_v0  ;;  %s2989_s8 = smov 118   ;;  %s2990_s9 = smov 117   ;;  %v2914_v5 = vld [vmem:[%s3487_s0] sm:$0xff]   ;;  %v2916_v7 = vld [vmem:[%s3487_s0 + $0x8] sm:$0xff]   ;;  %v2919_v10 = vld [vmem:[%s3487_s0 + $0x10] sm:$0xff]   ;;  %vm315_vm6 = vcmask 654336  }
  0x15   :  { %78 = vrot.lane.b32.xlu0 %v3036_v1, %s2987_s29  ;;  %80 = vrot.lane.b32.xlu1 %v3041_v2, %s2987_s29  ;;  %s2991_s10 = smov 116   ;;  %v2915_v6 = vld [vmem:[%s3487_s0] sm:$0xff]   ;;  %v2917_v8 = vld [vmem:[%s3487_s0 + $0x8] sm:$0xff]   ;;  %s2992_s19 = smov 108   ;;  %v2930_v32 = vld [vmem:[#allocation2 + $0x10] sm:$0xff]   ;;  %vm308_vm7 = vcmask 650240  }
  0x16   :  { %s2993_s20 = smov 107   ;;  %s2994_s21 = smov 106   ;;  %v3110_v11 = vld [vmem:[%s3487_s0 + $0x18] sm:$0xff]   ;;  %v2924_v13 = vld [vmem:[%s3487_s0 + $0x10] sm:$0xff]   ;;  %v2922_v20 = vld [vmem:[#allocation2 + $0x8] sm:$0xff]   ;;  %vm32_vm8 = vcmask 15360  }
  0x17   :  { %v2921_v12 = vld [vmem:[%s3487_s0 + $0x18] sm:$0xff]   ;;  %v2926_v14 = vld [vmem:[%s3487_s0 + $0x10] sm:$0xff]   ;;  %v2923_v22 = vld [vmem:[#allocation2 + $0x28] sm:$0xff]   ;;  %33 = vst.msk [vmem:[%s3490_s3] sm:$0xff] %vm32_vm8, %v2985_v0  ;;  %vm2286_vm9 = vcmask 7168   ;;  %vm2293_vm10 = vcmask 15368  }
  0x18   :  { %v2927_v15 = vld [vmem:[%s3487_s0 + $0x18] sm:$0xff]   ;;  %v2925_v25 = vld [vmem:[#allocation2] sm:$0xff]   ;;  %v2931_v34 = vld [vmem:[#allocation2 + $0x30] sm:$0xff]   ;;  %34 = vst.msk [vmem:[%s3490_s3 + $0x8] sm:$0xff] %vm32_vm8, %v2985_v0 }
  0x19   :  { %359 = vrot.lane.b32.xlu0 %v2912_v3, %s2988_s7  ;;  %361 = vrot.lane.b32.xlu1 %v2913_v4, %s2988_s7  ;;  %v2929_v16 = vld [vmem:[%s3487_s0 + $0x18] sm:$0xff]   ;;  %v2928_v28 = vld [vmem:[#allocation2 + $0x20] sm:$0xff]   ;;  %v2934_v43 = vld [vmem:[#allocation2 + $0x48] sm:$0xff]  }
  0x1a   :  { %v2932_v38 = vld [vmem:[#allocation2 + $0x18] sm:$0xff]   ;;  %v2935_v46 = vld [vmem:[#allocation2 + $0x68] sm:$0xff]   ;;  %v2936_v49 = vld [vmem:[#allocation2 + $0x40] sm:$0xff]  }
  0x1b   :  { %v2933_v40 = vld [vmem:[#allocation2 + $0x38] sm:$0xff]   ;;  %v2937_v52 = vld [vmem:[#allocation2 + $0x60] sm:$0xff]   ;;  %v2938_v55 = vld [vmem:[#allocation2 + $0x50] sm:$0xff]  }
  0x1c   :  { %v2939_v58 = vld [vmem:[#allocation2 + $0x70] sm:$0xff]   ;;  %v2940_v61 = vld [vmem:[#allocation2 + $0x58] sm:$0xff]  }
  0x1d   :  { %414 = vrot.lane.b32.xlu0 %v2912_v3, %s2987_s29  ;;  %416 = vrot.lane.b32.xlu1 %v2913_v4, %s2987_s29 }
  0x21   :  { %188 = vrot.lane.b32.xlu0 %v3036_v1, %s2989_s8  ;;  %472 = vrot.lane.b32.xlu1 %v2912_v3, %s2990_s9 }
  0x25   :  { %190 = vrot.lane.b32.xlu0 %v3041_v2, %s2989_s8  ;;  %474 = vrot.lane.b32.xlu1 %v2913_v4, %s2990_s9 }
  0x29   :  { %248 = vrot.lane.b32.xlu0 %v3036_v1, %s2990_s9  ;;  %532 = vrot.lane.b32.xlu1 %v2912_v3, %s2991_s10  ;;  %v2942_v3 = vld [vmem:[#allocation2 + $0x8] sm:$0xff]  }
  0x2d   :  { %250 = vrot.lane.b32.xlu0 %v3041_v2, %s2990_s9  ;;  %534 = vrot.lane.b32.xlu1 %v2913_v4, %s2991_s10 }
  0x31   :  { %640 = vrot.lane.b32.xlu0 %v2914_v5, %s2990_s9  ;;  %921 = vrot.lane.b32.xlu1 %v2915_v6, %s2991_s10 }
  0x35   :  { %642 = vrot.lane.b32.xlu0 %v2916_v7, %s2990_s9  ;;  %923 = vrot.lane.b32.xlu1 %v2917_v8, %s2991_s10 }
  0x39   :  { %695 = vrot.lane.b32.xlu0 %v2914_v5, %s2989_s8  ;;  %976 = vrot.lane.b32.xlu1 %v2915_v6, %s2990_s9 }
  0x3d   :  { %697 = vrot.lane.b32.xlu0 %v2916_v7, %s2989_s8  ;;  %978 = vrot.lane.b32.xlu1 %v2917_v8, %s2990_s9 }
  0x41   :  { %753 = vrot.lane.b32.xlu0 %v2914_v5, %s2992_s19  ;;  %1034 = vrot.lane.b32.xlu1 %v2915_v6, %s2993_s20 }
  0x45   :  { %755 = vrot.lane.b32.xlu0 %v2916_v7, %s2992_s19  ;;  %1036 = vrot.lane.b32.xlu1 %v2917_v8, %s2993_s20 }
  0x49   :  { %813 = vrot.lane.b32.xlu0 %v2914_v5, %s2993_s20  ;;  %1094 = vrot.lane.b32.xlu1 %v2915_v6, %s2994_s21  ;;  %v2943_v5 = vld [vmem:[#allocation2 + $0x28] sm:$0xff]  }
  0x4d   :  { %815 = vrot.lane.b32.xlu0 %v2916_v7, %s2993_s20  ;;  %1096 = vrot.lane.b32.xlu1 %v2917_v8, %s2994_s21  ;;  %v2944_v8 = vld [vmem:[#allocation2] sm:$0xff]  }
  0x51   :  { %1201 = vrot.lane.b32.xlu0 %v3099_v9, %s2987_s29  ;;  %1474 = vrot.lane.b32.xlu1 %v2919_v10, %s2988_s7 }
  0x55   :  { %1203 = vrot.lane.b32.xlu0 %v3110_v11, %s2987_s29  ;;  %1476 = vrot.lane.b32.xlu1 %v2921_v12, %s2988_s7 }
  0x59   :  { %1529 = vrot.lane.b32.xlu0 %v2919_v10, %s2987_s29  ;;  %1531 = vrot.lane.b32.xlu1 %v2921_v12, %s2987_s29 }
  0x5d   :  { %1309 = vrot.lane.b32.xlu0 %v3099_v9, %s2989_s8  ;;  %1586 = vrot.lane.b32.xlu1 %v2919_v10, %s2990_s9 }
  0x61   :  { %1311 = vrot.lane.b32.xlu0 %v3110_v11, %s2989_s8  ;;  %1588 = vrot.lane.b32.xlu1 %v2921_v12, %s2990_s9 }
  0x65   :  { %1368 = vrot.lane.b32.xlu0 %v3099_v9, %s2990_s9  ;;  %1645 = vrot.lane.b32.xlu1 %v2919_v10, %s2991_s10 }
  0x69   :  { %1370 = vrot.lane.b32.xlu0 %v3110_v11, %s2990_s9  ;;  %1647 = vrot.lane.b32.xlu1 %v2921_v12, %s2991_s10  ;;  %v2945_v12 = vld [vmem:[#allocation2 + $0x20] sm:$0xff]  }
  0x6d   :  { %1751 = vrot.lane.b32.xlu0 %v2924_v13, %s2990_s9  ;;  %2028 = vrot.lane.b32.xlu1 %v2926_v14, %s2991_s10 }
  0x71   :  { %1753 = vrot.lane.b32.xlu0 %v2927_v15, %s2990_s9  ;;  %2030 = vrot.lane.b32.xlu1 %v2929_v16, %s2991_s10 }
  0x75   :  { %1806 = vrot.lane.b32.xlu0 %v2924_v13, %s2989_s8  ;;  %2083 = vrot.lane.b32.xlu1 %v2926_v14, %s2990_s9 }
  0x79   :  { %1808 = vrot.lane.b32.xlu0 %v2927_v15, %s2989_s8  ;;  %2085 = vrot.lane.b32.xlu1 %v2929_v16, %s2990_s9 }
  0x7d   :  { %1863 = vrot.lane.b32.xlu0 %v2924_v13, %s2992_s19  ;;  %2140 = vrot.lane.b32.xlu1 %v2926_v14, %s2993_s20 }
  0x81   :  { %1865 = vrot.lane.b32.xlu0 %v2927_v15, %s2992_s19  ;;  %2142 = vrot.lane.b32.xlu1 %v2929_v16, %s2993_s20 }
  0x85   :  { %1922 = vrot.lane.b32.xlu0 %v2924_v13, %s2993_s20  ;;  %2199 = vrot.lane.b32.xlu1 %v2926_v14, %s2994_s21 }
  0x87   :  { %v79_v17 = vpop.permute.xlu0 %78  ;;  %v81_v18 = vpop.permute.xlu1 %80 }
  0x88   :  { %2544 = vmatpush3.bf16.msra.mxu0 %v79_v17  ;;  %v2947_v17 = vld [vmem:[#allocation2 + $0x30] sm:$0xff]  }
  0x89   :  { %2545 = vmatprep.subr.bf16.mxu0 %v2985_v0  ;;  %1924 = vrot.lane.b32.xlu0 %v2927_v15, %s2993_s20  ;;  %v2946_v15 = vld [vmem:[#allocation2 + $0x10] sm:$0xff]  }
  0x8a   :  { %2201 = vrot.lane.b32.xlu1 %v2929_v16, %s2994_s21 }
  0x8b   :  { %v360_v19 = vpop.permute.xlu0 %359  ;;  %v362_v21 = vpop.permute.xlu1 %361 }
  0x8c   :  { %2546 = vmatpush3.bf16.msra.mxu0 %v81_v18  ;;  %2576 = vmatpush3.bf16.msra.mxu1 %v360_v19 }
  0x8d   :  { %2551 = vmatprep.subr.bf16.mxu0 %v2985_v0  ;;  %2577 = vmatprep.subr.bf16.mxu1 %v2985_v0 }
  0x8f   :  { %2548 = vmatmul.mubr.msk.bf16.vlgmr.msra.gmra.mrb[0].mxu0 %vm84_vm1, %v2922_v20  ;;  %v415_v23 = vpop.permute.xlu0 %414  ;;  %v417_v24 = vpop.permute.xlu1 %416 }
  0x90   :  { %2552 = vmatpush3.bf16.msra.mxu0 %v3036_v1  ;;  %2578 = vmatpush3.bf16.msra.mxu1 %v362_v21  ;;  %v2941_v1 = vld [vmem:[#allocation2 + $0x78] sm:$0xff]  }
  0x91   :  { %2583 = vmatprep.subr.bf16.mxu1 %v2985_v0  ;;  %2553 = vmatprep.subr.bf16.mxu0 %v2985_v0  ;;  %v2948_v21 = vld [vmem:[#allocation2 + $0x18] sm:$0xff]  }
  0x92   :  { %2555 = vmatprep.mubr.msk.bf16.mxu0 %vm2986_vm0, %v2985_v0 }
  0x93   :  { %2580 = vmatmul.mubr.msk.bf16.vlgmr.msra.gmra.mrb[0].mxu1 %vm84_vm1, %v2923_v22  ;;  %v189_v26 = vpop.permute.xlu0 %188  ;;  %v473_v27 = vpop.permute.xlu1 %472 }
  0x94   :  { %2584 = vmatpush3.bf16.msra.mxu1 %v415_v23  ;;  %2554 = vmatpush3.bf16.msra.mxu0 %v3041_v2  ;;  %v2949_v23 = vld [vmem:[#allocation2 + $0x38] sm:$0xff]  }
  0x95   :  { %2585 = vmatprep.subr.bf16.mxu1 %v2985_v0  ;;  %2559 = vmatprep.subr.bf16.mxu0 %v2985_v0 }
  0x96   :  { %2587 = vmatprep.mubr.msk.bf16.mxu1 %vm2986_vm0, %v2985_v0 }
  0x97   :  { %v191_v29 = vpop.permute.xlu0 %190  ;;  %v475_v30 = vpop.permute.xlu1 %474 }
  0x98   :  { %2586 = vmatpush3.bf16.msra.mxu1 %v417_v24 }
  0x99   :  { %2591 = vmatprep.subr.bf16.mxu1 %v2985_v0 }
  0x9b   :  { %2556 = vmatmul.mubr.msk.bf16.vlgmr.msra.gmra.mrb[0].mxu0 %vm84_vm1, %v2925_v25  ;;  %v249_v31 = vpop.permute.xlu0 %248  ;;  %v533_v33 = vpop.permute.xlu1 %532 }
  0x9c   :  { %2560 = vmatpush3.bf16.msra.mxu0 %v189_v26  ;;  %2563 = vmatprep.mubr.msk.bf16.mxu0 %vm2986_vm0, %v2985_v0  ;;  %v2950_v26 = vld [vmem:[#allocation2 + $0x48] sm:$0xff]  }
  0x9d   :  { %2561 = vmatprep.subr.bf16.mxu0 %v2985_v0 }
  0x9f   :  { %2588 = vmatmul.mubr.msk.bf16.vlgmr.msra.gmra.mrb[0].mxu1 %vm84_vm1, %v2928_v28  ;;  %v251_v35 = vpop.permute.xlu0 %250  ;;  %v535_v36 = vpop.permute.xlu1 %534 }
  0xa0   :  { %2592 = vmatpush3.bf16.msra.mxu1 %v473_v27  ;;  %2562 = vmatpush3.bf16.msra.mxu0 %v191_v29  ;;  %v2951_v29 = vld [vmem:[#allocation2 + $0x68] sm:$0xff]  }
  0xa1   :  { %2593 = vmatprep.subr.bf16.mxu1 %v2985_v0  ;;  %2567 = vmatprep.subr.bf16.mxu0 %v2985_v0 }
  0xa2   :  { %2595 = vmatprep.mubr.msk.bf16.mxu1 %vm2986_vm0, %v2985_v0 }
  0xa3   :  { %v641_v37 = vpop.permute.xlu0 %640  ;;  %v922_v39 = vpop.permute.xlu1 %921 }
  0xa4   :  { %2594 = vmatpush3.bf16.msra.mxu1 %v475_v30 }
  0xa5   :  { %2599 = vmatprep.subr.bf16.mxu1 %v2985_v0 }
  0xa7   :  { %2564 = vmatmul.mubr.msk.bf16.vlgmr.msra.gmra.mrb[0].mxu0 %vm84_vm1, %v2930_v32  ;;  %v643_v41 = vpop.permute.xlu0 %642  ;;  %v924_v42 = vpop.permute.xlu1 %923  ;;  %v2952_v32 = vld [vmem:[#allocation2 + $0x40] sm:$0xff]  }
  0xa8   :  { %2568 = vmatpush3.bf16.msra.mxu0 %v249_v31  ;;  %2571 = vmatprep.mubr.msk.bf16.mxu0 %vm2986_vm0, %v2985_v0 }
  0xa9   :  { %2569 = vmatprep.subr.bf16.mxu0 %v2985_v0 }
  0xab   :  { %2596 = vmatmul.mubr.msk.bf16.vlgmr.msra.gmra.mrb[0].mxu1 %vm84_vm1, %v2931_v34  ;;  %v696_v44 = vpop.permute.xlu0 %695  ;;  %v977_v45 = vpop.permute.xlu1 %976 }
  0xac   :  { %2600 = vmatpush3.bf16.msra.mxu1 %v533_v33  ;;  %2570 = vmatpush3.bf16.msra.mxu0 %v251_v35  ;;  %v2953_v35 = vld [vmem:[#allocation2 + $0x60] sm:$0xff]  }
  0xad   :  { %2601 = vmatprep.subr.bf16.mxu1 %v2985_v0  ;;  %2607 = vmatprep.subr.bf16.mxu0 %v2985_v0 }
  0xae   :  { %2603 = vmatprep.mubr.msk.bf16.mxu1 %vm2986_vm0, %v2985_v0 }
  0xaf   :  { %v698_v47 = vpop.permute.xlu0 %697  ;;  %v979_v48 = vpop.permute.xlu1 %978 }
  0xb0   :  { %2602 = vmatpush3.bf16.msra.mxu1 %v535_v36 }
  0xb1   :  { %2639 = vmatprep.subr.bf16.mxu1 %v2985_v0 }
  0xb3   :  { %2572 = vmatmul.mubr.msk.bf16.vlgmr.msra.gmra.mrb[0].mxu0 %vm84_vm1, %v2932_v38  ;;  %v754_v50 = vpop.permute.xlu0 %753  ;;  %v1035_v51 = vpop.permute.xlu1 %1034  ;;  %v2954_v38 = vld [vmem:[#allocation2 + $0x50] sm:$0xff]  }
  0xb4   :  { %2608 = vmatpush3.bf16.msra.mxu0 %v641_v37  ;;  %2611 = vmatprep.mubr.msk.bf16.mxu0 %vm2986_vm0, %v2985_v0 }
  0xb5   :  { %2609 = vmatprep.subr.bf16.mxu0 %v2985_v0 }
  0xb7   :  { %2604 = vmatmul.mubr.msk.bf16.vlgmr.msra.gmra.mrb[0].mxu1 %vm84_vm1, %v2933_v40  ;;  %v756_v53 = vpop.permute.xlu0 %755  ;;  %v1037_v54 = vpop.permute.xlu1 %1036 }
  0xb8   :  { %2610 = vmatpush3.bf16.msra.mxu0 %v643_v41  ;;  %2640 = vmatpush3.bf16.msra.mxu1 %v922_v39  ;;  %v2955_v41 = vld [vmem:[#allocation2 + $0x70] sm:$0xff]  }
  0xb9   :  { %2615 = vmatprep.subr.bf16.mxu0 %v2985_v0  ;;  %2641 = vmatprep.subr.bf16.mxu1 %v2985_v0 }
  0xba   :  { %2643 = vmatprep.mubr.msk.bf16.mxu1 %vm2986_vm0, %v2985_v0 }
  0xbb   :  { %2612 = vmatmul.mubr.msk.bf16.vlgmr.msra.gmra.mrb[4].mxu0 %vm84_vm1, %v2934_v43  ;;  %v814_v56 = vpop.permute.xlu0 %813  ;;  %v1095_v57 = vpop.permute.xlu1 %1094 }
  0xbc   :  { %2616 = vmatpush3.bf16.msra.mxu0 %v696_v44  ;;  %2642 = vmatpush3.bf16.msra.mxu1 %v924_v42  ;;  %v2956_v44 = vld [vmem:[#allocation2 + $0x58] sm:$0xff]  }
  0xbd   :  { %2647 = vmatprep.subr.bf16.mxu1 %v2985_v0  ;;  %2617 = vmatprep.subr.bf16.mxu0 %v2985_v0 }
  0xbe   :  { %2619 = vmatprep.mubr.msk.bf16.mxu0 %vm2986_vm0, %v2985_v0 }
  0xbf   :  { %2644 = vmatmul.mubr.msk.bf16.vlgmr.msra.gmra.mrb[4].mxu1 %vm84_vm1, %v2935_v46  ;;  %v816_v59 = vpop.permute.xlu0 %815  ;;  %v1097_v60 = vpop.permute.xlu1 %1096  ;;  %v35_v46 = vlaneseq }
  0xc0   :  { %2648 = vmatpush3.bf16.msra.mxu1 %v977_v45  ;;  %2618 = vmatpush3.bf16.msra.mxu0 %v698_v47  ;;  %v2957_v45 = vld [vmem:[#allocation2 + $0x78] sm:$0xff]  }
  0xc1   :  { %2649 = vmatprep.subr.bf16.mxu1 %v2985_v0  ;;  %2623 = vmatprep.subr.bf16.mxu0 %v2985_v0  ;;  %v36_v47 = vand.u32 127, %v35_v46 }
  0xc2   :  { %2651 = vmatprep.mubr.msk.bf16.mxu1 %vm2986_vm0, %v2985_v0 }
  0xc3   :  { %v1202_v62 = vpop.permute.xlu0 %1201  ;;  %v1475_v63 = vpop.permute.xlu1 %1474 }
  0xc4   :  { %2650 = vmatpush3.bf16.msra.mxu1 %v979_v48 }
  0xc5   :  { %2655 = vmatprep.subr.bf16.mxu1 %v2985_v0 }
  0xc7   :  { %2620 = vmatmul.mubr.msk.bf16.vlgmr.msra.gmra.mrb[4].mxu0 %vm84_vm1, %v2936_v49  ;;  %v1204_v2 = vpop.permute.xlu0 %1203  ;;  %v1477_v4 = vpop.permute.xlu1 %1476  ;;  %v3319_v48 = vmul.u32.u64.low 3435973837, %v36_v47  ;;  %v3320_v49 = vmul.u32.u64.high 3435973837, %v36_v47, %v3319_v48 }
  0xc8   :  { %2624 = vmatpush3.bf16.msra.mxu0 %v754_v50  ;;  %2627 = vmatprep.mubr.msk.bf16.mxu0 %vm2986_vm0, %v2985_v0 }
  0xc9   :  { %2625 = vmatprep.subr.bf16.mxu0 %v2985_v0  ;;  %v43_v50 = vshrl.u32 %v3320_v49, 3 }
  0xcb   :  { %2652 = vmatmul.mubr.msk.bf16.vlgmr.msra.gmra.mrb[4].mxu1 %vm84_vm1, %v2937_v52  ;;  %v1530_v6 = vpop.permute.xlu0 %1529  ;;  %v1532_v7 = vpop.permute.xlu1 %1531 }
  0xcc   :  { %2656 = vmatpush3.bf16.msra.mxu1 %v1035_v51  ;;  %2626 = vmatpush3.bf16.msra.mxu0 %v756_v53  ;;  %v44_v51 = vmul.u32 10, %v43_v50 }
  0xcd   :  { %2657 = vmatprep.subr.bf16.mxu1 %v2985_v0  ;;  %2631 = vmatprep.subr.bf16.mxu0 %v2985_v0 }
  0xce   :  { %2659 = vmatprep.mubr.msk.bf16.mxu1 %vm2986_vm0, %v2985_v0  ;;  %v45_v52 = vsub.s32 %v36_v47, %v44_v51 }
  0xcf   :  { %v1587_v10 = vpop.permute.xlu1 %1586 }
  0xd0   :  { %2658 = vmatpush3.bf16.msra.mxu1 %v1037_v54  ;;  %vm48_vm2 = vcmp.ne.s32.totalorder %v45_v52, 0  ;;  %vm49_vm3 = vcmp.lt.s32.totalorder %v45_v52, 0  ;;  %v51_v53 = vadd.s32 10, %v45_v52 }
  0xd1   :  { %2663 = vmatprep.subr.bf16.mxu1 %v2985_v0  ;;  %vm50_vm4 = vmand %vm49_vm3, %vm48_vm2 }
  0xd2   :  { %v52_v54 = vsel %vm50_vm4, %v51_v53, %v45_v52 }
  0xd3   :  { %2628 = vmatmul.mubr.msk.bf16.vlgmr.msra.gmra.mrb[4].mxu0 %vm84_vm1, %v2938_v55  ;;  %v1589_v13 = vpop.permute.xlu1 %1588  ;;  %vm3323_vm5 = vcmp.lt.s32.totalorder %v52_v54, 8 }
  0xd4   :  { %2632 = vmatpush3.bf16.msra.mxu0 %v814_v56  ;;  %2635 = vmatprep.mubr.msk.bf16.mxu0 %vm2986_vm0, %v2985_v0 }
  0xd5   :  { %2633 = vmatprep.subr.bf16.mxu0 %v2985_v0 }
  0xd7   :  { %2660 = vmatmul.mubr.msk.bf16.vlgmr.msra.gmra.mrb[4].mxu1 %vm84_vm1, %v2939_v58  ;;  %v1646_v16 = vpop.permute.xlu1 %1645 }
  0xd8   :  { %2664 = vmatpush3.bf16.msra.mxu1 %v1095_v57  ;;  %2634 = vmatpush3.bf16.msra.mxu0 %v816_v59 }
  0xd9   :  { %2665 = vmatprep.subr.bf16.mxu1 %v2985_v0  ;;  %2671 = vmatprep.subr.bf16.mxu0 %v2985_v0 }
  0xda   :  { %2667 = vmatprep.mubr.msk.bf16.mxu1 %vm2986_vm0, %v2985_v0 }
  0xdb   :  { %v1648_v19 = vpop.permute.xlu1 %1647 }
  0xdc   :  { %2666 = vmatpush3.bf16.msra.mxu1 %v1097_v60 }
  0xdd   :  { %2703 = vmatprep.subr.bf16.mxu1 %v2985_v0 }
  0xdf   :  { %2636 = vmatmul.mubr.msk.bf16.vlgmr.msra.gmra.mrb[4].mxu0 %vm84_vm1, %v2940_v61  ;;  %v2029_v22 = vpop.permute.xlu1 %2028 }
  0xe0   :  { %2672 = vmatpush3.bf16.msra.mxu0 %v1202_v62  ;;  %2675 = vmatprep.mubr.msk.bf16.mxu0 %vm2986_vm0, %v2985_v0 }
  0xe1   :  { %2673 = vmatprep.subr.bf16.mxu0 %v2985_v0 }
  0xe3   :  { %2668 = vmatmul.mubr.msk.bf16.vlgmr.msra.gmra.mrb[4].mxu1 %vm84_vm1, %v2941_v1  ;;  %v2031_v25 = vpop.permute.xlu1 %2030 }
  0xe4   :  { %2674 = vmatpush3.bf16.msra.mxu0 %v1204_v2  ;;  %2704 = vmatpush3.bf16.msra.mxu1 %v1475_v63 }
  0xe5   :  { %2679 = vmatprep.subr.bf16.mxu0 %v2985_v0  ;;  %2705 = vmatprep.subr.bf16.mxu1 %v2985_v0 }
  0xe6   :  { %2707 = vmatprep.mubr.msk.bf16.mxu1 %vm2986_vm0, %v2985_v0 }
  0xe7   :  { %2676 = vmatmul.mubr.msk.bf16.vlgmr.msra.gmra.mrb[8].mxu0 %vm84_vm1, %v2942_v3  ;;  %v2084_v28 = vpop.permute.xlu1 %2083 }
  0xe8   :  { %2680 = vmatpush3.bf16.msra.mxu0 %v3099_v9  ;;  %2706 = vmatpush3.bf16.msra.mxu1 %v1477_v4  ;;  %v1310_v9 = vpop.permute.xlu0 %1309 }
  0xe9   :  { %2711 = vmatprep.subr.bf16.mxu1 %v2985_v0  ;;  %2681 = vmatprep.subr.bf16.mxu0 %v2985_v0 }
  0xea   :  { %2683 = vmatprep.mubr.msk.bf16.mxu0 %vm2986_vm0, %v2985_v0 }
  0xeb   :  { %2708 = vmatmul.mubr.msk.bf16.vlgmr.msra.gmra.mrb[8].mxu1 %vm84_vm1, %v2943_v5  ;;  %v2086_v31 = vpop.permute.xlu1 %2085 }
  0xec   :  { %2712 = vmatpush3.bf16.msra.mxu1 %v1530_v6  ;;  %2682 = vmatpush3.bf16.msra.mxu0 %v3110_v11  ;;  %v1312_v11 = vpop.permute.xlu0 %1311 }
  0xed   :  { %2713 = vmatprep.subr.bf16.mxu1 %v2985_v0  ;;  %2687 = vmatprep.subr.bf16.mxu0 %v2985_v0 }
  0xee   :  { %2715 = vmatprep.mubr.msk.bf16.mxu1 %vm2986_vm0, %v2985_v0 }
  0xef   :  { %v2141_v34 = vpop.permute.xlu1 %2140 }
  0xf0   :  { %2714 = vmatpush3.bf16.msra.mxu1 %v1532_v7  ;;  %v1369_v14 = vpop.permute.xlu0 %1368 }
  0xf1   :  { %2719 = vmatprep.subr.bf16.mxu1 %v2985_v0 }
  0xf3   :  { %2684 = vmatmul.mubr.msk.bf16.vlgmr.msra.gmra.mrb[8].mxu0 %vm84_vm1, %v2944_v8  ;;  %v2143_v37 = vpop.permute.xlu1 %2142 }
  0xf4   :  { %2688 = vmatpush3.bf16.msra.mxu0 %v1310_v9  ;;  %2691 = vmatprep.mubr.msk.bf16.mxu0 %vm2986_vm0, %v2985_v0  ;;  %v1371_v18 = vpop.permute.xlu0 %1370 }
  0xf5   :  { %2689 = vmatprep.subr.bf16.mxu0 %v2985_v0 }
  0xf7   :  { %2716 = vmatmul.mubr.msk.bf16.vlgmr.msra.gmra.mrb[8].mxu1 %vm84_vm1, %v2945_v12  ;;  %v2200_v40 = vpop.permute.xlu1 %2199 }
  0xf8   :  { %2720 = vmatpush3.bf16.msra.mxu1 %v1587_v10  ;;  %2690 = vmatpush3.bf16.msra.mxu0 %v1312_v11  ;;  %v1752_v20 = vpop.permute.xlu0 %1751 }
  0xf9   :  { %2721 = vmatprep.subr.bf16.mxu1 %v2985_v0  ;;  %2695 = vmatprep.subr.bf16.mxu0 %v2985_v0 }
  0xfa   :  { %2723 = vmatprep.mubr.msk.bf16.mxu1 %vm2986_vm0, %v2985_v0 }
  0xfc   :  { %2722 = vmatpush3.bf16.msra.mxu1 %v1589_v13  ;;  %v1754_v24 = vpop.permute.xlu0 %1753  ;;  %v2202_v43 = vpop.permute.xlu1 %2201 }
  0xfd   :  { %2727 = vmatprep.subr.bf16.mxu1 %v2985_v0 }
  0xff   :  { %2692 = vmatmul.mubr.msk.bf16.vlgmr.msra.gmra.mrb[8].mxu0 %vm84_vm1, %v2946_v15 }
 0x100   :  { %2696 = vmatpush3.bf16.msra.mxu0 %v1369_v14  ;;  %2699 = vmatprep.mubr.msk.bf16.mxu0 %vm2986_vm0, %v2985_v0  ;;  %v1807_v27 = vpop.permute.xlu0 %1806 }
 0x101   :  { %2697 = vmatprep.subr.bf16.mxu0 %v2985_v0 }
 0x103   :  { %2724 = vmatmul.mubr.msk.bf16.vlgmr.msra.gmra.mrb[8].mxu1 %vm84_vm1, %v2947_v17 }
 0x104   :  { %2728 = vmatpush3.bf16.msra.mxu1 %v1646_v16  ;;  %2698 = vmatpush3.bf16.msra.mxu0 %v1371_v18  ;;  %v1809_v30 = vpop.permute.xlu0 %1808 }
 0x105   :  { %2729 = vmatprep.subr.bf16.mxu1 %v2985_v0  ;;  %2735 = vmatprep.subr.bf16.mxu0 %v2985_v0 }
 0x106   :  { %2731 = vmatprep.mubr.msk.bf16.mxu1 %vm2986_vm0, %v2985_v0 }
 0x108   :  { %2730 = vmatpush3.bf16.msra.mxu1 %v1648_v19  ;;  %v1864_v33 = vpop.permute.xlu0 %1863 }
 0x109   :  { %2767 = vmatprep.subr.bf16.mxu1 %v2985_v0 }
 0x10b   :  { %2700 = vmatmul.mubr.msk.bf16.vlgmr.msra.gmra.mrb[8].mxu0 %vm84_vm1, %v2948_v21 }
 0x10c   :  { %2736 = vmatpush3.bf16.msra.mxu0 %v1752_v20  ;;  %2739 = vmatprep.mubr.msk.bf16.mxu0 %vm2986_vm0, %v2985_v0  ;;  %v1866_v36 = vpop.permute.xlu0 %1865 }
 0x10d   :  { %2737 = vmatprep.subr.bf16.mxu0 %v2985_v0 }
 0x10f   :  { %2732 = vmatmul.mubr.msk.bf16.vlgmr.msra.gmra.mrb[8].mxu1 %vm84_vm1, %v2949_v23 }
 0x110   :  { %2738 = vmatpush3.bf16.msra.mxu0 %v1754_v24  ;;  %2768 = vmatpush3.bf16.msra.mxu1 %v2029_v22  ;;  %v1923_v39 = vpop.permute.xlu0 %1922 }
 0x111   :  { %2743 = vmatprep.subr.bf16.mxu0 %v2985_v0  ;;  %2769 = vmatprep.subr.bf16.mxu1 %v2985_v0 }
 0x112   :  { %2771 = vmatprep.mubr.msk.bf16.mxu1 %vm2986_vm0, %v2985_v0 }
 0x113   :  { %2740 = vmatmul.mubr.msk.bf16.vlgmr.msra.gmra.mrb[12].mxu0 %vm84_vm1, %v2950_v26 }
 0x114   :  { %2744 = vmatpush3.bf16.msra.mxu0 %v1807_v27  ;;  %2770 = vmatpush3.bf16.msra.mxu1 %v2031_v25  ;;  %v1925_v42 = vpop.permute.xlu0 %1924 }
 0x115   :  { %2775 = vmatprep.subr.bf16.mxu1 %v2985_v0  ;;  %2745 = vmatprep.subr.bf16.mxu0 %v2985_v0 }
 0x116   :  { %2747 = vmatprep.mubr.msk.bf16.mxu0 %vm2986_vm0, %v2985_v0 }
 0x117   :  { %2772 = vmatmul.mubr.msk.bf16.vlgmr.msra.gmra.mrb[12].mxu1 %vm84_vm1, %v2951_v29 }
 0x118   :  { %2776 = vmatpush3.bf16.msra.mxu1 %v2084_v28  ;;  %2746 = vmatpush3.bf16.msra.mxu0 %v1809_v30 }
 0x119   :  { %2777 = vmatprep.subr.bf16.mxu1 %v2985_v0  ;;  %2751 = vmatprep.subr.bf16.mxu0 %v2985_v0 }
 0x11a   :  { %2779 = vmatprep.mubr.msk.bf16.mxu1 %vm2986_vm0, %v2985_v0 }
 0x11c   :  { %2778 = vmatpush3.bf16.msra.mxu1 %v2086_v31 }
 0x11d   :  { %2783 = vmatprep.subr.bf16.mxu1 %v2985_v0 }
 0x11f   :  { %2748 = vmatmul.mubr.msk.bf16.vlgmr.msra.gmra.mrb[12].mxu0 %vm84_vm1, %v2952_v32 }
 0x120   :  { %2752 = vmatpush3.bf16.msra.mxu0 %v1864_v33  ;;  %2755 = vmatprep.mubr.msk.bf16.mxu0 %vm2986_vm0, %v2985_v0 }
 0x121   :  { %2753 = vmatprep.subr.bf16.mxu0 %v2985_v0 }
 0x123   :  { %2780 = vmatmul.mubr.msk.bf16.vlgmr.msra.gmra.mrb[12].mxu1 %vm84_vm1, %v2953_v35 }
 0x124   :  { %2784 = vmatpush3.bf16.msra.mxu1 %v2141_v34  ;;  %2754 = vmatpush3.bf16.msra.mxu0 %v1866_v36 }
 0x125   :  { %2785 = vmatprep.subr.bf16.mxu1 %v2985_v0  ;;  %2759 = vmatprep.subr.bf16.mxu0 %v2985_v0 }
 0x126   :  { %2787 = vmatprep.mubr.msk.bf16.mxu1 %vm2986_vm0, %v2985_v0 }
 0x128   :  { %2786 = vmatpush3.bf16.msra.mxu1 %v2143_v37 }
 0x129   :  { %2791 = vmatprep.subr.bf16.mxu1 %v2985_v0 }
 0x12b   :  { %2756 = vmatmul.mubr.msk.bf16.vlgmr.msra.gmra.mrb[12].mxu0 %vm84_vm1, %v2954_v38 }
 0x12c   :  { %2760 = vmatpush3.bf16.msra.mxu0 %v1923_v39  ;;  %2763 = vmatprep.mubr.msk.bf16.mxu0 %vm2986_vm0, %v2985_v0 }
 0x12d   :  { %2761 = vmatprep.subr.bf16.mxu0 %v2985_v0 }
 0x12f   :  { %2788 = vmatmul.mubr.msk.bf16.vlgmr.msra.gmra.mrb[12].mxu1 %vm84_vm1, %v2955_v41 }
 0x130   :  { %2792 = vmatpush3.bf16.msra.mxu1 %v2200_v40  ;;  %2762 = vmatpush3.bf16.msra.mxu0 %v1925_v42 }
 0x131   :  { %2793 = vmatprep.subr.bf16.mxu1 %v2985_v0  ;;  %2795 = vmatprep.mubr.msk.bf16.mxu1 %vm2986_vm0, %v2985_v0 }
 0x134   :  { %2794 = vmatpush3.bf16.msra.mxu1 %v2202_v43 }
 0x137   :  { %2764 = vmatmul.mubr.msk.bf16.vlgmr.msra.gmra.mrb[12].mxu0 %vm84_vm1, %v2956_v44 }
 0x13b   :  { %2796 = vmatmul.mubr.msk.bf16.vlgmr.msra.gmra.mrb[12].mxu1 %vm84_vm1, %v2957_v45 }
 0x186   :  { %v291_v56 = vpop.f32.mrb[0].mxu0 }
 0x187   :  { %v2431_v57 = vpack.c.bf16 %v291_v56, %v291_v56  ;;  %v2573_v58 = vpop.f32.mrb[1].mxu0  ;;  %v313_v59 = vsel %vm3323_vm5, %v291_v56, 0.0 }
 0x188   :  { %v294_v60 = vpop.f32.mrb[2].mxu0  ;;  %v316_v61 = vsel %vm315_vm6, %v313_v59, 0.0  ;;  %v324_v62 = vmul.f32 %v313_v59, %v313_v59 }
 0x189   :  { %309 = vst.msk [vmem:[%s3489_s2] sm:$0xf] %vm308_vm7, %v2431_v57  ;;  %v2432_v63 = vpack.c.bf16 %v294_v60, %v294_v60  ;;  %317 = vadd.xlane.f32.xlu0 %v316_v61  ;;  %v2574_v1 = vpop.f32.mrb[3].mxu0  ;;  %v314_v11 = vsel %vm3323_vm5, %v294_v60, 0.0 }
 0x18a   :  { %v575_v2 = vpop.f32.mrb[0].mxu1  ;;  %v326_v8 = vsel %vm315_vm6, %v324_v62, 0.0  ;;  %v319_v14 = vsel %vm315_vm6, %v314_v11, 0.0  ;;  %v325_v15 = vmul.f32 %v314_v11, %v314_v11 }
 0x18b   :  { %310 = vst.msk [vmem:[%s3489_s2 + $0x4] sm:$0xf] %vm308_vm7, %v2432_v63  ;;  %v2433_v3 = vpack.c.bf16 %v575_v2, %v575_v2  ;;  %v2605_v4 = vpop.f32.mrb[1].mxu1  ;;  %v595_v5 = vsel %vm3323_vm5, %v575_v2, 0.0 }
 0x18c   :  { %v578_v6 = vpop.f32.mrb[2].mxu1  ;;  %v597_v7 = vsel %vm315_vm6, %v595_v5, 0.0  ;;  %v605_v16 = vmul.f32 %v595_v5, %v595_v5  ;;  %v329_v17 = vsel %vm315_vm6, %v325_v15, 0.0 }
 0x18d   :  { %2329 = vst.msk [vmem:[%s3489_s2 + $0x8] sm:$0xf] %vm308_vm7, %v2433_v3  ;;  %v2434_v9 = vpack.c.bf16 %v578_v6, %v578_v6  ;;  %598 = vadd.xlane.f32.xlu1 %v597_v7  ;;  %v2606_v10 = vpop.f32.mrb[3].mxu1  ;;  %327 = vadd.xlane.f32.xlu0 %v326_v8  ;;  %v596_v12 = vsel %vm3323_vm5, %v578_v6, 0.0 }
 0x18e   :  { %v600_v13 = vsel %vm315_vm6, %v596_v12, 0.0  ;;  %v607_v18 = vsel %vm315_vm6, %v605_v16, 0.0  ;;  %v606_v19 = vmul.f32 %v596_v12, %v596_v12 }
 0x18f   :  { %2330 = vst.msk [vmem:[%s3489_s2 + $0xc] sm:$0xf] %vm308_vm7, %v2434_v9 }
 0x190   :  { %v610_v20 = vsel %vm315_vm6, %v606_v19, 0.0 }
 0x191   :  { %601 = vadd.xlane.f32.xlu0 %v600_v13  ;;  %320 = vadd.xlane.f32.xlu1 %v319_v14 }
 0x195   :  { %330 = vadd.xlane.f32.xlu0 %v329_v17  ;;  %608 = vadd.xlane.f32.xlu1 %v607_v18 }
 0x199   :  { %611 = vadd.xlane.f32.xlu0 %v610_v20 }
 0x1b2   :  { %v856_v21 = vpop.f32.mrb[4].mxu0 }
 0x1b3   :  { %v2435_v22 = vpack.c.bf16 %v856_v21, %v856_v21  ;;  %v2637_v23 = vpop.f32.mrb[5].mxu0  ;;  %v876_v24 = vsel %vm3323_vm5, %v856_v21, 0.0 }
 0x1b4   :  { %v859_v25 = vpop.f32.mrb[6].mxu0  ;;  %v878_v26 = vsel %vm315_vm6, %v876_v24, 0.0  ;;  %v886_v37 = vmul.f32 %v876_v24, %v876_v24 }
 0x1b5   :  { %2343 = vst.msk [vmem:[%s3489_s2 + $0x10] sm:$0xf] %vm308_vm7, %v2435_v22  ;;  %v2436_v27 = vpack.c.bf16 %v859_v25, %v859_v25  ;;  %879 = vadd.xlane.f32.xlu1 %v878_v26  ;;  %v2638_v28 = vpop.f32.mrb[7].mxu0  ;;  %v877_v29 = vsel %vm3323_vm5, %v859_v25, 0.0 }
 0x1b6   :  { %v1137_v30 = vpop.f32.mrb[4].mxu1  ;;  %v881_v31 = vsel %vm315_vm6, %v877_v29, 0.0  ;;  %v887_v42 = vmul.f32 %v877_v29, %v877_v29  ;;  %v888_v43 = vsel %vm315_vm6, %v886_v37, 0.0 }
 0x1b7   :  { %2344 = vst.msk [vmem:[%s3489_s2 + $0x14] sm:$0xf] %vm308_vm7, %v2436_v27  ;;  %v2437_v32 = vpack.c.bf16 %v1137_v30, %v1137_v30  ;;  %v2669_v33 = vpop.f32.mrb[5].mxu1  ;;  %882 = vadd.xlane.f32.xlu0 %v881_v31  ;;  %v1157_v34 = vsel %vm3323_vm5, %v1137_v30, 0.0 }
 0x1b8   :  { %v1140_v35 = vpop.f32.mrb[6].mxu1  ;;  %v1159_v36 = vsel %vm315_vm6, %v1157_v34, 0.0  ;;  %v1167_v44 = vmul.f32 %v1157_v34, %v1157_v34  ;;  %v891_v45 = vsel %vm315_vm6, %v887_v42, 0.0 }
 0x1b9   :  { %2357 = vst.msk [vmem:[%s3489_s2 + $0x18] sm:$0xf] %vm308_vm7, %v2437_v32  ;;  %v2438_v38 = vpack.c.bf16 %v1140_v35, %v1140_v35  ;;  %v2670_v39 = vpop.f32.mrb[7].mxu1  ;;  %1160 = vadd.xlane.f32.xlu1 %v1159_v36  ;;  %v1158_v40 = vsel %vm3323_vm5, %v1140_v35, 0.0 }
 0x1ba   :  { %v1162_v41 = vsel %vm315_vm6, %v1158_v40, 0.0  ;;  %v1168_v46 = vmul.f32 %v1158_v40, %v1158_v40  ;;  %v1169_v47 = vsel %vm315_vm6, %v1167_v44, 0.0 }
 0x1bb   :  { %2358 = vst.msk [vmem:[%s3489_s2 + $0x1c] sm:$0xf] %vm308_vm7, %v2438_v38  ;;  %1163 = vadd.xlane.f32.xlu0 %v1162_v41 }
 0x1bc   :  { %v1172_v48 = vsel %vm315_vm6, %v1168_v46, 0.0 }
 0x1bd   :  { %889 = vadd.xlane.f32.xlu1 %v888_v43 }
 0x1bf   :  { %892 = vadd.xlane.f32.xlu0 %v891_v45 }
 0x1c1   :  { %1170 = vadd.xlane.f32.xlu1 %v1169_v47 }
 0x1c3   :  { %1173 = vadd.xlane.f32.xlu0 %v1172_v48 }
 0x1de   :  { %v1411_v49 = vpop.f32.mrb[8].mxu0 }
 0x1df   :  { %v2439_v50 = vpack.c.bf16 %v1411_v49, %v1411_v49  ;;  %v2701_v51 = vpop.f32.mrb[9].mxu0  ;;  %v1431_v52 = vsel %vm3323_vm5, %v1411_v49, 0.0 }
 0x1e0   :  { %v1414_v53 = vpop.f32.mrb[10].mxu0  ;;  %v1433_v54 = vsel %vm315_vm6, %v1431_v52, 0.0  ;;  %v1441_v3 = vmul.f32 %v1431_v52, %v1431_v52 }
 0x1e1   :  { %2375 = vst.msk [vmem:[%s3489_s2 + $0x20] sm:$0xf] %vm308_vm7, %v2439_v50  ;;  %v2440_v56 = vpack.c.bf16 %v1414_v53, %v1414_v53  ;;  %1434 = vadd.xlane.f32.xlu1 %v1433_v54  ;;  %v2702_v57 = vpop.f32.mrb[11].mxu0  ;;  %v1432_v58 = vsel %vm3323_vm5, %v1414_v53, 0.0 }
 0x1e2   :  { %v1688_v59 = vpop.f32.mrb[8].mxu1  ;;  %v1436_v60 = vsel %vm315_vm6, %v1432_v58, 0.0  ;;  %v1442_v8 = vmul.f32 %v1432_v58, %v1432_v58  ;;  %v1443_v9 = vsel %vm315_vm6, %v1441_v3, 0.0 }
 0x1e3   :  { %2376 = vst.msk [vmem:[%s3489_s2 + $0x24] sm:$0xf] %vm308_vm7, %v2440_v56  ;;  %v2441_v61 = vpack.c.bf16 %v1688_v59, %v1688_v59  ;;  %v2733_v62 = vpop.f32.mrb[9].mxu1  ;;  %1437 = vadd.xlane.f32.xlu0 %v1436_v60  ;;  %v1708_v63 = vsel %vm3323_vm5, %v1688_v59, 0.0 }
 0x1e4   :  { %v1691_v1 = vpop.f32.mrb[10].mxu1  ;;  %v1710_v2 = vsel %vm315_vm6, %v1708_v63, 0.0  ;;  %v1718_v10 = vmul.f32 %v1708_v63, %v1708_v63  ;;  %v1446_v12 = vsel %vm315_vm6, %v1442_v8, 0.0 }
 0x1e5   :  { %2393 = vst.msk [vmem:[%s3489_s2 + $0x28] sm:$0xf] %vm308_vm7, %v2441_v61  ;;  %v2442_v4 = vpack.c.bf16 %v1691_v1, %v1691_v1  ;;  %v2734_v5 = vpop.f32.mrb[11].mxu1  ;;  %1711 = vadd.xlane.f32.xlu1 %v1710_v2  ;;  %v1709_v6 = vsel %vm3323_vm5, %v1691_v1, 0.0 }
 0x1e6   :  { %v1713_v7 = vsel %vm315_vm6, %v1709_v6, 0.0  ;;  %v1719_v11 = vmul.f32 %v1709_v6, %v1709_v6  ;;  %v1720_v13 = vsel %vm315_vm6, %v1718_v10, 0.0 }
 0x1e7   :  { %2394 = vst.msk [vmem:[%s3489_s2 + $0x2c] sm:$0xf] %vm308_vm7, %v2442_v4  ;;  %1714 = vadd.xlane.f32.xlu0 %v1713_v7 }
 0x1e8   :  { %v1723_v14 = vsel %vm315_vm6, %v1719_v11, 0.0 }
 0x1e9   :  { %1444 = vadd.xlane.f32.xlu1 %v1443_v9 }
 0x1eb   :  { %1447 = vadd.xlane.f32.xlu0 %v1446_v12 }
 0x1ed   :  { %1721 = vadd.xlane.f32.xlu1 %v1720_v13 }
 0x1ef   :  { %1724 = vadd.xlane.f32.xlu0 %v1723_v14 }
 0x20a   :  { %v1965_v15 = vpop.f32.mrb[12].mxu0 }
 0x20b   :  { %v2443_v16 = vpack.c.bf16 %v1965_v15, %v1965_v15  ;;  %v2765_v17 = vpop.f32.mrb[13].mxu0  ;;  %v1985_v18 = vsel %vm3323_vm5, %v1965_v15, 0.0 }
 0x20c   :  { %v1968_v19 = vpop.f32.mrb[14].mxu0  ;;  %v1987_v20 = vsel %vm315_vm6, %v1985_v18, 0.0  ;;  %v1995_v31 = vmul.f32 %v1985_v18, %v1985_v18  ;;  %v2282_v18 = vld [vmem:[%s3490_s3] sm:$0xff] }
 0x20d   :  { %2411 = vst.msk [vmem:[%s3489_s2 + $0x30] sm:$0xf] %vm308_vm7, %v2443_v16  ;;  %v2444_v21 = vpack.c.bf16 %v1968_v19, %v1968_v19  ;;  %1988 = vadd.xlane.f32.xlu1 %v1987_v20  ;;  %v2766_v22 = vpop.f32.mrb[15].mxu0  ;;  %v1986_v23 = vsel %vm3323_vm5, %v1968_v19, 0.0 }
 0x20e   :  { %v2242_v24 = vpop.f32.mrb[12].mxu1  ;;  %v1990_v25 = vsel %vm315_vm6, %v1986_v23, 0.0  ;;  %v1996_v36 = vmul.f32 %v1986_v23, %v1986_v23  ;;  %v1997_v37 = vsel %vm315_vm6, %v1995_v31, 0.0 }
 0x20f   :  { %2412 = vst.msk [vmem:[%s3489_s2 + $0x34] sm:$0xf] %vm308_vm7, %v2444_v21  ;;  %v2445_v26 = vpack.c.bf16 %v2242_v24, %v2242_v24  ;;  %v2797_v27 = vpop.f32.mrb[13].mxu1  ;;  %1991 = vadd.xlane.f32.xlu0 %v1990_v25  ;;  %v2262_v28 = vsel %vm3323_vm5, %v2242_v24, 0.0  ;;  %v2283_v24 = vld [vmem:[%s3490_s3 + $0x8] sm:$0xff] }
 0x210   :  { %v2245_v29 = vpop.f32.mrb[14].mxu1  ;;  %v2264_v30 = vsel %vm315_vm6, %v2262_v28, 0.0  ;;  %v2272_v38 = vmul.f32 %v2262_v28, %v2262_v28  ;;  %v2000_v39 = vsel %vm315_vm6, %v1996_v36, 0.0 }
 0x211   :  { %2429 = vst.msk [vmem:[%s3489_s2 + $0x38] sm:$0xf] %vm308_vm7, %v2445_v26  ;;  %v2446_v32 = vpack.c.bf16 %v2245_v29, %v2245_v29  ;;  %v2798_v33 = vpop.f32.mrb[15].mxu1  ;;  %2265 = vadd.xlane.f32.xlu1 %v2264_v30  ;;  %v2263_v34 = vsel %vm3323_vm5, %v2245_v29, 0.0 }
 0x212   :  { %v2267_v35 = vsel %vm315_vm6, %v2263_v34, 0.0  ;;  %v2273_v40 = vmul.f32 %v2263_v34, %v2263_v34  ;;  %v2274_v55 = vsel %vm315_vm6, %v2272_v38, 0.0 }
 0x213   :  { %2430 = vst.msk [vmem:[%s3489_s2 + $0x3c] sm:$0xf] %vm308_vm7, %v2446_v32  ;;  %2268 = vadd.xlane.f32.xlu0 %v2267_v35 }
 0x214   :  { %v2277_v41 = vsel %vm315_vm6, %v2273_v40, 0.0 }
 0x215   :  { %1998 = vadd.xlane.f32.xlu1 %v1997_v37 }
 0x216   :  { %v318_v42 = vpop.xlane.xlu0 %317 }
 0x217   :  { %2001 = vadd.xlane.f32.xlu0 %v2000_v39 }
 0x219   :  { %2275 = vadd.xlane.f32.xlu1 %v2274_v55 }
 0x21a   :  { %v328_v43 = vpop.xlane.xlu0 %327  ;;  %v599_v44 = vpop.xlane.xlu1 %598 }
 0x21b   :  { %2278 = vadd.xlane.f32.xlu0 %v2277_v41  ;;  %v603_v1 = vadd.f32 %v599_v44, %v318_v42 }
 0x21e   :  { %v602_v45 = vpop.xlane.xlu0 %601  ;;  %v321_v46 = vpop.xlane.xlu1 %320 }
 0x21f   :  { %v604_v2 = vadd.f32 %v602_v45, %v321_v46 }
 0x222   :  { %v331_v47 = vpop.xlane.xlu0 %330  ;;  %v609_v48 = vpop.xlane.xlu1 %608 }
 0x223   :  { %v613_v14 = vadd.f32 %v609_v48, %v328_v43 }
 0x226   :  { %v612_v49 = vpop.xlane.xlu0 %611 }
 0x227   :  { %v614_v19 = vadd.f32 %v612_v49, %v331_v47 }
 0x242   :  { %v880_v50 = vpop.xlane.xlu1 %879 }
 0x243   :  { %v884_v3 = vadd.f32 %v880_v50, %v603_v1 }
 0x244   :  { %v883_v51 = vpop.xlane.xlu0 %882 }
 0x245   :  { %v885_v5 = vadd.f32 %v883_v51, %v604_v2 }
 0x246   :  { %v1161_v52 = vpop.xlane.xlu1 %1160 }
 0x247   :  { %v1165_v6 = vadd.f32 %v1161_v52, %v884_v3 }
 0x248   :  { %v1164_v53 = vpop.xlane.xlu0 %1163 }
 0x249   :  { %v1166_v8 = vadd.f32 %v1164_v53, %v885_v5 }
 0x24a   :  { %v890_v54 = vpop.xlane.xlu1 %889 }
 0x24b   :  { %v894_v20 = vadd.f32 %v890_v54, %v613_v14 }
 0x24c   :  { %v893_v56 = vpop.xlane.xlu0 %892 }
 0x24d   :  { %v895_v25 = vadd.f32 %v893_v56, %v614_v19 }
 0x24e   :  { %v1171_v57 = vpop.xlane.xlu1 %1170 }
 0x24f   :  { %v1175_v26 = vadd.f32 %v1171_v57, %v894_v20 }
 0x250   :  { %v1174_v58 = vpop.xlane.xlu0 %1173 }
 0x251   :  { %v1176_v30 = vadd.f32 %v1174_v58, %v895_v25 }
 0x26e   :  { %v1435_v0 = vpop.xlane.xlu1 %1434 }
 0x26f   :  { %v1439_v9 = vadd.f32 %v1435_v0, %v1165_v6 }
 0x270   :  { %v1438_v59 = vpop.xlane.xlu0 %1437 }
 0x271   :  { %v1440_v12 = vadd.f32 %v1438_v59, %v1166_v8 }
 0x272   :  { %v1712_v60 = vpop.xlane.xlu1 %1711 }
 0x273   :  { %v1716_v11 = vadd.f32 %v1712_v60, %v1439_v9 }
 0x274   :  { %v1715_v61 = vpop.xlane.xlu0 %1714 }
 0x275   :  { %v1717_v15 = vadd.f32 %v1715_v61, %v1440_v12 }
 0x276   :  { %v1445_v62 = vpop.xlane.xlu1 %1444 }
 0x277   :  { %v1449_v31 = vadd.f32 %v1445_v62, %v1175_v26 }
 0x278   :  { %v1448_v63 = vpop.xlane.xlu0 %1447 }
 0x279   :  { %v1450_v34 = vadd.f32 %v1448_v63, %v1176_v30 }
 0x27a   :  { %v1722_v4 = vpop.xlane.xlu1 %1721 }
 0x27b   :  { %v1726_v35 = vadd.f32 %v1722_v4, %v1449_v31 }
 0x27c   :  { %v1725_v7 = vpop.xlane.xlu0 %1724 }
 0x27d   :  { %v1727_v37 = vadd.f32 %v1725_v7, %v1450_v34 }
 0x29a   :  { %v1989_v10 = vpop.xlane.xlu1 %1988 }
 0x29b   :  { %v1993_v16 = vadd.f32 %v1989_v10, %v1716_v11 }
 0x29c   :  { %v1992_v13 = vpop.xlane.xlu0 %1991 }
 0x29d   :  { %v1994_v21 = vadd.f32 %v1992_v13, %v1717_v15 }
 0x29e   :  { %v2266_v17 = vpop.xlane.xlu1 %2265 }
 0x29f   :  { %v2270_v22 = vadd.f32 %v2266_v17, %v1993_v16 }
 0x2a0   :  { %v2269_v23 = vpop.xlane.xlu0 %2268 }
 0x2a1   :  { %v2284_v27 = vadd.f32 %v2282_v18, %v2270_v22  ;;  %v2271_v28 = vadd.f32 %v2269_v23, %v1994_v21 }
 0x2a2   :  { %v1999_v29 = vpop.xlane.xlu1 %1998 }
 0x2a3   :  { %2287 = vst.msk [vmem:[%s3490_s3] sm:$0xff] %vm2286_vm9, %v2284_v27  ;;  %v2285_v32 = vadd.f32 %v2283_v24, %v2271_v28  ;;  %v2003_v38 = vadd.f32 %v1999_v29, %v1726_v35 }
 0x2a4   :  { %v2002_v33 = vpop.xlane.xlu0 %2001 }
 0x2a5   :  { %2288 = vst.msk [vmem:[%s3490_s3 + $0x8] sm:$0xff] %vm2286_vm9, %v2285_v32  ;;  %v2004_v40 = vadd.f32 %v2002_v33, %v1727_v37 }
 0x2a6   :  { %v2276_v36 = vpop.xlane.xlu1 %2275 }
 0x2a7   :  { %v2280_v55 = vadd.f32 %v2276_v36, %v2003_v38 }
 0x2a8   :  { %v2279_v39 = vpop.xlane.xlu0 %2278 }
 0x2a9   :  { %v2281_v43 = vadd.f32 %v2279_v39, %v2004_v40 }
 0x2aa   :  { %v2289_v41 = vld [vmem:[%s3490_s3] sm:$0xff] }
 0x2ab   :  { %v2291_v42 = vadd.f32 %v2289_v41, %v2280_v55 }
 0x2ac   :  { %v2290_v44 = vld [vmem:[%s3490_s3 + $0x8] sm:$0xff] }
 0x2ad   :  { %2294 = vst.msk [vmem:[%s3490_s3] sm:$0xff] %vm2293_vm10, %v2291_v42  ;;  %v2292_v45 = vadd.f32 %v2290_v44, %v2281_v43 }
 0x2af   :  { %2295 = vst.msk [vmem:[%s3490_s3 + $0x8] sm:$0xff] %vm2293_vm10, %v2292_v45 }
 0x2b0   :  { %2304 = vsyncpa [#allocation3], 1 }

// kernel: netG_forward.6
= control target key start
LH: loop header
LB: loop body
LE: loop exit
PB: predicated region body
PF: predicated region fallthrough
CT: control target
= control target key end

     0   :  { %9 = vsyncpa [#allocation3], 0  ;;  %s4553_s12 = smov [#allocation2]   ;;  %s5391_s0 = inlined_call_operand.vmem [shape: bf16[2,64,42], index: 0, kind: input, shape index: {}]   ;;  %s5392_s1 = inlined_call_operand.hbm [shape: bf16[16,32,64], index: 1, kind: input, shape index: {}]   ;;  %s5393_s2 = inlined_call_operand.vmem [shape: bf16[2,4,32,24], index: 2, kind: output, shape index: {0}]   ;;  %s5394_s3 = inlined_call_operand.vmem [shape: f32[32,2], index: 3, kind: output, shape index: {1}]  }
   0x1   :  { %s17_s13 = sshll.u32 %s4553_s12, 4  ;;  %s4529_s16 = scalar_lea.hbm %s5392_s1, 4096  ;;  %s18_s13 = int_to_ptr.vmem [resolvable:$true] %s17_s13 }
   0x2   :  { %p4530_p0 = scmp.ne.s32.totalorder %s5392_s1, %s4529_s16  ;;  %p4533_p1 = scmp.lt.u32.totalorder %s4529_s16, %s5392_s1 }
   0x4   :  { %p4535_p2 = pnand %p4533_p1, %p4530_p0 }
   0x6   :  { %4538 = shalt.err (!%p4535_p2)
}
   0x7   :  { %s4539_s21 = scalar_lea.vmem %s18_s13, 4096  ;;  %p4544_p4 = scmp.lt.s32.totalorder %s18_s13, %s18_s13 }
   0x8   :  { %p4540_p3 = scmp.ne.s32.totalorder %s18_s13, %s4539_s21  ;;  %p4545_p5 = scmp.lt.s32.totalorder %s4539_s21, %s4539_s21 }
   0xa   :  { %p4546_p6 = por %p4545_p5, %p4544_p4 }
   0xc   :  { %p4547_p7 = pnand %p4546_p6, %p4540_p3 }
   0xe   :  { %4550 = shalt.err (!%p4547_p7)
}
   0xf   :  { %s4554_s22 = smov 64   ;;  %s4555_s23 = smov 4  }
  0x10   :  { %23 = dma.hbm_to_vmem [thread:$0]  %s5392_s1, 4096, %s18_s13, [#allocation3], %s4554_s22, %s4554_s22, %s4555_s23  }
  0x11   :  { %4551 = dma.done.wait [#allocation3], 4096  }
  0x12   :  { %4552 = vsyncadd [#allocation3], 4294963200  ;;  %v4600_v0 = vld [vmem:[%s5391_s0] sm:$0xff]   ;;  %v4605_v1 = vld [vmem:[%s5391_s0 + $0x8] sm:$0xff]   ;;  %s4556_s30 = smov 127   ;;  %s4557_s7 = smov 126  }
  0x13   :  { %103 = vrot.lane.b32.xlu0 %v4600_v0, %s4556_s30  ;;  %v4435_v2 = vld [vmem:[%s5391_s0] sm:$0xff]   ;;  %105 = vrot.lane.b32.xlu1 %v4605_v1, %s4556_s30  ;;  %v4436_v3 = vld [vmem:[%s5391_s0 + $0x8] sm:$0xff]   ;;  %vm115_vm0 = vcmask 523264   ;;  %v4450_v8 = vld [vmem:[#allocation2 + $0x10] sm:$0xff]   ;;  %s4558_s16 = smov 122   ;;  %s4559_s17 = smov 121  }
  0x14   :  { %v4621_v4 = vld [vmem:[%s5391_s0 + $0x10] sm:$0xff]   ;;  %v4632_v6 = vld [vmem:[%s5391_s0 + $0x18] sm:$0xff]   ;;  %3947 = vmatprep.mubr.msk.bf16.mxu0 %vm115_vm0, %v4450_v8  ;;  %s4560_s18 = smov 120   ;;  %v4441_v10 = vld [vmem:[%s5391_s0] sm:$0xff]   ;;  %s4561_s9 = smov 116   ;;  %vm439_vm5 = vcmask 195584  }
  0x15   :  { %v4438_v5 = vld [vmem:[%s5391_s0 + $0x10] sm:$0xff]   ;;  %v4440_v7 = vld [vmem:[%s5391_s0 + $0x18] sm:$0xff]   ;;  %v4442_v11 = vld [vmem:[%s5391_s0] sm:$0xff]   ;;  %s4562_s10 = smov 115   ;;  %s4563_s11 = smov 114   ;;  %vm428_vm6 = vcmask 191488  }
  0x16   :  { %v4454_v9 = vld [vmem:[#allocation2 + $0x50] sm:$0xff]   ;;  %v4443_v12 = vld [vmem:[%s5391_s0 + $0x8] sm:$0xff]   ;;  %v4447_v16 = vld [vmem:[%s5391_s0 + $0x18] sm:$0xff]   ;;  %vm32_vm7 = vcmask 15360   ;;  %vm3436_vm8 = vcmask 7168   ;;  %vm3449_vm9 = vcmask 15368  }
  0x17   :  { %524 = vrot.lane.b32.xlu0 %v4435_v2, %s4557_s7  ;;  %526 = vrot.lane.b32.xlu1 %v4436_v3, %s4557_s7  ;;  %v4444_v13 = vld [vmem:[%s5391_s0 + $0x8] sm:$0xff]   ;;  %v4445_v14 = vld [vmem:[%s5391_s0 + $0x10] sm:$0xff]   ;;  %v4453_v32 = vld [vmem:[#allocation2 + $0x18] sm:$0xff]  }
  0x18   :  { %3995 = vmatprep.mubr.msk.bf16.mxu1 %vm115_vm0, %v4454_v9  ;;  %v4446_v15 = vld [vmem:[%s5391_s0 + $0x10] sm:$0xff]   ;;  %v4448_v17 = vld [vmem:[%s5391_s0 + $0x18] sm:$0xff]   ;;  %v4730_v20 = vld [vmem:[%s5391_s0 + $0x20] sm:$0xff]  }
  0x19   :  { %v4735_v22 = vld [vmem:[%s5391_s0 + $0x20] sm:$0xff]   ;;  %v4742_v24 = vld [vmem:[%s5391_s0 + $0x28] sm:$0xff]   ;;  %v4758_v29 = vld [vmem:[%s5391_s0 + $0x30] sm:$0xff]  }
  0x1a   :  { %v4749_v26 = vld [vmem:[%s5391_s0 + $0x28] sm:$0xff]   ;;  %v4763_v30 = vld [vmem:[%s5391_s0 + $0x30] sm:$0xff]   ;;  %v4773_v34 = vld [vmem:[%s5391_s0 + $0x38] sm:$0xff]  }
  0x1b   :  { %107 = vrot.lane.b32.xlu0 %v4621_v4, %s4556_s30  ;;  %528 = vrot.lane.b32.xlu1 %v4438_v5, %s4557_s7  ;;  %v4778_v35 = vld [vmem:[%s5391_s0 + $0x38] sm:$0xff]   ;;  %v4461_v38 = vld [vmem:[#allocation2] sm:$0xff]   ;;  %v4462_v45 = vld [vmem:[#allocation2 + $0x8] sm:$0xff]  }
  0x1c   :  { %v4457_v36 = vld [vmem:[#allocation2 + $0x58] sm:$0xff]   ;;  %v4463_v40 = vld [vmem:[#allocation2 + $0x40] sm:$0xff]   ;;  %v4464_v49 = vld [vmem:[#allocation2 + $0x48] sm:$0xff]  }
  0x1d   :  { %v4465_v48 = vld [vmem:[#allocation2 + $0x20] sm:$0xff]   ;;  %v4466_v57 = vld [vmem:[#allocation2 + $0x28] sm:$0xff]   ;;  %v4469_v60 = vld [vmem:[#allocation2 + $0x30] sm:$0xff]  }
  0x1e   :  { %v4467_v52 = vld [vmem:[#allocation2 + $0x60] sm:$0xff]   ;;  %v4468_v61 = vld [vmem:[#allocation2 + $0x68] sm:$0xff]  }
  0x1f   :  { %109 = vrot.lane.b32.xlu0 %v4632_v6, %s4556_s30  ;;  %530 = vrot.lane.b32.xlu1 %v4440_v7, %s4557_s7  ;;  %v4851_v8 = vld [vmem:[%s5391_s0 + $0x20] sm:$0xff]  }
  0x23   :  { %601 = vrot.lane.b32.xlu0 %v4435_v2, %s4556_s30  ;;  %603 = vrot.lane.b32.xlu1 %v4436_v3, %s4556_s30 }
  0x27   :  { %605 = vrot.lane.b32.xlu0 %v4438_v5, %s4556_s30  ;;  %607 = vrot.lane.b32.xlu1 %v4440_v7, %s4556_s30 }
  0x2b   :  { %255 = vrot.lane.b32.xlu0 %v4600_v0, %s4558_s16  ;;  %683 = vrot.lane.b32.xlu1 %v4435_v2, %s4559_s17 }
  0x2f   :  { %257 = vrot.lane.b32.xlu0 %v4605_v1, %s4558_s16  ;;  %685 = vrot.lane.b32.xlu1 %v4436_v3, %s4559_s17 }
  0x33   :  { %259 = vrot.lane.b32.xlu0 %v4621_v4, %s4558_s16  ;;  %687 = vrot.lane.b32.xlu1 %v4438_v5, %s4559_s17 }
  0x37   :  { %261 = vrot.lane.b32.xlu0 %v4632_v6, %s4558_s16  ;;  %689 = vrot.lane.b32.xlu1 %v4440_v7, %s4559_s17 }
  0x3b   :  { %341 = vrot.lane.b32.xlu0 %v4600_v0, %s4559_s17  ;;  %769 = vrot.lane.b32.xlu1 %v4435_v2, %s4560_s18 }
  0x3f   :  { %343 = vrot.lane.b32.xlu0 %v4605_v1, %s4559_s17  ;;  %771 = vrot.lane.b32.xlu1 %v4436_v3, %s4560_s18 }
  0x43   :  { %345 = vrot.lane.b32.xlu0 %v4621_v4, %s4559_s17  ;;  %773 = vrot.lane.b32.xlu1 %v4438_v5, %s4560_s18  ;;  %v4844_v5 = vld [vmem:[%s5391_s0 + $0x20] sm:$0xff]  }
  0x47   :  { %347 = vrot.lane.b32.xlu0 %v4632_v6, %s4559_s17  ;;  %775 = vrot.lane.b32.xlu1 %v4440_v7, %s4560_s18 }
  0x4b   :  { %949 = vrot.lane.b32.xlu0 %v4441_v10, %s4559_s17  ;;  %1374 = vrot.lane.b32.xlu1 %v4442_v11, %s4560_s18 }
  0x4f   :  { %951 = vrot.lane.b32.xlu0 %v4443_v12, %s4559_s17  ;;  %1376 = vrot.lane.b32.xlu1 %v4444_v13, %s4560_s18 }
  0x53   :  { %953 = vrot.lane.b32.xlu0 %v4445_v14, %s4559_s17  ;;  %1378 = vrot.lane.b32.xlu1 %v4446_v15, %s4560_s18 }
  0x57   :  { %955 = vrot.lane.b32.xlu0 %v4447_v16, %s4559_s17  ;;  %1380 = vrot.lane.b32.xlu1 %v4448_v17, %s4560_s18 }
  0x5b   :  { %1026 = vrot.lane.b32.xlu0 %v4441_v10, %s4558_s16  ;;  %1451 = vrot.lane.b32.xlu1 %v4442_v11, %s4559_s17 }
  0x5f   :  { %1028 = vrot.lane.b32.xlu0 %v4443_v12, %s4558_s16  ;;  %1453 = vrot.lane.b32.xlu1 %v4444_v13, %s4559_s17 }
  0x63   :  { %1030 = vrot.lane.b32.xlu0 %v4445_v14, %s4558_s16  ;;  %1455 = vrot.lane.b32.xlu1 %v4446_v15, %s4559_s17 }
  0x67   :  { %1032 = vrot.lane.b32.xlu0 %v4447_v16, %s4558_s16  ;;  %1457 = vrot.lane.b32.xlu1 %v4448_v17, %s4559_s17 }
  0x6b   :  { %1108 = vrot.lane.b32.xlu0 %v4441_v10, %s4561_s9  ;;  %1533 = vrot.lane.b32.xlu1 %v4442_v11, %s4562_s10 }
  0x6f   :  { %1110 = vrot.lane.b32.xlu0 %v4443_v12, %s4561_s9  ;;  %1535 = vrot.lane.b32.xlu1 %v4444_v13, %s4562_s10 }
  0x73   :  { %1112 = vrot.lane.b32.xlu0 %v4445_v14, %s4561_s9  ;;  %1537 = vrot.lane.b32.xlu1 %v4446_v15, %s4562_s10 }
  0x77   :  { %1114 = vrot.lane.b32.xlu0 %v4447_v16, %s4561_s9  ;;  %1539 = vrot.lane.b32.xlu1 %v4448_v17, %s4562_s10 }
  0x7b   :  { %1194 = vrot.lane.b32.xlu0 %v4441_v10, %s4562_s10  ;;  %1619 = vrot.lane.b32.xlu1 %v4442_v11, %s4563_s11  ;;  %v4474_v10 = vld [vmem:[#allocation2 + $0x90] sm:$0xff]   ;;  %v4858_v11 = vld [vmem:[%s5391_s0 + $0x28] sm:$0xff]  }
  0x7f   :  { %1196 = vrot.lane.b32.xlu0 %v4443_v12, %s4562_s10  ;;  %1621 = vrot.lane.b32.xlu1 %v4444_v13, %s4563_s11  ;;  %v4472_v12 = vld [vmem:[#allocation2 + $0x78] sm:$0xff]  }
  0x83   :  { %1198 = vrot.lane.b32.xlu0 %v4445_v14, %s4562_s10  ;;  %1623 = vrot.lane.b32.xlu1 %v4446_v15, %s4563_s11  ;;  %v4866_v14 = vld [vmem:[%s5391_s0 + $0x28] sm:$0xff]  }
  0x85   :  { %v104_v18 = vpop.permute.xlu0 %103  ;;  %v106_v19 = vpop.permute.xlu1 %105 }
  0x86   :  { %3939 = vmatprep.subr.bf16.mxu0 %v104_v18 }
  0x87   :  { %3940 = vmatpush3.bf16.msra.mxu0 %v104_v18  ;;  %1200 = vrot.lane.b32.xlu0 %v4447_v16, %s4562_s10  ;;  %v4478_v16 = vld [vmem:[#allocation2 + $0xd0] sm:$0xff]  }
  0x88   :  { %3941 = vmatprep.subr.bf16.mxu0 %v106_v19  ;;  %1625 = vrot.lane.b32.xlu1 %v4448_v17, %s4563_s11  ;;  %v4874_v17 = vld [vmem:[%s5391_s0 + $0x30] sm:$0xff]  }
  0x89   :  { %v525_v21 = vpop.permute.xlu0 %524  ;;  %v527_v23 = vpop.permute.xlu1 %526 }
  0x8a   :  { %3987 = vmatprep.subr.bf16.mxu1 %v525_v21 }
  0x8b   :  { %3942 = vmatpush3.bf16.msra.mxu0 %v106_v19  ;;  %3988 = vmatpush3.bf16.msra.mxu1 %v525_v21  ;;  %v4882_v19 = vld [vmem:[%s5391_s0 + $0x30] sm:$0xff]  }
  0x8c   :  { %3989 = vmatprep.subr.bf16.mxu1 %v527_v23  ;;  %1798 = vrot.lane.b32.xlu0 %v4730_v20, %s4556_s30 }
  0x8d   :  { %v108_v25 = vpop.permute.xlu0 %107  ;;  %2211 = vrot.lane.b32.xlu1 %v4735_v22, %s4557_s7  ;;  %v529_v27 = vpop.permute.xlu1 %528 }
  0x8e   :  { %3943 = vmatprep.subr.bf16.mxu0 %v108_v25 }
  0x8f   :  { %3944 = vmatpush3.bf16.msra.mxu0 %v108_v25  ;;  %3990 = vmatpush3.bf16.msra.mxu1 %v527_v23  ;;  %v4897_v25 = vld [vmem:[%s5391_s0 + $0x38] sm:$0xff]  }
  0x90   :  { %3991 = vmatprep.subr.bf16.mxu1 %v529_v27  ;;  %1800 = vrot.lane.b32.xlu0 %v4742_v24, %s4556_s30 }
  0x91   :  { %v110_v28 = vpop.permute.xlu0 %109  ;;  %2213 = vrot.lane.b32.xlu1 %v4749_v26, %s4557_s7  ;;  %v531_v31 = vpop.permute.xlu1 %530 }
  0x92   :  { %3945 = vmatprep.subr.bf16.mxu0 %v110_v28 }
  0x93   :  { %3946 = vmatpush3.bf16.msra.mxu0 %v110_v28  ;;  %3992 = vmatpush3.bf16.msra.mxu1 %v529_v27  ;;  %v4477_v27 = vld [vmem:[#allocation2 + $0x98] sm:$0xff]  }
  0x94   :  { %3951 = vmatprep.subr.bf16.mxu0 %v4600_v0  ;;  %3993 = vmatprep.subr.bf16.mxu1 %v531_v31 }
  0x95   :  { %v602_v33 = vpop.permute.xlu0 %601  ;;  %1802 = vrot.lane.b32.xlu0 %v4758_v29, %s4556_s30  ;;  %2215 = vrot.lane.b32.xlu1 %v4763_v30, %s4557_s7  ;;  %v604_v37 = vpop.permute.xlu1 %603 }
  0x96   :  { %3948 = vmatmul.mubr.msk.bf16.vlgmr.msra.gmra.mrb[0].mxu0 %vm115_vm0, %v4453_v32  ;;  %v4481_v32 = vld [vmem:[#allocation2 + $0xd8] sm:$0xff]  }
  0x97   :  { %3952 = vmatpush3.bf16.msra.mxu0 %v4600_v0  ;;  %3994 = vmatpush3.bf16.msra.mxu1 %v531_v31  ;;  %v4471_v0 = vld [vmem:[#allocation2 + $0x70] sm:$0xff]   ;;  %v4485_v31 = vld [vmem:[#allocation2 + $0x80] sm:$0xff]  }
  0x98   :  { %3953 = vmatprep.subr.bf16.mxu0 %v4605_v1  ;;  %3999 = vmatprep.subr.bf16.mxu1 %v602_v33 }
  0x99   :  { %1804 = vrot.lane.b32.xlu0 %v4773_v34, %s4556_s30  ;;  %v606_v39 = vpop.permute.xlu0 %605  ;;  %2217 = vrot.lane.b32.xlu1 %v4778_v35, %s4557_s7  ;;  %v608_v41 = vpop.permute.xlu1 %607 }
  0x9a   :  { %3996 = vmatmul.mubr.msk.bf16.vlgmr.msra.gmra.mrb[0].mxu1 %vm115_vm0, %v4457_v36  ;;  %3959 = vmatprep.mubr.msk.bf16.mxu0 %vm115_vm0, %v4461_v38  ;;  %v4487_v36 = vld [vmem:[#allocation2 + $0xc0] sm:$0xff]  }
  0x9b   :  { %3954 = vmatpush3.bf16.msra.mxu0 %v4605_v1  ;;  %4000 = vmatpush3.bf16.msra.mxu1 %v602_v33 }
  0x9c   :  { %3955 = vmatprep.subr.bf16.mxu0 %v4621_v4  ;;  %4001 = vmatprep.subr.bf16.mxu1 %v604_v37 }
  0x9d   :  { %v256_v42 = vpop.permute.xlu0 %255  ;;  %2288 = vrot.lane.b32.xlu0 %v4735_v22, %s4556_s30  ;;  %4007 = vmatprep.mubr.msk.bf16.mxu1 %vm115_vm0, %v4463_v40  ;;  %v684_v43 = vpop.permute.xlu1 %683 }
  0x9e   :  { %2290 = vrot.lane.b32.xlu1 %v4749_v26, %s4556_s30 }
  0x9f   :  { %3956 = vmatpush3.bf16.msra.mxu0 %v4621_v4  ;;  %4002 = vmatpush3.bf16.msra.mxu1 %v604_v37 }
  0xa0   :  { %3957 = vmatprep.subr.bf16.mxu0 %v4632_v6  ;;  %4003 = vmatprep.subr.bf16.mxu1 %v606_v39 }
  0xa1   :  { %v258_v44 = vpop.permute.xlu0 %257  ;;  %2292 = vrot.lane.b32.xlu0 %v4763_v30, %s4556_s30  ;;  %v686_v46 = vpop.permute.xlu1 %685 }
  0xa2   :  { %2294 = vrot.lane.b32.xlu1 %v4778_v35, %s4556_s30 }
  0xa3   :  { %3958 = vmatpush3.bf16.msra.mxu0 %v4632_v6  ;;  %4004 = vmatpush3.bf16.msra.mxu1 %v606_v39  ;;  %v4470_v6 = vld [vmem:[#allocation2 + $0x38] sm:$0xff]  }
  0xa4   :  { %3963 = vmatprep.subr.bf16.mxu0 %v256_v42  ;;  %4005 = vmatprep.subr.bf16.mxu1 %v608_v41 }
  0xa5   :  { %v260_v47 = vpop.permute.xlu0 %259  ;;  %1948 = vrot.lane.b32.xlu0 %v4730_v20, %s4558_s16  ;;  %v688_v50 = vpop.permute.xlu1 %687 }
  0xa6   :  { %3960 = vmatmul.mubr.msk.bf16.vlgmr.msra.gmra.mrb[0].mxu0 %vm115_vm0, %v4462_v45  ;;  %2369 = vrot.lane.b32.xlu1 %v4735_v22, %s4559_s17  ;;  %v4488_v45 = vld [vmem:[#allocation2 + $0xc8] sm:$0xff]  }
  0xa7   :  { %3964 = vmatpush3.bf16.msra.mxu0 %v256_v42  ;;  %4006 = vmatpush3.bf16.msra.mxu1 %v608_v41  ;;  %v4486_v41 = vld [vmem:[#allocation2 + $0x88] sm:$0xff]  }
  0xa8   :  { %3965 = vmatprep.subr.bf16.mxu0 %v258_v44  ;;  %4011 = vmatprep.subr.bf16.mxu1 %v684_v43 }
  0xa9   :  { %v262_v51 = vpop.permute.xlu0 %261  ;;  %3971 = vmatprep.mubr.msk.bf16.mxu0 %vm115_vm0, %v4465_v48  ;;  %1950 = vrot.lane.b32.xlu0 %v4742_v24, %s4558_s16  ;;  %v690_v53 = vpop.permute.xlu1 %689  ;;  %v4491_v48 = vld [vmem:[#allocation2 + $0xe0] sm:$0xff]  }
  0xaa   :  { %4008 = vmatmul.mubr.msk.bf16.vlgmr.msra.gmra.mrb[0].mxu1 %vm115_vm0, %v4464_v49  ;;  %2371 = vrot.lane.b32.xlu1 %v4749_v26, %s4559_s17 }
  0xab   :  { %3966 = vmatpush3.bf16.msra.mxu0 %v258_v44  ;;  %4012 = vmatpush3.bf16.msra.mxu1 %v684_v43  ;;  %v4489_v44 = vld [vmem:[#allocation2 + $0xa0] sm:$0xff]  }
  0xac   :  { %3967 = vmatprep.subr.bf16.mxu0 %v260_v47  ;;  %4013 = vmatprep.subr.bf16.mxu1 %v686_v46 }
  0xad   :  { %v342_v54 = vpop.permute.xlu0 %341  ;;  %4019 = vmatprep.mubr.msk.bf16.mxu1 %vm115_vm0, %v4467_v52  ;;  %1952 = vrot.lane.b32.xlu0 %v4758_v29, %s4558_s16  ;;  %v770_v55 = vpop.permute.xlu1 %769 }
  0xae   :  { %2373 = vrot.lane.b32.xlu1 %v4763_v30, %s4559_s17 }
  0xaf   :  { %3968 = vmatpush3.bf16.msra.mxu0 %v260_v47  ;;  %4014 = vmatpush3.bf16.msra.mxu1 %v686_v46 }
  0xb0   :  { %3969 = vmatprep.subr.bf16.mxu0 %v262_v51  ;;  %4015 = vmatprep.subr.bf16.mxu1 %v688_v50 }
  0xb1   :  { %v344_v56 = vpop.permute.xlu0 %343  ;;  %1954 = vrot.lane.b32.xlu0 %v4773_v34, %s4558_s16  ;;  %v772_v58 = vpop.permute.xlu1 %771 }
  0xb2   :  { %2375 = vrot.lane.b32.xlu1 %v4778_v35, %s4559_s17 }
  0xb3   :  { %3970 = vmatpush3.bf16.msra.mxu0 %v262_v51  ;;  %4016 = vmatpush3.bf16.msra.mxu1 %v688_v50 }
  0xb4   :  { %3975 = vmatprep.subr.bf16.mxu0 %v342_v54  ;;  %4017 = vmatprep.subr.bf16.mxu1 %v690_v53 }
  0xb5   :  { %v346_v59 = vpop.permute.xlu0 %345  ;;  %2033 = vrot.lane.b32.xlu0 %v4730_v20, %s4559_s17  ;;  %v774_v62 = vpop.permute.xlu1 %773 }
  0xb6   :  { %3972 = vmatmul.mubr.msk.bf16.vlgmr.msra.gmra.mrb[0].mxu0 %vm115_vm0, %v4466_v57  ;;  %2454 = vrot.lane.b32.xlu1 %v4735_v22, %s4560_s18  ;;  %v4890_v22 = vld [vmem:[%s5391_s0 + $0x38] sm:$0xff]   ;;  %v4492_v57 = vld [vmem:[#allocation2 + $0xe8] sm:$0xff]  }
  0xb7   :  { %3976 = vmatpush3.bf16.msra.mxu0 %v342_v54  ;;  %4018 = vmatpush3.bf16.msra.mxu1 %v690_v53  ;;  %v4490_v53 = vld [vmem:[#allocation2 + $0xa8] sm:$0xff]  }
  0xb8   :  { %3977 = vmatprep.subr.bf16.mxu0 %v344_v56  ;;  %4023 = vmatprep.subr.bf16.mxu1 %v770_v55 }
  0xb9   :  { %v348_v63 = vpop.permute.xlu0 %347  ;;  %3983 = vmatprep.mubr.msk.bf16.mxu0 %vm115_vm0, %v4469_v60  ;;  %2035 = vrot.lane.b32.xlu0 %v4742_v24, %s4559_s17  ;;  %v776_v1 = vpop.permute.xlu1 %775  ;;  %v4495_v60 = vld [vmem:[#allocation2 + $0xf0] sm:$0xff]  }
  0xba   :  { %4020 = vmatmul.mubr.msk.bf16.vlgmr.msra.gmra.mrb[0].mxu1 %vm115_vm0, %v4468_v61  ;;  %2456 = vrot.lane.b32.xlu1 %v4749_v26, %s4560_s18 }
  0xbb   :  { %3978 = vmatpush3.bf16.msra.mxu0 %v344_v56  ;;  %4024 = vmatpush3.bf16.msra.mxu1 %v770_v55  ;;  %v4493_v56 = vld [vmem:[#allocation2 + $0xb0] sm:$0xff]  }
  0xbc   :  { %3979 = vmatprep.subr.bf16.mxu0 %v346_v59  ;;  %4025 = vmatprep.subr.bf16.mxu1 %v772_v58 }
  0xbd   :  { %v950_v2 = vpop.permute.xlu0 %949  ;;  %4031 = vmatprep.mubr.msk.bf16.mxu1 %vm115_vm0, %v4471_v0  ;;  %2037 = vrot.lane.b32.xlu0 %v4758_v29, %s4559_s17  ;;  %v1375_v3 = vpop.permute.xlu1 %1374  ;;  %v4494_v0 = vld [vmem:[#allocation2 + $0xb8] sm:$0xff]  }
  0xbe   :  { %2458 = vrot.lane.b32.xlu1 %v4763_v30, %s4560_s18 }
  0xbf   :  { %3980 = vmatpush3.bf16.msra.mxu0 %v346_v59  ;;  %4026 = vmatpush3.bf16.msra.mxu1 %v772_v58 }
  0xc0   :  { %3981 = vmatprep.subr.bf16.mxu0 %v348_v63  ;;  %4027 = vmatprep.subr.bf16.mxu1 %v774_v62 }
  0xc1   :  { %v952_v4 = vpop.permute.xlu0 %951  ;;  %2039 = vrot.lane.b32.xlu0 %v4773_v34, %s4559_s17  ;;  %v1377_v7 = vpop.permute.xlu1 %1376 }
  0xc2   :  { %2460 = vrot.lane.b32.xlu1 %v4778_v35, %s4560_s18 }
  0xc3   :  { %3982 = vmatpush3.bf16.msra.mxu0 %v348_v63  ;;  %4028 = vmatpush3.bf16.msra.mxu1 %v774_v62 }
  0xc4   :  { %4029 = vmatprep.subr.bf16.mxu1 %v776_v1  ;;  %4035 = vmatprep.subr.bf16.mxu0 %v950_v2 }
  0xc5   :  { %v954_v9 = vpop.permute.xlu0 %953  ;;  %2632 = vrot.lane.b32.xlu0 %v4844_v5, %s4559_s17  ;;  %v1379_v13 = vpop.permute.xlu1 %1378 }
  0xc6   :  { %3984 = vmatmul.mubr.msk.bf16.vlgmr.msra.gmra.mrb[0].mxu0 %vm115_vm0, %v4470_v6  ;;  %3053 = vrot.lane.b32.xlu1 %v4851_v8, %s4560_s18 }
  0xc7   :  { %4030 = vmatpush3.bf16.msra.mxu1 %v776_v1  ;;  %4036 = vmatpush3.bf16.msra.mxu0 %v950_v2 }
  0xc8   :  { %4037 = vmatprep.subr.bf16.mxu0 %v952_v4  ;;  %4083 = vmatprep.subr.bf16.mxu1 %v1375_v3 }
  0xc9   :  { %v956_v15 = vpop.permute.xlu0 %955  ;;  %4043 = vmatprep.mubr.msk.bf16.mxu0 %vm115_vm0, %v4474_v10  ;;  %2634 = vrot.lane.b32.xlu0 %v4858_v11, %s4559_s17  ;;  %v1381_v18 = vpop.permute.xlu1 %1380 }
  0xca   :  { %4032 = vmatmul.mubr.msk.bf16.vlgmr.msra.gmra.mrb[0].mxu1 %vm115_vm0, %v4472_v12  ;;  %3055 = vrot.lane.b32.xlu1 %v4866_v14, %s4560_s18  ;;  %v4498_v12 = vld [vmem:[#allocation2 + $0x18] sm:$0xff]  }
  0xcb   :  { %4038 = vmatpush3.bf16.msra.mxu0 %v952_v4  ;;  %4084 = vmatpush3.bf16.msra.mxu1 %v1375_v3  ;;  %v4497_v3 = vld [vmem:[#allocation2 + $0x10] sm:$0xff]   ;;  %v4496_v4 = vld [vmem:[#allocation2 + $0xf8] sm:$0xff]  }
  0xcc   :  { %4039 = vmatprep.subr.bf16.mxu0 %v954_v9  ;;  %4085 = vmatprep.subr.bf16.mxu1 %v1377_v7 }
  0xcd   :  { %v1027_v21 = vpop.permute.xlu0 %1026  ;;  %4091 = vmatprep.mubr.msk.bf16.mxu1 %vm115_vm0, %v4478_v16  ;;  %2636 = vrot.lane.b32.xlu0 %v4874_v17, %s4559_s17  ;;  %v1452_v23 = vpop.permute.xlu1 %1451  ;;  %v4500_v16 = vld [vmem:[#allocation2 + $0x58] sm:$0xff]  }
  0xce   :  { %3057 = vrot.lane.b32.xlu1 %v4882_v19, %s4560_s18 }
  0xcf   :  { %4040 = vmatpush3.bf16.msra.mxu0 %v954_v9  ;;  %4086 = vmatpush3.bf16.msra.mxu1 %v1377_v7  ;;  %v4499_v7 = vld [vmem:[#allocation2 + $0x50] sm:$0xff]  }
  0xd0   :  { %4041 = vmatprep.subr.bf16.mxu0 %v956_v15  ;;  %4087 = vmatprep.subr.bf16.mxu1 %v1379_v13 }
  0xd1   :  { %v1029_v26 = vpop.permute.xlu0 %1028  ;;  %2638 = vrot.lane.b32.xlu0 %v4890_v22, %s4559_s17  ;;  %v1454_v28 = vpop.permute.xlu1 %1453 }
  0xd2   :  { %3059 = vrot.lane.b32.xlu1 %v4897_v25, %s4560_s18 }
  0xd3   :  { %4042 = vmatpush3.bf16.msra.mxu0 %v956_v15  ;;  %4088 = vmatpush3.bf16.msra.mxu1 %v1379_v13  ;;  %v4501_v15 = vld [vmem:[#allocation2] sm:$0xff]  }
  0xd4   :  { %4047 = vmatprep.subr.bf16.mxu0 %v1027_v21  ;;  %4089 = vmatprep.subr.bf16.mxu1 %v1381_v18 }
  0xd5   :  { %v1031_v30 = vpop.permute.xlu0 %1030  ;;  %2709 = vrot.lane.b32.xlu0 %v4844_v5, %s4558_s16  ;;  %v1456_v33 = vpop.permute.xlu1 %1455 }
  0xd6   :  { %4044 = vmatmul.mubr.msk.bf16.vlgmr.msra.gmra.mrb[4].mxu0 %vm115_vm0, %v4477_v27  ;;  %3130 = vrot.lane.b32.xlu1 %v4851_v8, %s4559_s17  ;;  %v4505_v27 = vld [vmem:[#allocation2 + $0x20] sm:$0xff]  }
  0xd7   :  { %4048 = vmatpush3.bf16.msra.mxu0 %v1027_v21  ;;  %4090 = vmatpush3.bf16.msra.mxu1 %v1381_v18 }
  0xd8   :  { %4049 = vmatprep.subr.bf16.mxu0 %v1029_v26  ;;  %4095 = vmatprep.subr.bf16.mxu1 %v1452_v23 }
  0xd9   :  { %v1033_v35 = vpop.permute.xlu0 %1032  ;;  %4055 = vmatprep.mubr.msk.bf16.mxu0 %vm115_vm0, %v4485_v31  ;;  %2711 = vrot.lane.b32.xlu0 %v4858_v11, %s4558_s16  ;;  %v1458_v37 = vpop.permute.xlu1 %1457  ;;  %v4507_v31 = vld [vmem:[#allocation2 + $0x60] sm:$0xff]  }
  0xda   :  { %4092 = vmatmul.mubr.msk.bf16.vlgmr.msra.gmra.mrb[4].mxu1 %vm115_vm0, %v4481_v32  ;;  %3132 = vrot.lane.b32.xlu1 %v4866_v14, %s4559_s17 }
  0xdb   :  { %4050 = vmatpush3.bf16.msra.mxu0 %v1029_v26  ;;  %4096 = vmatpush3.bf16.msra.mxu1 %v1452_v23 }
  0xdc   :  { %4051 = vmatprep.subr.bf16.mxu0 %v1031_v30  ;;  %4097 = vmatprep.subr.bf16.mxu1 %v1454_v28 }
  0xdd   :  { %v1109_v38 = vpop.permute.xlu0 %1108  ;;  %4103 = vmatprep.mubr.msk.bf16.mxu1 %vm115_vm0, %v4487_v36  ;;  %2713 = vrot.lane.b32.xlu0 %v4874_v17, %s4558_s16  ;;  %v1534_v39 = vpop.permute.xlu1 %1533  ;;  %v4506_v36 = vld [vmem:[#allocation2 + $0x28] sm:$0xff]  }
  0xde   :  { %3134 = vrot.lane.b32.xlu1 %v4882_v19, %s4559_s17 }
  0xdf   :  { %4052 = vmatpush3.bf16.msra.mxu0 %v1031_v30  ;;  %4098 = vmatpush3.bf16.msra.mxu1 %v1454_v28  ;;  %v4504_v28 = vld [vmem:[#allocation2 + $0x48] sm:$0xff]  }
  0xe0   :  { %4053 = vmatprep.subr.bf16.mxu0 %v1033_v35  ;;  %4099 = vmatprep.subr.bf16.mxu1 %v1456_v33 }
  0xe1   :  { %v1111_v40 = vpop.permute.xlu0 %1110  ;;  %2715 = vrot.lane.b32.xlu0 %v4890_v22, %s4558_s16  ;;  %v1536_v42 = vpop.permute.xlu1 %1535 }
  0xe2   :  { %3136 = vrot.lane.b32.xlu1 %v4897_v25, %s4559_s17 }
  0xe3   :  { %4054 = vmatpush3.bf16.msra.mxu0 %v1033_v35  ;;  %4100 = vmatpush3.bf16.msra.mxu1 %v1456_v33 }
  0xe4   :  { %4059 = vmatprep.subr.bf16.mxu0 %v1109_v38  ;;  %4101 = vmatprep.subr.bf16.mxu1 %v1458_v37 }
  0xe5   :  { %v1113_v43 = vpop.permute.xlu0 %1112  ;;  %2790 = vrot.lane.b32.xlu0 %v4844_v5, %s4561_s9  ;;  %v1538_v46 = vpop.permute.xlu1 %1537 }
  0xe6   :  { %4056 = vmatmul.mubr.msk.bf16.vlgmr.msra.gmra.mrb[4].mxu0 %vm115_vm0, %v4486_v41  ;;  %3211 = vrot.lane.b32.xlu1 %v4851_v8, %s4562_s10 }
  0xe7   :  { %4060 = vmatpush3.bf16.msra.mxu0 %v1109_v38  ;;  %4102 = vmatpush3.bf16.msra.mxu1 %v1458_v37 }
  0xe8   :  { %4061 = vmatprep.subr.bf16.mxu0 %v1111_v40  ;;  %4107 = vmatprep.subr.bf16.mxu1 %v1534_v39 }
  0xe9   :  { %v1115_v47 = vpop.permute.xlu0 %1114  ;;  %4067 = vmatprep.mubr.msk.bf16.mxu0 %vm115_vm0, %v4489_v44  ;;  %2792 = vrot.lane.b32.xlu0 %v4858_v11, %s4561_s9  ;;  %v1540_v49 = vpop.permute.xlu1 %1539 }
  0xea   :  { %4104 = vmatmul.mubr.msk.bf16.vlgmr.msra.gmra.mrb[4].mxu1 %vm115_vm0, %v4488_v45  ;;  %3213 = vrot.lane.b32.xlu1 %v4866_v14, %s4562_s10 }
  0xeb   :  { %4062 = vmatpush3.bf16.msra.mxu0 %v1111_v40  ;;  %4108 = vmatpush3.bf16.msra.mxu1 %v1534_v39  ;;  %v4509_v39 = vld [vmem:[#allocation2 + $0x30] sm:$0xff]   ;;  %v4508_v40 = vld [vmem:[#allocation2 + $0x68] sm:$0xff]  }
  0xec   :  { %4063 = vmatprep.subr.bf16.mxu0 %v1113_v43  ;;  %4109 = vmatprep.subr.bf16.mxu1 %v1536_v42 }
  0xed   :  { %v1195_v50 = vpop.permute.xlu0 %1194  ;;  %4115 = vmatprep.mubr.msk.bf16.mxu1 %vm115_vm0, %v4491_v48  ;;  %2794 = vrot.lane.b32.xlu0 %v4874_v17, %s4561_s9  ;;  %v1620_v51 = vpop.permute.xlu1 %1619  ;;  %v4510_v48 = vld [vmem:[#allocation2 + $0x38] sm:$0xff]  }
  0xee   :  { %3215 = vrot.lane.b32.xlu1 %v4882_v19, %s4562_s10 }
  0xef   :  { %4064 = vmatpush3.bf16.msra.mxu0 %v1113_v43  ;;  %4110 = vmatpush3.bf16.msra.mxu1 %v1536_v42  ;;  %v4511_v43 = vld [vmem:[#allocation2 + $0x70] sm:$0xff]  }
  0xf0   :  { %4065 = vmatprep.subr.bf16.mxu0 %v1115_v47  ;;  %4111 = vmatprep.subr.bf16.mxu1 %v1538_v46 }
  0xf1   :  { %v1197_v52 = vpop.permute.xlu0 %1196  ;;  %2796 = vrot.lane.b32.xlu0 %v4890_v22, %s4561_s9  ;;  %v1622_v54 = vpop.permute.xlu1 %1621 }
  0xf2   :  { %3217 = vrot.lane.b32.xlu1 %v4897_v25, %s4562_s10 }
  0xf3   :  { %4066 = vmatpush3.bf16.msra.mxu0 %v1115_v47  ;;  %4112 = vmatpush3.bf16.msra.mxu1 %v1538_v46 }
  0xf4   :  { %4071 = vmatprep.subr.bf16.mxu0 %v1195_v50  ;;  %4113 = vmatprep.subr.bf16.mxu1 %v1540_v49 }
  0xf5   :  { %v1199_v55 = vpop.permute.xlu0 %1198  ;;  %2875 = vrot.lane.b32.xlu0 %v4844_v5, %s4562_s10  ;;  %v1624_v58 = vpop.permute.xlu1 %1623 }
  0xf6   :  { %4068 = vmatmul.mubr.msk.bf16.vlgmr.msra.gmra.mrb[4].mxu0 %vm115_vm0, %v4490_v53  ;;  %3296 = vrot.lane.b32.xlu1 %v4851_v8, %s4563_s11 }
  0xf7   :  { %4072 = vmatpush3.bf16.msra.mxu0 %v1195_v50  ;;  %4114 = vmatpush3.bf16.msra.mxu1 %v1540_v49 }
  0xf8   :  { %4073 = vmatprep.subr.bf16.mxu0 %v1197_v52  ;;  %4119 = vmatprep.subr.bf16.mxu1 %v1620_v51 }
  0xf9   :  { %v1201_v59 = vpop.permute.xlu0 %1200  ;;  %4079 = vmatprep.mubr.msk.bf16.mxu0 %vm115_vm0, %v4493_v56  ;;  %2877 = vrot.lane.b32.xlu0 %v4858_v11, %s4562_s10 }
  0xfa   :  { %4116 = vmatmul.mubr.msk.bf16.vlgmr.msra.gmra.mrb[4].mxu1 %vm115_vm0, %v4492_v57  ;;  %v1626_v61 = vpop.permute.xlu1 %1625  ;;  %3298 = vrot.lane.b32.xlu1 %v4866_v14, %s4563_s11 }
  0xfb   :  { %4120 = vmatpush3.bf16.msra.mxu1 %v1620_v51  ;;  %4074 = vmatpush3.bf16.msra.mxu0 %v1197_v52  ;;  %v4513_v51 = vld [vmem:[#allocation2 + $0x90] sm:$0xff]   ;;  %v4512_v52 = vld [vmem:[#allocation2 + $0x78] sm:$0xff]  }
  0xfc   :  { %4075 = vmatprep.subr.bf16.mxu0 %v1199_v55  ;;  %4121 = vmatprep.subr.bf16.mxu1 %v1622_v54 }
  0xfd   :  { %4127 = vmatprep.mubr.msk.bf16.mxu1 %vm115_vm0, %v4495_v60  ;;  %2879 = vrot.lane.b32.xlu0 %v4874_v17, %s4562_s10  ;;  %v4514_v60 = vld [vmem:[#allocation2 + $0x98] sm:$0xff]  }
  0xfe   :  { %v1799_v62 = vpop.permute.xlu0 %1798  ;;  %3300 = vrot.lane.b32.xlu1 %v4882_v19, %s4563_s11  ;;  %v4503_v19 = vld [vmem:[#allocation2 + $0x40] sm:$0xff]  }
  0xff   :  { %4122 = vmatpush3.bf16.msra.mxu1 %v1622_v54  ;;  %4076 = vmatpush3.bf16.msra.mxu0 %v1199_v55  ;;  %v2212_v63 = vpop.permute.xlu1 %2211  ;;  %v4515_v55 = vld [vmem:[#allocation2 + $0xd0] sm:$0xff]  }
 0x100   :  { %4077 = vmatprep.subr.bf16.mxu0 %v1201_v59  ;;  %4123 = vmatprep.subr.bf16.mxu1 %v1624_v58 }
 0x101   :  { %2881 = vrot.lane.b32.xlu0 %v4890_v22, %s4562_s10 }
 0x102   :  { %v1801_v1 = vpop.permute.xlu0 %1800  ;;  %3302 = vrot.lane.b32.xlu1 %v4897_v25, %s4563_s11  ;;  %v4502_v25 = vld [vmem:[#allocation2 + $0x8] sm:$0xff]  }
 0x103   :  { %4124 = vmatpush3.bf16.msra.mxu1 %v1624_v58  ;;  %4078 = vmatpush3.bf16.msra.mxu0 %v1201_v59  ;;  %v2214_v2 = vpop.permute.xlu1 %2213 }
 0x104   :  { %4125 = vmatprep.subr.bf16.mxu1 %v1626_v61  ;;  %4131 = vmatprep.subr.bf16.mxu0 %v1799_v62 }
 0x106   :  { %4080 = vmatmul.mubr.msk.bf16.vlgmr.msra.gmra.mrb[4].mxu0 %vm115_vm0, %v4494_v0  ;;  %v4516_v0 = vld [vmem:[#allocation2 + $0xd8] sm:$0xff]  }
 0x107   :  { %4126 = vmatpush3.bf16.msra.mxu1 %v1626_v61  ;;  %4132 = vmatpush3.bf16.msra.mxu0 %v1799_v62  ;;  %v1803_v5 = vpop.permute.xlu0 %1802  ;;  %v2216_v6 = vpop.permute.xlu1 %2215 }
 0x108   :  { %4133 = vmatprep.subr.bf16.mxu0 %v1801_v1  ;;  %4179 = vmatprep.subr.bf16.mxu1 %v2212_v63 }
 0x109   :  { %4139 = vmatprep.mubr.msk.bf16.mxu0 %vm115_vm0, %v4497_v3  ;;  %v4519_v3 = vld [vmem:[#allocation2 + $0xc0] sm:$0xff]  }
 0x10a   :  { %4128 = vmatmul.mubr.msk.bf16.vlgmr.msra.gmra.mrb[4].mxu1 %vm115_vm0, %v4496_v4 }
 0x10b   :  { %4180 = vmatpush3.bf16.msra.mxu1 %v2212_v63  ;;  %4134 = vmatpush3.bf16.msra.mxu0 %v1801_v1  ;;  %v1805_v8 = vpop.permute.xlu0 %1804  ;;  %v2218_v9 = vpop.permute.xlu1 %2217  ;;  %v4517_v63 = vld [vmem:[#allocation2 + $0x80] sm:$0xff]  }
 0x10c   :  { %4135 = vmatprep.subr.bf16.mxu0 %v1803_v5  ;;  %4181 = vmatprep.subr.bf16.mxu1 %v2214_v2 }
 0x10d   :  { %4187 = vmatprep.mubr.msk.bf16.mxu1 %vm115_vm0, %v4499_v7  ;;  %v4518_v7 = vld [vmem:[#allocation2 + $0x88] sm:$0xff]  }
 0x10f   :  { %4182 = vmatpush3.bf16.msra.mxu1 %v2214_v2  ;;  %4136 = vmatpush3.bf16.msra.mxu0 %v1803_v5  ;;  %v2289_v10 = vpop.permute.xlu0 %2288 }
 0x110   :  { %4137 = vmatprep.subr.bf16.mxu0 %v1805_v8  ;;  %4183 = vmatprep.subr.bf16.mxu1 %v2216_v6  ;;  %v2291_v11 = vpop.permute.xlu1 %2290 }
 0x113   :  { %4138 = vmatpush3.bf16.msra.mxu0 %v1805_v8  ;;  %4184 = vmatpush3.bf16.msra.mxu1 %v2216_v6  ;;  %v2293_v13 = vpop.permute.xlu0 %2292 }
 0x114   :  { %4143 = vmatprep.subr.bf16.mxu0 %v4730_v20  ;;  %4185 = vmatprep.subr.bf16.mxu1 %v2218_v9  ;;  %v2295_v14 = vpop.permute.xlu1 %2294 }
 0x116   :  { %4140 = vmatmul.mubr.msk.bf16.vlgmr.msra.gmra.mrb[8].mxu0 %vm115_vm0, %v4498_v12 }
 0x117   :  { %4144 = vmatpush3.bf16.msra.mxu0 %v4730_v20  ;;  %4186 = vmatpush3.bf16.msra.mxu1 %v2218_v9  ;;  %v1949_v17 = vpop.permute.xlu0 %1948 }
 0x118   :  { %4145 = vmatprep.subr.bf16.mxu0 %v4742_v24  ;;  %4191 = vmatprep.subr.bf16.mxu1 %v2289_v10  ;;  %v2370_v18 = vpop.permute.xlu1 %2369 }
 0x119   :  { %4151 = vmatprep.mubr.msk.bf16.mxu0 %vm115_vm0, %v4501_v15 }
 0x11a   :  { %4188 = vmatmul.mubr.msk.bf16.vlgmr.msra.gmra.mrb[8].mxu1 %vm115_vm0, %v4500_v16 }
 0x11b   :  { %4146 = vmatpush3.bf16.msra.mxu0 %v4742_v24  ;;  %4192 = vmatpush3.bf16.msra.mxu1 %v2289_v10  ;;  %v1951_v21 = vpop.permute.xlu0 %1950  ;;  %v4521_v10 = vld [vmem:[#allocation2 + $0xa0] sm:$0xff]  }
 0x11c   :  { %4147 = vmatprep.subr.bf16.mxu0 %v4758_v29  ;;  %4193 = vmatprep.subr.bf16.mxu1 %v2291_v11  ;;  %v2372_v22 = vpop.permute.xlu1 %2371 }
 0x11d   :  { %4199 = vmatprep.mubr.msk.bf16.mxu1 %vm115_vm0, %v4503_v19 }
 0x11f   :  { %4148 = vmatpush3.bf16.msra.mxu0 %v4758_v29  ;;  %4194 = vmatpush3.bf16.msra.mxu1 %v2291_v11  ;;  %v1953_v20 = vpop.permute.xlu0 %1952  ;;  %v4520_v11 = vld [vmem:[#allocation2 + $0xc8] sm:$0xff]  }
 0x120   :  { %4149 = vmatprep.subr.bf16.mxu0 %v4773_v34  ;;  %4195 = vmatprep.subr.bf16.mxu1 %v2293_v13  ;;  %v2374_v23 = vpop.permute.xlu1 %2373 }
 0x123   :  { %4150 = vmatpush3.bf16.msra.mxu0 %v4773_v34  ;;  %4196 = vmatpush3.bf16.msra.mxu1 %v2293_v13  ;;  %v1955_v24 = vpop.permute.xlu0 %1954  ;;  %v4523_v13 = vld [vmem:[#allocation2 + $0xe0] sm:$0xff]  }
 0x124   :  { %4155 = vmatprep.subr.bf16.mxu0 %v1949_v17  ;;  %4197 = vmatprep.subr.bf16.mxu1 %v2295_v14  ;;  %v2376_v26 = vpop.permute.xlu1 %2375 }
 0x126   :  { %4152 = vmatmul.mubr.msk.bf16.vlgmr.msra.gmra.mrb[8].mxu0 %vm115_vm0, %v4502_v25  ;;  %v4527_v25 = vld [vmem:[#allocation2 + $0xf0] sm:$0xff]  }
 0x127   :  { %4156 = vmatpush3.bf16.msra.mxu0 %v1949_v17  ;;  %4198 = vmatpush3.bf16.msra.mxu1 %v2295_v14  ;;  %v2034_v29 = vpop.permute.xlu0 %2033  ;;  %v4522_v17 = vld [vmem:[#allocation2 + $0xa8] sm:$0xff]  }
 0x128   :  { %4157 = vmatprep.subr.bf16.mxu0 %v1951_v21  ;;  %4203 = vmatprep.subr.bf16.mxu1 %v2370_v18  ;;  %v2455_v30 = vpop.permute.xlu1 %2454 }
 0x129   :  { %4163 = vmatprep.mubr.msk.bf16.mxu0 %vm115_vm0, %v4505_v27 }
 0x12a   :  { %4200 = vmatmul.mubr.msk.bf16.vlgmr.msra.gmra.mrb[8].mxu1 %vm115_vm0, %v4504_v28 }
 0x12b   :  { %4158 = vmatpush3.bf16.msra.mxu0 %v1951_v21  ;;  %4204 = vmatpush3.bf16.msra.mxu1 %v2370_v18  ;;  %v2036_v34 = vpop.permute.xlu0 %2035  ;;  %v37_v18 = vlaneseq  ;;  %v4525_v21 = vld [vmem:[#allocation2 + $0xb0] sm:$0xff]  }
 0x12c   :  { %4159 = vmatprep.subr.bf16.mxu0 %v1953_v20  ;;  %4205 = vmatprep.subr.bf16.mxu1 %v2372_v22  ;;  %v2457_v32 = vpop.permute.xlu1 %2456 }
 0x12d   :  { %4211 = vmatprep.mubr.msk.bf16.mxu1 %vm115_vm0, %v4507_v31 }
 0x12f   :  { %4160 = vmatpush3.bf16.msra.mxu0 %v1953_v20  ;;  %4206 = vmatpush3.bf16.msra.mxu1 %v2372_v22  ;;  %v2038_v33 = vpop.permute.xlu0 %2037  ;;  %v4524_v22 = vld [vmem:[#allocation2 + $0xe8] sm:$0xff]   ;;  %v38_v20 = vand.u32 127, %v37_v18 }
 0x130   :  { %4161 = vmatprep.subr.bf16.mxu0 %v1955_v24  ;;  %4207 = vmatprep.subr.bf16.mxu1 %v2374_v23  ;;  %v2459_v35 = vpop.permute.xlu1 %2458 }
 0x133   :  { %4162 = vmatpush3.bf16.msra.mxu0 %v1955_v24  ;;  %4208 = vmatpush3.bf16.msra.mxu1 %v2374_v23  ;;  %v2040_v37 = vpop.permute.xlu0 %2039 }
 0x134   :  { %4167 = vmatprep.subr.bf16.mxu0 %v2034_v29  ;;  %4209 = vmatprep.subr.bf16.mxu1 %v2376_v26  ;;  %v2461_v38 = vpop.permute.xlu1 %2460 }
 0x136   :  { %4164 = vmatmul.mubr.msk.bf16.vlgmr.msra.gmra.mrb[8].mxu0 %vm115_vm0, %v4506_v36 }
 0x137   :  { %4168 = vmatpush3.bf16.msra.mxu0 %v2034_v29  ;;  %4210 = vmatpush3.bf16.msra.mxu1 %v2376_v26  ;;  %v2633_v41 = vpop.permute.xlu0 %2632  ;;  %v5002_v24 = vmul.u32.u64.low 2863311531, %v38_v20  ;;  %v5003_v26 = vmul.u32.u64.high 2863311531, %v38_v20, %v5002_v24 }
 0x138   :  { %4169 = vmatprep.subr.bf16.mxu0 %v2036_v34  ;;  %4215 = vmatprep.subr.bf16.mxu1 %v2455_v30  ;;  %v3054_v42 = vpop.permute.xlu1 %3053 }
 0x139   :  { %4175 = vmatprep.mubr.msk.bf16.mxu0 %vm115_vm0, %v4509_v39  ;;  %v45_v31 = vshrl.u32 %v5003_v26, 2 }
 0x13a   :  { %4212 = vmatmul.mubr.msk.bf16.vlgmr.msra.gmra.mrb[8].mxu1 %vm115_vm0, %v4508_v40 }
 0x13b   :  { %4170 = vmatpush3.bf16.msra.mxu0 %v2036_v34  ;;  %4216 = vmatpush3.bf16.msra.mxu1 %v2455_v30  ;;  %v2635_v44 = vpop.permute.xlu0 %2634  ;;  %v4526_v30 = vld [vmem:[#allocation2 + $0xb8] sm:$0xff]  }
 0x13c   :  { %4171 = vmatprep.subr.bf16.mxu0 %v2038_v33  ;;  %4217 = vmatprep.subr.bf16.mxu1 %v2457_v32  ;;  %v3056_v45 = vpop.permute.xlu1 %3055  ;;  %v4528_v34 = vld [vmem:[#allocation2 + $0xf8] sm:$0xff]  }
 0x13d   :  { %4223 = vmatprep.mubr.msk.bf16.mxu1 %vm115_vm0, %v4511_v43 }
 0x13f   :  { %4172 = vmatpush3.bf16.msra.mxu0 %v2038_v33  ;;  %4218 = vmatpush3.bf16.msra.mxu1 %v2457_v32  ;;  %v2637_v46 = vpop.permute.xlu0 %2636  ;;  %v46_v32 = vmul.u32 6, %v45_v31 }
 0x140   :  { %4173 = vmatprep.subr.bf16.mxu0 %v2040_v37  ;;  %4219 = vmatprep.subr.bf16.mxu1 %v2459_v35  ;;  %v3058_v47 = vpop.permute.xlu1 %3057 }
 0x141   :  { %v47_v33 = vsub.s32 %v38_v20, %v46_v32 }
 0x143   :  { %4174 = vmatpush3.bf16.msra.mxu0 %v2040_v37  ;;  %4220 = vmatpush3.bf16.msra.mxu1 %v2459_v35  ;;  %v2639_v49 = vpop.permute.xlu0 %2638  ;;  %vm50_vm1 = vcmp.ne.s32.totalorder %v47_v33, 0  ;;  %vm51_vm2 = vcmp.lt.s32.totalorder %v47_v33, 0  ;;  %v53_v35 = vadd.s32 6, %v47_v33 }
 0x144   :  { %4221 = vmatprep.subr.bf16.mxu1 %v2461_v38  ;;  %4227 = vmatprep.subr.bf16.mxu0 %v2633_v41  ;;  %v3060_v50 = vpop.permute.xlu1 %3059  ;;  %vm52_vm3 = vmand %vm51_vm2, %vm50_vm1 }
 0x145   :  { %v54_v36 = vsel %vm52_vm3, %v53_v35, %v47_v33 }
 0x146   :  { %4176 = vmatmul.mubr.msk.bf16.vlgmr.msra.gmra.mrb[8].mxu0 %vm115_vm0, %v4510_v48  ;;  %vm5009_vm4 = vcmp.lt.s32.totalorder %v54_v36, 4 }
 0x147   :  { %4222 = vmatpush3.bf16.msra.mxu1 %v2461_v38  ;;  %4228 = vmatpush3.bf16.msra.mxu0 %v2633_v41  ;;  %v2710_v53 = vpop.permute.xlu0 %2709 }
 0x148   :  { %4229 = vmatprep.subr.bf16.mxu0 %v2635_v44  ;;  %4275 = vmatprep.subr.bf16.mxu1 %v3054_v42  ;;  %v3131_v54 = vpop.permute.xlu1 %3130 }
 0x149   :  { %4235 = vmatprep.mubr.msk.bf16.mxu0 %vm115_vm0, %v4513_v51 }
 0x14a   :  { %4224 = vmatmul.mubr.msk.bf16.vlgmr.msra.gmra.mrb[8].mxu1 %vm115_vm0, %v4512_v52 }
 0x14b   :  { %4230 = vmatpush3.bf16.msra.mxu0 %v2635_v44  ;;  %4276 = vmatpush3.bf16.msra.mxu1 %v3054_v42  ;;  %v2712_v56 = vpop.permute.xlu0 %2711 }
 0x14c   :  { %4231 = vmatprep.subr.bf16.mxu0 %v2637_v46  ;;  %4277 = vmatprep.subr.bf16.mxu1 %v3056_v45  ;;  %v3133_v57 = vpop.permute.xlu1 %3132 }
 0x14d   :  { %4283 = vmatprep.mubr.msk.bf16.mxu1 %vm115_vm0, %v4515_v55 }
 0x14f   :  { %4232 = vmatpush3.bf16.msra.mxu0 %v2637_v46  ;;  %4278 = vmatpush3.bf16.msra.mxu1 %v3056_v45  ;;  %v2714_v58 = vpop.permute.xlu0 %2713 }
 0x150   :  { %4233 = vmatprep.subr.bf16.mxu0 %v2639_v49  ;;  %4279 = vmatprep.subr.bf16.mxu1 %v3058_v47  ;;  %v3135_v59 = vpop.permute.xlu1 %3134 }
 0x153   :  { %4234 = vmatpush3.bf16.msra.mxu0 %v2639_v49  ;;  %4280 = vmatpush3.bf16.msra.mxu1 %v3058_v47  ;;  %v2716_v61 = vpop.permute.xlu0 %2715 }
 0x154   :  { %4239 = vmatprep.subr.bf16.mxu0 %v2710_v53  ;;  %4281 = vmatprep.subr.bf16.mxu1 %v3060_v50  ;;  %v3137_v62 = vpop.permute.xlu1 %3136 }
 0x156   :  { %4236 = vmatmul.mubr.msk.bf16.vlgmr.msra.gmra.mrb[12].mxu0 %vm115_vm0, %v4514_v60 }
 0x157   :  { %4240 = vmatpush3.bf16.msra.mxu0 %v2710_v53  ;;  %4282 = vmatpush3.bf16.msra.mxu1 %v3060_v50  ;;  %v2791_v1 = vpop.permute.xlu0 %2790 }
 0x158   :  { %4241 = vmatprep.subr.bf16.mxu0 %v2712_v56  ;;  %4287 = vmatprep.subr.bf16.mxu1 %v3131_v54  ;;  %v3212_v2 = vpop.permute.xlu1 %3211 }
 0x159   :  { %4247 = vmatprep.mubr.msk.bf16.mxu0 %vm115_vm0, %v4517_v63 }
 0x15a   :  { %4284 = vmatmul.mubr.msk.bf16.vlgmr.msra.gmra.mrb[12].mxu1 %vm115_vm0, %v4516_v0 }
 0x15b   :  { %4242 = vmatpush3.bf16.msra.mxu0 %v2712_v56  ;;  %4288 = vmatpush3.bf16.msra.mxu1 %v3131_v54  ;;  %v2793_v4 = vpop.permute.xlu0 %2792 }
 0x15c   :  { %4243 = vmatprep.subr.bf16.mxu0 %v2714_v58  ;;  %4289 = vmatprep.subr.bf16.mxu1 %v3133_v57  ;;  %v3214_v5 = vpop.permute.xlu1 %3213 }
 0x15d   :  { %4295 = vmatprep.mubr.msk.bf16.mxu1 %vm115_vm0, %v4519_v3 }
 0x15f   :  { %4244 = vmatpush3.bf16.msra.mxu0 %v2714_v58  ;;  %4290 = vmatpush3.bf16.msra.mxu1 %v3133_v57  ;;  %v2795_v6 = vpop.permute.xlu0 %2794 }
 0x160   :  { %4245 = vmatprep.subr.bf16.mxu0 %v2716_v61  ;;  %4291 = vmatprep.subr.bf16.mxu1 %v3135_v59  ;;  %v3216_v8 = vpop.permute.xlu1 %3215 }
 0x163   :  { %4246 = vmatpush3.bf16.msra.mxu0 %v2716_v61  ;;  %4292 = vmatpush3.bf16.msra.mxu1 %v3135_v59  ;;  %v2797_v9 = vpop.permute.xlu0 %2796 }
 0x164   :  { %4251 = vmatprep.subr.bf16.mxu0 %v2791_v1  ;;  %4293 = vmatprep.subr.bf16.mxu1 %v3137_v62  ;;  %v3218_v12 = vpop.permute.xlu1 %3217 }
 0x166   :  { %4248 = vmatmul.mubr.msk.bf16.vlgmr.msra.gmra.mrb[12].mxu0 %vm115_vm0, %v4518_v7 }
 0x167   :  { %4252 = vmatpush3.bf16.msra.mxu0 %v2791_v1  ;;  %4294 = vmatpush3.bf16.msra.mxu1 %v3137_v62  ;;  %v2876_v14 = vpop.permute.xlu0 %2875 }
 0x168   :  { %4253 = vmatprep.subr.bf16.mxu0 %v2793_v4  ;;  %4299 = vmatprep.subr.bf16.mxu1 %v3212_v2  ;;  %v3297_v15 = vpop.permute.xlu1 %3296 }
 0x169   :  { %4259 = vmatprep.mubr.msk.bf16.mxu0 %vm115_vm0, %v4521_v10 }
 0x16a   :  { %4296 = vmatmul.mubr.msk.bf16.vlgmr.msra.gmra.mrb[12].mxu1 %vm115_vm0, %v4520_v11 }
 0x16b   :  { %4254 = vmatpush3.bf16.msra.mxu0 %v2793_v4  ;;  %4300 = vmatpush3.bf16.msra.mxu1 %v3212_v2  ;;  %v2878_v16 = vpop.permute.xlu0 %2877 }
 0x16c   :  { %4255 = vmatprep.subr.bf16.mxu0 %v2795_v6  ;;  %4301 = vmatprep.subr.bf16.mxu1 %v3214_v5  ;;  %v3299_v19 = vpop.permute.xlu1 %3298 }
 0x16d   :  { %4307 = vmatprep.mubr.msk.bf16.mxu1 %vm115_vm0, %v4523_v13 }
 0x16f   :  { %4256 = vmatpush3.bf16.msra.mxu0 %v2795_v6  ;;  %4302 = vmatpush3.bf16.msra.mxu1 %v3214_v5  ;;  %v2880_v23 = vpop.permute.xlu0 %2879 }
 0x170   :  { %4257 = vmatprep.subr.bf16.mxu0 %v2797_v9  ;;  %4303 = vmatprep.subr.bf16.mxu1 %v3216_v8  ;;  %v3301_v27 = vpop.permute.xlu1 %3300 }
 0x173   :  { %4258 = vmatpush3.bf16.msra.mxu0 %v2797_v9  ;;  %4304 = vmatpush3.bf16.msra.mxu1 %v3216_v8  ;;  %v2882_v28 = vpop.permute.xlu0 %2881 }
 0x174   :  { %4263 = vmatprep.subr.bf16.mxu0 %v2876_v14  ;;  %4305 = vmatprep.subr.bf16.mxu1 %v3218_v12  ;;  %v3303_v29 = vpop.permute.xlu1 %3302 }
 0x176   :  { %4260 = vmatmul.mubr.msk.bf16.vlgmr.msra.gmra.mrb[12].mxu0 %vm115_vm0, %v4522_v17 }
 0x177   :  { %4264 = vmatpush3.bf16.msra.mxu0 %v2876_v14  ;;  %4306 = vmatpush3.bf16.msra.mxu1 %v3218_v12 }
 0x178   :  { %4265 = vmatprep.subr.bf16.mxu0 %v2878_v16  ;;  %4311 = vmatprep.subr.bf16.mxu1 %v3297_v15 }
 0x179   :  { %4271 = vmatprep.mubr.msk.bf16.mxu0 %vm115_vm0, %v4525_v21 }
 0x17a   :  { %4308 = vmatmul.mubr.msk.bf16.vlgmr.msra.gmra.mrb[12].mxu1 %vm115_vm0, %v4524_v22 }
 0x17b   :  { %4266 = vmatpush3.bf16.msra.mxu0 %v2878_v16  ;;  %4312 = vmatpush3.bf16.msra.mxu1 %v3297_v15 }
 0x17c   :  { %4267 = vmatprep.subr.bf16.mxu0 %v2880_v23  ;;  %4313 = vmatprep.subr.bf16.mxu1 %v3299_v19 }
 0x17d   :  { %4319 = vmatprep.mubr.msk.bf16.mxu1 %vm115_vm0, %v4527_v25 }
 0x17f   :  { %4268 = vmatpush3.bf16.msra.mxu0 %v2880_v23  ;;  %4314 = vmatpush3.bf16.msra.mxu1 %v3299_v19 }
 0x180   :  { %4269 = vmatprep.subr.bf16.mxu0 %v2882_v28  ;;  %4315 = vmatprep.subr.bf16.mxu1 %v3301_v27 }
 0x183   :  { %4270 = vmatpush3.bf16.msra.mxu0 %v2882_v28  ;;  %4316 = vmatpush3.bf16.msra.mxu1 %v3301_v27 }
 0x184   :  { %4317 = vmatprep.subr.bf16.mxu1 %v3303_v29 }
 0x186   :  { %4272 = vmatmul.mubr.msk.bf16.vlgmr.msra.gmra.mrb[12].mxu0 %vm115_vm0, %v4526_v30 }
 0x187   :  { %4318 = vmatpush3.bf16.msra.mxu1 %v3303_v29 }
 0x18a   :  { %4320 = vmatmul.mubr.msk.bf16.vlgmr.msra.gmra.mrb[12].mxu1 %vm115_vm0, %v4528_v34 }
 0x199   :  { %v3985_v38 = vpop.f32.mrb[0].mxu0 }
 0x19a   :  { %v3717_v39 = vpack.c.bf16 %v3985_v38, %v3985_v38  ;;  %v437_v40 = vsel %vm5009_vm4, %v3985_v38, 0.0  ;;  %v393_v41 = vpop.f32.mrb[1].mxu0 }
 0x19b   :  { %v3715_v42 = vpack.c.bf16 %v393_v41, %v393_v41  ;;  %v3986_v43 = vpop.f32.mrb[2].mxu0  ;;  %v446_v44 = vsel %vm439_vm5, %v437_v40, 0.0  ;;  %v435_v45 = vsel %vm5009_vm4, %v393_v41, 0.0  ;;  %v458_v62 = vmul.f32 %v437_v40, %v437_v40 }
 0x19c   :  { %431 = vst.msk [vmem:[%s5393_s2 + $0x8] sm:$0xf] %vm428_vm6, %v3717_v39  ;;  %v3718_v46 = vpack.c.bf16 %v3986_v43, %v3986_v43  ;;  %447 = vadd.xlane.f32.xlu0 %v446_v44  ;;  %v396_v47 = vpop.f32.mrb[3].mxu0  ;;  %v440_v56 = vsel %vm439_vm5, %v435_v45, 0.0  ;;  %v438_v57 = vsel %vm5009_vm4, %v3986_v43, 0.0  ;;  %v456_v10 = vmul.f32 %v435_v45, %v435_v45 }
 0x19d   :  { %429 = vst.msk [vmem:[%s5393_s2] sm:$0xf] %vm428_vm6, %v3715_v42  ;;  %v3716_v48 = vpack.c.bf16 %v396_v47, %v396_v47  ;;  %v4033_v49 = vpop.f32.mrb[0].mxu1  ;;  %v449_v0 = vsel %vm439_vm5, %v438_v57, 0.0  ;;  %v466_v3 = vsel %vm439_vm5, %v458_v62, 0.0  ;;  %v459_v6 = vmul.f32 %v438_v57, %v438_v57 }
 0x19e   :  { %432 = vst.msk [vmem:[%s5393_s2 + $0xc] sm:$0xf] %vm428_vm6, %v3718_v46  ;;  %v3721_v50 = vpack.c.bf16 %v4033_v49, %v4033_v49  ;;  %v863_v51 = vsel %vm5009_vm4, %v4033_v49, 0.0  ;;  %v821_v52 = vpop.f32.mrb[1].mxu1  ;;  %v436_v9 = vsel %vm5009_vm4, %v396_v47, 0.0  ;;  %v460_v16 = vsel %vm439_vm5, %v456_v10, 0.0 }
 0x19f   :  { %430 = vst.msk [vmem:[%s5393_s2 + $0x4] sm:$0xf] %vm428_vm6, %v3716_v48  ;;  %v3719_v53 = vpack.c.bf16 %v821_v52, %v821_v52  ;;  %v4034_v54 = vpop.f32.mrb[2].mxu1  ;;  %v871_v55 = vsel %vm439_vm5, %v863_v51, 0.0  ;;  %v861_v58 = vsel %vm5009_vm4, %v821_v52, 0.0  ;;  %v883_v2 = vmul.f32 %v863_v51, %v863_v51 }
 0x1a0   :  { %3513 = vst.msk [vmem:[%s5393_s2 + $0x18] sm:$0xf] %vm428_vm6, %v3721_v50  ;;  %v3722_v59 = vpack.c.bf16 %v4034_v54, %v4034_v54  ;;  %872 = vadd.xlane.f32.xlu1 %v871_v55  ;;  %v824_v60 = vpop.f32.mrb[3].mxu1  ;;  %441 = vadd.xlane.f32.xlu0 %v440_v56  ;;  %v865_v63 = vsel %vm439_vm5, %v861_v58, 0.0  ;;  %v864_v1 = vsel %vm5009_vm4, %v4034_v54, 0.0  ;;  %v443_v12 = vsel %vm439_vm5, %v436_v9, 0.0 }
 0x1a1   :  { %3511 = vst.msk [vmem:[%s5393_s2 + $0x10] sm:$0xf] %vm428_vm6, %v3719_v53  ;;  %v3720_v61 = vpack.c.bf16 %v824_v60, %v824_v60  ;;  %v874_v4 = vsel %vm439_vm5, %v864_v1, 0.0  ;;  %v862_v5 = vsel %vm5009_vm4, %v824_v60, 0.0  ;;  %v891_v7 = vsel %vm439_vm5, %v883_v2, 0.0 }
 0x1a2   :  { %3514 = vst.msk [vmem:[%s5393_s2 + $0x1c] sm:$0xf] %vm428_vm6, %v3722_v59  ;;  %v868_v8 = vsel %vm439_vm5, %v862_v5, 0.0  ;;  %v884_v11 = vmul.f32 %v864_v1, %v864_v1  ;;  %v469_v13 = vsel %vm439_vm5, %v459_v6, 0.0  ;;  %v457_v14 = vmul.f32 %v436_v9, %v436_v9 }
 0x1a3   :  { %3512 = vst.msk [vmem:[%s5393_s2 + $0x14] sm:$0xf] %vm428_vm6, %v3720_v61  ;;  %v881_v15 = vmul.f32 %v861_v58, %v861_v58  ;;  %v882_v18 = vmul.f32 %v862_v5, %v862_v5 }
 0x1a4   :  { %866 = vadd.xlane.f32.xlu1 %v865_v63  ;;  %450 = vadd.xlane.f32.xlu0 %v449_v0  ;;  %v894_v17 = vsel %vm439_vm5, %v884_v11, 0.0  ;;  %v463_v21 = vsel %vm439_vm5, %v457_v14, 0.0 }
 0x1a5   :  { %v885_v19 = vsel %vm439_vm5, %v881_v15, 0.0  ;;  %v888_v22 = vsel %vm439_vm5, %v882_v18, 0.0 }
 0x1a8   :  { %467 = vadd.xlane.f32.xlu1 %v466_v3  ;;  %875 = vadd.xlane.f32.xlu0 %v874_v4 }
 0x1ac   :  { %892 = vadd.xlane.f32.xlu1 %v891_v7  ;;  %869 = vadd.xlane.f32.xlu0 %v868_v8 }
 0x1b0   :  { %444 = vadd.xlane.f32.xlu1 %v443_v12  ;;  %470 = vadd.xlane.f32.xlu0 %v469_v13 }
 0x1b4   :  { %461 = vadd.xlane.f32.xlu1 %v460_v16  ;;  %895 = vadd.xlane.f32.xlu0 %v894_v17 }
 0x1b8   :  { %886 = vadd.xlane.f32.xlu1 %v885_v19  ;;  %464 = vadd.xlane.f32.xlu0 %v463_v21 }
 0x1bc   :  { %889 = vadd.xlane.f32.xlu0 %v888_v22 }
 0x1d9   :  { %v4081_v20 = vpop.f32.mrb[4].mxu0 }
 0x1da   :  { %v3725_v23 = vpack.c.bf16 %v4081_v20, %v4081_v20  ;;  %v1288_v25 = vsel %vm5009_vm4, %v4081_v20, 0.0  ;;  %v1246_v24 = vpop.f32.mrb[5].mxu0 }
 0x1db   :  { %v3723_v26 = vpack.c.bf16 %v1246_v24, %v1246_v24  ;;  %v4082_v27 = vpop.f32.mrb[6].mxu0  ;;  %v1296_v28 = vsel %vm439_vm5, %v1288_v25, 0.0  ;;  %v1286_v42 = vsel %vm5009_vm4, %v1246_v24, 0.0  ;;  %v1308_v53 = vmul.f32 %v1288_v25, %v1288_v25 }
 0x1dc   :  { %3541 = vst.msk [vmem:[%s5393_s2 + $0x28] sm:$0xf] %vm428_vm6, %v3725_v23  ;;  %v3726_v29 = vpack.c.bf16 %v4082_v27, %v4082_v27  ;;  %v1289_v30 = vsel %vm5009_vm4, %v4082_v27, 0.0  ;;  %1297 = vadd.xlane.f32.xlu1 %v1296_v28  ;;  %v1249_v31 = vpop.f32.mrb[7].mxu0  ;;  %v1290_v49 = vsel %vm439_vm5, %v1286_v42, 0.0  ;;  %v1306_v61 = vmul.f32 %v1286_v42, %v1286_v42 }
 0x1dd   :  { %3539 = vst.msk [vmem:[%s5393_s2 + $0x20] sm:$0xf] %vm428_vm6, %v3723_v26  ;;  %v3724_v34 = vpack.c.bf16 %v1249_v31, %v1249_v31  ;;  %v4129_v32 = vpop.f32.mrb[4].mxu1  ;;  %v1299_v33 = vsel %vm439_vm5, %v1289_v30, 0.0  ;;  %v1287_v48 = vsel %vm5009_vm4, %v1249_v31, 0.0  ;;  %v1309_v55 = vmul.f32 %v1289_v30, %v1289_v30 }
 0x1de   :  { %3542 = vst.msk [vmem:[%s5393_s2 + $0x2c] sm:$0xf] %vm428_vm6, %v3726_v29  ;;  %v3729_v35 = vpack.c.bf16 %v4129_v32, %v4129_v32  ;;  %v1713_v36 = vsel %vm5009_vm4, %v4129_v32, 0.0  ;;  %v1671_v38 = vpop.f32.mrb[5].mxu1  ;;  %1300 = vadd.xlane.f32.xlu0 %v1299_v33  ;;  %v1293_v51 = vsel %vm439_vm5, %v1287_v48, 0.0  ;;  %v1316_v58 = vsel %vm439_vm5, %v1308_v53, 0.0 }
 0x1df   :  { %3540 = vst.msk [vmem:[%s5393_s2 + $0x24] sm:$0xf] %vm428_vm6, %v3724_v34  ;;  %v3727_v39 = vpack.c.bf16 %v1671_v38, %v1671_v38  ;;  %v4130_v40 = vpop.f32.mrb[6].mxu1  ;;  %v1721_v41 = vsel %vm439_vm5, %v1713_v36, 0.0  ;;  %v1711_v50 = vsel %vm5009_vm4, %v1671_v38, 0.0  ;;  %v1733_v57 = vmul.f32 %v1713_v36, %v1713_v36 }
 0x1e0   :  { %3569 = vst.msk [vmem:[%s5393_s2 + $0x38] sm:$0xf] %vm428_vm6, %v3729_v35  ;;  %v3730_v43 = vpack.c.bf16 %v4130_v40, %v4130_v40  ;;  %v1714_v44 = vsel %vm5009_vm4, %v4130_v40, 0.0  ;;  %v1674_v45 = vpop.f32.mrb[7].mxu1  ;;  %1722 = vadd.xlane.f32.xlu1 %v1721_v41  ;;  %v1715_v54 = vsel %vm439_vm5, %v1711_v50, 0.0  ;;  %v1319_v60 = vsel %vm439_vm5, %v1309_v55, 0.0 }
 0x1e1   :  { %3567 = vst.msk [vmem:[%s5393_s2 + $0x30] sm:$0xf] %vm428_vm6, %v3727_v39  ;;  %v3728_v46 = vpack.c.bf16 %v1674_v45, %v1674_v45  ;;  %v1724_v47 = vsel %vm439_vm5, %v1714_v44, 0.0  ;;  %v1712_v52 = vsel %vm5009_vm4, %v1674_v45, 0.0  ;;  %v1734_v59 = vmul.f32 %v1714_v44, %v1714_v44 }
 0x1e2   :  { %3570 = vst.msk [vmem:[%s5393_s2 + $0x3c] sm:$0xf] %vm428_vm6, %v3730_v43  ;;  %1725 = vadd.xlane.f32.xlu0 %v1724_v47  ;;  %v1718_v56 = vsel %vm439_vm5, %v1712_v52, 0.0  ;;  %v1741_v62 = vsel %vm439_vm5, %v1733_v57, 0.0  ;;  %v1307_v63 = vmul.f32 %v1287_v48, %v1287_v48  ;;  %v1731_v1 = vmul.f32 %v1711_v50, %v1711_v50 }
 0x1e3   :  { %3568 = vst.msk [vmem:[%s5393_s2 + $0x34] sm:$0xf] %vm428_vm6, %v3728_v46  ;;  %v1744_v0 = vsel %vm439_vm5, %v1734_v59, 0.0  ;;  %v1310_v2 = vsel %vm439_vm5, %v1306_v61, 0.0  ;;  %v1732_v3 = vmul.f32 %v1712_v52, %v1712_v52 }
 0x1e4   :  { %1291 = vadd.xlane.f32.xlu1 %v1290_v49  ;;  %v1313_v4 = vsel %vm439_vm5, %v1307_v63, 0.0  ;;  %v1735_v5 = vsel %vm439_vm5, %v1731_v1, 0.0 }
 0x1e5   :  { %v1738_v6 = vsel %vm439_vm5, %v1732_v3, 0.0 }
 0x1e6   :  { %1294 = vadd.xlane.f32.xlu0 %v1293_v51 }
 0x1e8   :  { %1716 = vadd.xlane.f32.xlu1 %v1715_v54 }
 0x1ea   :  { %1719 = vadd.xlane.f32.xlu0 %v1718_v56 }
 0x1ec   :  { %1317 = vadd.xlane.f32.xlu1 %v1316_v58 }
 0x1ee   :  { %1320 = vadd.xlane.f32.xlu0 %v1319_v60 }
 0x1f0   :  { %1742 = vadd.xlane.f32.xlu1 %v1741_v62 }
 0x1f2   :  { %1745 = vadd.xlane.f32.xlu0 %v1744_v0 }
 0x1f4   :  { %1311 = vadd.xlane.f32.xlu1 %v1310_v2 }
 0x1f6   :  { %1314 = vadd.xlane.f32.xlu0 %v1313_v4 }
 0x1f8   :  { %1736 = vadd.xlane.f32.xlu1 %v1735_v5 }
 0x1fa   :  { %1739 = vadd.xlane.f32.xlu0 %v1738_v6 }
 0x219   :  { %v4177_v7 = vpop.f32.mrb[8].mxu0 }
 0x21a   :  { %v3733_v8 = vpack.c.bf16 %v4177_v7, %v4177_v7  ;;  %v2127_v9 = vsel %vm5009_vm4, %v4177_v7, 0.0  ;;  %v2085_v10 = vpop.f32.mrb[9].mxu0 }
 0x21b   :  { %v3731_v11 = vpack.c.bf16 %v2085_v10, %v2085_v10  ;;  %v4178_v12 = vpop.f32.mrb[10].mxu0  ;;  %v2135_v13 = vsel %vm439_vm5, %v2127_v9, 0.0  ;;  %v2125_v26 = vsel %vm5009_vm4, %v2085_v10, 0.0  ;;  %v2147_v38 = vmul.f32 %v2127_v9, %v2127_v9 }
 0x21c   :  { %3605 = vst.msk [vmem:[%s5393_s2 + $0x48] sm:$0xf] %vm428_vm6, %v3733_v8  ;;  %v3734_v14 = vpack.c.bf16 %v4178_v12, %v4178_v12  ;;  %v2128_v15 = vsel %vm5009_vm4, %v4178_v12, 0.0  ;;  %2136 = vadd.xlane.f32.xlu1 %v2135_v13  ;;  %v2088_v16 = vpop.f32.mrb[11].mxu0  ;;  %v2129_v32 = vsel %vm439_vm5, %v2125_v26, 0.0  ;;  %v2145_v50 = vmul.f32 %v2125_v26, %v2125_v26 }
 0x21d   :  { %3603 = vst.msk [vmem:[%s5393_s2 + $0x40] sm:$0xf] %vm428_vm6, %v3731_v11  ;;  %v3732_v17 = vpack.c.bf16 %v2088_v16, %v2088_v16  ;;  %v4225_v18 = vpop.f32.mrb[8].mxu1  ;;  %v2138_v19 = vsel %vm439_vm5, %v2128_v15, 0.0  ;;  %v2126_v34 = vsel %vm5009_vm4, %v2088_v16, 0.0  ;;  %v2148_v40 = vmul.f32 %v2128_v15, %v2128_v15 }
 0x21e   :  { %3606 = vst.msk [vmem:[%s5393_s2 + $0x4c] sm:$0xf] %vm428_vm6, %v3734_v14  ;;  %v3737_v21 = vpack.c.bf16 %v4225_v18, %v4225_v18  ;;  %v2548_v22 = vsel %vm5009_vm4, %v4225_v18, 0.0  ;;  %v2506_v20 = vpop.f32.mrb[9].mxu1  ;;  %2139 = vadd.xlane.f32.xlu0 %v2138_v19  ;;  %v2132_v35 = vsel %vm439_vm5, %v2126_v34, 0.0  ;;  %v2155_v44 = vsel %vm439_vm5, %v2147_v38, 0.0 }
 0x21f   :  { %3604 = vst.msk [vmem:[%s5393_s2 + $0x44] sm:$0xf] %vm428_vm6, %v3732_v17  ;;  %v3735_v23 = vpack.c.bf16 %v2506_v20, %v2506_v20  ;;  %v4226_v25 = vpop.f32.mrb[10].mxu1  ;;  %v2556_v24 = vsel %vm439_vm5, %v2548_v22, 0.0  ;;  %v2546_v33 = vsel %vm5009_vm4, %v2506_v20, 0.0  ;;  %v2568_v43 = vmul.f32 %v2548_v22, %v2548_v22 }
 0x220   :  { %3641 = vst.msk [vmem:[%s5393_s2 + $0x58] sm:$0xf] %vm428_vm6, %v3737_v21  ;;  %v3738_v27 = vpack.c.bf16 %v4226_v25, %v4226_v25  ;;  %v2549_v28 = vsel %vm5009_vm4, %v4226_v25, 0.0  ;;  %v2509_v29 = vpop.f32.mrb[11].mxu1  ;;  %2557 = vadd.xlane.f32.xlu1 %v2556_v24  ;;  %v2550_v39 = vsel %vm439_vm5, %v2546_v33, 0.0  ;;  %v2158_v48 = vsel %vm439_vm5, %v2148_v40, 0.0 }
 0x221   :  { %3639 = vst.msk [vmem:[%s5393_s2 + $0x50] sm:$0xf] %vm428_vm6, %v3735_v23  ;;  %v3736_v30 = vpack.c.bf16 %v2509_v29, %v2509_v29  ;;  %v2559_v31 = vsel %vm439_vm5, %v2549_v28, 0.0  ;;  %v2547_v36 = vsel %vm5009_vm4, %v2509_v29, 0.0  ;;  %v2569_v45 = vmul.f32 %v2549_v28, %v2549_v28 }
 0x222   :  { %3642 = vst.msk [vmem:[%s5393_s2 + $0x5c] sm:$0xf] %vm428_vm6, %v3738_v27  ;;  %2560 = vadd.xlane.f32.xlu0 %v2559_v31  ;;  %v2553_v42 = vsel %vm439_vm5, %v2547_v36, 0.0  ;;  %v2576_v51 = vsel %vm439_vm5, %v2568_v43, 0.0  ;;  %v2146_v52 = vmul.f32 %v2126_v34, %v2126_v34  ;;  %v2566_v57 = vmul.f32 %v2546_v33, %v2546_v33 }
 0x223   :  { %3640 = vst.msk [vmem:[%s5393_s2 + $0x54] sm:$0xf] %vm428_vm6, %v3736_v30  ;;  %v2579_v55 = vsel %vm439_vm5, %v2569_v45, 0.0  ;;  %v2149_v58 = vsel %vm439_vm5, %v2145_v50, 0.0  ;;  %v2567_v59 = vmul.f32 %v2547_v36, %v2547_v36 }
 0x224   :  { %2130 = vadd.xlane.f32.xlu1 %v2129_v32  ;;  %v2152_v62 = vsel %vm439_vm5, %v2146_v52, 0.0  ;;  %v2570_v0 = vsel %vm439_vm5, %v2566_v57, 0.0 }
 0x225   :  { %v2573_v3 = vsel %vm439_vm5, %v2567_v59, 0.0  ;;  %v4564_v59 = vmov 0.0  }
 0x226   :  { %2133 = vadd.xlane.f32.xlu0 %v2132_v35  ;;  %35 = vst.msk [vmem:[%s5394_s3 + $0x10] sm:$0xff] %vm32_vm7, %v4564_v59  ;;  %33 = vst.msk [vmem:[%s5394_s3] sm:$0xff] %vm32_vm7, %v4564_v59 }
 0x227   :  { %34 = vst.msk [vmem:[%s5394_s3 + $0x8] sm:$0xff] %vm32_vm7, %v4564_v59  ;;  %36 = vst.msk [vmem:[%s5394_s3 + $0x18] sm:$0xff] %vm32_vm7, %v4564_v59 }
 0x228   :  { %2551 = vadd.xlane.f32.xlu1 %v2550_v39 }
 0x229   :  { %v448_v41 = vpop.xlane.xlu0 %447 }
 0x22a   :  { %2554 = vadd.xlane.f32.xlu0 %v2553_v42 }
 0x22c   :  { %2156 = vadd.xlane.f32.xlu1 %v2155_v44 }
 0x22d   :  { %v873_v46 = vpop.xlane.xlu1 %872  ;;  %v442_v47 = vpop.xlane.xlu0 %441 }
 0x22e   :  { %v5199_v49 = vadd.f32 %v873_v46, %v448_v41  ;;  %2159 = vadd.xlane.f32.xlu0 %v2158_v48 }
 0x230   :  { %2577 = vadd.xlane.f32.xlu1 %v2576_v51 }
 0x231   :  { %v867_v53 = vpop.xlane.xlu1 %866  ;;  %v451_v54 = vpop.xlane.xlu0 %450 }
 0x232   :  { %v5203_v56 = vadd.f32 %v867_v53, %v442_v47  ;;  %2580 = vadd.xlane.f32.xlu0 %v2579_v55 }
 0x234   :  { %2150 = vadd.xlane.f32.xlu1 %v2149_v58 }
 0x235   :  { %v468_v60 = vpop.xlane.xlu1 %467  ;;  %v876_v61 = vpop.xlane.xlu0 %875 }
 0x236   :  { %v5207_v63 = vadd.f32 %v876_v61, %v451_v54  ;;  %2153 = vadd.xlane.f32.xlu0 %v2152_v62 }
 0x238   :  { %2571 = vadd.xlane.f32.xlu1 %v2570_v0 }
 0x239   :  { %v893_v1 = vpop.xlane.xlu1 %892  ;;  %v870_v2 = vpop.xlane.xlu0 %869 }
 0x23a   :  { %v5211_v4 = vadd.f32 %v893_v1, %v468_v60  ;;  %2574 = vadd.xlane.f32.xlu0 %v2573_v3 }
 0x23d   :  { %v445_v5 = vpop.xlane.xlu1 %444  ;;  %v471_v6 = vpop.xlane.xlu0 %470 }
 0x23e   :  { %v5213_v7 = vadd.f32 %v870_v2, %v445_v5 }
 0x241   :  { %v462_v8 = vpop.xlane.xlu1 %461  ;;  %v896_v9 = vpop.xlane.xlu0 %895 }
 0x242   :  { %v5215_v10 = vadd.f32 %v896_v9, %v471_v6 }
 0x245   :  { %v887_v11 = vpop.xlane.xlu1 %886  ;;  %v465_v12 = vpop.xlane.xlu0 %464 }
 0x246   :  { %v5217_v13 = vadd.f32 %v887_v11, %v462_v8 }
 0x249   :  { %v890_v14 = vpop.xlane.xlu0 %889 }
 0x24a   :  { %v5219_v15 = vadd.f32 %v890_v14, %v465_v12 }
 0x259   :  { %v4273_v16 = vpop.f32.mrb[12].mxu0 }
 0x25a   :  { %v3741_v17 = vpack.c.bf16 %v4273_v16, %v4273_v16  ;;  %v2969_v18 = vsel %vm5009_vm4, %v4273_v16, 0.0  ;;  %v2927_v19 = vpop.f32.mrb[13].mxu0 }
 0x25b   :  { %v3739_v21 = vpack.c.bf16 %v2927_v19, %v2927_v19  ;;  %v4274_v22 = vpop.f32.mrb[14].mxu0  ;;  %v2977_v20 = vsel %vm439_vm5, %v2969_v18, 0.0  ;;  %v2967_v35 = vsel %vm5009_vm4, %v2927_v19, 0.0  ;;  %v2989_v47 = vmul.f32 %v2969_v18, %v2969_v18 }
 0x25c   :  { %3677 = vst.msk [vmem:[%s5393_s2 + $0x68] sm:$0xf] %vm428_vm6, %v3741_v17  ;;  %v3742_v23 = vpack.c.bf16 %v4274_v22, %v4274_v22  ;;  %v2970_v25 = vsel %vm5009_vm4, %v4274_v22, 0.0  ;;  %2978 = vadd.xlane.f32.xlu1 %v2977_v20  ;;  %v2930_v24 = vpop.f32.mrb[15].mxu0  ;;  %v2971_v43 = vsel %vm439_vm5, %v2967_v35, 0.0  ;;  %v2987_v53 = vmul.f32 %v2967_v35, %v2967_v35 }
 0x25d   :  { %3675 = vst.msk [vmem:[%s5393_s2 + $0x60] sm:$0xf] %vm428_vm6, %v3739_v21  ;;  %v3740_v26 = vpack.c.bf16 %v2930_v24, %v2930_v24  ;;  %v4321_v27 = vpop.f32.mrb[12].mxu1  ;;  %v2980_v28 = vsel %vm439_vm5, %v2970_v25, 0.0  ;;  %v2968_v42 = vsel %vm5009_vm4, %v2930_v24, 0.0  ;;  %v2990_v50 = vmul.f32 %v2970_v25, %v2970_v25 }
 0x25e   :  { %3678 = vst.msk [vmem:[%s5393_s2 + $0x6c] sm:$0xf] %vm428_vm6, %v3742_v23  ;;  %v3745_v29 = vpack.c.bf16 %v4321_v27, %v4321_v27  ;;  %v3390_v30 = vsel %vm5009_vm4, %v4321_v27, 0.0  ;;  %v3348_v31 = vpop.f32.mrb[13].mxu1  ;;  %2981 = vadd.xlane.f32.xlu0 %v2980_v28  ;;  %v2974_v45 = vsel %vm439_vm5, %v2968_v42, 0.0  ;;  %v2997_v55 = vsel %vm439_vm5, %v2989_v47, 0.0 }
 0x25f   :  { %3676 = vst.msk [vmem:[%s5393_s2 + $0x64] sm:$0xf] %vm428_vm6, %v3740_v26  ;;  %v3743_v34 = vpack.c.bf16 %v3348_v31, %v3348_v31  ;;  %v4322_v32 = vpop.f32.mrb[14].mxu1  ;;  %v3398_v33 = vsel %vm439_vm5, %v3390_v30, 0.0  ;;  %v3388_v44 = vsel %vm5009_vm4, %v3348_v31, 0.0  ;;  %v2988_v57 = vmul.f32 %v2968_v42, %v2968_v42 }
 0x260   :  { %3713 = vst.msk [vmem:[%s5393_s2 + $0x78] sm:$0xf] %vm428_vm6, %v3745_v29  ;;  %v3746_v36 = vpack.c.bf16 %v4322_v32, %v4322_v32  ;;  %v3391_v38 = vsel %vm5009_vm4, %v4322_v32, 0.0  ;;  %v3351_v39 = vpop.f32.mrb[15].mxu1  ;;  %3399 = vadd.xlane.f32.xlu1 %v3398_v33  ;;  %v3392_v48 = vsel %vm439_vm5, %v3388_v44, 0.0  ;;  %v3000_v58 = vsel %vm439_vm5, %v2990_v50, 0.0 }
 0x261   :  { %3711 = vst.msk [vmem:[%s5393_s2 + $0x70] sm:$0xf] %vm428_vm6, %v3743_v34  ;;  %v3744_v40 = vpack.c.bf16 %v3351_v39, %v3351_v39  ;;  %v3401_v41 = vsel %vm439_vm5, %v3391_v38, 0.0  ;;  %v3389_v46 = vsel %vm5009_vm4, %v3351_v39, 0.0  ;;  %v3408_v60 = vmul.f32 %v3388_v44, %v3388_v44 }
 0x262   :  { %3714 = vst.msk [vmem:[%s5393_s2 + $0x7c] sm:$0xf] %vm428_vm6, %v3746_v36  ;;  %3402 = vadd.xlane.f32.xlu0 %v3401_v41  ;;  %v3395_v51 = vsel %vm439_vm5, %v3389_v46, 0.0  ;;  %v2991_v62 = vsel %vm439_vm5, %v2987_v53, 0.0  ;;  %v3409_v0 = vmul.f32 %v3389_v46, %v3389_v46  ;;  %v2994_v2 = vsel %vm439_vm5, %v2988_v57, 0.0 }
 0x263   :  { %3712 = vst.msk [vmem:[%s5393_s2 + $0x74] sm:$0xf] %vm428_vm6, %v3744_v40  ;;  %v3410_v3 = vmul.f32 %v3390_v30, %v3390_v30  ;;  %v3412_v6 = vsel %vm439_vm5, %v3408_v60, 0.0  ;;  %v3411_v8 = vmul.f32 %v3391_v38, %v3391_v38 }
 0x264   :  { %2972 = vadd.xlane.f32.xlu1 %v2971_v43  ;;  %v3415_v11 = vsel %vm439_vm5, %v3409_v0, 0.0 }
 0x265   :  { %v3418_v14 = vsel %vm439_vm5, %v3410_v3, 0.0  ;;  %v3421_v17 = vsel %vm439_vm5, %v3411_v8, 0.0 }
 0x266   :  { %2975 = vadd.xlane.f32.xlu0 %v2974_v45 }
 0x268   :  { %3393 = vadd.xlane.f32.xlu1 %v3392_v48 }
 0x269   :  { %v5277_v52 = vpop.xlane.xlu1 %1297 }
 0x26a   :  { %3396 = vadd.xlane.f32.xlu0 %v3395_v51  ;;  %v1304_v42 = vadd.f32 %v5277_v52, %v5199_v49  ;;  %v3430_v49 = vld [vmem:[%s5394_s3 + $0x10] sm:$0xff] }
 0x26b   :  { %v1301_v54 = vpop.xlane.xlu0 %1300 }
 0x26c   :  { %2998 = vadd.xlane.f32.xlu1 %v2997_v55  ;;  %v1305_v44 = vadd.f32 %v1301_v54, %v5207_v63 }
 0x26d   :  { %v1723_v37 = vpop.xlane.xlu1 %1722 }
 0x26e   :  { %3001 = vadd.xlane.f32.xlu0 %v3000_v58  ;;  %v1729_v45 = vadd.f32 %v1723_v37, %v1304_v42 }
 0x26f   :  { %v1726_v61 = vpop.xlane.xlu0 %1725 }
 0x270   :  { %2992 = vadd.xlane.f32.xlu1 %v2991_v62  ;;  %v1730_v47 = vadd.f32 %v1726_v61, %v1305_v44  ;;  %v3431_v62 = vld [vmem:[%s5394_s3 + $0x18] sm:$0xff] }
 0x271   :  { %v1292_v1 = vpop.xlane.xlu1 %1291 }
 0x272   :  { %2995 = vadd.xlane.f32.xlu0 %v2994_v2  ;;  %v1302_v57 = vadd.f32 %v1292_v1, %v5203_v56 }
 0x273   :  { %v1295_v5 = vpop.xlane.xlu0 %1294 }
 0x274   :  { %3413 = vadd.xlane.f32.xlu1 %v3412_v6  ;;  %v1303_v52 = vadd.f32 %v1295_v5, %v5213_v7 }
 0x275   :  { %v1717_v9 = vpop.xlane.xlu1 %1716 }
 0x276   :  { %3416 = vadd.xlane.f32.xlu0 %v3415_v11  ;;  %v1727_v63 = vadd.f32 %v1717_v9, %v1302_v57 }
 0x277   :  { %v1720_v12 = vpop.xlane.xlu0 %1719 }
 0x278   :  { %3419 = vadd.xlane.f32.xlu1 %v3418_v14  ;;  %v1728_v0 = vadd.f32 %v1720_v12, %v1303_v52  ;;  %v3428_v14 = vld [vmem:[%s5394_s3] sm:$0xff] }
 0x279   :  { %v1318_v16 = vpop.xlane.xlu1 %1317 }
 0x27a   :  { %v1324_v18 = vadd.f32 %v1318_v16, %v5211_v4  ;;  %3422 = vadd.xlane.f32.xlu0 %v3421_v17 }
 0x27b   :  { %v1321_v19 = vpop.xlane.xlu0 %1320 }
 0x27c   :  { %v1325_v21 = vadd.f32 %v1321_v19, %v5215_v10  ;;  %v3429_v19 = vld [vmem:[%s5394_s3 + $0x8] sm:$0xff] }
 0x27d   :  { %v1743_v22 = vpop.xlane.xlu1 %1742 }
 0x27e   :  { %v5301_v20 = vadd.f32 %v1743_v22, %v1324_v18 }
 0x27f   :  { %v1746_v23 = vpop.xlane.xlu0 %1745 }
 0x280   :  { %v5303_v25 = vadd.f32 %v1746_v23, %v1325_v21 }
 0x281   :  { %v1312_v24 = vpop.xlane.xlu1 %1311 }
 0x282   :  { %v1322_v21 = vadd.f32 %v1312_v24, %v5217_v13 }
 0x283   :  { %v5305_v26 = vpop.xlane.xlu0 %1314 }
 0x285   :  { %v5307_v27 = vpop.xlane.xlu1 %1736 }
 0x287   :  { %v5309_v28 = vpop.xlane.xlu0 %1739 }
 0x2a9   :  { %v2137_v29 = vpop.xlane.xlu1 %2136 }
 0x2aa   :  { %v2143_v48 = vadd.f32 %v2137_v29, %v1729_v45 }
 0x2ab   :  { %v2140_v30 = vpop.xlane.xlu0 %2139 }
 0x2ac   :  { %v2144_v51 = vadd.f32 %v2140_v30, %v1730_v47  ;;  %v1323_v30 = vadd.f32 %v5305_v26, %v5219_v15 }
 0x2ad   :  { %v2558_v4 = vpop.xlane.xlu1 %2557 }
 0x2ae   :  { %v2564_v53 = vadd.f32 %v2558_v4, %v2143_v48  ;;  %v1747_v4 = vadd.f32 %v5307_v27, %v1322_v21 }
 0x2af   :  { %v2561_v31 = vpop.xlane.xlu0 %2560 }
 0x2b0   :  { %v2565_v58 = vadd.f32 %v2561_v31, %v2144_v51 }
 0x2b1   :  { %v2131_v34 = vpop.xlane.xlu1 %2130 }
 0x2b2   :  { %v2141_v56 = vadd.f32 %v2131_v34, %v1727_v63 }
 0x2b3   :  { %v2134_v32 = vpop.xlane.xlu0 %2133 }
 0x2b4   :  { %v2142_v6 = vadd.f32 %v2134_v32, %v1728_v0  ;;  %v1748_v32 = vadd.f32 %v5309_v28, %v1323_v30 }
 0x2b5   :  { %v2552_v10 = vpop.xlane.xlu1 %2551 }
 0x2b6   :  { %v2562_v8 = vadd.f32 %v2552_v10, %v2141_v56 }
 0x2b7   :  { %v2555_v33 = vpop.xlane.xlu0 %2554 }
 0x2b8   :  { %v2563_v9 = vadd.f32 %v2555_v33, %v2142_v6 }
 0x2b9   :  { %v5311_v35 = vpop.xlane.xlu1 %2156 }
 0x2ba   :  { %v2163_v27 = vadd.f32 %v5311_v35, %v5301_v20 }
 0x2bb   :  { %v5313_v36 = vpop.xlane.xlu0 %2159 }
 0x2bc   :  { %v2164_v45 = vadd.f32 %v5313_v36, %v5303_v25 }
 0x2bd   :  { %v5315_v38 = vpop.xlane.xlu1 %2577 }
 0x2be   :  { %v2584_v28 = vadd.f32 %v5315_v38, %v2163_v27 }
 0x2bf   :  { %v5317_v39 = vpop.xlane.xlu0 %2580 }
 0x2c0   :  { %v2585_v48 = vadd.f32 %v5317_v39, %v2164_v45 }
 0x2c1   :  { %v2151_v40 = vpop.xlane.xlu1 %2150 }
 0x2c2   :  { %v2161_v10 = vadd.f32 %v2151_v40, %v1747_v4 }
 0x2c3   :  { %v2154_v41 = vpop.xlane.xlu0 %2153 }
 0x2c4   :  { %v2162_v24 = vadd.f32 %v2154_v41, %v1748_v32 }
 0x2c5   :  { %v2572_v43 = vpop.xlane.xlu1 %2571 }
 0x2c6   :  { %v2582_v15 = vadd.f32 %v2572_v43, %v2161_v10 }
 0x2c7   :  { %v2575_v46 = vpop.xlane.xlu0 %2574 }
 0x2c8   :  { %v2583_v33 = vadd.f32 %v2575_v46, %v2162_v24 }
 0x2e9   :  { %v2979_v50 = vpop.xlane.xlu1 %2978 }
 0x2ea   :  { %v2985_v59 = vadd.f32 %v2979_v50, %v2564_v53 }
 0x2eb   :  { %v2982_v55 = vpop.xlane.xlu0 %2981 }
 0x2ec   :  { %v2986_v54 = vadd.f32 %v2982_v55, %v2565_v58 }
 0x2ed   :  { %v3400_v60 = vpop.xlane.xlu1 %3399 }
 0x2ee   :  { %v3406_v37 = vadd.f32 %v3400_v60, %v2985_v59 }
 0x2ef   :  { %v3403_v61 = vpop.xlane.xlu0 %3402 }
 0x2f0   :  { %v3434_v1 = vadd.f32 %v3430_v49, %v3406_v37  ;;  %v3407_v2 = vadd.f32 %v3403_v61, %v2986_v54 }
 0x2f1   :  { %v2973_v3 = vpop.xlane.xlu1 %2972 }
 0x2f2   :  { %3439 = vst.msk [vmem:[%s5394_s3 + $0x10] sm:$0xff] %vm3436_vm8, %v3434_v1  ;;  %v3435_v7 = vadd.f32 %v3431_v62, %v3407_v2  ;;  %v2983_v11 = vadd.f32 %v2973_v3, %v2562_v8 }
 0x2f3   :  { %v2976_v5 = vpop.xlane.xlu0 %2975 }
 0x2f4   :  { %3440 = vst.msk [vmem:[%s5394_s3 + $0x18] sm:$0xff] %vm3436_vm8, %v3435_v7  ;;  %v2984_v16 = vadd.f32 %v2976_v5, %v2563_v9 }
 0x2f5   :  { %v3394_v12 = vpop.xlane.xlu1 %3393 }
 0x2f6   :  { %v3404_v17 = vadd.f32 %v3394_v12, %v2983_v11 }
 0x2f7   :  { %v3397_v18 = vpop.xlane.xlu0 %3396 }
 0x2f8   :  { %v3432_v22 = vadd.f32 %v3428_v14, %v3404_v17  ;;  %v3405_v23 = vadd.f32 %v3397_v18, %v2984_v16 }
 0x2f9   :  { %v2999_v29 = vpop.xlane.xlu1 %2998  ;;  %v3443_v39 = vld [vmem:[%s5394_s3 + $0x10] sm:$0xff] }
 0x2fa   :  { %3437 = vst.msk [vmem:[%s5394_s3] sm:$0xff] %vm3436_vm8, %v3432_v22  ;;  %v3433_v31 = vadd.f32 %v3429_v19, %v3405_v23  ;;  %v3005_v50 = vadd.f32 %v2999_v29, %v2584_v28 }
 0x2fb   :  { %v3002_v34 = vpop.xlane.xlu0 %3001  ;;  %v3444_v58 = vld [vmem:[%s5394_s3 + $0x18] sm:$0xff] }
 0x2fc   :  { %3438 = vst.msk [vmem:[%s5394_s3 + $0x8] sm:$0xff] %vm3436_vm8, %v3433_v31  ;;  %v3006_v36 = vadd.f32 %v3002_v34, %v2585_v48 }
 0x2fd   :  { %v2993_v13 = vpop.xlane.xlu1 %2992 }
 0x2fe   :  { %v3003_v42 = vadd.f32 %v2993_v13, %v2582_v15 }
 0x2ff   :  { %v2996_v26 = vpop.xlane.xlu0 %2995 }
 0x300   :  { %v3004_v40 = vadd.f32 %v2996_v26, %v2583_v33 }
 0x301   :  { %v3414_v44 = vpop.xlane.xlu1 %3413  ;;  %v3441_v41 = vld [vmem:[%s5394_s3] sm:$0xff] }
 0x302   :  { %v3424_v47 = vadd.f32 %v3414_v44, %v3003_v42 }
 0x303   :  { %v3417_v43 = vpop.xlane.xlu0 %3416  ;;  %v3442_v46 = vld [vmem:[%s5394_s3 + $0x8] sm:$0xff] }
 0x304   :  { %v3445_v20 = vadd.f32 %v3441_v41, %v3424_v47  ;;  %v3425_v35 = vadd.f32 %v3417_v43, %v3004_v40 }
 0x305   :  { %v3420_v25 = vpop.xlane.xlu1 %3419 }
 0x306   :  { %3450 = vst.msk [vmem:[%s5394_s3] sm:$0xff] %vm3449_vm9, %v3445_v20  ;;  %v3446_v38 = vadd.f32 %v3442_v46, %v3425_v35  ;;  %v3426_v51 = vadd.f32 %v3420_v25, %v3005_v50 }
 0x307   :  { %v3423_v53 = vpop.xlane.xlu0 %3422 }
 0x308   :  { %3451 = vst.msk [vmem:[%s5394_s3 + $0x8] sm:$0xff] %vm3449_vm9, %v3446_v38  ;;  %v3447_v55 = vadd.f32 %v3443_v39, %v3426_v51  ;;  %v3427_v57 = vadd.f32 %v3423_v53, %v3006_v36 }
 0x30a   :  { %3452 = vst.msk [vmem:[%s5394_s3 + $0x10] sm:$0xff] %vm3449_vm9, %v3447_v55  ;;  %v3448_v59 = vadd.f32 %v3444_v58, %v3427_v57 }
 0x30c   :  { %3453 = vst.msk [vmem:[%s5394_s3 + $0x18] sm:$0xff] %vm3449_vm9, %v3448_v59 }
 0x30d   :  { %3462 = vsyncpa [#allocation3], 1 }

// kernel: netG_forward.8
= control target key start
LH: loop header
LB: loop body
LE: loop exit
PB: predicated region body
PF: predicated region fallthrough
CT: control target
= control target key end

     0   :  { %9 = vsyncpa [#allocation3], 0  ;;  %s2539_s12 = smov 0   ;;  %s2875_s0 = inlined_call_operand.vmem [shape: bf16[2,16,342], index: 0, kind: input, shape index: {}]   ;;  %s2876_s1 = inlined_call_operand.hbm [shape: bf16[16,8,16], index: 1, kind: input, shape index: {}]   ;;  %s2877_s2 = inlined_call_operand.vmem [shape: bf16[2,4,8,288], index: 2, kind: output, shape index: {0}]   ;;  %s2878_s3 = inlined_call_operand.vmem [shape: f32[8,2], index: 3, kind: output, shape index: {1}]  }
   0x1 LB: > { %s2545_s13 = sadd.s32 4294967295, %s2502_s12   ;;  %p2116_p0 = scmp.ge.s32.totalorder %s2502_s12, 1  ;;  %s2502_s12 = sphi %s2539_s12, %s15_s12  }
   0x2   : > { %p114_p1 = scmp.lt.s32.totalorder %s2502_s12, 3  ;;  %s2504_s14 = smov [#allocation2]  }
   0x3   : > { %s126_s15 = sshll.u32 %s2504_s14, 4  ;;  %p2879_p4 = scmp.eq.s32.totalorder %s2545_s13, 0  ;;  %s127_s15 = int_to_ptr.vmem [resolvable:$true] %s126_s15 }
   0x4   : > { %p2550_p3 = pnand %p2116_p0, %p114_p1  ;;  %s2464_s20 = scalar_lea.hbm %s2876_s1, 1024 }
   0x5   : > { %p2465_p7 = scmp.ne.s32.totalorder %s2876_s1, %s2464_s20  ;;  %p2471_p11 = scmp.lt.u32.totalorder %s2464_s20, %s2876_s1 }
   0x6   : > { %s2881_s16 = scalar_select %p2550_p3, 1, 0 }
   0x7   : > { %p2428_p5 = pneg %p2550_p3 }
   0x9   : > { %p2559_p6 = pnand %p2879_p4, %p2428_p5 }
   0xb   : > { %p2466_p8 = pneg %p2559_p6 }
   0xd   : > { %p2467_p9 = pnand %p2466_p8, %p2465_p7 }
   0xf   : > { %p2468_p10 = pneg %p2467_p9 }
  0x11   : > { %p2473_p12 = pnand %p2471_p11, %p2468_p10 }
  0x13   : > { %2476 = shalt.err (!%p2473_p12)
}
  0x14   : > { %s2477_s25 = scalar_lea.vmem %s127_s15, 1024  ;;  %p2485_p5 = scmp.lt.s32.totalorder %s127_s15, %s127_s15 }
  0x15   : > { %p2478_p13 = scmp.ne.s32.totalorder %s127_s15, %s2477_s25  ;;  %p2486_p2 = scmp.lt.s32.totalorder %s2477_s25, %s2477_s25 }
  0x17   : > { %p2480_p0 = pnand %p2478_p13, %p2466_p8  ;;  %p2487_p4 = por %p2486_p2, %p2485_p5 }
  0x19   : > { %p2481_p1 = pneg %p2480_p0 }
  0x1b   : > { %p2488_p3 = pnand %p2487_p4, %p2481_p1 }
  0x1d   : > { %2491 = shalt.err (!%p2488_p3)
}
  0x1e   : > { %s2505_s26 = smov 64   ;;  %s2506_s27 = smov 4  }
  0x1f   : > { %2431 = dma.hbm_to_vmem [thread:$0]  (!%p2559_p6), %s2876_s1, 1024, %s127_s15, [#allocation3], %s2505_s26, %s2505_s26, %s2506_s27  }
  0x20   : > { %p2883_p7 = scmp.ne.s32.totalorder %s2881_s16, 0 }
  0x21   : > { %p2884_p9 = scmp.eq.s32.totalorder (!%p2883_p7), %s2545_s13, 0 }
  0x22   : > { %150 = sbr.rel (%p2883_p7) target bundleno = 720 (0x2d0), region = 28 }
  0x29   : > { %2497 = dma.done.wait (%p2884_p9), [#allocation3], 1024   ;;  %p2885_p8 = pmov %p2884_p9 }
  0x2a   : > { %p174_p2 = scmp.lt.s32.totalorder %s2545_s13, 1  ;;  %p2886_p3 = scmp.ne.s32.totalorder %s2545_s13, 0 }
  0x2b   : > { %2499 = vsyncadd (%p2885_p8), [#allocation3], 4294966272  ;;  %vm189_vm0 = vcmask (!%p2886_p3), 15360   ;;  %v2507_v0 = vmov (!%p2886_p3), 0.0  }
  0x2c   : > { %s175_s30 = scalar_select %p174_p2, %s2545_s13, 1 }
  0x2d   : > { %188 = sbr.rel (%p2886_p3) target bundleno = 52 (0x34), region = 36  ;;  %190 = vst.msk [vmem:[%s2878_s3] sm:$0xff] (!%p2886_p3), %vm189_vm0, %v2507_v0 }
  0x2e   : > { %s2416_s4 = smul.u32 24, %s175_s30 }
  0x2f   : > { %s2417_s5 = smul.u32 48, %s175_s30 }
  0x30   : > { %s2590_s8 = scalar_lea.vmem %s2875_s0, %s2416_s4 }
  0x31   : > { %s2595_s11 = scalar_lea.vmem %s2877_s2, %s2417_s5 }
  0x34 PF: > { %v2603_v1 = vld [vmem:[%s2590_s8 + $0x4] ss:$12 sps:$4 sm:$0xff]   ;;  %v2606_v2 = vld [vmem:[%s2590_s8] ss:$12 sps:$4 sm:$0xff]   ;;  %s2508_s16 = smov 127   ;;  %v2509_v4 = vmov 0.0  }
  0x35   : > { %268 = vrot.lane.b32.xlu0 %v2603_v1, %s2508_s16  ;;  %v2610_v3 = vld [vmem:[%s2590_s8 + $0x8] ss:$12 sps:$4 sm:$0xff]   ;;  %266 = vrot.lane.b32.xlu1 %v2606_v2, %s2508_s16  ;;  %s2510_s13 = smov 110   ;;  %vm2511_vm1 = vmmov 0   ;;  %v2512_v5 = vmov 0   ;;  %s2513_s17 = smov 109  }
  0x36   : > { %2224 = vmatprep.subr.bf16.mxu1 %v2509_v4  ;;  %2226 = vmatprep.mubr.msk.bf16.mxu1 %vm2511_vm1, %v2509_v4  ;;  %v2461_v6 = vld [vmem:[%s2590_s8 + $0x8] ss:$12 sps:$4 sm:$0xff]   ;;  %s2514_s18 = smov 126   ;;  %s2515_s19 = smov 108   ;;  %vm272_vm2 = vcmask 1039360   ;;  %vm278_vm3 = vcmask 130048  }
  0x37   : > { %314 = vmatprep.mubr.bf16.mxu0 %v2512_v5  ;;  %v2462_v7 = vld [vmem:[%s2590_s8 + $0x8] ss:$12 sps:$4 sm:$0xff]   ;;  %s2516_s20 = smov 92   ;;  %s2517_s21 = smov 91   ;;  %v252_v13 = vld [vmem:[#allocation2 + $0x4] sm:$0xf] }
  0x38   : > { %v2463_v8 = vld [vmem:[%s2590_s8 + $0x8] ss:$12 sps:$4 sm:$0xff]   ;;  %s2518_s22 = smov 90   ;;  %vm458_vm4 = vcmask 900096   ;;  %v250_v19 = vld [vmem:[#allocation2] sm:$0xf] }
  0x39   : > { %270 = vrot.lane.b32.xlu0 %v2610_v3, %s2508_s16  ;;  %454 = vrot.lane.b32.xlu1 %v2603_v1, %s2510_s13  ;;  %vm559_vm5 = vcmask 891904   ;;  %v451_v25 = vld [vmem:[#allocation2 + $0x8] sm:$0xf]  ;;  %vm720_vm6 = vcmask 1031168   ;;  %v552_v32 = vld [vmem:[#allocation2 + $0xc] sm:$0xf] }
  0x3a   : > { %v700_v37 = vld [vmem:[#allocation2 + $0x14] sm:$0xf]  ;;  %v698_v43 = vld [vmem:[#allocation2 + $0x10] sm:$0xf]  ;;  %vm1013_vm7 = vcmask 883712   ;;  %vm1359_vm8 = vcmask 752640  }
  0x3b   : > { %v906_v49 = vld [vmem:[#allocation2 + $0x18] sm:$0xf]  ;;  %v1006_v56 = vld [vmem:[#allocation2 + $0x1c] sm:$0xf]  ;;  %v1147_v61 = vld [vmem:[#allocation2 + $0x24] sm:$0xf] }
  0x3c   : > { %vm1460_vm9 = vcmask 744448   ;;  %vm1906_vm10 = vcmask 736256  }
  0x3d   : > { %456 = vrot.lane.b32.xlu0 %v2610_v3, %s2510_s13  ;;  %452 = vrot.lane.b32.xlu1 %v2606_v2, %s2510_s13 }
  0x41   : > { %555 = vrot.lane.b32.xlu0 %v2603_v1, %s2513_s17  ;;  %557 = vrot.lane.b32.xlu1 %v2610_v3, %s2513_s17 }
  0x45   : > { %553 = vrot.lane.b32.xlu0 %v2606_v2, %s2513_s17  ;;  %716 = vrot.lane.b32.xlu1 %v2603_v1, %s2514_s18 }
  0x49   : > { %718 = vrot.lane.b32.xlu0 %v2461_v6, %s2514_s18  ;;  %714 = vrot.lane.b32.xlu1 %v2606_v2, %s2514_s18 }
  0x4d   : > { %812 = vrot.lane.b32.xlu0 %v2603_v1, %s2508_s16  ;;  %814 = vrot.lane.b32.xlu1 %v2461_v6, %s2508_s16 }
  0x51   : > { %810 = vrot.lane.b32.xlu0 %v2606_v2, %s2508_s16  ;;  %909 = vrot.lane.b32.xlu1 %v2603_v1, %s2513_s17 }
  0x55   : > { %911 = vrot.lane.b32.xlu0 %v2461_v6, %s2513_s17  ;;  %907 = vrot.lane.b32.xlu1 %v2606_v2, %s2513_s17 }
  0x59   : > { %1009 = vrot.lane.b32.xlu0 %v2603_v1, %s2515_s19  ;;  %1011 = vrot.lane.b32.xlu1 %v2461_v6, %s2515_s19 }
  0x5d   : > { %1007 = vrot.lane.b32.xlu0 %v2606_v2, %s2515_s19  ;;  %1163 = vrot.lane.b32.xlu1 %v2603_v1, %s2513_s17 }
  0x61   : > { %1165 = vrot.lane.b32.xlu0 %v2462_v7, %s2513_s17  ;;  %1161 = vrot.lane.b32.xlu1 %v2606_v2, %s2513_s17 }
  0x65   : > { %1258 = vrot.lane.b32.xlu0 %v2603_v1, %s2510_s13  ;;  %1260 = vrot.lane.b32.xlu1 %v2462_v7, %s2510_s13 }
  0x69   : > { %1256 = vrot.lane.b32.xlu0 %v2606_v2, %s2510_s13  ;;  %1355 = vrot.lane.b32.xlu1 %v2603_v1, %s2516_s20 }
  0x6d   : > { %1357 = vrot.lane.b32.xlu0 %v2462_v7, %s2516_s20  ;;  %1353 = vrot.lane.b32.xlu1 %v2606_v2, %s2516_s20 }
  0x71   : > { %1456 = vrot.lane.b32.xlu0 %v2603_v1, %s2517_s21  ;;  %1458 = vrot.lane.b32.xlu1 %v2462_v7, %s2517_s21 }
  0x75   : > { %1454 = vrot.lane.b32.xlu0 %v2606_v2, %s2517_s21  ;;  %1610 = vrot.lane.b32.xlu1 %v2603_v1, %s2515_s19 }
  0x79   : > { %1612 = vrot.lane.b32.xlu0 %v2463_v8, %s2515_s19  ;;  %1608 = vrot.lane.b32.xlu1 %v2606_v2, %s2515_s19 }
  0x7d   : > { %1705 = vrot.lane.b32.xlu0 %v2603_v1, %s2513_s17  ;;  %1707 = vrot.lane.b32.xlu1 %v2463_v8, %s2513_s17 }
  0x81   : > { %1703 = vrot.lane.b32.xlu0 %v2606_v2, %s2513_s17  ;;  %1802 = vrot.lane.b32.xlu1 %v2603_v1, %s2517_s21 }
  0x85   : > { %1804 = vrot.lane.b32.xlu0 %v2463_v8, %s2517_s21  ;;  %1800 = vrot.lane.b32.xlu1 %v2606_v2, %s2517_s21 }
  0x89   : > { %1902 = vrot.lane.b32.xlu0 %v2603_v1, %s2518_s22  ;;  %1904 = vrot.lane.b32.xlu1 %v2463_v8, %s2518_s22 }
  0x8d   : > { %1900 = vrot.lane.b32.xlu0 %v2606_v2, %s2518_s22 }
  0xa7   : > { %v269_v9 = vpop.permute.xlu0 %268  ;;  %v267_v10 = vpop.permute.xlu1 %266 }
  0xa8   : > { %v273_v14 = vsel %vm272_vm2, %v267_v10, %v269_v9 }
  0xab   : > { %v271_v11 = vpop.permute.xlu0 %270  ;;  %v455_v15 = vpop.permute.xlu1 %454 }
  0xac   : > { %2225 = vmatpush3.bf16.msra.mxu1 %v271_v11  ;;  %v274_v12 = vsel %vm272_vm2, %v269_v9, %v271_v11  ;;  %v1352_v11 = vld [vmem:[#allocation2 + $0x28] sm:$0xf] }
  0xad   : > { %282 = vmatprep.subr.bf16.mxu0 %v274_v12  ;;  %2230 = vmatprep.subr.bf16.mxu1 %v2509_v4 }
  0xae   : > { %283 = vmatpush1.bf16.msra.mxu0 %v273_v14 }
  0xaf   : > { %2227 = vmatmul.mubr.msk.bf16.vlgmr.msra.gmra.mrb[0].mxu1 %vm278_vm3, %v252_v13  ;;  %369 = vmatprep.subr.bf16.mxu0 %v2603_v1  ;;  %v457_v16 = vpop.permute.xlu0 %456  ;;  %v453_v18 = vpop.permute.xlu1 %452 }
  0xb0   : > { %2231 = vmatpush3.bf16.msra.mxu1 %v2610_v3  ;;  %2232 = vmatprep.mubr.msk.bf16.mxu1 %vm2511_vm1, %v2509_v4  ;;  %v460_v17 = vsel %vm458_vm4, %v455_v15, %v457_v16  ;;  %v459_v21 = vsel %vm458_vm4, %v453_v18, %v455_v15  ;;  %v1145_v3 = vld [vmem:[#allocation2 + $0x20] sm:$0xf]  ;;  %v1453_v18 = vld [vmem:[#allocation2 + $0x2c] sm:$0xf] }
  0xb1   : > { %2127 = vmatmul.mubr.msk.bf16.vlgmr.msra.gmra.mrb[0].mxu0 %vm278_vm3, %v252_v13  ;;  %2236 = vmatprep.subr.bf16.mxu1 %v2509_v4 }
  0xb2   : > { %370 = vmatpush1.bf16.msra.mxu0 %v2606_v2  ;;  %401 = vmatprep.mubr.bf16.mxu0 %v2512_v5 }
  0xb3   : > { %467 = vmatprep.subr.bf16.mxu0 %v460_v17  ;;  %v558_v20 = vpop.permute.xlu1 %557  ;;  %v556_v22 = vpop.permute.xlu0 %555 }
  0xb4   : > { %v561_v23 = vsel %vm559_vm5, %v556_v22, %v558_v20 }
  0xb7   : > { %v554_v24 = vpop.permute.xlu0 %553  ;;  %v717_v28 = vpop.permute.xlu1 %716 }
  0xb8   : > { %v560_v27 = vsel %vm559_vm5, %v554_v24, %v556_v22 }
  0xbb   : > { %2233 = vmatmul.mubr.msk.bf16.vlgmr.msra.gmra.mrb[0].mxu1 %vm278_vm3, %v250_v19  ;;  %v719_v26 = vpop.permute.xlu0 %718  ;;  %v715_v30 = vpop.permute.xlu1 %714 }
  0xbc   : > { %2237 = vmatpush3.bf16.msra.mxu1 %v457_v16  ;;  %2238 = vmatprep.mubr.msk.bf16.mxu1 %vm2511_vm1, %v2509_v4  ;;  %v722_v29 = vsel %vm720_vm6, %v717_v28, %v719_v26  ;;  %v721_v34 = vsel %vm720_vm6, %v715_v30, %v717_v28 }
  0xbd   : > { %2129 = vmatmul.mubr.msk.bf16.vlgmr.msra.gmra.mrb[0].mxu0 %vm278_vm3, %v250_v19  ;;  %2242 = vmatprep.subr.bf16.mxu1 %v2509_v4 }
  0xbe   : > { %468 = vmatpush1.bf16.msra.mxu0 %v459_v21  ;;  %499 = vmatprep.mubr.bf16.mxu0 %v2512_v5 }
  0xbf   : > { %568 = vmatprep.subr.bf16.mxu0 %v561_v23  ;;  %v813_v31 = vpop.permute.xlu0 %812  ;;  %v815_v33 = vpop.permute.xlu1 %814  ;;  %v1594_v23 = vld [vmem:[#allocation2 + $0x34] sm:$0xf] }
  0xc0   : > { %v817_v35 = vsel %vm272_vm2, %v813_v31, %v815_v33 }
  0xc3   : > { %v811_v36 = vpop.permute.xlu0 %810  ;;  %v910_v40 = vpop.permute.xlu1 %909 }
  0xc4   : > { %v816_v39 = vsel %vm272_vm2, %v811_v36, %v813_v31 }
  0xc7   : > { %2239 = vmatmul.mubr.msk.bf16.vlgmr.msra.gmra.mrb[0].mxu1 %vm278_vm3, %v451_v25  ;;  %v912_v38 = vpop.permute.xlu0 %911  ;;  %v908_v42 = vpop.permute.xlu1 %907 }
  0xc8   : > { %2243 = vmatpush3.bf16.msra.mxu1 %v558_v20  ;;  %2244 = vmatprep.mubr.msk.bf16.mxu1 %vm2511_vm1, %v2509_v4  ;;  %v914_v41 = vsel %vm559_vm5, %v910_v40, %v912_v38  ;;  %v913_v45 = vsel %vm559_vm5, %v908_v42, %v910_v40 }
  0xc9   : > { %2131 = vmatmul.mubr.msk.bf16.vlgmr.msra.gmra.mrb[0].mxu0 %vm278_vm3, %v451_v25  ;;  %2248 = vmatprep.subr.bf16.mxu1 %v2509_v4 }
  0xca   : > { %569 = vmatpush1.bf16.msra.mxu0 %v560_v27  ;;  %600 = vmatprep.mubr.bf16.mxu0 %v2512_v5 }
  0xcb   : > { %729 = vmatprep.subr.bf16.mxu0 %v722_v29  ;;  %v1012_v44 = vpop.permute.xlu1 %1011  ;;  %v1010_v46 = vpop.permute.xlu0 %1009  ;;  %v1592_v29 = vld [vmem:[#allocation2 + $0x30] sm:$0xf] }
  0xcc   : > { %v1015_v47 = vsel %vm1013_vm7, %v1010_v46, %v1012_v44 }
  0xcf   : > { %v1008_v48 = vpop.permute.xlu0 %1007  ;;  %v1164_v52 = vpop.permute.xlu1 %1163 }
  0xd0   : > { %v1014_v51 = vsel %vm1013_vm7, %v1008_v48, %v1010_v46 }
  0xd3   : > { %2245 = vmatmul.mubr.msk.bf16.vlgmr.msra.gmra.mrb[0].mxu1 %vm278_vm3, %v552_v32  ;;  %v1166_v50 = vpop.permute.xlu0 %1165  ;;  %v1162_v54 = vpop.permute.xlu1 %1161 }
  0xd4   : > { %2249 = vmatpush3.bf16.msra.mxu1 %v719_v26  ;;  %2250 = vmatprep.mubr.msk.bf16.mxu1 %vm2511_vm1, %v2509_v4  ;;  %v1168_v53 = vsel %vm559_vm5, %v1164_v52, %v1166_v50  ;;  %v1167_v58 = vsel %vm559_vm5, %v1162_v54, %v1164_v52 }
  0xd5   : > { %2133 = vmatmul.mubr.msk.bf16.vlgmr.msra.gmra.mrb[0].mxu0 %vm278_vm3, %v552_v32  ;;  %2254 = vmatprep.subr.bf16.mxu1 %v2509_v4 }
  0xd6   : > { %730 = vmatpush1.bf16.msra.mxu0 %v721_v34  ;;  %761 = vmatprep.mubr.bf16.mxu0 %v2512_v5 }
  0xd7   : > { %824 = vmatprep.subr.bf16.mxu0 %v817_v35  ;;  %v1259_v55 = vpop.permute.xlu0 %1258  ;;  %v1261_v57 = vpop.permute.xlu1 %1260  ;;  %v1799_v35 = vld [vmem:[#allocation2 + $0x38] sm:$0xf] }
  0xd8   : > { %v1263_v59 = vsel %vm458_vm4, %v1259_v55, %v1261_v57 }
  0xdb   : > { %2251 = vmatmul.mubr.msk.bf16.vlgmr.msra.gmra.mrb[4].mxu1 %vm278_vm3, %v700_v37  ;;  %v1257_v60 = vpop.permute.xlu0 %1256  ;;  %v1356_v0 = vpop.permute.xlu1 %1355 }
  0xdc   : > { %2255 = vmatpush3.bf16.msra.mxu1 %v815_v33  ;;  %2256 = vmatprep.mubr.msk.bf16.mxu1 %vm2511_vm1, %v2509_v4  ;;  %v1262_v63 = vsel %vm458_vm4, %v1257_v60, %v1259_v55 }
  0xdd   : > { %2140 = vmatmul.mubr.msk.bf16.vlgmr.msra.gmra.mrb[4].mxu0 %vm278_vm3, %v700_v37  ;;  %2260 = vmatprep.subr.bf16.mxu1 %v2509_v4  ;;  %v1899_v37 = vld [vmem:[#allocation2 + $0x3c] sm:$0xf] }
  0xde   : > { %825 = vmatpush1.bf16.msra.mxu0 %v816_v39  ;;  %856 = vmatprep.mubr.bf16.mxu0 %v2512_v5 }
  0xdf   : > { %921 = vmatprep.subr.bf16.mxu0 %v914_v41  ;;  %v1358_v62 = vpop.permute.xlu0 %1357  ;;  %v1354_v2 = vpop.permute.xlu1 %1353 }
  0xe0   : > { %v1361_v1 = vsel %vm1359_vm8, %v1356_v0, %v1358_v62  ;;  %v1360_v7 = vsel %vm1359_vm8, %v1354_v2, %v1356_v0  ;;  %vm678_vm8 = vcmask 261120  }
  0xe3   : > { %v1459_v6 = vpop.permute.xlu1 %1458  ;;  %v1457_v8 = vpop.permute.xlu0 %1456 }
  0xe4   : > { %v1462_v9 = vsel %vm1460_vm9, %v1457_v8, %v1459_v6 }
  0xe7   : > { %2257 = vmatmul.mubr.msk.bf16.vlgmr.msra.gmra.mrb[4].mxu1 %vm278_vm3, %v698_v43  ;;  %v1455_v10 = vpop.permute.xlu0 %1454  ;;  %v1611_v14 = vpop.permute.xlu1 %1610 }
  0xe8   : > { %2261 = vmatpush3.bf16.msra.mxu1 %v912_v38  ;;  %2262 = vmatprep.mubr.msk.bf16.mxu1 %vm2511_vm1, %v2509_v4  ;;  %v1461_v13 = vsel %vm1460_vm9, %v1455_v10, %v1457_v8  ;;  %v191_v38 = vlaneseq }
  0xe9   : > { %2142 = vmatmul.mubr.msk.bf16.vlgmr.msra.gmra.mrb[4].mxu0 %vm278_vm3, %v698_v43  ;;  %2266 = vmatprep.subr.bf16.mxu1 %v2509_v4 }
  0xea   : > { %922 = vmatpush1.bf16.msra.mxu0 %v913_v45  ;;  %953 = vmatprep.mubr.bf16.mxu0 %v2512_v5  ;;  %v192_v39 = vand.u32 127, %v191_v38 }
  0xeb   : > { %1022 = vmatprep.subr.bf16.mxu0 %v1015_v47  ;;  %v1613_v12 = vpop.permute.xlu0 %1612  ;;  %v1609_v16 = vpop.permute.xlu1 %1608 }
  0xec   : > { %v1615_v15 = vsel %vm1013_vm7, %v1611_v14, %v1613_v12  ;;  %v1614_v20 = vsel %vm1013_vm7, %v1609_v16, %v1611_v14  ;;  %v194_v40 = vadd.s32 256, %v192_v39  ;;  %v193_v41 = vadd.s32 128, %v192_v39 }
  0xee   : > { %v2792_v42 = vmul.u32.u64.low 3817748708, %v194_v40  ;;  %v2793_v43 = vmul.u32.u64.high 3817748708, %v194_v40, %v2792_v42 }
  0xef   : > { %v1706_v17 = vpop.permute.xlu0 %1705  ;;  %v1708_v19 = vpop.permute.xlu1 %1707 }
  0xf0   : > { %v1710_v21 = vsel %vm559_vm5, %v1706_v17, %v1708_v19 }
  0xf3   : > { %2263 = vmatmul.mubr.msk.bf16.vlgmr.msra.gmra.mrb[4].mxu1 %vm278_vm3, %v906_v49  ;;  %v1704_v22 = vpop.permute.xlu0 %1703  ;;  %v1803_v26 = vpop.permute.xlu1 %1802 }
  0xf4   : > { %2267 = vmatpush3.bf16.msra.mxu1 %v1012_v44  ;;  %2268 = vmatprep.mubr.msk.bf16.mxu1 %vm2511_vm1, %v2509_v4  ;;  %v1709_v25 = vsel %vm559_vm5, %v1704_v22, %v1706_v17  ;;  %v2795_v44 = vmul.u32.u64.low 3817748708, %v192_v39  ;;  %v2796_v45 = vmul.u32.u64.high 3817748708, %v192_v39, %v2795_v44  ;;  %vm666_vm5 = vcmask 257024  }
  0xf5   : > { %2144 = vmatmul.mubr.msk.bf16.vlgmr.msra.gmra.mrb[4].mxu0 %vm278_vm3, %v906_v49  ;;  %2272 = vmatprep.subr.bf16.mxu1 %v2509_v4 }
  0xf6   : > { %1023 = vmatpush1.bf16.msra.mxu0 %v1014_v51  ;;  %1054 = vmatprep.mubr.bf16.mxu0 %v2512_v5  ;;  %v201_v47 = vshrl.u32 %v2796_v45, 4 }
  0xf7   : > { %1175 = vmatprep.subr.bf16.mxu0 %v1168_v53  ;;  %v1805_v24 = vpop.permute.xlu0 %1804  ;;  %v1801_v28 = vpop.permute.xlu1 %1800 }
  0xf8   : > { %v1807_v27 = vsel %vm1460_vm9, %v1803_v26, %v1805_v24  ;;  %v1806_v31 = vsel %vm1460_vm9, %v1801_v28, %v1803_v26  ;;  %vm2035_vm9 = vcmask 7168  }
  0xfb   : > { %v1905_v30 = vpop.permute.xlu1 %1904  ;;  %v1903_v32 = vpop.permute.xlu0 %1902 }
  0xfc   : > { %v1908_v33 = vsel %vm1906_vm10, %v1903_v32, %v1905_v30 }
  0xff   : > { %2269 = vmatmul.mubr.msk.bf16.vlgmr.msra.gmra.mrb[4].mxu1 %vm278_vm3, %v1006_v56  ;;  %v1901_v34 = vpop.permute.xlu0 %1900 }
 0x100   : > { %2273 = vmatpush3.bf16.msra.mxu1 %v1166_v50  ;;  %2274 = vmatprep.mubr.msk.bf16.mxu1 %vm2511_vm1, %v2509_v4  ;;  %v1907_v36 = vsel %vm1906_vm10, %v1901_v34, %v1903_v32  ;;  %v202_v50 = vmul.u32 18, %v201_v47  ;;  %vm2039_vm10 = vcmask 15368  }
 0x101   : > { %2146 = vmatmul.mubr.msk.bf16.vlgmr.msra.gmra.mrb[4].mxu0 %vm278_vm3, %v1006_v56  ;;  %2278 = vmatprep.subr.bf16.mxu1 %v2509_v4 }
 0x102   : > { %1176 = vmatpush1.bf16.msra.mxu0 %v1167_v58  ;;  %1207 = vmatprep.mubr.bf16.mxu0 %v2512_v5  ;;  %v203_v53 = vsub.s32 %v192_v39, %v202_v50 }
 0x103   : > { %1270 = vmatprep.subr.bf16.mxu0 %v1263_v59 }
 0x104   : > { %vm228_vm13 = vcmp.ne.s32.totalorder %v203_v53, 0  ;;  %vm231_vm14 = vcmp.lt.s32.totalorder %v203_v53, 0  ;;  %v237_v56 = vadd.s32 18, %v203_v53 }
 0x105   : > { %vm234_vm2 = vmand %vm231_vm14, %vm228_vm13 }
 0x106   : > { %v240_v59 = vsel %vm234_vm2, %v237_v56, %v203_v53 }
 0x107   : > { %2275 = vmatmul.mubr.msk.bf16.vlgmr.msra.gmra.mrb[8].mxu1 %vm278_vm3, %v1147_v61  ;;  %vm2808_vm6 = vcmp.lt.s32.totalorder %v240_v59, 16 }
 0x108   : > { %2279 = vmatpush3.bf16.msra.mxu1 %v1261_v57  ;;  %2280 = vmatprep.mubr.msk.bf16.mxu1 %vm2511_vm1, %v2509_v4 }
 0x109   : > { %2155 = vmatmul.mubr.msk.bf16.vlgmr.msra.gmra.mrb[8].mxu0 %vm278_vm3, %v1147_v61  ;;  %2284 = vmatprep.subr.bf16.mxu1 %v2509_v4 }
 0x10a   : > { %1271 = vmatpush1.bf16.msra.mxu0 %v1262_v63  ;;  %1302 = vmatprep.mubr.bf16.mxu0 %v2512_v5 }
 0x10b   : > { %1368 = vmatprep.subr.bf16.mxu0 %v1361_v1 }
 0x113   : > { %2281 = vmatmul.mubr.msk.bf16.vlgmr.msra.gmra.mrb[8].mxu1 %vm278_vm3, %v1145_v3 }
 0x114   : > { %2285 = vmatpush3.bf16.msra.mxu1 %v1358_v62  ;;  %2286 = vmatprep.mubr.msk.bf16.mxu1 %vm2511_vm1, %v2509_v4 }
 0x115   : > { %2157 = vmatmul.mubr.msk.bf16.vlgmr.msra.gmra.mrb[8].mxu0 %vm278_vm3, %v1145_v3  ;;  %2290 = vmatprep.subr.bf16.mxu1 %v2509_v4 }
 0x116   : > { %1369 = vmatpush1.bf16.msra.mxu0 %v1360_v7  ;;  %1400 = vmatprep.mubr.bf16.mxu0 %v2512_v5 }
 0x117   : > { %1469 = vmatprep.subr.bf16.mxu0 %v1462_v9 }
 0x11f   : > { %2287 = vmatmul.mubr.msk.bf16.vlgmr.msra.gmra.mrb[8].mxu1 %vm278_vm3, %v1352_v11 }
 0x120   : > { %2291 = vmatpush3.bf16.msra.mxu1 %v1459_v6  ;;  %2292 = vmatprep.mubr.msk.bf16.mxu1 %vm2511_vm1, %v2509_v4 }
 0x121   : > { %2159 = vmatmul.mubr.msk.bf16.vlgmr.msra.gmra.mrb[8].mxu0 %vm278_vm3, %v1352_v11  ;;  %2296 = vmatprep.subr.bf16.mxu1 %v2509_v4 }
 0x122   : > { %1470 = vmatpush1.bf16.msra.mxu0 %v1461_v13  ;;  %1501 = vmatprep.mubr.bf16.mxu0 %v2512_v5 }
 0x123   : > { %1622 = vmatprep.subr.bf16.mxu0 %v1615_v15 }
 0x12b   : > { %2293 = vmatmul.mubr.msk.bf16.vlgmr.msra.gmra.mrb[8].mxu1 %vm278_vm3, %v1453_v18 }
 0x12c   : > { %2297 = vmatpush3.bf16.msra.mxu1 %v1613_v12  ;;  %2298 = vmatprep.mubr.msk.bf16.mxu1 %vm2511_vm1, %v2509_v4 }
 0x12d   : > { %2161 = vmatmul.mubr.msk.bf16.vlgmr.msra.gmra.mrb[8].mxu0 %vm278_vm3, %v1453_v18  ;;  %2302 = vmatprep.subr.bf16.mxu1 %v2509_v4 }
 0x12e   : > { %1623 = vmatpush1.bf16.msra.mxu0 %v1614_v20  ;;  %1654 = vmatprep.mubr.bf16.mxu0 %v2512_v5 }
 0x12f   : > { %1717 = vmatprep.subr.bf16.mxu0 %v1710_v21 }
 0x133   : > { %2299 = vmatmul.mubr.msk.bf16.vlgmr.msra.gmra.mrb[12].mxu1 %vm278_vm3, %v1594_v23 }
 0x134   : > { %2303 = vmatpush3.bf16.msra.mxu1 %v1708_v19  ;;  %2304 = vmatprep.mubr.msk.bf16.mxu1 %vm2511_vm1, %v2509_v4 }
 0x135   : > { %2170 = vmatmul.mubr.msk.bf16.vlgmr.msra.gmra.mrb[12].mxu0 %vm278_vm3, %v1594_v23  ;;  %2308 = vmatprep.subr.bf16.mxu1 %v2509_v4 }
 0x136   : > { %1718 = vmatpush1.bf16.msra.mxu0 %v1709_v25  ;;  %1749 = vmatprep.mubr.bf16.mxu0 %v2512_v5 }
 0x137   : > { %1814 = vmatprep.subr.bf16.mxu0 %v1807_v27 }
 0x13f   : > { %2305 = vmatmul.mubr.msk.bf16.vlgmr.msra.gmra.mrb[12].mxu1 %vm278_vm3, %v1592_v29 }
 0x140   : > { %2309 = vmatpush3.bf16.msra.mxu1 %v1805_v24  ;;  %2310 = vmatprep.mubr.msk.bf16.mxu1 %vm2511_vm1, %v2509_v4 }
 0x141   : > { %2172 = vmatmul.mubr.msk.bf16.vlgmr.msra.gmra.mrb[12].mxu0 %vm278_vm3, %v1592_v29  ;;  %2314 = vmatprep.subr.bf16.mxu1 %v2509_v4 }
 0x142   : > { %1815 = vmatpush1.bf16.msra.mxu0 %v1806_v31  ;;  %1846 = vmatprep.mubr.bf16.mxu0 %v2512_v5 }
 0x143   : > { %1915 = vmatprep.subr.bf16.mxu0 %v1908_v33 }
 0x14b   : > { %2311 = vmatmul.mubr.msk.bf16.vlgmr.msra.gmra.mrb[12].mxu1 %vm278_vm3, %v1799_v35 }
 0x14c   : > { %2315 = vmatpush3.bf16.msra.mxu1 %v1905_v30  ;;  %2316 = vmatprep.mubr.msk.bf16.mxu1 %vm2511_vm1, %v2509_v4  ;;  %v2798_v4 = vmul.u32.u64.low 3817748708, %v193_v41  ;;  %v2799_v46 = vmul.u32.u64.high 3817748708, %v193_v41, %v2798_v4 }
 0x14d   : > { %2174 = vmatmul.mubr.msk.bf16.vlgmr.msra.gmra.mrb[12].mxu0 %vm278_vm3, %v1799_v35 }
 0x14e   : > { %1916 = vmatpush1.bf16.msra.mxu0 %v1907_v36  ;;  %1947 = vmatprep.mubr.bf16.mxu0 %v2512_v5  ;;  %v223_v5 = vshrl.u32 %v2793_v43, 4  ;;  %v212_v48 = vshrl.u32 %v2799_v46, 4 }
 0x150   : > { %v224_v49 = vmul.u32 18, %v223_v5  ;;  %v213_v51 = vmul.u32 18, %v212_v48 }
 0x152   : > { %v225_v52 = vsub.s32 %v194_v40, %v224_v49  ;;  %v214_v54 = vsub.s32 %v193_v41, %v213_v51 }
 0x154   : > { %vm230_vm11 = vcmp.ne.s32.totalorder %v225_v52, 0  ;;  %vm233_vm12 = vcmp.lt.s32.totalorder %v225_v52, 0  ;;  %v239_v55 = vadd.s32 18, %v225_v52  ;;  %vm229_vm0 = vcmp.ne.s32.totalorder %v214_v54, 0 }
 0x155   : > { %vm236_vm15 = vmand %vm233_vm12, %vm230_vm11  ;;  %vm232_vm1 = vcmp.lt.s32.totalorder %v214_v54, 0  ;;  %v238_v57 = vadd.s32 18, %v214_v54 }
 0x156   : > { %v242_v58 = vsel %vm236_vm15, %v239_v55, %v225_v52 }
 0x157   : > { %2317 = vmatmul.mubr.msk.bf16.vlgmr.msra.gmra.mrb[12].mxu1 %vm278_vm3, %v1899_v37  ;;  %vm2804_vm4 = vcmp.lt.s32.totalorder %v242_v58, 16 }
 0x159   : > { %2176 = vmatmul.mubr.msk.bf16.vlgmr.msra.gmra.mrb[12].mxu0 %vm278_vm3, %v1899_v37  ;;  %vm235_vm3 = vmand %vm232_vm1, %vm229_vm0 }
 0x15a   : > { %v241_v61 = vsel %vm235_vm3, %v238_v57, %v214_v54 }
 0x15b   : > { %vm2814_vm7 = vcmp.lt.s32.totalorder %v241_v61, 16 }
 0x1a6   : > { %v643_v62 = vpop.f32.mrb[0].mxu1 }
 0x1a7   : > { %v2185_v0 = vpack.c.bf16 %v643_v62, %v643_v62  ;;  %v676_v1 = vsel %vm2804_vm4, %v643_v62, 0.0  ;;  %v2246_v2 = vpop.f32.mrb[1].mxu1 }
 0x1a8   : > { %v602_v6 = vpop.f32.mrb[0].mxu0  ;;  %v646_v7 = vpop.f32.mrb[2].mxu1  ;;  %v686_v11 = vmul.f32 %v676_v1, %v676_v1  ;;  %v679_v19 = vsel %vm678_vm8, %v676_v1, 0.0 }
 0x1a9   : > { %667 = vst.msk [vmem:[%s2595_s11 + $0x8] sm:$0xf] %vm666_vm5, %v2185_v0  ;;  %v674_v8 = vsel %vm2808_vm6, %v602_v6, 0.0  ;;  %v604_v9 = vpop.f32.mrb[1].mxu0  ;;  %v2247_v10 = vpop.f32.mrb[3].mxu1 }
 0x1aa   : > { %v684_v12 = vmul.f32 %v674_v8, %v674_v8  ;;  %v2184_v13 = vpack.c.bf16 %v604_v9, %v602_v6  ;;  %v675_v14 = vsel %vm2814_vm7, %v604_v9, 0.0  ;;  %v606_v15 = vpop.f32.mrb[2].mxu0  ;;  %v688_v22 = vsel %vm678_vm8, %v686_v11, 0.0 }
 0x1ab   : > { %v677_v16 = vadd.f32 %v675_v14, %v674_v8  ;;  %v685_v17 = vmul.f32 %v675_v14, %v675_v14  ;;  %v607_v18 = vpop.f32.mrb[3].mxu0 }
 0x1ac   : > { %665 = vst [vmem:[%s2595_s11] sm:$0xff] %v2184_v13 }
 0x1ad   : > { %v680_v20 = vadd.f32 %v679_v19, %v677_v16  ;;  %v687_v21 = vadd.f32 %v685_v17, %v684_v12 }
 0x1af   : > { %681 = vadd.xlane.f32.xlu1 %v680_v20  ;;  %v689_v23 = vadd.f32 %v688_v22, %v687_v21 }
 0x1d2   : > { %v1097_v24 = vpop.f32.mrb[4].mxu1 }
 0x1d3   : > { %v2187_v25 = vpack.c.bf16 %v1097_v24, %v1097_v24  ;;  %v1124_v26 = vsel %vm2804_vm4, %v1097_v24, 0.0  ;;  %v2270_v27 = vpop.f32.mrb[5].mxu1 }
 0x1d4   : > { %v1056_v28 = vpop.f32.mrb[4].mxu0  ;;  %v1100_v29 = vpop.f32.mrb[6].mxu1  ;;  %v1133_v33 = vmul.f32 %v1124_v26, %v1124_v26  ;;  %v1126_v41 = vsel %vm678_vm8, %v1124_v26, 0.0 }
 0x1d5   : > { %2151 = vst.msk [vmem:[%s2595_s11 + $0x14] sm:$0xf] %vm666_vm5, %v2187_v25  ;;  %v1122_v30 = vsel %vm2808_vm6, %v1056_v28, 0.0  ;;  %v1058_v31 = vpop.f32.mrb[5].mxu0  ;;  %v2271_v32 = vpop.f32.mrb[7].mxu1 }
 0x1d6   : > { %v1131_v34 = vmul.f32 %v1122_v30, %v1122_v30  ;;  %v2186_v35 = vpack.c.bf16 %v1058_v31, %v1056_v28  ;;  %v1123_v36 = vsel %vm2814_vm7, %v1058_v31, 0.0  ;;  %v1060_v37 = vpop.f32.mrb[6].mxu0  ;;  %v1135_v44 = vsel %vm678_vm8, %v1133_v33, 0.0  ;;  %v2033_v32 = vld [vmem:[%s2878_s3] sm:$0xff] }
 0x1d7   : > { %v1125_v38 = vadd.f32 %v1123_v36, %v1122_v30  ;;  %v1132_v39 = vmul.f32 %v1123_v36, %v1123_v36  ;;  %v1061_v40 = vpop.f32.mrb[7].mxu0 }
 0x1d8   : > { %2150 = vst [vmem:[%s2595_s11 + $0xc] sm:$0xff] %v2186_v35 }
 0x1d9   : > { %v1127_v42 = vadd.f32 %v1126_v41, %v1125_v38  ;;  %v1134_v43 = vadd.f32 %v1132_v39, %v1131_v34 }
 0x1db   : > { %1128 = vadd.xlane.f32.xlu0 %v1127_v42  ;;  %v1136_v45 = vadd.f32 %v1135_v44, %v1134_v43 }
 0x1fe   : > { %v1544_v4 = vpop.f32.mrb[8].mxu1 }
 0x1ff   : > { %v2189_v46 = vpack.c.bf16 %v1544_v4, %v1544_v4  ;;  %v1571_v5 = vsel %vm2804_vm4, %v1544_v4, 0.0  ;;  %v2294_v47 = vpop.f32.mrb[9].mxu1 }
 0x200   : > { %v1503_v48 = vpop.f32.mrb[8].mxu0  ;;  %v1547_v49 = vpop.f32.mrb[10].mxu1  ;;  %v1580_v53 = vmul.f32 %v1571_v5, %v1571_v5  ;;  %v1573_v62 = vsel %vm678_vm8, %v1571_v5, 0.0 }
 0x201   : > { %2166 = vst.msk [vmem:[%s2595_s11 + $0x20] sm:$0xf] %vm666_vm5, %v2189_v46  ;;  %v1569_v50 = vsel %vm2808_vm6, %v1503_v48, 0.0  ;;  %v1505_v51 = vpop.f32.mrb[9].mxu0  ;;  %v2295_v52 = vpop.f32.mrb[11].mxu1 }
 0x202   : > { %v1578_v54 = vmul.f32 %v1569_v50, %v1569_v50  ;;  %v2188_v55 = vpack.c.bf16 %v1505_v51, %v1503_v48  ;;  %v1570_v56 = vsel %vm2814_vm7, %v1505_v51, 0.0  ;;  %v1507_v57 = vpop.f32.mrb[10].mxu0  ;;  %v1582_v2 = vsel %vm678_vm8, %v1580_v53, 0.0 }
 0x203   : > { %v1572_v58 = vadd.f32 %v1570_v56, %v1569_v50  ;;  %v1579_v59 = vmul.f32 %v1570_v56, %v1570_v56  ;;  %v1508_v61 = vpop.f32.mrb[11].mxu0 }
 0x204   : > { %2165 = vst [vmem:[%s2595_s11 + $0x18] sm:$0xff] %v2188_v55 }
 0x205   : > { %v1574_v0 = vadd.f32 %v1573_v62, %v1572_v58  ;;  %v1581_v1 = vadd.f32 %v1579_v59, %v1578_v54 }
 0x207   : > { %1575 = vadd.xlane.f32.xlu0 %v1574_v0  ;;  %v1583_v6 = vadd.f32 %v1582_v2, %v1581_v1 }
 0x20b   : > { %690 = vadd.xlane.f32.xlu0 %v689_v23 }
 0x20f   : > { %1584 = vadd.xlane.f32.xlu0 %v1583_v6 }
 0x22a   : > { %v1990_v7 = vpop.f32.mrb[12].mxu1 }
 0x22b   : > { %v2191_v8 = vpack.c.bf16 %v1990_v7, %v1990_v7  ;;  %v2017_v9 = vsel %vm2804_vm4, %v1990_v7, 0.0  ;;  %v2318_v10 = vpop.f32.mrb[13].mxu1 }
 0x22c   : > { %v1949_v11 = vpop.f32.mrb[12].mxu0  ;;  %v1993_v12 = vpop.f32.mrb[14].mxu1  ;;  %v2026_v16 = vmul.f32 %v2017_v9, %v2017_v9  ;;  %v2019_v23 = vsel %vm678_vm8, %v2017_v9, 0.0 }
 0x22d   : > { %2181 = vst.msk [vmem:[%s2595_s11 + $0x2c] sm:$0xf] %vm666_vm5, %v2191_v8  ;;  %v2015_v13 = vsel %vm2808_vm6, %v1949_v11, 0.0  ;;  %v1951_v14 = vpop.f32.mrb[13].mxu0  ;;  %v2319_v15 = vpop.f32.mrb[15].mxu1 }
 0x22e   : > { %v2024_v17 = vmul.f32 %v2015_v13, %v2015_v13  ;;  %v2190_v18 = vpack.c.bf16 %v1951_v14, %v1949_v11  ;;  %v2016_v19 = vsel %vm2814_vm7, %v1951_v14, 0.0  ;;  %v1953_v20 = vpop.f32.mrb[14].mxu0  ;;  %v2028_v63 = vsel %vm678_vm8, %v2026_v16, 0.0 }
 0x22f   : > { %v2018_v60 = vadd.f32 %v2016_v19, %v2015_v13  ;;  %v2025_v21 = vmul.f32 %v2016_v19, %v2016_v19  ;;  %v1954_v22 = vpop.f32.mrb[15].mxu0 }
 0x230   : > { %2180 = vst [vmem:[%s2595_s11 + $0x24] sm:$0xff] %v2190_v18 }
 0x231   : > { %v2020_v24 = vadd.f32 %v2019_v23, %v2018_v60  ;;  %v2027_v25 = vadd.f32 %v2025_v21, %v2024_v17 }
 0x233   : > { %2021 = vadd.xlane.f32.xlu1 %v2020_v24  ;;  %v2029_v26 = vadd.f32 %v2028_v63, %v2027_v25 }
 0x237   : > { %1137 = vadd.xlane.f32.xlu1 %v1136_v45 }
 0x23b   : > { %2030 = vadd.xlane.f32.xlu1 %v2029_v26 }
 0x23c   : > { %v682_v29 = vpop.xlane.xlu1 %681 }
 0x268   : > { %v1129_v27 = vpop.xlane.xlu0 %1128 }
 0x269   : > { %v1130_v3 = vadd.f32 %v1129_v27, %v682_v29 }
 0x294   : > { %v1576_v28 = vpop.xlane.xlu0 %1575 }
 0x295   : > { %v1577_v30 = vadd.f32 %v1576_v28, %v1130_v3 }
 0x298   : > { %v691_v31 = vpop.xlane.xlu0 %690 }
 0x29c   : > { %v1585_v38 = vpop.xlane.xlu0 %1584 }
 0x2c0   : > { %v2022_v33 = vpop.xlane.xlu1 %2021 }
 0x2c1   : > { %v2023_v34 = vadd.f32 %v2022_v33, %v1577_v30 }
 0x2c3   : > { %v2034_v35 = vadd.f32 %v2033_v32, %v2023_v34 }
 0x2c4   : > { %v1138_v36 = vpop.xlane.xlu1 %1137 }
 0x2c5   : > { %2036 = vst.msk [vmem:[%s2878_s3] sm:$0xff] %vm2035_vm9, %v2034_v35  ;;  %v1139_v37 = vadd.f32 %v1138_v36, %v691_v31 }
 0x2c7   : > { %v1586_v39 = vadd.f32 %v1585_v38, %v1139_v37 }
 0x2c8   : > { %v2031_v40 = vpop.xlane.xlu1 %2030 }
 0x2c9   : > { %v2032_v41 = vadd.f32 %v2031_v40, %v1586_v39 }
 0x2cc   : > { %v2037_v42 = vld [vmem:[%s2878_s3] sm:$0xff] }
 0x2cd   : > { %v2038_v43 = vadd.f32 %v2037_v42, %v2032_v41 }
 0x2cf   : > { %2040 = vst.msk [vmem:[%s2878_s3] sm:$0xff] %vm2039_vm10, %v2038_v43 }
 0x2d0 PF: > { %s15_s12 = sadd.s32 1, %s2502_s12  }
 0x2d1   : > { %p12_p4 = scmp.ge.s32.totalorder %s15_s12, 4  }
 0x2d3   :  { %14 = sbr.rel (!%p12_p4) target bundleno = 1 (0x1), region = 93 }
 0x2da   :  { %2068 = vsyncpa [#allocation3], 1 }
 0x2db   :  { %2070 = vsyncpa [#allocation3 + $0x1], 1 }

// kernel: netG_forward.9
= control target key start
LH: loop header
LB: loop body
LE: loop exit
PB: predicated region body
PF: predicated region fallthrough
CT: control target
= control target key end

     0   :  { %s5499_s9 = smov 0   ;;  %s6821_s0 = inlined_call_operand.vmem [shape: bf16[2,8,1190], index: 0, kind: input, shape index: {}]   ;;  %s6822_s1 = inlined_call_operand.vmem [shape: bf16[16,3,8], index: 1, kind: input, shape index: {}]   ;;  %s6823_s2 = inlined_call_operand.vmem [shape: f32[2,4,3,1088], index: 2, kind: output, shape index: {}]  }
   0x1 LB: > { %s4755_s10 = sadd.s32 4294967295, %s5471_s9   ;;  %p4759_p0 = scmp.ge.s32.totalorder %s5471_s9, 1  ;;  %s5471_s9 = sphi %s5499_s9, %s12_s9  }
   0x2   : > { %p112_p1 = scmp.lt.s32.totalorder %s5471_s9, 3 }
   0x4   : > { %p113_p2 = pnand %p4759_p0, %p112_p1 }
   0x5   : > { %p134_p3 = scmp.lt.s32.totalorder (!%p113_p2), %s4755_s10, 1  ;;  %v5473_v0 = vmov (!%p113_p2), 0   ;;  %s5474_s15 = smov (!%p113_p2), 127   ;;  %vm194_vm0 = vcmask (!%p113_p2), 1039360   ;;  %vm207_vm1 = vcmask (!%p113_p2), 1043456   ;;  %vm203_vm2 = vcmask (!%p113_p2), 64512  }
   0x6   : > { %116 = sbr.rel (%p113_p2) target bundleno = 693 (0x2b5), region = 28  ;;  %267 = vmatprep.mubr.bf16.mxu0 (!%p113_p2), %v5473_v0  ;;  %805 = vmatprep.mubr.bf16.mxu1 (!%p113_p2), %v5473_v0  ;;  %s5475_s16 = smov (!%p113_p2), 94   ;;  %v5659_v23 = vld [vmem:[%s6822_s1 + $0x2] sm:$0x3] (!%p113_p2)  ;;  %vm693_vm3 = vcmask (!%p113_p2), 769024   ;;  %vm965_vm4 = vcmask (!%p113_p2), 760832  }
   0x7   : > { %s5476_s17 = smov (!%p113_p2), 93   ;;  %s5477_s18 = smov (!%p113_p2), 126   ;;  %v5685_v35 = vld [vmem:[%s6822_s1 + $0x4] sm:$0x3] (!%p113_p2)  ;;  %v5479_v53 = vmov (!%p113_p2), 0.0   ;;  %vm5480_vm5 = vmmov (!%p113_p2), 0  }
   0x8   : > { %s5478_s19 = smov (!%p113_p2), 92   ;;  %v5754_v58 = vld [vmem:[%s6822_s1 + $0x6] sm:$0x3] (!%p113_p2)  ;;  %vm1298_vm6 = vcmask (!%p113_p2), 1031168   ;;  %s5481_s4 = smov (!%p113_p2), 60   ;;  %vm2092_vm7 = vcmask (!%p113_p2), 752640  }
   0x9   : > { %s5482_s5 = smov (!%p113_p2), 59   ;;  %s5483_s8 = smov (!%p113_p2), 58   ;;  %vm2979_vm8 = vcmask (!%p113_p2), 490496   ;;  %vm3254_vm9 = vcmask (!%p113_p2), 482304   ;;  %vm4416_vm10 = vcmask (!%p113_p2), 474112   ;;  %vm1246_vm11 = vcmask (!%p113_p2), 518144  }
   0xd   : > { %s6825_s10 = smov (!%p134_p3, %s4755_s10), 1 }
   0xe   : > { %s5358_s11 = smul.u32 40, %s6825_s10 }
   0xf   : > { %s5359_s25 = smul.u32 144, %s6825_s10 }
  0x10   : > { %s5515_s14 = scalar_lea.vmem %s6821_s0, %s5358_s11 }
  0x11   : > { %v146_v1 = vld [vmem:[%s5515_s14 + $0x8] sm:$0xff]  ;;  %v145_v2 = vld [vmem:[%s5515_s14] sm:$0xff]  ;;  %v147_v7 = vld [vmem:[%s5515_s14 + $0x10] sm:$0xff]  ;;  %s6676_s28 = scalar_lea.vmem %s6823_s2, %s5359_s25 }
  0x12   : > { %v5519_v3 = vcombine.low %v146_v1, %v146_v1  ;;  %v5521_v4 = vcombine.low %v145_v2, %v145_v2  ;;  %v5527_v5 = vcombine.high %v146_v1, %v146_v1  ;;  %v5529_v6 = vcombine.high %v145_v2, %v145_v2  ;;  %v148_v9 = vld [vmem:[%s5515_s14 + $0x18] sm:$0xff]  ;;  %v5562_v13 = vld [vmem:[%s5515_s14 + $0x20] ss:$0 sps:$4 sm:$0xff]  }
  0x13   : > { %v5536_v8 = vcombine.low %v147_v7, %v147_v7  ;;  %v5547_v10 = vcombine.low %v148_v9, %v148_v9  ;;  %v5549_v11 = vcombine.high %v147_v7, %v147_v7  ;;  %v5555_v12 = vcombine.high %v148_v9, %v148_v9  ;;  %v5388_v14 = vld [vmem:[%s5515_s14 + $0x20] ss:$0 sps:$4 sm:$0xff]  }
  0x14   : > { %180 = vrot.lane.b32.xlu1 %v5519_v3, %s5474_s15  ;;  %176 = vrot.lane.b32.xlu0 %v5521_v4, %s5474_s15  ;;  %v443_v1 = vsel %vm207_vm1, %v5521_v4, 0  ;;  %v5782_v7 = vld [vmem:[%s5515_s14 + $0x20] ss:$0 sps:$4 sm:$0xff]  }
  0x18   : > { %182 = vrot.lane.b32.xlu1 %v5527_v5, %s5474_s15  ;;  %178 = vrot.lane.b32.xlu0 %v5529_v6, %s5474_s15 }
  0x1c   : > { %679 = vrot.lane.b32.xlu1 %v5519_v3, %s5475_s16  ;;  %184 = vrot.lane.b32.xlu0 %v5536_v8, %s5474_s15 }
  0x20   : > { %683 = vrot.lane.b32.xlu1 %v5536_v8, %s5475_s16  ;;  %681 = vrot.lane.b32.xlu0 %v5527_v5, %s5475_s16 }
  0x24   : > { %188 = vrot.lane.b32.xlu1 %v5547_v10, %s5474_s15  ;;  %186 = vrot.lane.b32.xlu0 %v5549_v11, %s5474_s15 }
  0x28   : > { %689 = vrot.lane.b32.xlu1 %v5555_v12, %s5475_s16  ;;  %687 = vrot.lane.b32.xlu0 %v5547_v10, %s5475_s16 }
  0x2c   : > { %190 = vrot.lane.b32.xlu1 %v5555_v12, %s5474_s15  ;;  %691 = vrot.lane.b32.xlu0 %v5562_v13, %s5475_s16 }
  0x30   : > { %951 = vrot.lane.b32.xlu1 %v5519_v3, %s5476_s17  ;;  %192 = vrot.lane.b32.xlu0 %v5562_v13, %s5474_s15 }
  0x34   : > { %955 = vrot.lane.b32.xlu1 %v5536_v8, %s5476_s17  ;;  %953 = vrot.lane.b32.xlu0 %v5527_v5, %s5476_s17 }
  0x38   : > { %961 = vrot.lane.b32.xlu1 %v5555_v12, %s5476_s17  ;;  %959 = vrot.lane.b32.xlu0 %v5547_v10, %s5476_s17 }
  0x3c   : > { %1280 = vrot.lane.b32.xlu1 %v5521_v4, %s5477_s18  ;;  %963 = vrot.lane.b32.xlu0 %v5562_v13, %s5476_s17 }
  0x40   : > { %1284 = vrot.lane.b32.xlu1 %v5519_v3, %s5477_s18  ;;  %1282 = vrot.lane.b32.xlu0 %v5529_v6, %s5477_s18 }
  0x44   : > { %1288 = vrot.lane.b32.xlu1 %v5536_v8, %s5477_s18  ;;  %1286 = vrot.lane.b32.xlu0 %v5527_v5, %s5477_s18 }
  0x48   : > { %1292 = vrot.lane.b32.xlu1 %v5547_v10, %s5477_s18  ;;  %1290 = vrot.lane.b32.xlu0 %v5549_v11, %s5477_s18 }
  0x4c   : > { %1296 = vrot.lane.b32.xlu1 %v5388_v14, %s5477_s18  ;;  %1294 = vrot.lane.b32.xlu0 %v5555_v12, %s5477_s18 }
  0x50   : > { %1543 = vrot.lane.b32.xlu1 %v5529_v6, %s5474_s15  ;;  %1541 = vrot.lane.b32.xlu0 %v5521_v4, %s5474_s15 }
  0x54   : > { %675 = vrot.lane.b32.xlu1 %v5521_v4, %s5475_s16  ;;  %1545 = vrot.lane.b32.xlu0 %v5519_v3, %s5474_s15 }
  0x58   : > { %1547 = vrot.lane.b32.xlu1 %v5527_v5, %s5474_s15  ;;  %677 = vrot.lane.b32.xlu0 %v5529_v6, %s5475_s16 }
  0x5c   : > { %685 = vrot.lane.b32.xlu1 %v5549_v11, %s5475_s16  ;;  %1549 = vrot.lane.b32.xlu0 %v5536_v8, %s5474_s15 }
  0x60   : > { %1553 = vrot.lane.b32.xlu1 %v5547_v10, %s5474_s15  ;;  %1551 = vrot.lane.b32.xlu0 %v5549_v11, %s5474_s15 }
  0x64   : > { %1557 = vrot.lane.b32.xlu1 %v5388_v14, %s5474_s15  ;;  %1555 = vrot.lane.b32.xlu0 %v5555_v12, %s5474_s15 }
  0x68   : > { %949 = vrot.lane.b32.xlu1 %v5529_v6, %s5476_s17  ;;  %947 = vrot.lane.b32.xlu0 %v5521_v4, %s5476_s17 }
  0x6c   : > { %1805 = vrot.lane.b32.xlu1 %v5529_v6, %s5476_s17  ;;  %1803 = vrot.lane.b32.xlu0 %v5521_v4, %s5476_s17 }
  0x70   : > { %957 = vrot.lane.b32.xlu1 %v5549_v11, %s5476_s17  ;;  %1807 = vrot.lane.b32.xlu0 %v5519_v3, %s5476_s17 }
  0x74   : > { %1809 = vrot.lane.b32.xlu0 %v5527_v5, %s5476_s17  ;;  %1811 = vrot.lane.b32.xlu1 %v5536_v8, %s5476_s17 }
  0x78   : > { %1813 = vrot.lane.b32.xlu0 %v5549_v11, %s5476_s17  ;;  %1815 = vrot.lane.b32.xlu1 %v5547_v10, %s5476_s17 }
  0x7c   : > { %1817 = vrot.lane.b32.xlu0 %v5555_v12, %s5476_s17  ;;  %1819 = vrot.lane.b32.xlu1 %v5388_v14, %s5476_s17 }
  0x80   : > { %2074 = vrot.lane.b32.xlu0 %v5521_v4, %s5478_s19  ;;  %2076 = vrot.lane.b32.xlu1 %v5529_v6, %s5478_s19 }
  0x84   : > { %2078 = vrot.lane.b32.xlu0 %v5519_v3, %s5478_s19  ;;  %2080 = vrot.lane.b32.xlu1 %v5527_v5, %s5478_s19 }
  0x86   : > { %v181_v15 = vpop.permute.xlu1 %180  ;;  %v177_v16 = vpop.permute.xlu0 %176 }
  0x88   : > { %2082 = vrot.lane.b32.xlu0 %v5536_v8, %s5478_s19  ;;  %2084 = vrot.lane.b32.xlu1 %v5549_v11, %s5478_s19 }
  0x8a   : > { %v183_v17 = vpop.permute.xlu1 %182  ;;  %v179_v18 = vpop.permute.xlu0 %178 }
  0x8b   : > { %v196_v19 = vsel %vm194_vm0, %v179_v18, %v181_v15  ;;  %v195_v20 = vsel %vm194_vm0, %v177_v16, %v179_v18  ;;  %v197_v22 = vsel %vm194_vm0, %v181_v15, %v183_v17  ;;  %v5798_v18 = vld [vmem:[%s5515_s14 + $0x20] ss:$0 sps:$4 sm:$0xff]  }
  0x8c   : > { %4772 = vmatprep.subr.msk.bf16.mxu0 %vm207_vm1, %v196_v19  ;;  %v209_v21 = vsel %vm207_vm1, %v195_v20, 0  ;;  %2086 = vrot.lane.b32.xlu0 %v5547_v10, %s5478_s19  ;;  %v215_v27 = vsel %vm207_vm1, %v197_v22, 0  ;;  %v5807_v20 = vld [vmem:[%s6822_s1] sm:$0x3] }
  0x8d   : > { %236 = vmatpush1.bf16.msra.mxu0 %v209_v21  ;;  %2088 = vrot.lane.b32.xlu1 %v5555_v12, %s5478_s19 }
  0x8e   : > { %v5663_v24 = vpop.permute.xlu1 %679  ;;  %v185_v25 = vpop.permute.xlu0 %184 }
  0x8f   : > { %v198_v26 = vsel %vm194_vm0, %v183_v17, %v185_v25 }
  0x90   : > { %4773 = vmatmul.mubr.msk.bf16.vlgmr.msra.gmra.mrb[0].mxu0 %vm203_vm2, %v5659_v23  ;;  %4774 = vmatprep.subr.msk.bf16.mxu0 %vm207_vm1, %v198_v26 }
  0x91   : > { %277 = vmatpush1.bf16.msra.mxu0 %v215_v27  ;;  %308 = vmatprep.mubr.bf16.mxu0 %v5473_v0  ;;  %v5824_v27 = vld [vmem:[%s6822_s1 + $0xa] sm:$0x3] }
  0x92   : > { %v5671_v28 = vpop.permute.xlu1 %683  ;;  %v682_v29 = vpop.permute.xlu0 %681  ;;  %2090 = vrot.lane.b32.xlu0 %v5388_v14, %s5478_s19  ;;  %2407 = vrot.lane.b32.xlu1 %v5521_v4, %s5476_s17 }
  0x93   : > { %v697_v30 = vsel %vm693_vm3, %v682_v29, %v5671_v28  ;;  %v696_v31 = vsel %vm693_vm3, %v5663_v24, %v682_v29 }
  0x94   : > { %4793 = vmatprep.subr.msk.bf16.mxu1 %vm207_vm1, %v697_v30  ;;  %v712_v32 = vsel %vm207_vm1, %v696_v31, 0 }
  0x95   : > { %774 = vmatpush1.bf16.msra.mxu1 %v712_v32 }
  0x96   : > { %v189_v33 = vpop.permute.xlu1 %188  ;;  %v187_v34 = vpop.permute.xlu0 %186  ;;  %2409 = vrot.lane.b32.xlu0 %v5529_v6, %s5476_s17  ;;  %2411 = vrot.lane.b32.xlu1 %v5519_v3, %s5476_s17 }
  0x97   : > { %v199_v36 = vsel %vm194_vm0, %v185_v25, %v187_v34  ;;  %v200_v37 = vsel %vm194_vm0, %v187_v34, %v189_v33 }
  0x98   : > { %4775 = vmatmul.mubr.msk.bf16.vlgmr.msra.gmra.mrb[4].mxu0 %vm203_vm2, %v5659_v23  ;;  %4776 = vmatprep.subr.msk.bf16.mxu0 %vm207_vm1, %v200_v37  ;;  %v221_v38 = vsel %vm207_vm1, %v199_v36, 0  ;;  %v455_v36 = vsel %vm207_vm1, %v5536_v8, 0 }
  0x99   : > { %318 = vmatpush1.bf16.msra.mxu0 %v221_v38  ;;  %4794 = vmatmul.mubr.msk.bf16.vlgmr.msra.gmra.mrb[0].mxu1 %vm203_vm2, %v5685_v35 }
  0x9a   : > { %v690_v39 = vpop.permute.xlu1 %689  ;;  %v5699_v40 = vpop.permute.xlu0 %687  ;;  %349 = vmatprep.mubr.bf16.mxu0 %v5473_v0  ;;  %887 = vmatprep.mubr.bf16.mxu1 %v5473_v0 }
  0x9b   : > { %3570 = vrot.lane.b32.xlu0 %v5521_v4, %s5478_s19  ;;  %3572 = vrot.lane.b32.xlu1 %v5529_v6, %s5478_s19  ;;  %v700_v41 = vsel %vm693_vm3, %v5699_v40, %v690_v39 }
  0x9c   : > { %v724_v45 = vsel %vm207_vm1, %v700_v41, 0 }
  0x9e   : > { %v191_v42 = vpop.permute.xlu1 %190  ;;  %v5709_v43 = vpop.permute.xlu0 %691 }
  0x9f   : > { %v701_v44 = vsel %vm693_vm3, %v690_v39, %v5709_v43  ;;  %3574 = vrot.lane.b32.xlu0 %v5519_v3, %s5478_s19  ;;  %2413 = vrot.lane.b32.xlu1 %v5527_v5, %s5476_s17  ;;  %v201_v46 = vsel %vm194_vm0, %v189_v33, %v191_v42 }
  0xa0   : > { %4777 = vmatmul.mubr.msk.bf16.vlgmr.msra.gmra.mrb[8].mxu0 %vm203_vm2, %v5659_v23  ;;  %4797 = vmatprep.subr.msk.bf16.mxu1 %vm207_vm1, %v701_v44  ;;  %v227_v50 = vsel %vm207_vm1, %v201_v46, 0  ;;  %v461_v46 = vsel %vm207_vm1, %v5547_v10, 0 }
  0xa1   : > { %856 = vmatpush1.bf16.msra.mxu1 %v724_v45  ;;  %390 = vmatprep.mubr.bf16.mxu0 %v5473_v0 }
  0xa2   : > { %v5723_v47 = vpop.permute.xlu1 %951  ;;  %v193_v48 = vpop.permute.xlu0 %192 }
  0xa3   : > { %v202_v49 = vsel %vm194_vm0, %v191_v42, %v193_v48  ;;  %2415 = vrot.lane.b32.xlu0 %v5536_v8, %s5476_s17  ;;  %3576 = vrot.lane.b32.xlu1 %v5527_v5, %s5478_s19  ;;  %v233_v56 = vsel %vm207_vm1, %v193_v48, 0 }
  0xa4   : > { %4778 = vmatprep.subr.msk.bf16.mxu0 %vm207_vm1, %v202_v49  ;;  %4798 = vmatmul.mubr.msk.bf16.vlgmr.msra.gmra.mrb[4].mxu1 %vm203_vm2, %v5685_v35 }
  0xa5   : > { %359 = vmatpush1.bf16.msra.mxu0 %v227_v50  ;;  %1077 = vmatprep.mubr.bf16.mxu1 %v5473_v0 }
  0xa6   : > { %v5735_v51 = vpop.permute.xlu1 %955  ;;  %v954_v52 = vpop.permute.xlu0 %953  ;;  %5026 = vmatprep.subr.bf16.mxu0 %v5479_v53 }
  0xa7   : > { %v968_v54 = vsel %vm965_vm4, %v5723_v47, %v954_v52  ;;  %v969_v55 = vsel %vm965_vm4, %v954_v52, %v5735_v51  ;;  %3578 = vrot.lane.b32.xlu0 %v5536_v8, %s5478_s19  ;;  %2417 = vrot.lane.b32.xlu1 %v5549_v11, %s5476_s17 }
  0xa8   : > { %4779 = vmatmul.mubr.msk.bf16.vlgmr.msra.gmra.mrb[12].mxu0 %vm203_vm2, %v5659_v23  ;;  %4803 = vmatprep.subr.msk.bf16.mxu1 %vm207_vm1, %v969_v55  ;;  %v984_v57 = vsel %vm207_vm1, %v968_v54, 0 }
  0xa9   : > { %5027 = vmatpush3.bf16.msra.mxu0 %v233_v56  ;;  %1046 = vmatpush1.bf16.msra.mxu1 %v984_v57  ;;  %v467_v56 = vsel %vm207_vm1, %v5562_v13, 0 }
  0xaa   : > { %v962_v59 = vpop.permute.xlu1 %961  ;;  %v5756_v60 = vpop.permute.xlu0 %959  ;;  %5028 = vmatprep.mubr.msk.bf16.mxu0 %vm5480_vm5, %v5479_v53  ;;  %4781 = vmatprep.subr.msk.bf16.mxu0 %vm207_vm1, %v5529_v6 }
  0xab   : > { %2419 = vrot.lane.b32.xlu0 %v5547_v10, %s5476_s17  ;;  %3580 = vrot.lane.b32.xlu1 %v5549_v11, %s5478_s19  ;;  %v972_v61 = vsel %vm965_vm4, %v5756_v60, %v962_v59 }
  0xac   : > { %4804 = vmatmul.mubr.msk.bf16.vlgmr.msra.gmra.mrb[0].mxu1 %vm203_vm2, %v5754_v58  ;;  %v996_v9 = vsel %vm207_vm1, %v972_v61, 0 }
  0xad   : > { %1159 = vmatprep.mubr.bf16.mxu1 %v5473_v0 }
  0xae   : > { %v1281_v62 = vpop.permute.xlu1 %1280  ;;  %v5771_v63 = vpop.permute.xlu0 %963 }
  0xaf   : > { %v973_v2 = vsel %vm965_vm4, %v962_v59, %v5771_v63  ;;  %3582 = vrot.lane.b32.xlu0 %v5547_v10, %s5478_s19  ;;  %2421 = vrot.lane.b32.xlu1 %v5555_v12, %s5476_s17 }
  0xb0   : > { %5029 = vmatmul.mubr.msk.bf16.vlgmr.msra.gmra.mrb[16].mxu0 %vm203_vm2, %v5659_v23  ;;  %4807 = vmatprep.subr.msk.bf16.mxu1 %vm207_vm1, %v973_v2  ;;  %v449_v23 = vsel %vm207_vm1, %v5519_v3, 0 }
  0xb1   : > { %1128 = vmatpush1.bf16.msra.mxu1 %v996_v9  ;;  %470 = vmatpush1.bf16.msra.mxu0 %v443_v1 }
  0xb2   : > { %v1285_v14 = vpop.permute.xlu1 %1284  ;;  %v1283_v15 = vpop.permute.xlu0 %1282  ;;  %501 = vmatprep.mubr.bf16.mxu0 %v5473_v0  ;;  %4783 = vmatprep.subr.msk.bf16.mxu0 %vm207_vm1, %v5527_v5 }
  0xb3   : > { %v1299_v16 = vsel %vm1298_vm6, %v1281_v62, %v1283_v15  ;;  %v1300_v17 = vsel %vm1298_vm6, %v1283_v15, %v1285_v14  ;;  %2423 = vrot.lane.b32.xlu0 %v5782_v7, %s5476_s17  ;;  %3584 = vrot.lane.b32.xlu1 %v5555_v12, %s5478_s19 }
  0xb4   : > { %4808 = vmatmul.mubr.msk.bf16.vlgmr.msra.gmra.mrb[4].mxu1 %vm203_vm2, %v5754_v58  ;;  %4821 = vmatprep.subr.msk.bf16.mxu1 %vm207_vm1, %v1300_v17  ;;  %v1311_v19 = vsel %vm207_vm1, %v1299_v16, 0 }
  0xb5   : > { %1338 = vmatpush1.bf16.msra.mxu1 %v1311_v19  ;;  %1369 = vmatprep.mubr.bf16.mxu1 %v5473_v0  ;;  %v5927_v19 = vld [vmem:[%s6822_s1 + $0x8] sm:$0x3] }
  0xb6   : > { %v1289_v21 = vpop.permute.xlu1 %1288  ;;  %v1287_v22 = vpop.permute.xlu0 %1286 }
  0xb7   : > { %v1302_v25 = vsel %vm1298_vm6, %v1287_v22, %v1289_v21  ;;  %3586 = vrot.lane.b32.xlu0 %v5798_v18, %s5478_s19  ;;  %2667 = vrot.lane.b32.xlu1 %v5521_v4, %s5475_s16  ;;  %v1301_v26 = vsel %vm1298_vm6, %v1285_v14, %v1287_v22 }
  0xb8   : > { %4782 = vmatmul.mubr.msk.bf16.vlgmr.msra.gmra.mrb[0].mxu0 %vm203_vm2, %v5807_v20  ;;  %4823 = vmatprep.subr.msk.bf16.mxu1 %vm207_vm1, %v1302_v25  ;;  %v1317_v32 = vsel %vm207_vm1, %v1301_v26, 0 }
  0xb9   : > { %511 = vmatpush1.bf16.msra.mxu0 %v449_v23  ;;  %542 = vmatprep.mubr.bf16.mxu0 %v5473_v0 }
  0xba   : > { %v1293_v29 = vpop.permute.xlu1 %1292  ;;  %v1291_v30 = vpop.permute.xlu0 %1290  ;;  %4785 = vmatprep.subr.msk.bf16.mxu0 %vm207_vm1, %v5549_v11 }
  0xbb   : > { %v1304_v31 = vsel %vm1298_vm6, %v1291_v30, %v1293_v29  ;;  %2669 = vrot.lane.b32.xlu0 %v5529_v6, %s5475_s16  ;;  %2671 = vrot.lane.b32.xlu1 %v5519_v3, %s5475_s16  ;;  %v1303_v37 = vsel %vm1298_vm6, %v1289_v21, %v1291_v30 }
  0xbc   : > { %4822 = vmatmul.mubr.msk.bf16.vlgmr.msra.gmra.mrb[8].mxu1 %vm203_vm2, %v5824_v27  ;;  %v1323_v42 = vsel %vm207_vm1, %v1303_v37, 0 }
  0xbd   : > { %1379 = vmatpush1.bf16.msra.mxu1 %v1317_v32  ;;  %1410 = vmatprep.mubr.bf16.mxu1 %v5473_v0 }
  0xbe   : > { %v5838_v33 = vpop.permute.xlu1 %1296  ;;  %v1295_v34 = vpop.permute.xlu0 %1294  ;;  %4825 = vmatprep.subr.msk.bf16.mxu1 %vm207_vm1, %v1304_v31 }
  0xbf   : > { %3830 = vrot.lane.b32.xlu0 %v5521_v4, %s5476_s17  ;;  %3832 = vrot.lane.b32.xlu1 %v5529_v6, %s5476_s17  ;;  %v1306_v41 = vsel %vm1298_vm6, %v1295_v34, %v5838_v33  ;;  %v1305_v48 = vsel %vm1298_vm6, %v1293_v29, %v1295_v34 }
  0xc0   : > { %4784 = vmatmul.mubr.msk.bf16.vlgmr.msra.gmra.mrb[4].mxu0 %vm203_vm2, %v5807_v20  ;;  %v1329_v54 = vsel %vm207_vm1, %v1305_v48, 0 }
  0xc1   : > { %552 = vmatpush1.bf16.msra.mxu0 %v455_v36  ;;  %583 = vmatprep.mubr.bf16.mxu0 %v5473_v0  ;;  %v730_v36 = vsel %vm207_vm1, %v5709_v43, 0 }
  0xc2   : > { %v1544_v38 = vpop.permute.xlu1 %1543  ;;  %v1542_v39 = vpop.permute.xlu0 %1541  ;;  %4787 = vmatprep.subr.msk.bf16.mxu0 %vm207_vm1, %v5555_v12 }
  0xc3   : > { %3834 = vrot.lane.b32.xlu0 %v5519_v3, %s5476_s17  ;;  %2673 = vrot.lane.b32.xlu1 %v5527_v5, %s5475_s16  ;;  %v1559_v59 = vsel %vm194_vm0, %v1542_v39, %v1544_v38 }
  0xc4   : > { %4824 = vmatmul.mubr.msk.bf16.vlgmr.msra.gmra.mrb[12].mxu1 %vm203_vm2, %v5824_v27  ;;  %v1571_v13 = vsel %vm207_vm1, %v1559_v59, 0 }
  0xc5   : > { %1420 = vmatpush1.bf16.msra.mxu1 %v1323_v42  ;;  %1451 = vmatprep.mubr.bf16.mxu1 %v5473_v0 }
  0xc6   : > { %v676_v44 = vpop.permute.xlu1 %675  ;;  %v1546_v45 = vpop.permute.xlu0 %1545  ;;  %4827 = vmatprep.subr.msk.bf16.mxu1 %vm207_vm1, %v1306_v41 }
  0xc7   : > { %2675 = vrot.lane.b32.xlu0 %v5536_v8, %s5475_s16  ;;  %3836 = vrot.lane.b32.xlu1 %v5527_v5, %s5476_s17  ;;  %v1560_v52 = vsel %vm194_vm0, %v1544_v38, %v1546_v45 }
  0xc8   : > { %4786 = vmatmul.mubr.msk.bf16.vlgmr.msra.gmra.mrb[8].mxu0 %vm203_vm2, %v5807_v20 }
  0xc9   : > { %593 = vmatpush1.bf16.msra.mxu0 %v461_v46  ;;  %624 = vmatprep.mubr.bf16.mxu0 %v5473_v0 }
  0xca   : > { %v1548_v49 = vpop.permute.xlu1 %1547  ;;  %v678_v50 = vpop.permute.xlu0 %677  ;;  %5032 = vmatprep.subr.bf16.mxu0 %v5479_v53 }
  0xcb   : > { %3838 = vrot.lane.b32.xlu0 %v5536_v8, %s5476_s17  ;;  %2677 = vrot.lane.b32.xlu1 %v5549_v11, %s5475_s16  ;;  %v695_v61 = vsel %vm693_vm3, %v678_v50, %v5663_v24  ;;  %v694_v2 = vsel %vm693_vm3, %v676_v44, %v678_v50  ;;  %v1561_v16 = vsel %vm194_vm0, %v1546_v45, %v1548_v49 }
  0xcc   : > { %4826 = vmatmul.mubr.msk.bf16.vlgmr.msra.gmra.mrb[16].mxu1 %vm203_vm2, %v5824_v27  ;;  %v706_v14 = vsel %vm207_vm1, %v694_v2, 0 }
  0xcd   : > { %1461 = vmatpush1.bf16.msra.mxu1 %v1329_v54  ;;  %1492 = vmatprep.mubr.bf16.mxu1 %v5473_v0 }
  0xce   : > { %v686_v55 = vpop.permute.xlu1 %685  ;;  %4830 = vmatprep.subr.msk.bf16.mxu1 %vm207_vm1, %v1560_v52  ;;  %v1550_v57 = vpop.permute.xlu0 %1549 }
  0xcf   : > { %2679 = vrot.lane.b32.xlu0 %v5547_v10, %s5475_s16  ;;  %3840 = vrot.lane.b32.xlu1 %v5549_v11, %s5476_s17  ;;  %v1562_v9 = vsel %vm194_vm0, %v1548_v49, %v1550_v57  ;;  %v699_v17 = vsel %vm693_vm3, %v686_v55, %v5699_v40  ;;  %v1577_v40 = vsel %vm207_vm1, %v1561_v16, 0  ;;  %v698_v22 = vsel %vm693_vm3, %v5671_v28, %v686_v55 }
  0xd0   : > { %4788 = vmatmul.mubr.msk.bf16.vlgmr.msra.gmra.mrb[12].mxu0 %vm203_vm2, %v5807_v20 }
  0xd1   : > { %5033 = vmatpush3.bf16.msra.mxu0 %v467_v56  ;;  %5034 = vmatprep.mubr.msk.bf16.mxu0 %vm5480_vm5, %v5479_v53 }
  0xd2   : > { %4791 = vmatprep.subr.msk.bf16.mxu0 %vm207_vm1, %v695_v61  ;;  %v5900_v62 = vpop.permute.xlu1 %1553  ;;  %v1552_v1 = vpop.permute.xlu0 %1551 }
  0xd3   : > { %3842 = vrot.lane.b32.xlu0 %v5547_v10, %s5476_s17  ;;  %2681 = vrot.lane.b32.xlu1 %v5555_v12, %s5475_s16  ;;  %v1563_v28 = vsel %vm194_vm0, %v1550_v57, %v1552_v1 }
  0xd4   : > { %4828 = vmatmul.mubr.msk.bf16.vlgmr.msra.gmra.mrb[20].mxu1 %vm203_vm2, %v5824_v27  ;;  %v1583_v31 = vsel %vm207_vm1, %v1563_v28, 0 }
  0xd5   : > { %1598 = vmatpush1.bf16.msra.mxu1 %v1571_v13  ;;  %1629 = vmatprep.mubr.bf16.mxu1 %v5473_v0  ;;  %v6052_v13 = vld [vmem:[%s6822_s1 + $0xc] sm:$0x3] }
  0xd6   : > { %v5911_v24 = vpop.permute.xlu1 %1557  ;;  %4832 = vmatprep.subr.msk.bf16.mxu1 %vm207_vm1, %v1562_v9  ;;  %v1556_v15 = vpop.permute.xlu0 %1555 }
  0xd7   : > { %2683 = vrot.lane.b32.xlu0 %v5782_v7, %s5475_s16  ;;  %3844 = vrot.lane.b32.xlu1 %v5555_v12, %s5476_s17  ;;  %v1566_v30 = vsel %vm194_vm0, %v1556_v15, %v5911_v24  ;;  %v1565_v38 = vsel %vm194_vm0, %v5900_v62, %v1556_v15 }
  0xd8   : > { %5035 = vmatmul.mubr.msk.bf16.vlgmr.msra.gmra.mrb[16].mxu0 %vm203_vm2, %v5807_v20  ;;  %v1564_v20 = vsel %vm194_vm0, %v1552_v1, %v5900_v62 }
  0xd9   : > { %733 = vmatpush1.bf16.msra.mxu0 %v706_v14  ;;  %764 = vmatprep.mubr.bf16.mxu0 %v5473_v0 }
  0xda   : > { %4795 = vmatprep.subr.msk.bf16.mxu0 %vm207_vm1, %v699_v17  ;;  %v950_v7 = vpop.permute.xlu1 %949  ;;  %v948_v21 = vpop.permute.xlu0 %947  ;;  %v1002_v17 = vsel %vm207_vm1, %v5771_v63, 0 }
  0xdb   : > { %3846 = vrot.lane.b32.xlu0 %v5798_v18, %s5476_s17  ;;  %2959 = vrot.lane.b32.xlu1 %v5521_v4, %s5481_s4  ;;  %v718_v18 = vsel %vm207_vm1, %v698_v22, 0  ;;  %v967_v37 = vsel %vm965_vm4, %v950_v7, %v5723_v47  ;;  %v966_v42 = vsel %vm965_vm4, %v948_v21, %v950_v7  ;;  %v1589_v47 = vsel %vm207_vm1, %v1565_v38, 0 }
  0xdc   : > { %4831 = vmatmul.mubr.msk.bf16.vlgmr.msra.gmra.mrb[8].mxu1 %vm203_vm2, %v5927_v19  ;;  %v978_v44 = vsel %vm207_vm1, %v966_v42, 0  ;;  %v1335_v22 = vsel %vm207_vm1, %v5838_v33, 0 }
  0xdd   : > { %1639 = vmatpush1.bf16.msra.mxu1 %v1577_v40  ;;  %1670 = vmatprep.mubr.bf16.mxu1 %v5473_v0 }
  0xde   : > { %v1806_v23 = vpop.permute.xlu1 %1805  ;;  %4834 = vmatprep.subr.msk.bf16.mxu1 %vm207_vm1, %v1564_v20  ;;  %v1804_v25 = vpop.permute.xlu0 %1803 }
  0xdf   : > { %2961 = vrot.lane.b32.xlu0 %v5529_v6, %s5481_s4  ;;  %2963 = vrot.lane.b32.xlu1 %v5519_v3, %s5481_s4  ;;  %v1821_v48 = vsel %vm965_vm4, %v1804_v25, %v1806_v23 }
  0xe0   : > { %4792 = vmatmul.mubr.msk.bf16.vlgmr.msra.gmra.mrb[0].mxu0 %vm203_vm2, %v5685_v35  ;;  %v1833_v50 = vsel %vm207_vm1, %v1821_v48, 0 }
  0xe1   : > { %815 = vmatpush1.bf16.msra.mxu0 %v718_v18  ;;  %846 = vmatprep.mubr.bf16.mxu0 %v5473_v0 }
  0xe2   : > { %v958_v26 = vpop.permute.xlu1 %957  ;;  %5038 = vmatprep.subr.bf16.mxu0 %v5479_v53  ;;  %v5954_v29 = vpop.permute.xlu0 %1807 }
  0xe3   : > { %4122 = vrot.lane.b32.xlu0 %v5521_v4, %s5482_s5  ;;  %4124 = vrot.lane.b32.xlu1 %v5529_v6, %s5482_s5  ;;  %v1822_v43 = vsel %vm965_vm4, %v1806_v23, %v5954_v29  ;;  %v971_v49 = vsel %vm965_vm4, %v958_v26, %v5756_v60  ;;  %v970_v60 = vsel %vm965_vm4, %v5735_v51, %v958_v26 }
  0xe4   : > { %4833 = vmatmul.mubr.msk.bf16.vlgmr.msra.gmra.mrb[12].mxu1 %vm203_vm2, %v5927_v19  ;;  %v990_v61 = vsel %vm207_vm1, %v970_v60, 0 }
  0xe5   : > { %1680 = vmatpush1.bf16.msra.mxu1 %v1583_v31  ;;  %1711 = vmatprep.mubr.bf16.mxu1 %v5473_v0 }
  0xe6   : > { %4836 = vmatprep.subr.msk.bf16.mxu1 %vm207_vm1, %v1566_v30  ;;  %v1810_v32 = vpop.permute.xlu0 %1809  ;;  %v5967_v34 = vpop.permute.xlu1 %1811 }
  0xe7   : > { %4126 = vrot.lane.b32.xlu0 %v5519_v3, %s5482_s5  ;;  %2965 = vrot.lane.b32.xlu1 %v5527_v5, %s5481_s4  ;;  %v1824_v55 = vsel %vm965_vm4, %v1810_v32, %v5967_v34  ;;  %v1823_v51 = vsel %vm965_vm4, %v5954_v29, %v1810_v32  ;;  %v4849_v32 = vld [vmem:[%s6822_s1 + $0xe] sm:$0x3] }
  0xe8   : > { %4796 = vmatmul.mubr.msk.bf16.vlgmr.msra.gmra.mrb[8].mxu0 %vm203_vm2, %v5685_v35  ;;  %v1839_v14 = vsel %vm207_vm1, %v1823_v51, 0 }
  0xe9   : > { %5039 = vmatpush3.bf16.msra.mxu0 %v730_v36  ;;  %5040 = vmatprep.mubr.msk.bf16.mxu0 %vm5480_vm5, %v5479_v53 }
  0xea   : > { %4801 = vmatprep.subr.msk.bf16.mxu0 %vm207_vm1, %v967_v37  ;;  %v5984_v39 = vpop.permute.xlu0 %1813  ;;  %v5986_v41 = vpop.permute.xlu1 %1815 }
  0xeb   : > { %2967 = vrot.lane.b32.xlu0 %v5536_v8, %s5481_s4  ;;  %4128 = vrot.lane.b32.xlu1 %v5527_v5, %s5482_s5  ;;  %v1826_v2 = vsel %vm965_vm4, %v5984_v39, %v5986_v41  ;;  %v1825_v7 = vsel %vm965_vm4, %v5967_v34, %v5984_v39 }
  0xec   : > { %4835 = vmatmul.mubr.msk.bf16.vlgmr.msra.gmra.mrb[16].mxu1 %vm203_vm2, %v5927_v19  ;;  %v1845_v63 = vsel %vm207_vm1, %v1825_v7, 0 }
  0xed   : > { %1721 = vmatpush1.bf16.msra.mxu1 %v1589_v47  ;;  %1752 = vmatprep.mubr.bf16.mxu1 %v5473_v0 }
  0xee   : > { %4840 = vmatprep.subr.msk.bf16.mxu1 %vm207_vm1, %v1822_v43  ;;  %v6001_v45 = vpop.permute.xlu0 %1817  ;;  %v6003_v46 = vpop.permute.xlu1 %1819 }
  0xef   : > { %4130 = vrot.lane.b32.xlu0 %v5536_v8, %s5482_s5  ;;  %2969 = vrot.lane.b32.xlu1 %v5549_v11, %s5481_s4  ;;  %v1828_v21 = vsel %vm965_vm4, %v6001_v45, %v6003_v46  ;;  %v1827_v18 = vsel %vm965_vm4, %v5986_v41, %v6001_v45 }
  0xf0   : > { %5041 = vmatmul.mubr.msk.bf16.vlgmr.msra.gmra.mrb[16].mxu0 %vm203_vm2, %v5685_v35  ;;  %v2931_v35 = vld [vmem:[%s5515_s14 + $0x20] sm:$0xff]  ;;  %v1851_v33 = vsel %vm207_vm1, %v1827_v18, 0 }
  0xf1   : > { %1005 = vmatpush1.bf16.msra.mxu0 %v978_v44  ;;  %1036 = vmatprep.mubr.bf16.mxu0 %v5473_v0  ;;  %v6042_v59 = vcombine.low %v2931_v35, %v2931_v35  ;;  %v6067_v9 = vcombine.high %v2931_v35, %v2931_v35 }
  0xf2   : > { %4805 = vmatprep.subr.msk.bf16.mxu0 %vm207_vm1, %v971_v49  ;;  %v6017_v52 = vpop.permute.xlu0 %2074  ;;  %v6019_v54 = vpop.permute.xlu1 %2076 }
  0xf3   : > { %2971 = vrot.lane.b32.xlu0 %v5547_v10, %s5481_s4  ;;  %4132 = vrot.lane.b32.xlu1 %v5549_v11, %s5482_s5 }
  0xf4   : > { %4837 = vmatmul.mubr.msk.bf16.vlgmr.msra.gmra.mrb[20].mxu1 %vm203_vm2, %v5927_v19 }
  0xf5   : > { %1860 = vmatpush1.bf16.msra.mxu1 %v1833_v50  ;;  %1891 = vmatprep.mubr.bf16.mxu1 %v5473_v0 }
  0xf6   : > { %4842 = vmatprep.subr.msk.bf16.mxu1 %vm207_vm1, %v1824_v55  ;;  %v6034_v56 = vpop.permute.xlu0 %2078  ;;  %v6036_v57 = vpop.permute.xlu1 %2080 }
  0xf7   : > { %4134 = vrot.lane.b32.xlu0 %v5547_v10, %s5482_s5  ;;  %2973 = vrot.lane.b32.xlu1 %v5555_v12, %s5481_s4 }
  0xf8   : > { %4802 = vmatmul.mubr.msk.bf16.vlgmr.msra.gmra.mrb[0].mxu0 %vm203_vm2, %v5754_v58 }
  0xf9   : > { %1087 = vmatpush1.bf16.msra.mxu0 %v990_v61  ;;  %1118 = vmatprep.mubr.bf16.mxu0 %v5473_v0 }
  0xfa   : > { %5044 = vmatprep.subr.bf16.mxu0 %v5479_v53  ;;  %v6056_v62 = vpop.permute.xlu0 %2082  ;;  %v6058_v1 = vpop.permute.xlu1 %2084 }
  0xfb   : > { %2975 = vrot.lane.b32.xlu0 %v6042_v59, %s5481_s4  ;;  %4136 = vrot.lane.b32.xlu1 %v5555_v12, %s5482_s5 }
  0xfc   : > { %4841 = vmatmul.mubr.msk.bf16.vlgmr.msra.gmra.mrb[8].mxu1 %vm203_vm2, %v6052_v13 }
  0xfd   : > { %1901 = vmatpush1.bf16.msra.mxu1 %v1839_v14  ;;  %1932 = vmatprep.mubr.bf16.mxu1 %v5473_v0  ;;  %v6309_v14 = vld [vmem:[%s6822_s1 + $0x12] sm:$0x3] }
  0xfe   : > { %4844 = vmatprep.subr.msk.bf16.mxu1 %vm207_vm1, %v1826_v2  ;;  %v6074_v15 = vpop.permute.xlu0 %2086 }
  0xff   : > { %v6076_v16 = vpop.permute.xlu1 %2088  ;;  %4138 = vrot.lane.b32.xlu0 %v6042_v59, %s5482_s5  ;;  %2977 = vrot.lane.b32.xlu1 %v6067_v9, %s5481_s4  ;;  %v2098_v37 = vsel %vm2092_vm7, %v6058_v1, %v6074_v15 }
 0x100   : > { %4806 = vmatmul.mubr.msk.bf16.vlgmr.msra.gmra.mrb[8].mxu0 %vm203_vm2, %v5754_v58  ;;  %v2099_v48 = vsel %vm2092_vm7, %v6074_v15, %v6076_v16  ;;  %v6314_v15 = vld [vmem:[%s6822_s1 + $0x1a] sm:$0x3] }
 0x101   : > { %5045 = vmatpush3.bf16.msra.mxu0 %v1002_v17  ;;  %5046 = vmatprep.mubr.msk.bf16.mxu0 %vm5480_vm5, %v5479_v53 }
 0x102   : > { %5050 = vmatprep.subr.bf16.mxu0 %v5479_v53 }
 0x103   : > { %4140 = vrot.lane.b32.xlu0 %v6067_v9, %s5482_s5  ;;  %3234 = vrot.lane.b32.xlu1 %v5521_v4, %s5482_s5 }
 0x104   : > { %4843 = vmatmul.mubr.msk.bf16.vlgmr.msra.gmra.mrb[12].mxu1 %vm203_vm2, %v6052_v13  ;;  %v6102_v20 = vpop.permute.xlu0 %2090  ;;  %v6104_v40 = vpop.permute.xlu1 %2407 }
 0x105   : > { %1942 = vmatpush1.bf16.msra.mxu1 %v1845_v63  ;;  %1973 = vmatprep.mubr.bf16.mxu1 %v5473_v0  ;;  %v2100_v43 = vsel %vm2092_vm7, %v6076_v16, %v6102_v20  ;;  %v2129_v45 = vsel %vm207_vm1, %v6102_v20, 0 }
 0x106   : > { %4846 = vmatprep.subr.msk.bf16.mxu1 %vm207_vm1, %v1828_v21 }
 0x107   : > { %3236 = vrot.lane.b32.xlu0 %v5529_v6, %s5482_s5  ;;  %3238 = vrot.lane.b32.xlu1 %v5519_v3, %s5482_s5 }
 0x108   : > { %5047 = vmatmul.mubr.msk.bf16.vlgmr.msra.gmra.mrb[16].mxu0 %vm203_vm2, %v5754_v58  ;;  %v6116_v23 = vpop.permute.xlu0 %2409  ;;  %v6118_v25 = vpop.permute.xlu1 %2411  ;;  %v2094_v58 = vsel %vm2092_vm7, %v6019_v54, %v6034_v56 }
 0x109   : > { %5051 = vmatpush3.bf16.msra.mxu0 %v1335_v22  ;;  %5052 = vmatprep.mubr.msk.bf16.mxu0 %vm5480_vm5, %v5479_v53  ;;  %v2425_v60 = vsel %vm965_vm4, %v6104_v40, %v6116_v23 }
 0x10a   : > { %5056 = vmatprep.subr.bf16.mxu0 %v5479_v53  ;;  %v2437_v51 = vsel %vm207_vm1, %v2425_v60, 0 }
 0x10b   : > { %4396 = vrot.lane.b32.xlu0 %v5521_v4, %s5483_s8  ;;  %4398 = vrot.lane.b32.xlu1 %v5529_v6, %s5483_s8  ;;  %v2093_v4 = vsel %vm2092_vm7, %v6017_v52, %v6019_v54  ;;  %v1595_v6 = vsel %vm207_vm1, %v5911_v24, 0  ;;  %v2123_v52 = vsel %vm207_vm1, %v2099_v48, 0 }
 0x10c   : > { %4845 = vmatmul.mubr.msk.bf16.vlgmr.msra.gmra.mrb[16].mxu1 %vm203_vm2, %v6052_v13  ;;  %v2105_v31 = vsel %vm207_vm1, %v2093_v4, 0 }
 0x10d   : > { %1983 = vmatpush1.bf16.msra.mxu1 %v1851_v33  ;;  %2014 = vmatprep.mubr.bf16.mxu1 %v5473_v0  ;;  %v6137_v28 = vpop.permute.xlu0 %3570  ;;  %v6139_v26 = vpop.permute.xlu1 %3572 }
 0x10e   : > { %4850 = vmatprep.subr.msk.bf16.mxu1 %vm207_vm1, %v2094_v58  ;;  %v3588_v35 = vsel %vm2092_vm7, %v6137_v28, %v6139_v26 }
 0x10f   : > { %4400 = vrot.lane.b32.xlu0 %v5519_v3, %s5483_s8  ;;  %3240 = vrot.lane.b32.xlu1 %v5527_v5, %s5482_s5  ;;  %v2096_v3 = vsel %vm2092_vm7, %v6036_v57, %v6056_v62 }
 0x110   : > { %5053 = vmatmul.mubr.msk.bf16.vlgmr.msra.gmra.mrb[20].mxu0 %vm203_vm2, %v5824_v27 }
 0x111   : > { %5057 = vmatpush3.bf16.msra.mxu0 %v1595_v6  ;;  %5058 = vmatprep.mubr.msk.bf16.mxu0 %vm5480_vm5, %v5479_v53  ;;  %v6155_v29 = vpop.permute.xlu0 %3574  ;;  %v6157_v30 = vpop.permute.xlu1 %2413 }
 0x112   : > { %5062 = vmatprep.subr.bf16.mxu0 %v5479_v53  ;;  %v3589_v50 = vsel %vm2092_vm7, %v6139_v26, %v6155_v29  ;;  %v2427_v2 = vsel %vm965_vm4, %v6118_v25, %v6157_v30 }
 0x113   : > { %3242 = vrot.lane.b32.xlu0 %v5536_v8, %s5482_s5  ;;  %4402 = vrot.lane.b32.xlu1 %v5527_v5, %s5483_s8  ;;  %v2095_v5 = vsel %vm2092_vm7, %v6034_v56, %v6036_v57  ;;  %v2443_v21 = vsel %vm207_vm1, %v2427_v2, 0 }
 0x114   : > { %4847 = vmatmul.mubr.msk.bf16.vlgmr.msra.gmra.mrb[20].mxu1 %vm203_vm2, %v6052_v13  ;;  %v2111_v38 = vsel %vm207_vm1, %v2095_v5, 0 }
 0x115   : > { %2132 = vmatpush1.bf16.msra.mxu1 %v2105_v31  ;;  %2163 = vmatprep.mubr.bf16.mxu1 %v5473_v0  ;;  %v6171_v27 = vpop.permute.xlu0 %2415  ;;  %v6173_v24 = vpop.permute.xlu1 %3576 }
 0x116   : > { %4852 = vmatprep.subr.msk.bf16.mxu1 %vm207_vm1, %v2096_v3  ;;  %v2428_v61 = vsel %vm965_vm4, %v6157_v30, %v6171_v27 }
 0x117   : > { %4404 = vrot.lane.b32.xlu0 %v5536_v8, %s5483_s8  ;;  %3244 = vrot.lane.b32.xlu1 %v5549_v11, %s5482_s5  ;;  %v1857_v8 = vsel %vm207_vm1, %v6003_v46, 0  ;;  %v2426_v46 = vsel %vm965_vm4, %v6116_v23, %v6118_v25 }
 0x119   : > { %v6186_v34 = vpop.permute.xlu0 %3578  ;;  %v6188_v36 = vpop.permute.xlu1 %2417 }
 0x11a   : > { %v2429_v23 = vsel %vm965_vm4, %v6171_v27, %v6188_v36 }
 0x11b   : > { %3246 = vrot.lane.b32.xlu0 %v5547_v10, %s5482_s5  ;;  %4406 = vrot.lane.b32.xlu1 %v5549_v11, %s5483_s8  ;;  %v2097_v11 = vsel %vm2092_vm7, %v6056_v62, %v6058_v1  ;;  %v2449_v28 = vsel %vm207_vm1, %v2429_v23, 0 }
 0x11c   : > { %5059 = vmatmul.mubr.msk.bf16.vlgmr.msra.gmra.mrb[20].mxu0 %vm203_vm2, %v5927_v19  ;;  %4851 = vmatmul.mubr.msk.bf16.vlgmr.msra.gmra.mrb[8].mxu1 %vm203_vm2, %v4849_v32  ;;  %v2117_v47 = vsel %vm207_vm1, %v2097_v11, 0 }
 0x11d   : > { %5063 = vmatpush3.bf16.msra.mxu0 %v1857_v8  ;;  %2173 = vmatpush1.bf16.msra.mxu1 %v2111_v38  ;;  %v6203_v39 = vpop.permute.xlu0 %2419  ;;  %v6205_v41 = vpop.permute.xlu1 %3580 }
 0x11e   : > { %2204 = vmatprep.mubr.bf16.mxu1 %v5473_v0  ;;  %4854 = vmatprep.subr.msk.bf16.mxu1 %vm207_vm1, %v2098_v37  ;;  %v2430_v7 = vsel %vm965_vm4, %v6188_v36, %v6203_v39  ;;  %v3592_v25 = vsel %vm2092_vm7, %v6186_v34, %v6205_v41 }
 0x11f   : > { %5064 = vmatprep.mubr.msk.bf16.mxu0 %vm5480_vm5, %v5479_v53  ;;  %5068 = vmatprep.subr.bf16.mxu0 %v5479_v53  ;;  %v3612_v26 = vsel %vm207_vm1, %v3592_v25, 0 }
 0x120   : > { %4408 = vrot.lane.b32.xlu0 %v5547_v10, %s5483_s8  ;;  %3248 = vrot.lane.b32.xlu1 %v5555_v12, %s5482_s5 }
 0x121   : > { %v6219_v19 = vpop.permute.xlu0 %3582  ;;  %v6221_v42 = vpop.permute.xlu1 %2421 }
 0x122   : > { %v3593_v20 = vsel %vm2092_vm7, %v6205_v41, %v6219_v19  ;;  %v2431_v30 = vsel %vm965_vm4, %v6203_v39, %v6221_v42 }
 0x124   : > { %4853 = vmatmul.mubr.msk.bf16.vlgmr.msra.gmra.mrb[12].mxu1 %vm203_vm2, %v4849_v32  ;;  %3250 = vrot.lane.b32.xlu0 %v6042_v59, %s5482_s5 }
 0x125   : > { %2214 = vmatpush1.bf16.msra.mxu1 %v2117_v47  ;;  %2245 = vmatprep.mubr.bf16.mxu1 %v5473_v0  ;;  %v6231_v10 = vpop.permute.xlu0 %2423  ;;  %v6233_v44 = vpop.permute.xlu1 %3584 }
 0x126   : > { %4856 = vmatprep.subr.msk.bf16.mxu1 %vm207_vm1, %v2100_v43  ;;  %4410 = vrot.lane.b32.xlu1 %v5555_v12, %s5483_s8  ;;  %v2432_v33 = vsel %vm965_vm4, %v6221_v42, %v6231_v10  ;;  %v3594_v31 = vsel %vm2092_vm7, %v6219_v19, %v6233_v44  ;;  %v2461_v8 = vsel %vm207_vm1, %v6231_v10, 0 }
 0x127   : > { %v3618_v5 = vsel %vm207_vm1, %v3594_v31, 0 }
 0x128   : > { %5065 = vmatmul.mubr.msk.bf16.vlgmr.msra.gmra.mrb[20].mxu0 %vm203_vm2, %v6052_v13  ;;  %4412 = vrot.lane.b32.xlu0 %v6042_v59, %s5483_s8  ;;  %v3600_v59 = vsel %vm207_vm1, %v3588_v35, 0  ;;  %v3591_v13 = vsel %vm2092_vm7, %v6173_v24, %v6186_v34 }
 0x129   : > { %5069 = vmatpush3.bf16.msra.mxu0 %v2129_v45  ;;  %5070 = vmatprep.mubr.msk.bf16.mxu0 %vm5480_vm5, %v5479_v53  ;;  %v6252_v49 = vpop.permute.xlu0 %3586  ;;  %v6254_v12 = vpop.permute.xlu1 %2667 }
 0x12a   : > { %4875 = vmatprep.subr.msk.bf16.mxu0 %vm207_vm1, %v2426_v46  ;;  %3252 = vrot.lane.b32.xlu1 %v6067_v9, %s5482_s5  ;;  %v3595_v4 = vsel %vm2092_vm7, %v6233_v44, %v6252_v49  ;;  %v3624_v38 = vsel %vm207_vm1, %v6252_v49, 0 }
 0x12c   : > { %4855 = vmatmul.mubr.msk.bf16.vlgmr.msra.gmra.mrb[16].mxu1 %vm203_vm2, %v4849_v32  ;;  %4414 = vrot.lane.b32.xlu0 %v6067_v9, %s5483_s8  ;;  %v3590_v9 = vsel %vm2092_vm7, %v6155_v29, %v6173_v24  ;;  %v2455_v24 = vsel %vm207_vm1, %v2431_v30, 0 }
 0x12d   : > { %2255 = vmatpush1.bf16.msra.mxu1 %v2123_v52  ;;  %2286 = vmatprep.mubr.bf16.mxu1 %v5473_v0  ;;  %v6267_v54 = vpop.permute.xlu0 %2669  ;;  %v6269_v55 = vpop.permute.xlu1 %2671  ;;  %v3606_v63 = vsel %vm207_vm1, %v3590_v9, 0  ;;  %v6462_v52 = vld [vmem:[%s6822_s1 + $0x18] sm:$0x3] }
 0x12e   : > { %4939 = vmatprep.subr.msk.bf16.mxu1 %vm207_vm1, %v3589_v50  ;;  %v2686_v37 = vsel %vm693_vm3, %v6267_v54, %v6269_v55  ;;  %v2685_v42 = vsel %vm693_vm3, %v6254_v12, %v6267_v54  ;;  %v6457_v50 = vld [vmem:[%s6822_s1 + $0x10] sm:$0x3] }
 0x12f   : > { %v2697_v45 = vsel %vm207_vm1, %v2685_v42, 0 }
 0x131   : > { %v6278_v56 = vpop.permute.xlu0 %3830  ;;  %v6280_v57 = vpop.permute.xlu1 %3832 }
 0x132   : > { %v3848_v19 = vsel %vm965_vm4, %v6278_v56, %v6280_v57 }
 0x133   : > { %v3860_v47 = vsel %vm207_vm1, %v3848_v19, 0 }
 0x134   : > { %4857 = vmatmul.mubr.msk.bf16.vlgmr.msra.gmra.mrb[20].mxu1 %vm203_vm2, %v4849_v32  ;;  %5071 = vmatmul.mubr.msk.bf16.vlgmr.msra.gmra.mrb[20].mxu0 %vm203_vm2, %v4849_v32 }
 0x135   : > { %2464 = vmatpush1.bf16.msra.mxu0 %v2437_v51  ;;  %3627 = vmatpush1.bf16.msra.mxu1 %v3600_v59  ;;  %v6292_v62 = vpop.permute.xlu0 %3834  ;;  %v6294_v1 = vpop.permute.xlu1 %2673 }
 0x136   : > { %2495 = vmatprep.mubr.bf16.mxu0 %v5473_v0  ;;  %4877 = vmatprep.subr.msk.bf16.mxu0 %vm207_vm1, %v2428_v61  ;;  %v3849_v39 = vsel %vm965_vm4, %v6280_v57, %v6292_v62  ;;  %v2687_v49 = vsel %vm693_vm3, %v6269_v55, %v6294_v1 }
 0x137   : > { %3658 = vmatprep.mubr.bf16.mxu1 %v5473_v0  ;;  %4941 = vmatprep.subr.msk.bf16.mxu1 %vm207_vm1, %v3591_v13  ;;  %v2703_v35 = vsel %vm207_vm1, %v2687_v49, 0 }
 0x139   : > { %v6316_v16 = vpop.permute.xlu0 %2675  ;;  %v6318_v17 = vpop.permute.xlu1 %3836 }
 0x13a   : > { %v2688_v10 = vsel %vm693_vm3, %v6294_v1, %v6316_v16  ;;  %v3850_v12 = vsel %vm965_vm4, %v6292_v62, %v6318_v17 }
 0x13b   : > { %v3866_v60 = vsel %vm207_vm1, %v3850_v12, 0 }
 0x13c   : > { %4876 = vmatmul.mubr.msk.bf16.vlgmr.msra.gmra.mrb[24].mxu0 %vm203_vm2, %v6309_v14  ;;  %4940 = vmatmul.mubr.msk.bf16.vlgmr.msra.gmra.mrb[24].mxu1 %vm203_vm2, %v6314_v15 }
 0x13d   : > { %2505 = vmatpush1.bf16.msra.mxu0 %v2443_v21  ;;  %3668 = vmatpush1.bf16.msra.mxu1 %v3606_v63  ;;  %v6332_v40 = vpop.permute.xlu0 %3838  ;;  %v6334_v22 = vpop.permute.xlu1 %2677 }
 0x13e   : > { %2536 = vmatprep.mubr.bf16.mxu0 %v5473_v0  ;;  %4879 = vmatprep.subr.msk.bf16.mxu0 %vm207_vm1, %v2430_v7  ;;  %v3851_v46 = vsel %vm965_vm4, %v6318_v17, %v6332_v40  ;;  %v2689_v61 = vsel %vm693_vm3, %v6316_v16, %v6334_v22 }
 0x13f   : > { %3699 = vmatprep.mubr.bf16.mxu1 %v5473_v0  ;;  %4943 = vmatprep.subr.msk.bf16.mxu1 %vm207_vm1, %v3593_v20  ;;  %v2709_v1 = vsel %vm207_vm1, %v2689_v61, 0 }
 0x141   : > { %v6346_v18 = vpop.permute.xlu0 %2679  ;;  %v6348_v58 = vpop.permute.xlu1 %3840 }
 0x142   : > { %v2690_v55 = vsel %vm693_vm3, %v6334_v22, %v6346_v18  ;;  %v3852_v51 = vsel %vm965_vm4, %v6332_v40, %v6348_v58 }
 0x143   : > { %v3872_v2 = vsel %vm207_vm1, %v3852_v51, 0 }
 0x144   : > { %4878 = vmatmul.mubr.msk.bf16.vlgmr.msra.gmra.mrb[28].mxu0 %vm203_vm2, %v6309_v14  ;;  %4942 = vmatmul.mubr.msk.bf16.vlgmr.msra.gmra.mrb[28].mxu1 %vm203_vm2, %v6314_v15 }
 0x145   : > { %2546 = vmatpush1.bf16.msra.mxu0 %v2449_v28  ;;  %3709 = vmatpush1.bf16.msra.mxu1 %v3612_v26  ;;  %v6362_v6 = vpop.permute.xlu0 %3842  ;;  %v6364_v29 = vpop.permute.xlu1 %2681 }
 0x146   : > { %2577 = vmatprep.mubr.bf16.mxu0 %v5473_v0  ;;  %4881 = vmatprep.subr.msk.bf16.mxu0 %vm207_vm1, %v2432_v33  ;;  %v3853_v56 = vsel %vm965_vm4, %v6348_v58, %v6362_v6 }
 0x147   : > { %3740 = vmatprep.mubr.bf16.mxu1 %v5473_v0  ;;  %4945 = vmatprep.subr.msk.bf16.mxu1 %vm207_vm1, %v3595_v4 }
 0x149   : > { %v6376_v3 = vpop.permute.xlu0 %2683  ;;  %v6378_v27 = vpop.permute.xlu1 %3844 }
 0x14a   : > { %v2692_v13 = vsel %vm693_vm3, %v6364_v29, %v6376_v3  ;;  %v3854_v16 = vsel %vm965_vm4, %v6362_v6, %v6378_v27  ;;  %v2721_v23 = vsel %vm207_vm1, %v6376_v3, 0 }
 0x14b   : > { %v3878_v63 = vsel %vm207_vm1, %v3854_v16, 0 }
 0x14c   : > { %4880 = vmatmul.mubr.msk.bf16.vlgmr.msra.gmra.mrb[32].mxu0 %vm203_vm2, %v6309_v14  ;;  %4944 = vmatmul.mubr.msk.bf16.vlgmr.msra.gmra.mrb[32].mxu1 %vm203_vm2, %v6314_v15 }
 0x14d   : > { %2587 = vmatpush1.bf16.msra.mxu0 %v2455_v24  ;;  %3750 = vmatpush1.bf16.msra.mxu1 %v3618_v5  ;;  %v6386_v32 = vpop.permute.xlu0 %3846  ;;  %v6392_v34 = vpop.permute.xlu1 %2959 }
 0x14e   : > { %2618 = vmatprep.mubr.bf16.mxu0 %v5473_v0  ;;  %5074 = vmatprep.subr.bf16.mxu0 %v5479_v53  ;;  %v3855_v9 = vsel %vm965_vm4, %v6378_v27, %v6386_v32  ;;  %v3884_v25 = vsel %vm207_vm1, %v6386_v32, 0 }
 0x14f   : > { %3781 = vmatprep.mubr.bf16.mxu1 %v5473_v0  ;;  %5098 = vmatprep.subr.bf16.mxu1 %v5479_v53 }
 0x151   : > { %v6394_v36 = vpop.permute.xlu0 %2961  ;;  %v6410_v41 = vpop.permute.xlu1 %2963 }
 0x152   : > { %v2981_v22 = vsel %vm2979_vm8, %v6394_v36, %v6410_v41  ;;  %v2980_v6 = vsel %vm2979_vm8, %v6392_v34, %v6394_v36 }
 0x153   : > { %v2993_v24 = vsel %vm207_vm1, %v2980_v6, 0 }
 0x154   : > { %4882 = vmatmul.mubr.msk.bf16.vlgmr.msra.gmra.mrb[36].mxu0 %vm203_vm2, %v6309_v14  ;;  %4946 = vmatmul.mubr.msk.bf16.vlgmr.msra.gmra.mrb[36].mxu1 %vm203_vm2, %v6314_v15 }
 0x155   : > { %5075 = vmatpush3.bf16.msra.mxu0 %v2461_v8  ;;  %5099 = vmatpush3.bf16.msra.mxu1 %v3624_v38  ;;  %v6412_v11 = vpop.permute.xlu0 %4122  ;;  %v6432_v44 = vpop.permute.xlu1 %4124 }
 0x156   : > { %4884 = vmatprep.subr.msk.bf16.mxu0 %vm207_vm1, %v2686_v37  ;;  %5076 = vmatprep.mubr.msk.bf16.mxu0 %vm5480_vm5, %v5479_v53  ;;  %v4142_v33 = vsel %vm3254_vm9, %v6412_v11, %v6432_v44  ;;  %v6604_v11 = vld [vmem:[%s6822_s1 + $0x1c] sm:$0x3] }
 0x157   : > { %5100 = vmatprep.mubr.msk.bf16.mxu1 %vm5480_vm5, %v5479_v53  ;;  %4948 = vmatprep.subr.msk.bf16.mxu1 %vm207_vm1, %v3849_v39  ;;  %v4155_v30 = vsel %vm207_vm1, %v4142_v33, 0  ;;  %v6599_v39 = vld [vmem:[%s6822_s1 + $0x14] sm:$0x3] }
 0x159   : > { %v6426_v43 = vpop.permute.xlu0 %4126  ;;  %v6464_v54 = vpop.permute.xlu1 %2965 }
 0x15a   : > { %v2982_v37 = vsel %vm2979_vm8, %v6410_v41, %v6464_v54 }
 0x15c   : > { %5077 = vmatmul.mubr.msk.bf16.vlgmr.msra.gmra.mrb[40].mxu0 %vm203_vm2, %v6309_v14  ;;  %5101 = vmatmul.mubr.msk.bf16.vlgmr.msra.gmra.mrb[40].mxu1 %vm203_vm2, %v6314_v15  ;;  %v2691_v15 = vsel %vm693_vm3, %v6346_v18, %v6364_v29  ;;  %v4143_v18 = vsel %vm3254_vm9, %v6432_v44, %v6426_v43 }
 0x15d   : > { %2724 = vmatpush1.bf16.msra.mxu0 %v2697_v45  ;;  %3887 = vmatpush1.bf16.msra.mxu1 %v3860_v47  ;;  %v6446_v48 = vpop.permute.xlu0 %2967  ;;  %v6484_v59 = vpop.permute.xlu1 %4128  ;;  %v2715_v21 = vsel %vm207_vm1, %v2691_v15, 0 }
 0x15e   : > { %2755 = vmatprep.mubr.bf16.mxu0 %v5473_v0  ;;  %4886 = vmatprep.subr.msk.bf16.mxu0 %vm207_vm1, %v2688_v10  ;;  %v2983_v3 = vsel %vm2979_vm8, %v6464_v54, %v6446_v48  ;;  %v4144_v8 = vsel %vm3254_vm9, %v6426_v43, %v6484_v59  ;;  %v2999_v43 = vsel %vm207_vm1, %v2982_v37, 0 }
 0x15f   : > { %3918 = vmatprep.mubr.bf16.mxu1 %v5473_v0  ;;  %4950 = vmatprep.subr.msk.bf16.mxu1 %vm207_vm1, %v3851_v46  ;;  %v4161_v10 = vsel %vm207_vm1, %v4144_v8, 0 }
 0x161   : > { %v6478_v57 = vpop.permute.xlu0 %4130  ;;  %v6506_v14 = vpop.permute.xlu1 %2969 }
 0x162   : > { %v4145_v5 = vsel %vm3254_vm9, %v6484_v59, %v6478_v57  ;;  %v2984_v46 = vsel %vm2979_vm8, %v6446_v48, %v6506_v14 }
 0x163   : > { %v3005_v54 = vsel %vm207_vm1, %v2984_v46, 0 }
 0x164   : > { %4885 = vmatmul.mubr.msk.bf16.vlgmr.msra.gmra.mrb[24].mxu0 %vm203_vm2, %v6457_v50  ;;  %4949 = vmatmul.mubr.msk.bf16.vlgmr.msra.gmra.mrb[24].mxu1 %vm203_vm2, %v6462_v52 }
 0x165   : > { %2765 = vmatpush1.bf16.msra.mxu0 %v2703_v35  ;;  %3928 = vmatpush1.bf16.msra.mxu1 %v3866_v60  ;;  %v6495_v62 = vpop.permute.xlu0 %2971  ;;  %v6520_v7 = vpop.permute.xlu1 %4132 }
 0x166   : > { %2796 = vmatprep.mubr.bf16.mxu0 %v5473_v0  ;;  %4888 = vmatprep.subr.msk.bf16.mxu0 %vm207_vm1, %v2690_v55  ;;  %v2985_v41 = vsel %vm2979_vm8, %v6506_v14, %v6495_v62  ;;  %v4146_v49 = vsel %vm3254_vm9, %v6478_v57, %v6520_v7 }
 0x167   : > { %3959 = vmatprep.mubr.bf16.mxu1 %v5473_v0  ;;  %4952 = vmatprep.subr.msk.bf16.mxu1 %vm207_vm1, %v3853_v56  ;;  %v4167_v55 = vsel %vm207_vm1, %v4146_v49, 0 }
 0x169   : > { %v6518_v17 = vpop.permute.xlu0 %4134  ;;  %v6534_v40 = vpop.permute.xlu1 %2973 }
 0x16a   : > { %v4147_v44 = vsel %vm3254_vm9, %v6520_v7, %v6518_v17 }
 0x16c   : > { %4887 = vmatmul.mubr.msk.bf16.vlgmr.msra.gmra.mrb[28].mxu0 %vm203_vm2, %v6457_v50  ;;  %4951 = vmatmul.mubr.msk.bf16.vlgmr.msra.gmra.mrb[28].mxu1 %vm203_vm2, %v6462_v52 }
 0x16d   : > { %2806 = vmatpush1.bf16.msra.mxu0 %v2709_v1  ;;  %3969 = vmatpush1.bf16.msra.mxu1 %v3872_v2  ;;  %v6532_v20 = vpop.permute.xlu0 %2975  ;;  %v6561_v26 = vpop.permute.xlu1 %4136 }
 0x16e   : > { %2837 = vmatprep.mubr.bf16.mxu0 %v5473_v0  ;;  %4890 = vmatprep.subr.msk.bf16.mxu0 %vm207_vm1, %v2692_v13  ;;  %v2986_v13 = vsel %vm2979_vm8, %v6495_v62, %v6534_v40  ;;  %v4148_v1 = vsel %vm3254_vm9, %v6518_v17, %v6561_v26 }
 0x16f   : > { %4000 = vmatprep.mubr.bf16.mxu1 %v5473_v0  ;;  %4954 = vmatprep.subr.msk.bf16.mxu1 %vm207_vm1, %v3855_v9  ;;  %v3011_v9 = vsel %vm207_vm1, %v2986_v13, 0  ;;  %v4173_v14 = vsel %vm207_vm1, %v4148_v1, 0 }
 0x171   : > { %v6550_v58 = vpop.permute.xlu0 %4138  ;;  %v6580_v32 = vpop.permute.xlu1 %2977 }
 0x172   : > { %v4149_v48 = vsel %vm3254_vm9, %v6561_v26, %v6550_v58  ;;  %v2988_v17 = vsel %vm2979_vm8, %v6532_v20, %v6580_v32 }
 0x174   : > { %4889 = vmatmul.mubr.msk.bf16.vlgmr.msra.gmra.mrb[32].mxu0 %vm203_vm2, %v6457_v50  ;;  %4953 = vmatmul.mubr.msk.bf16.vlgmr.msra.gmra.mrb[32].mxu1 %vm203_vm2, %v6462_v52 }
 0x175   : > { %2847 = vmatpush1.bf16.msra.mxu0 %v2715_v21  ;;  %4010 = vmatpush1.bf16.msra.mxu1 %v3878_v63  ;;  %v6570_v27 = vpop.permute.xlu0 %4140  ;;  %v6611_v47 = vpop.permute.xlu1 %3234 }
 0x176   : > { %2878 = vmatprep.mubr.bf16.mxu0 %v5473_v0  ;;  %5080 = vmatprep.subr.bf16.mxu0 %v5479_v53  ;;  %v4150_v7 = vsel %vm3254_vm9, %v6550_v58, %v6570_v27 }
 0x177   : > { %4041 = vmatprep.mubr.bf16.mxu1 %v5473_v0  ;;  %5104 = vmatprep.subr.bf16.mxu1 %v5479_v53 }
 0x179   : > { %v6606_v19 = vpop.permute.xlu0 %3236  ;;  %v6634_v12 = vpop.permute.xlu1 %3238 }
 0x17c   : > { %4891 = vmatmul.mubr.msk.bf16.vlgmr.msra.gmra.mrb[36].mxu0 %vm203_vm2, %v6457_v50  ;;  %4955 = vmatmul.mubr.msk.bf16.vlgmr.msra.gmra.mrb[36].mxu1 %vm203_vm2, %v6462_v52 }
 0x17d   : > { %5081 = vmatpush3.bf16.msra.mxu0 %v2721_v23  ;;  %5105 = vmatpush3.bf16.msra.mxu1 %v3884_v25  ;;  %v6626_v45 = vpop.permute.xlu0 %4396  ;;  %v4399_v51 = vpop.permute.xlu1 %4398  ;;  %v3017_v25 = vsel %vm207_vm1, %v2988_v17, 0 }
 0x17e   : > { %4904 = vmatprep.subr.msk.bf16.mxu0 %vm207_vm1, %v2981_v22  ;;  %5082 = vmatprep.mubr.msk.bf16.mxu0 %vm5480_vm5, %v5479_v53  ;;  %v4417_v6 = vsel %vm4416_vm10, %v6626_v45, %v4399_v51 }
 0x17f   : > { %v1079_v28 = vpop.f32.mrb[0].mxu1  ;;  %5106 = vmatprep.mubr.msk.bf16.mxu1 %vm5480_vm5, %v5479_v53  ;;  %4968 = vmatprep.subr.msk.bf16.mxu1 %vm207_vm1, %v4143_v18  ;;  %v4179_v18 = vsel %vm207_vm1, %v4150_v7, 0 }
 0x180   : > { %v1081_v4 = vpop.f32.mrb[1].mxu1 }
 0x181   : > { %v1083_v29 = vpop.f32.mrb[2].mxu1  ;;  %v6648_v59 = vpop.permute.xlu0 %4400 }
 0x182   : > { %v1084_v31 = vpop.f32.mrb[3].mxu1  ;;  %v3241_v62 = vpop.permute.xlu1 %3240  ;;  %v4418_v58 = vsel %vm4416_vm10, %v4399_v51, %v6648_v59 }
 0x183   : > { %v3257_v8 = vsel %vm3254_vm9, %v6634_v12, %v3241_v62 }
 0x184   : > { %5083 = vmatmul.mubr.msk.bf16.vlgmr.msra.gmra.mrb[40].mxu0 %vm203_vm2, %v6457_v50  ;;  %5107 = vmatmul.mubr.msk.bf16.vlgmr.msra.gmra.mrb[40].mxu1 %vm203_vm2, %v6462_v52  ;;  %v2987_v52 = vsel %vm2979_vm8, %v6534_v40, %v6532_v20  ;;  %v3256_v40 = vsel %vm3254_vm9, %v6606_v19, %v6634_v12 }
 0x185   : > { %3020 = vmatpush1.bf16.msra.mxu0 %v2993_v24  ;;  %4182 = vmatpush1.bf16.msra.mxu1 %v4155_v30  ;;  %v6660_v2 = vpop.permute.xlu0 %3242  ;;  %v3255_v30 = vsel %vm3254_vm9, %v6611_v47, %v6606_v19  ;;  %v3274_v47 = vsel %vm207_vm1, %v3257_v8, 0 }
 0x186   : > { %3051 = vmatprep.mubr.bf16.mxu0 %v5473_v0  ;;  %4906 = vmatprep.subr.msk.bf16.mxu0 %vm207_vm1, %v2983_v3  ;;  %v4403_v23 = vpop.permute.xlu1 %4402  ;;  %v4430_v3 = vsel %vm207_vm1, %v4417_v6, 0  ;;  %v3258_v27 = vsel %vm3254_vm9, %v3241_v62, %v6660_v2  ;;  %v3268_v24 = vsel %vm207_vm1, %v3255_v30, 0 }
 0x187   : > { %v6584_v34 = vpop.f32.mrb[4].mxu1  ;;  %4213 = vmatprep.mubr.bf16.mxu1 %v5473_v0  ;;  %4970 = vmatprep.subr.msk.bf16.mxu1 %vm207_vm1, %v4145_v5 }
 0x188   : > { %v6588_v36 = vpop.f32.mrb[5].mxu1 }
 0x189   : > { %v1165_v38 = vpop.f32.mrb[6].mxu1  ;;  %v6684_v21 = vpop.permute.xlu0 %4404 }
 0x18a   : > { %v1166_v42 = vpop.f32.mrb[7].mxu1  ;;  %v3245_v31 = vpop.permute.xlu1 %3244  ;;  %v4420_v5 = vsel %vm4416_vm10, %v4403_v23, %v6684_v21  ;;  %v4419_v38 = vsel %vm4416_vm10, %v6648_v59, %v4403_v23 }
 0x18b   : > { %v3259_v45 = vsel %vm3254_vm9, %v6660_v2, %v3245_v31 }
 0x18c   : > { %4905 = vmatmul.mubr.msk.bf16.vlgmr.msra.gmra.mrb[24].mxu0 %vm203_vm2, %v6599_v39  ;;  %4969 = vmatmul.mubr.msk.bf16.vlgmr.msra.gmra.mrb[24].mxu1 %vm203_vm2, %v6604_v11 }
 0x18d   : > { %3061 = vmatpush1.bf16.msra.mxu0 %v2999_v43  ;;  %4223 = vmatpush1.bf16.msra.mxu1 %v4161_v10  ;;  %v3247_v29 = vpop.permute.xlu0 %3246  ;;  %v4436_v43 = vsel %vm207_vm1, %v4419_v38, 0 }
 0x18e   : > { %3092 = vmatprep.mubr.bf16.mxu0 %v5473_v0  ;;  %4908 = vmatprep.subr.msk.bf16.mxu0 %vm207_vm1, %v2985_v41  ;;  %v3260_v42 = vsel %vm3254_vm9, %v3245_v31, %v3247_v29 }
 0x18f   : > { %4254 = vmatprep.mubr.bf16.mxu1 %v5473_v0  ;;  %4972 = vmatprep.subr.msk.bf16.mxu1 %vm207_vm1, %v4147_v44 }
 0x192   : > { %v4409_v32 = vpop.permute.xlu0 %4408 }
 0x193   : > { %v544_v50 = vpop.f32.mrb[4].mxu0 }
 0x194   : > { %v5122_v35 = vadd.f32 %v1079_v28, %v544_v50  ;;  %v546_v60 = vpop.f32.mrb[5].mxu0  ;;  %4907 = vmatmul.mubr.msk.bf16.vlgmr.msra.gmra.mrb[28].mxu0 %vm203_vm2, %v6599_v39  ;;  %4971 = vmatmul.mubr.msk.bf16.vlgmr.msra.gmra.mrb[28].mxu1 %vm203_vm2, %v6604_v11 }
 0x195   : > { %v5123_v56 = vadd.f32 %v1081_v4, %v546_v60  ;;  %3102 = vmatpush1.bf16.msra.mxu0 %v3005_v54  ;;  %4264 = vmatpush1.bf16.msra.mxu1 %v4167_v55  ;;  %v548_v57 = vpop.f32.mrb[6].mxu0 }
 0x196   : > { %5393 = vtanh.f32 %v5122_v35  ;;  %v549_v61 = vpop.f32.mrb[7].mxu0  ;;  %3133 = vmatprep.mubr.bf16.mxu0 %v5473_v0  ;;  %4910 = vmatprep.subr.msk.bf16.mxu0 %vm207_vm1, %v2987_v52  ;;  %v3251_v41 = vpop.permute.xlu0 %3250  ;;  %v3280_v52 = vsel %vm207_vm1, %v3259_v45, 0 }
 0x197   : > { %5395 = vtanh.f32 %v5123_v56  ;;  %4295 = vmatprep.mubr.bf16.mxu1 %v5473_v0  ;;  %4974 = vmatprep.subr.msk.bf16.mxu1 %vm207_vm1, %v4149_v48 }
 0x19a   : > { %v4413_v49 = vpop.permute.xlu0 %4412 }
 0x19c   : > { %4909 = vmatmul.mubr.msk.bf16.vlgmr.msra.gmra.mrb[32].mxu0 %vm203_vm2, %v6599_v39  ;;  %4973 = vmatmul.mubr.msk.bf16.vlgmr.msra.gmra.mrb[32].mxu1 %vm203_vm2, %v6604_v11 }
 0x19d   : > { %3143 = vmatpush1.bf16.msra.mxu0 %v3011_v9  ;;  %4305 = vmatpush1.bf16.msra.mxu1 %v4173_v14 }
 0x19e   : > { %3174 = vmatprep.mubr.bf16.mxu0 %v5473_v0  ;;  %5086 = vmatprep.subr.bf16.mxu0 %v5479_v53  ;;  %v4415_v59 = vpop.permute.xlu0 %4414 }
 0x19f   : > { %4336 = vmatprep.mubr.bf16.mxu1 %v5473_v0  ;;  %5110 = vmatprep.subr.bf16.mxu1 %v5479_v53  ;;  %v4425_v51 = vsel %vm4416_vm10, %v4413_v49, %v4415_v59 }
 0x1a0   : > { %v5394_v15 = vpop.eup %5393  ;;  %v4454_v2 = vsel %vm207_vm1, %v4425_v51, 0 }
 0x1a1   : > { %v5396_v16 = vpop.eup %5395 }
 0x1a2   : > { %v1235_v63 = vcombine.low %v5394_v15, %v5396_v16 }
 0x1a3   : > { %v626_v22 = vpop.f32.mrb[12].mxu0 }
 0x1a4   : > { %1243 = vst [vmem:[%s6676_s28 + $0x8] sm:$0x77] %v1235_v63  ;;  %v5124_v20 = vadd.f32 %v6584_v34, %v626_v22  ;;  %v628_v33 = vpop.f32.mrb[13].mxu0  ;;  %4911 = vmatmul.mubr.msk.bf16.vlgmr.msra.gmra.mrb[36].mxu0 %vm203_vm2, %v6599_v39  ;;  %4975 = vmatmul.mubr.msk.bf16.vlgmr.msra.gmra.mrb[36].mxu1 %vm203_vm2, %v6604_v11  ;;  %v4407_v34 = vpop.permute.xlu1 %4406 }
 0x1a5   : > { %v5125_v28 = vadd.f32 %v6588_v36, %v628_v33  ;;  %5087 = vmatpush3.bf16.msra.mxu0 %v3017_v25  ;;  %5111 = vmatpush3.bf16.msra.mxu1 %v4179_v18  ;;  %v630_v26 = vpop.f32.mrb[14].mxu0  ;;  %v4422_v10 = vsel %vm4416_vm10, %v4407_v34, %v4409_v32  ;;  %v4421_v46 = vsel %vm4416_vm10, %v6684_v21, %v4407_v34 }
 0x1a6   : > { %5397 = vtanh.f32 %v5124_v20  ;;  %v631_v4 = vpop.f32.mrb[15].mxu0  ;;  %4914 = vmatprep.subr.msk.bf16.mxu0 %vm207_vm1, %v3256_v40  ;;  %5088 = vmatprep.mubr.msk.bf16.mxu0 %vm5480_vm5, %v5479_v53  ;;  %v4442_v54 = vsel %vm207_vm1, %v4421_v46, 0 }
 0x1a7   : > { %5399 = vtanh.f32 %v5125_v28  ;;  %5112 = vmatprep.mubr.msk.bf16.mxu1 %vm5480_vm5, %v5479_v53  ;;  %4978 = vmatprep.subr.msk.bf16.mxu1 %vm207_vm1, %v4418_v58 }
 0x1a8   : > { %v3249_v44 = vpop.permute.xlu1 %3248 }
 0x1a9   : > { %v3262_v12 = vsel %vm3254_vm9, %v3249_v44, %v3251_v41  ;;  %v3261_v35 = vsel %vm3254_vm9, %v3247_v29, %v3249_v44 }
 0x1aa   : > { %v3286_v48 = vsel %vm207_vm1, %v3261_v35, 0 }
 0x1ac   : > { %5089 = vmatmul.mubr.msk.bf16.vlgmr.msra.gmra.mrb[40].mxu0 %vm203_vm2, %v6599_v39  ;;  %5113 = vmatmul.mubr.msk.bf16.vlgmr.msra.gmra.mrb[40].mxu1 %vm203_vm2, %v6604_v11  ;;  %v6732_v39 = vld [vmem:[%s6822_s1 + $0x16] sm:$0x3]  ;;  %v6737_v11 = vld [vmem:[%s6822_s1 + $0x1e] sm:$0x3]  ;;  %v4411_v50 = vpop.permute.xlu1 %4410 }
 0x1ad   : > { %3295 = vmatpush1.bf16.msra.mxu0 %v3268_v24  ;;  %4457 = vmatpush1.bf16.msra.mxu1 %v4430_v3  ;;  %v4424_v55 = vsel %vm4416_vm10, %v4411_v50, %v4413_v49  ;;  %v4423_v60 = vsel %vm4416_vm10, %v4409_v32, %v4411_v50 }
 0x1ae   : > { %3326 = vmatprep.mubr.bf16.mxu0 %v5473_v0  ;;  %4916 = vmatprep.subr.msk.bf16.mxu0 %vm207_vm1, %v3258_v27  ;;  %v4448_v56 = vsel %vm207_vm1, %v4423_v60, 0 }
 0x1af   : > { %4488 = vmatprep.mubr.bf16.mxu1 %v5473_v0  ;;  %4980 = vmatprep.subr.msk.bf16.mxu1 %vm207_vm1, %v4420_v5 }
 0x1b0   : > { %v5398_v36 = vpop.eup %5397  ;;  %v3253_v57 = vpop.permute.xlu1 %3252 }
 0x1b1   : > { %v5400_v37 = vpop.eup %5399  ;;  %v3263_v61 = vsel %vm3254_vm9, %v3251_v41, %v3253_v57 }
 0x1b2   : > { %v1237_v19 = vcombine.low %v5398_v36, %v5400_v37  ;;  %v3292_v1 = vsel %vm207_vm1, %v3263_v61, 0 }
 0x1b4   : > { %1245 = vst [vmem:[%s6676_s28 + $0x18] sm:$0x77] %v1237_v19  ;;  %4915 = vmatmul.mubr.msk.bf16.vlgmr.msra.gmra.mrb[24].mxu0 %vm203_vm2, %v6732_v39  ;;  %4979 = vmatmul.mubr.msk.bf16.vlgmr.msra.gmra.mrb[24].mxu1 %vm203_vm2, %v6737_v11 }
 0x1b5   : > { %3336 = vmatpush1.bf16.msra.mxu0 %v3274_v47  ;;  %4498 = vmatpush1.bf16.msra.mxu1 %v4436_v43 }
 0x1b6   : > { %3367 = vmatprep.mubr.bf16.mxu0 %v5473_v0  ;;  %4918 = vmatprep.subr.msk.bf16.mxu0 %vm207_vm1, %v3260_v42 }
 0x1b7   : > { %4529 = vmatprep.mubr.bf16.mxu1 %v5473_v0  ;;  %4982 = vmatprep.subr.msk.bf16.mxu1 %vm207_vm1, %v4422_v10 }
 0x1bc   : > { %4917 = vmatmul.mubr.msk.bf16.vlgmr.msra.gmra.mrb[28].mxu0 %vm203_vm2, %v6732_v39  ;;  %4981 = vmatmul.mubr.msk.bf16.vlgmr.msra.gmra.mrb[28].mxu1 %vm203_vm2, %v6737_v11 }
 0x1bd   : > { %3377 = vmatpush1.bf16.msra.mxu0 %v3280_v52  ;;  %4539 = vmatpush1.bf16.msra.mxu1 %v4442_v54 }
 0x1be   : > { %3408 = vmatprep.mubr.bf16.mxu0 %v5473_v0  ;;  %4920 = vmatprep.subr.msk.bf16.mxu0 %vm207_vm1, %v3262_v12 }
 0x1bf   : > { %4570 = vmatprep.mubr.bf16.mxu1 %v5473_v0  ;;  %4984 = vmatprep.subr.msk.bf16.mxu1 %vm207_vm1, %v4424_v55 }
 0x1c4   : > { %4919 = vmatmul.mubr.msk.bf16.vlgmr.msra.gmra.mrb[32].mxu0 %vm203_vm2, %v6732_v39  ;;  %4983 = vmatmul.mubr.msk.bf16.vlgmr.msra.gmra.mrb[32].mxu1 %vm203_vm2, %v6737_v11 }
 0x1c5   : > { %3418 = vmatpush1.bf16.msra.mxu0 %v3286_v48  ;;  %4580 = vmatpush1.bf16.msra.mxu1 %v4448_v56 }
 0x1c6   : > { %3449 = vmatprep.mubr.bf16.mxu0 %v5473_v0  ;;  %5092 = vmatprep.subr.bf16.mxu0 %v5479_v53 }
 0x1c7   : > { %4611 = vmatprep.mubr.bf16.mxu1 %v5473_v0  ;;  %5116 = vmatprep.subr.bf16.mxu1 %v5479_v53 }
 0x1cb   : > { %v1038_v13 = vpop.f32.mrb[0].mxu0 }
 0x1cc   : > { %5401 = vtanh.f32 %v1038_v13  ;;  %v1040_v9 = vpop.f32.mrb[1].mxu0  ;;  %4921 = vmatmul.mubr.msk.bf16.vlgmr.msra.gmra.mrb[36].mxu0 %vm203_vm2, %v6732_v39  ;;  %4985 = vmatmul.mubr.msk.bf16.vlgmr.msra.gmra.mrb[36].mxu1 %vm203_vm2, %v6737_v11 }
 0x1cd   : > { %5403 = vtanh.f32 %v1040_v9  ;;  %5093 = vmatpush3.bf16.msra.mxu0 %v3292_v1  ;;  %5117 = vmatpush3.bf16.msra.mxu1 %v4454_v2  ;;  %v1042_v0 = vpop.f32.mrb[2].mxu0 }
 0x1ce   : > { %v1043_v14 = vpop.f32.mrb[3].mxu0  ;;  %5094 = vmatprep.mubr.msk.bf16.mxu0 %vm5480_vm5, %v5479_v53  ;;  %5118 = vmatprep.mubr.msk.bf16.mxu1 %vm5480_vm5, %v5479_v53 }
 0x1d3   : > { %v1120_v62 = vpop.f32.mrb[8].mxu0 }
 0x1d4   : > { %5405 = vtanh.f32 %v1120_v62  ;;  %v1122_v15 = vpop.f32.mrb[9].mxu0  ;;  %5095 = vmatmul.mubr.msk.bf16.vlgmr.msra.gmra.mrb[40].mxu0 %vm203_vm2, %v6732_v39  ;;  %5119 = vmatmul.mubr.msk.bf16.vlgmr.msra.gmra.mrb[40].mxu1 %vm203_vm2, %v6737_v11 }
 0x1d5   : > { %5407 = vtanh.f32 %v1122_v15  ;;  %v1124_v16 = vpop.f32.mrb[10].mxu0 }
 0x1d6   : > { %v5402_v17 = vpop.eup %5401  ;;  %v1125_v7 = vpop.f32.mrb[11].mxu0 }
 0x1d7   : > { %v5404_v21 = vpop.eup %5403 }
 0x1d8   : > { %v1234_v63 = vcombine.low %v5402_v17, %v5404_v21 }
 0x1da   : > { %1242 = vst [vmem:[%s6676_s28] sm:$0x77] %v1234_v63 }
 0x1db   : > { %v1202_v40 = vpop.f32.mrb[16].mxu0 }
 0x1dc   : > { %5409 = vtanh.f32 %v1202_v40  ;;  %v5048_v53 = vpop.f32.mrb[17].mxu0 }
 0x1dd   : > { %v1205_v22 = vpop.f32.mrb[18].mxu0 }
 0x1de   : > { %v5406_v23 = vpop.eup %5405  ;;  %v5049_v25 = vpop.f32.mrb[19].mxu0 }
 0x1df   : > { %v5408_v18 = vpop.eup %5407 }
 0x1e0   : > { %v1236_v20 = vcombine.low %v5406_v23, %v5408_v18 }
 0x1e2   : > { %1244 = vst [vmem:[%s6676_s28 + $0x10] sm:$0x77] %v1236_v20 }
 0x1e6   : > { %v5410_v33 = vpop.eup %5409 }
 0x1e7   : > { %1247 = vst.msk [vmem:[%s6676_s28 + $0x20] sm:$0x7] %vm1246_vm11, %v5410_v33 }
 0x1ef   : > { %v2165_v58 = vpop.f32.mrb[8].mxu1 }
 0x1f0   : > { %5411 = vtanh.f32 %v2165_v58  ;;  %v2167_v28 = vpop.f32.mrb[9].mxu1 }
 0x1f1   : > { %5413 = vtanh.f32 %v2167_v28  ;;  %v2169_v26 = vpop.f32.mrb[10].mxu1 }
 0x1f2   : > { %v2170_v4 = vpop.f32.mrb[11].mxu1 }
 0x1f7   : > { %v2206_v6 = vpop.f32.mrb[12].mxu1 }
 0x1f8   : > { %5415 = vtanh.f32 %v2206_v6  ;;  %v2208_v29 = vpop.f32.mrb[13].mxu1 }
 0x1f9   : > { %5417 = vtanh.f32 %v2208_v29  ;;  %v2210_v30 = vpop.f32.mrb[14].mxu1 }
 0x1fa   : > { %v5412_v31 = vpop.eup %5411  ;;  %v2211_v3 = vpop.f32.mrb[15].mxu1 }
 0x1fb   : > { %v5414_v27 = vpop.eup %5413 }
 0x1fc   : > { %v2361_v24 = vcombine.low %v5412_v31, %v5414_v27 }
 0x1fe   : > { %4859 = vst [vmem:[%s6676_s28 + $0x24] sm:$0x77] %v2361_v24 }
 0x1ff   : > { %v2247_v5 = vpop.f32.mrb[16].mxu1 }
 0x200   : > { %5419 = vtanh.f32 %v2247_v5  ;;  %v2249_v32 = vpop.f32.mrb[17].mxu1 }
 0x201   : > { %5421 = vtanh.f32 %v2249_v32  ;;  %v2251_v34 = vpop.f32.mrb[18].mxu1 }
 0x202   : > { %v5416_v36 = vpop.eup %5415  ;;  %v2252_v37 = vpop.f32.mrb[19].mxu1 }
 0x203   : > { %v5418_v8 = vpop.eup %5417 }
 0x204   : > { %v2362_v38 = vcombine.low %v5416_v36, %v5418_v8 }
 0x206   : > { %4860 = vst [vmem:[%s6676_s28 + $0x2c] sm:$0x77] %v2362_v38 }
 0x207   : > { %v2288_v39 = vpop.f32.mrb[20].mxu1  ;;  %v2329_v11 = vpop.f32.mrb[20].mxu0 }
 0x208   : > { %5423 = vtanh.f32 %v2288_v39  ;;  %v2290_v19 = vpop.f32.mrb[21].mxu1  ;;  %v5072_v42 = vpop.f32.mrb[21].mxu0 }
 0x209   : > { %5425 = vtanh.f32 %v2329_v11  ;;  %v2292_v41 = vpop.f32.mrb[22].mxu1  ;;  %v2332_v47 = vpop.f32.mrb[22].mxu0 }
 0x20a   : > { %v5420_v43 = vpop.eup %5419  ;;  %5427 = vtanh.f32 %v2290_v19  ;;  %v2293_v10 = vpop.f32.mrb[23].mxu1 }
 0x20b   : > { %v5073_v44 = vpop.f32.mrb[23].mxu0  ;;  %v5422_v45 = vpop.eup %5421 }
 0x20c   : > { %v2363_v46 = vcombine.low %v5420_v43, %v5422_v45 }
 0x20e   : > { %4861 = vst [vmem:[%s6676_s28 + $0x34] sm:$0x77] %v2363_v46 }
 0x212   : > { %v5424_v49 = vpop.eup %5423 }
 0x213   : > { %v5426_v12 = vpop.eup %5425 }
 0x214   : > { %v5428_v50 = vpop.eup %5427  ;;  %4863 = vst.msk [vmem:[%s6676_s28 + $0x44] sm:$0x7] %vm1246_vm11, %v5426_v12 }
 0x215   : > { %v2364_v52 = vcombine.low %v5424_v49, %v5428_v50 }
 0x217   : > { %4862 = vst [vmem:[%s6676_s28 + $0x3c] sm:$0x77] %v2364_v52 }
 0x287   : > { %v3328_v54 = vpop.f32.mrb[24].mxu0  ;;  %v4490_v55 = vpop.f32.mrb[24].mxu1 }
 0x288   : > { %5429 = vtanh.f32 %v3328_v54  ;;  %v3330_v35 = vpop.f32.mrb[25].mxu0  ;;  %v4492_v60 = vpop.f32.mrb[25].mxu1 }
 0x289   : > { %5431 = vtanh.f32 %v4490_v55  ;;  %v3332_v48 = vpop.f32.mrb[26].mxu0  ;;  %v4494_v56 = vpop.f32.mrb[26].mxu1 }
 0x28a   : > { %5433 = vtanh.f32 %v3330_v35  ;;  %v3333_v57 = vpop.f32.mrb[27].mxu0  ;;  %v4495_v59 = vpop.f32.mrb[27].mxu1 }
 0x28b   : > { %5435 = vtanh.f32 %v4492_v60 }
 0x28f   : > { %v3369_v61 = vpop.f32.mrb[28].mxu0  ;;  %v4531_v51 = vpop.f32.mrb[28].mxu1 }
 0x290   : > { %5437 = vtanh.f32 %v3369_v61  ;;  %v3371_v13 = vpop.f32.mrb[29].mxu0  ;;  %v4533_v1 = vpop.f32.mrb[29].mxu1 }
 0x291   : > { %5439 = vtanh.f32 %v4531_v51  ;;  %v3373_v2 = vpop.f32.mrb[30].mxu0  ;;  %v4535_v9 = vpop.f32.mrb[30].mxu1 }
 0x292   : > { %v5430_v0 = vpop.eup %5429  ;;  %5441 = vtanh.f32 %v3371_v13  ;;  %v3374_v14 = vpop.f32.mrb[31].mxu0 }
 0x293   : > { %v4536_v62 = vpop.f32.mrb[31].mxu1  ;;  %v5432_v15 = vpop.eup %5431  ;;  %5443 = vtanh.f32 %v4533_v1 }
 0x294   : > { %v5434_v16 = vpop.eup %5433 }
 0x295   : > { %v5436_v17 = vpop.eup %5435  ;;  %v3524_v7 = vcombine.low %v5430_v0, %v5434_v16 }
 0x296   : > { %v4686_v21 = vcombine.low %v5432_v15, %v5436_v17 }
 0x297   : > { %4923 = vst [vmem:[%s6676_s28 + $0x48] sm:$0x77] %v3524_v7  ;;  %v3410_v63 = vpop.f32.mrb[32].mxu0  ;;  %v4572_v40 = vpop.f32.mrb[32].mxu1 }
 0x298   : > { %4987 = vst [vmem:[%s6676_s28 + $0x6c] sm:$0x77] %v4686_v21  ;;  %5445 = vtanh.f32 %v3410_v63  ;;  %v3412_v53 = vpop.f32.mrb[33].mxu0  ;;  %v4574_v22 = vpop.f32.mrb[33].mxu1 }
 0x299   : > { %5447 = vtanh.f32 %v4572_v40  ;;  %v3414_v23 = vpop.f32.mrb[34].mxu0  ;;  %v4576_v25 = vpop.f32.mrb[34].mxu1 }
 0x29a   : > { %v5438_v18 = vpop.eup %5437  ;;  %5449 = vtanh.f32 %v3412_v53  ;;  %v3415_v20 = vpop.f32.mrb[35].mxu0 }
 0x29b   : > { %v4577_v33 = vpop.f32.mrb[35].mxu1  ;;  %v5440_v58 = vpop.eup %5439  ;;  %5451 = vtanh.f32 %v4574_v22 }
 0x29c   : > { %v5442_v28 = vpop.eup %5441 }
 0x29d   : > { %v5444_v26 = vpop.eup %5443  ;;  %v3525_v4 = vcombine.low %v5438_v18, %v5442_v28 }
 0x29e   : > { %v4687_v6 = vcombine.low %v5440_v58, %v5444_v26 }
 0x29f   : > { %4924 = vst [vmem:[%s6676_s28 + $0x50] sm:$0x77] %v3525_v4  ;;  %v3451_v29 = vpop.f32.mrb[36].mxu0  ;;  %v4613_v30 = vpop.f32.mrb[36].mxu1 }
 0x2a0   : > { %4988 = vst [vmem:[%s6676_s28 + $0x74] sm:$0x77] %v4687_v6  ;;  %5453 = vtanh.f32 %v3451_v29  ;;  %v3453_v31 = vpop.f32.mrb[37].mxu0  ;;  %v4615_v3 = vpop.f32.mrb[37].mxu1 }
 0x2a1   : > { %5455 = vtanh.f32 %v4613_v30  ;;  %v3455_v27 = vpop.f32.mrb[38].mxu0  ;;  %v4617_v24 = vpop.f32.mrb[38].mxu1 }
 0x2a2   : > { %v5446_v5 = vpop.eup %5445  ;;  %5457 = vtanh.f32 %v3453_v31  ;;  %v3456_v32 = vpop.f32.mrb[39].mxu0 }
 0x2a3   : > { %v4618_v34 = vpop.f32.mrb[39].mxu1  ;;  %v5448_v36 = vpop.eup %5447  ;;  %5459 = vtanh.f32 %v4615_v3 }
 0x2a4   : > { %v5450_v37 = vpop.eup %5449 }
 0x2a5   : > { %v5452_v8 = vpop.eup %5451  ;;  %v3526_v38 = vcombine.low %v5446_v5, %v5450_v37 }
 0x2a6   : > { %v4688_v39 = vcombine.low %v5448_v36, %v5452_v8 }
 0x2a7   : > { %4925 = vst [vmem:[%s6676_s28 + $0x58] sm:$0x77] %v3526_v38  ;;  %v3492_v11 = vpop.f32.mrb[40].mxu0  ;;  %v4654_v19 = vpop.f32.mrb[40].mxu1 }
 0x2a8   : > { %4989 = vst [vmem:[%s6676_s28 + $0x7c] sm:$0x77] %v4688_v39  ;;  %5461 = vtanh.f32 %v3492_v11  ;;  %v5096_v42 = vpop.f32.mrb[41].mxu0  ;;  %v5120_v41 = vpop.f32.mrb[41].mxu1 }
 0x2a9   : > { %5463 = vtanh.f32 %v4654_v19  ;;  %v3495_v47 = vpop.f32.mrb[42].mxu0  ;;  %v4657_v43 = vpop.f32.mrb[42].mxu1 }
 0x2aa   : > { %v5454_v10 = vpop.eup %5453  ;;  %v5097_v44 = vpop.f32.mrb[43].mxu0 }
 0x2ab   : > { %v5121_v45 = vpop.f32.mrb[43].mxu1  ;;  %v5456_v46 = vpop.eup %5455 }
 0x2ac   : > { %v5458_v49 = vpop.eup %5457 }
 0x2ad   : > { %v5460_v12 = vpop.eup %5459  ;;  %v3527_v50 = vcombine.low %v5454_v10, %v5458_v49 }
 0x2ae   : > { %v4689_v52 = vcombine.low %v5456_v46, %v5460_v12 }
 0x2af   : > { %4926 = vst [vmem:[%s6676_s28 + $0x60] sm:$0x77] %v3527_v50 }
 0x2b0   : > { %4990 = vst [vmem:[%s6676_s28 + $0x84] sm:$0x77] %v4689_v52 }
 0x2b2   : > { %v5462_v54 = vpop.eup %5461 }
 0x2b3   : > { %v5464_v55 = vpop.eup %5463  ;;  %4927 = vst.msk [vmem:[%s6676_s28 + $0x68] sm:$0x7] %vm1246_vm11, %v5462_v54 }
 0x2b4   : > { %4991 = vst.msk [vmem:[%s6676_s28 + $0x8c] sm:$0x7] %vm1246_vm11, %v5464_v55 }
 0x2b5 PF: > { %s12_s9 = sadd.s32 1, %s5471_s9  }
 0x2b6   : > { %p9_p4 = scmp.ge.s32.totalorder %s12_s9, 4  }
 0x2b8   :  { %11 = sbr.rel (!%p9_p4) target bundleno = 1 (0x1), region = 76 }

</bundles_post_ra>
